<compile_context>
chip_gen: v7x
topology: tpu7x:2x2x1
jax: 0.10.0
libtpu: 0.0.40
codegen_flags: <defaults>
</compile_context>

<pallas_src>
import jax
import jax.numpy as jnp
from jax.experimental import pallas as pl
from jax.experimental.pallas import tpu as pltpu


# ----------------------------- parameter handling -----------------------------

def init_multi_cond_backbone(key, conditioning_channels=3,
                             block_out_channels=(16, 32, 96, 256),
                             num_conds=1):
    """Deterministic init matching nn.Conv2d defaults (uniform +-1/sqrt(fan_in))."""
    layer_defs = [(conditioning_channels, block_out_channels[0], 1)]
    for i in range(len(block_out_channels) - 1):
        layer_defs.append((block_out_channels[i], block_out_channels[i], 1))
        layer_defs.append((block_out_channels[i], block_out_channels[i + 1], 2))
    params = []
    for (cin, cout, stride) in layer_defs:
        groups = []
        for _ in range(num_conds):
            key, kw_, kb_ = jax.random.split(key, 3)
            fan_in = cin * 9
            bound = 1.0 / float(fan_in) ** 0.5
            w = jax.random.uniform(kw_, (3, 3, cin, cout), jnp.float32, -bound, bound)
            b = jax.random.uniform(kb_, (cout,), jnp.float32, -bound, bound)
            groups.append((w, b))
        params.append((stride, groups))
    return params


def _geometry(h, w, params):
    """Static per-layer geometry (input/padded/output spatial dims, channels)."""
    geo = []
    for stride, groups in params:
        w0, _ = groups[0]
        cin, cout = int(w0.shape[2]), int(w0.shape[3])
        ho = (h - 1) // stride + 1
        wo = (w - 1) // stride + 1
        geo.append(dict(cin=cin, cout=cout, stride=stride,
                        hi=h, wi=w, hp=h + 2, wp=w + 2, ho=ho, wo=wo))
        h, w = ho, wo
    return geo


def _tap_operator(w, kh, stride, wp, wo):
    """(3,3,Cin,Cout) conv weights -> dense (Wp*Cin, Wo*Cout) operator for row tap kh.

    Activation rows are stored as [interior W*C | 2*C zero pad] (pad columns at
    the tail), so the storage column block for padded W-position p is (p-1) % Wp.
    Applying the padded row-slab (Ho, Wp*Cin) @ T_kh yields the contribution of
    input rows (stride*i + kh) to every output pixel of output row i.
    """
    cin, cout = w.shape[2], w.shape[3]
    t = jnp.zeros((wp, cin, wo, cout), w.dtype)
    wo_idx = jnp.arange(wo)
    for kw in range(3):
        wi_idx = (stride * wo_idx + kw - 1) % wp   # storage column block
        t = t.at[wi_idx, :, wo_idx, :].set(w[kh, kw])
    return t.reshape(wp * cin, wo * cout)


def pack_params(params, in_h, in_w):
    """One-time repack of conv weights into per-layer matmul operators.

    Returns (geo, packed) with packed = [T_1, bias_1, ..., T_L, bias_L]:
      T_l    : (num_groups, 3, Wp*Cin, Wo*Cout)  f32
      bias_l : (num_groups, 1,  Wo*Cout)         f32 (bias tiled over Wo)
    """
    geo = _geometry(in_h, in_w, params)
    packed = []
    for (stride, groups), g in zip(params, geo):
        t_list, b_list = [], []
        for (w, b) in groups:
            taps = [_tap_operator(w, kh, stride, g["wp"], g["wo"]) for kh in range(3)]
            t_list.append(jnp.stack(taps, axis=0))
            b_list.append(jnp.tile(b, g["wo"])[None, :])
        packed.append(jnp.stack(t_list, axis=0))
        packed.append(jnp.stack(b_list, axis=0))
    return geo, packed


# --------------------------------- the kernel ---------------------------------

def _make_backbone_kernel(geo):
    n_layers = len(geo)

    def kernel(*refs):
        x_ref = refs[0]
        tb_refs = refs[1:1 + 2 * n_layers]
        out_ref = refs[1 + 2 * n_layers]
        act_refs = refs[2 + 2 * n_layers:]       # padded inputs of layers 2..L

        # Zero the padded-activation scratch: the untouched border rows and the
        # trailing pad columns implement the conv's padding=1.
        for a in act_refs:
            a[...] = jnp.zeros(a.shape, a.dtype)

        for l, g in enumerate(geo):
            t_ref, b_ref = tb_refs[2 * l], tb_refs[2 * l + 1]
            ho, hp, s = g["ho"], g["hp"], g["stride"]
            ncols = g["wo"] * g["cout"]

            if s == 2:
                # Row subsampling rows i -> s*i + kh via a tiny 0/1 matmul.
                full = x_ref[0, 0] if l == 0 else act_refs[l - 1][...]
                rows = jax.lax.broadcasted_iota(jnp.int32, (ho, hp), 0)
                cols = jax.lax.broadcasted_iota(jnp.int32, (ho, hp), 1)

            acc = jnp.zeros((ho, ncols), jnp.float32)
            for kh in range(3):
                if s == 1:
                    if l == 0:
                        x_kh = x_ref[0, 0, kh:kh + ho, :]
                    else:
                        x_kh = act_refs[l - 1][kh:kh + ho, :]
                else:
                    sel = jnp.where(cols == s * rows + kh, 1.0, 0.0)
                    x_kh = jnp.dot(sel.astype(full.dtype), full,
                                   preferred_element_type=jnp.float32)
                acc = acc + jnp.dot(x_kh, t_ref[0, kh],
                                    preferred_element_type=jnp.float32)

            y = acc + b_ref[0]
            y = y * (0.5 * (jnp.tanh(0.5 * y) + 1.0))   # SiLU (tanh -> EUP slot)

            if l + 1 < n_layers:
                # Write into the interior of the next layer's padded slab:
                # rows [1 : 1+Ho], lane offset 0 (pad columns are at the tail).
                act_refs[l][1:1 + ho, 0:ncols] = y
            else:
                out_ref[0, 0] = y.astype(out_ref.dtype)

    return kernel


# --------------------------------- the wrapper --------------------------------

def multi_cond_backbone_forward(x, geo, packed, num_conds=1):
    """x: (N, H, W, conditioning_channels * num_conds), NHWC.  Returns NHWC."""
    n, h, w, c_total = x.shape
    cc = geo[0]["cin"]
    assert c_total == cc * num_conds
    gl = geo[-1]
    out_cols = gl["wo"] * gl["cout"]

    # Split groups, flatten (H, W, C) -> (H, W*C), pad 1 row top/bottom and
    # 2*C zero columns at the tail (the kernel's padded-row storage layout).
    xg = x.reshape(n, h, w, num_conds, cc).transpose(3, 0, 1, 2, 4)
    xg = xg.reshape(num_conds, n, h, w * cc)
    xg = jnp.pad(xg, ((0, 0), (0, 0), (1, 1), (0, 2 * cc)))

    in_specs = [pl.BlockSpec((1, 1, h + 2, (w + 2) * cc),
                             lambda gi, bi: (gi, bi, 0, 0))]
    for t_l, b_l in zip(packed[0::2], packed[1::2]):
        in_specs.append(pl.BlockSpec((1,) + tuple(t_l.shape[1:]),
                                     lambda gi, bi: (gi, 0, 0, 0)))
        in_specs.append(pl.BlockSpec((1,) + tuple(b_l.shape[1:]),
                                     lambda gi, bi: (gi, 0, 0)))

    out_specs = pl.BlockSpec((1, 1, gl["ho"], out_cols),
                             lambda gi, bi: (gi, bi, 0, 0))

    scratch = [pltpu.VMEM((gm["hp"], gm["wp"] * gm["cin"]), jnp.float32)
               for gm in geo[1:]]

    out = pl.pallas_call(
        _make_backbone_kernel(geo),
        out_shape=jax.ShapeDtypeStruct((num_conds, n, gl["ho"], out_cols), x.dtype),
        grid_spec=pltpu.PrefetchScalarGridSpec(
            num_scalar_prefetch=0,
            grid=(num_conds, n),
            in_specs=in_specs,
            out_specs=out_specs,
            scratch_shapes=scratch),
        compiler_params=pltpu.CompilerParams(
            dimension_semantics=("parallel", "parallel"),
            vmem_limit_bytes=48 * 1024 * 1024),
    )(xg, *packed)

    # (G, N, Ho, Wo*Cout) -> NHWC (N, Ho, Wo, G*Cout), grouped-channel order.
    out = out.reshape(num_conds, n, gl["ho"], gl["wo"], gl["cout"])
    out = out.transpose(1, 2, 3, 0, 4)
    return out.reshape(n, gl["ho"], gl["wo"], num_conds * gl["cout"])


# ------------------------------ pure-JAX reference -----------------------------

def reference_forward(x, params, num_conds=1):
    """Pure-JAX reference (grouped 3x3 conv + SiLU), NHWC."""
    for stride, groups in params:
        cin_g = x.shape[-1] // num_conds
        outs = []
        for g, (w, b) in enumerate(groups):
            xg = x[..., g * cin_g:(g + 1) * cin_g]
            y = jax.lax.conv_general_dilated(
                xg, w, window_strides=(stride, stride),
                padding=((1, 1), (1, 1)),
                dimension_numbers=('NHWC', 'HWIO', 'NHWC'),
                precision=jax.lax.Precision.HIGHEST)
            outs.append(jax.nn.silu(y + b))
        x = jnp.concatenate(outs, axis=-1) if num_conds > 1 else outs[0]
    return x


if __name__ == "__main__":
    key = jax.random.PRNGKey(0)
    k_params, k_x = jax.random.split(key)

    conditioning_channels = 3
    block_out_channels = (16, 32, 96, 256)
    num_conds = 1

    params = init_multi_cond_backbone(
        k_params, conditioning_channels, block_out_channels, num_conds)

    # PyTorch input would be NCHW (2, 3, 16, 16); we use the NHWC equivalent.
    x = jax.random.normal(
        k_x, (2, 16, 16, conditioning_channels * num_conds), jnp.float32)

    # One-time weight repacking (done once at load time in a real model).
    geo, packed = pack_params(params, 16, 16)

    out = multi_cond_backbone_forward(x, geo, packed, num_conds)
    out = jax.block_until_ready(out)

    ref = jax.block_until_ready(reference_forward(x, params, num_conds))
    assert out.shape == ref.shape == (2, 2, 2, block_out_channels[-1] * num_conds)
    assert jnp.allclose(out, ref, rtol=2e-2, atol=2e-3), (
        float(jnp.max(jnp.abs(out - ref))))

    print("KERNEL_OK")
</pallas_src>

<mosaic_0001>
module attributes {stable_mosaic.version = 11 : i64} {
  func.func @kernel(%arg0: i32, %arg1: i32, %arg2: memref<1x1x18x54xf32, #tpu.memory_space<vmem>>, %arg3: memref<1x3x54x256xf32, #tpu.memory_space<vmem>>, %arg4: memref<1x1x256xf32, #tpu.memory_space<vmem>>, %arg5: memref<1x3x288x256xf32, #tpu.memory_space<vmem>>, %arg6: memref<1x1x256xf32, #tpu.memory_space<vmem>>, %arg7: memref<1x3x288x256xf32, #tpu.memory_space<vmem>>, %arg8: memref<1x1x256xf32, #tpu.memory_space<vmem>>, %arg9: memref<1x3x320x256xf32, #tpu.memory_space<vmem>>, %arg10: memref<1x1x256xf32, #tpu.memory_space<vmem>>, %arg11: memref<1x3x320x384xf32, #tpu.memory_space<vmem>>, %arg12: memref<1x1x384xf32, #tpu.memory_space<vmem>>, %arg13: memref<1x3x576x384xf32, #tpu.memory_space<vmem>>, %arg14: memref<1x1x384xf32, #tpu.memory_space<vmem>>, %arg15: memref<1x3x576x512xf32, #tpu.memory_space<vmem>>, %arg16: memref<1x1x512xf32, #tpu.memory_space<vmem>>, %arg17: memref<1x1x2x512xf32, #tpu.memory_space<vmem>>, %arg18: memref<18x288xf32, #tpu.memory_space<vmem>>, %arg19: memref<18x288xf32, #tpu.memory_space<vmem>>, %arg20: memref<10x320xf32, #tpu.memory_space<vmem>>, %arg21: memref<10x320xf32, #tpu.memory_space<vmem>>, %arg22: memref<6x576xf32, #tpu.memory_space<vmem>>, %arg23: memref<6x576xf32, #tpu.memory_space<vmem>>) attributes {dimension_semantics = [#tpu.dimension_semantics<parallel>, #tpu.dimension_semantics<parallel>], iteration_bounds = array<i64: 1, 2>, scalar_prefetch = 0 : i64, scratch_operands = 6 : i64, tpu.core_type = #tpu.core_type<tc>, window_params = [{transform_indices = @transform_0, window_bounds = array<i64: 1, 1, 18, 54>}, {transform_indices = @transform_1, window_bounds = array<i64: 1, 3, 54, 256>}, {transform_indices = @transform_2, window_bounds = array<i64: 1, 1, 256>}, {transform_indices = @transform_3, window_bounds = array<i64: 1, 3, 288, 256>}, {transform_indices = @transform_4, window_bounds = array<i64: 1, 1, 256>}, {transform_indices = @transform_5, window_bounds = array<i64: 1, 3, 288, 256>}, {transform_indices = @transform_6, window_bounds = array<i64: 1, 1, 256>}, {transform_indices = @transform_7, window_bounds = array<i64: 1, 3, 320, 256>}, {transform_indices = @transform_8, window_bounds = array<i64: 1, 1, 256>}, {transform_indices = @transform_9, window_bounds = array<i64: 1, 3, 320, 384>}, {transform_indices = @transform_10, window_bounds = array<i64: 1, 1, 384>}, {transform_indices = @transform_11, window_bounds = array<i64: 1, 3, 576, 384>}, {transform_indices = @transform_12, window_bounds = array<i64: 1, 1, 384>}, {transform_indices = @transform_13, window_bounds = array<i64: 1, 3, 576, 512>}, {transform_indices = @transform_14, window_bounds = array<i64: 1, 1, 512>}, {transform_indices = @transform_15, window_bounds = array<i64: 1, 1, 2, 512>}]} {
    %cst = arith.constant 0.000000e+00 : f32
    %0 = vector.broadcast %cst : f32 to vector<18x288xf32>
    %c0 = arith.constant 0 : index
    %c0_0 = arith.constant 0 : index
    %1 = vector.load %arg18[%c0, %c0_0] : memref<18x288xf32, #tpu.memory_space<vmem>>, vector<18x288xf32>
    tpu.vector_store %arg18[%c0, %c0_0], %0 {strides = array<i32>} : memref<18x288xf32, #tpu.memory_space<vmem>>, vector<18x288xf32>,
    %cst_1 = arith.constant 0.000000e+00 : f32
    %2 = vector.broadcast %cst_1 : f32 to vector<18x288xf32>
    %c0_2 = arith.constant 0 : index
    %c0_3 = arith.constant 0 : index
    %3 = vector.load %arg19[%c0_2, %c0_3] : memref<18x288xf32, #tpu.memory_space<vmem>>, vector<18x288xf32>
    tpu.vector_store %arg19[%c0_2, %c0_3], %2 {strides = array<i32>} : memref<18x288xf32, #tpu.memory_space<vmem>>, vector<18x288xf32>,
    %cst_4 = arith.constant 0.000000e+00 : f32
    %4 = vector.broadcast %cst_4 : f32 to vector<10x320xf32>
    %c0_5 = arith.constant 0 : index
    %c0_6 = arith.constant 0 : index
    %5 = vector.load %arg20[%c0_5, %c0_6] : memref<10x320xf32, #tpu.memory_space<vmem>>, vector<10x320xf32>
    tpu.vector_store %arg20[%c0_5, %c0_6], %4 {strides = array<i32>} : memref<10x320xf32, #tpu.memory_space<vmem>>, vector<10x320xf32>,
    %cst_7 = arith.constant 0.000000e+00 : f32
    %6 = vector.broadcast %cst_7 : f32 to vector<10x320xf32>
    %c0_8 = arith.constant 0 : index
    %c0_9 = arith.constant 0 : index
    %7 = vector.load %arg21[%c0_8, %c0_9] : memref<10x320xf32, #tpu.memory_space<vmem>>, vector<10x320xf32>
    tpu.vector_store %arg21[%c0_8, %c0_9], %6 {strides = array<i32>} : memref<10x320xf32, #tpu.memory_space<vmem>>, vector<10x320xf32>,
    %cst_10 = arith.constant 0.000000e+00 : f32
    %8 = vector.broadcast %cst_10 : f32 to vector<6x576xf32>
    %c0_11 = arith.constant 0 : index
    %c0_12 = arith.constant 0 : index
    %9 = vector.load %arg22[%c0_11, %c0_12] : memref<6x576xf32, #tpu.memory_space<vmem>>, vector<6x576xf32>
    tpu.vector_store %arg22[%c0_11, %c0_12], %8 {strides = array<i32>} : memref<6x576xf32, #tpu.memory_space<vmem>>, vector<6x576xf32>,
    %cst_13 = arith.constant 0.000000e+00 : f32
    %10 = vector.broadcast %cst_13 : f32 to vector<6x576xf32>
    %c0_14 = arith.constant 0 : index
    %c0_15 = arith.constant 0 : index
    %11 = vector.load %arg23[%c0_14, %c0_15] : memref<6x576xf32, #tpu.memory_space<vmem>>, vector<6x576xf32>
    tpu.vector_store %arg23[%c0_14, %c0_15], %10 {strides = array<i32>} : memref<6x576xf32, #tpu.memory_space<vmem>>, vector<6x576xf32>,
    %cst_16 = arith.constant 0.000000e+00 : f32
    %12 = vector.broadcast %cst_16 : f32 to vector<16x256xf32>
    %c0_17 = arith.constant 0 : index
    %c0_18 = arith.constant 0 : index
    %c0_19 = arith.constant 0 : index
    %c0_20 = arith.constant 0 : index
    %13 = vector.load %arg2[%c0_17, %c0_18, %c0_19, %c0_20] : memref<1x1x18x54xf32, #tpu.memory_space<vmem>>, vector<1x1x16x54xf32>
    %14 = vector.shape_cast %13 : vector<1x1x16x54xf32> to vector<16x54xf32>
    %c0_21 = arith.constant 0 : index
    %c0_22 = arith.constant 0 : index
    %c0_23 = arith.constant 0 : index
    %c0_24 = arith.constant 0 : index
    %15 = vector.load %arg3[%c0_21, %c0_22, %c0_23, %c0_24] : memref<1x3x54x256xf32, #tpu.memory_space<vmem>>, vector<1x1x54x256xf32>
    %16 = vector.shape_cast %15 : vector<1x1x54x256xf32> to vector<54x256xf32>
    %cst_25 = arith.constant dense<0.000000e+00> : vector<16x256xf32>
    %17 = tpu.matmul %14, %16, %cst_25 {dimension_numbers = #tpu.dot_dimension_numbers<[1], [0], [0], [1], [0, 0, 1, 1], [], []>} : vector<16x54xf32>, vector<54x256xf32>, vector<16x256xf32> -> vector<16x256xf32>
    %18 = arith.addf %12, %17 : vector<16x256xf32>
    %c0_26 = arith.constant 0 : index
    %c0_27 = arith.constant 0 : index
    %c1 = arith.constant 1 : index
    %c0_28 = arith.constant 0 : index
    %19 = vector.load %arg2[%c0_26, %c0_27, %c1, %c0_28] : memref<1x1x18x54xf32, #tpu.memory_space<vmem>>, vector<1x1x16x54xf32>
    %20 = vector.shape_cast %19 : vector<1x1x16x54xf32> to vector<16x54xf32>
    %c0_29 = arith.constant 0 : index
    %c1_30 = arith.constant 1 : index
    %c0_31 = arith.constant 0 : index
    %c0_32 = arith.constant 0 : index
    %21 = vector.load %arg3[%c0_29, %c1_30, %c0_31, %c0_32] : memref<1x3x54x256xf32, #tpu.memory_space<vmem>>, vector<1x1x54x256xf32>
    %22 = vector.shape_cast %21 : vector<1x1x54x256xf32> to vector<54x256xf32>
    %cst_33 = arith.constant dense<0.000000e+00> : vector<16x256xf32>
    %23 = tpu.matmul %20, %22, %cst_33 {dimension_numbers = #tpu.dot_dimension_numbers<[1], [0], [0], [1], [0, 0, 1, 1], [], []>} : vector<16x54xf32>, vector<54x256xf32>, vector<16x256xf32> -> vector<16x256xf32>
    %24 = arith.addf %18, %23 : vector<16x256xf32>
    %c0_34 = arith.constant 0 : index
    %c0_35 = arith.constant 0 : index
    %c2 = arith.constant 2 : index
    %c0_36 = arith.constant 0 : index
    %25 = vector.load %arg2[%c0_34, %c0_35, %c2, %c0_36] : memref<1x1x18x54xf32, #tpu.memory_space<vmem>>, vector<1x1x16x54xf32>
    %26 = vector.shape_cast %25 : vector<1x1x16x54xf32> to vector<16x54xf32>
    %c0_37 = arith.constant 0 : index
    %c2_38 = arith.constant 2 : index
    %c0_39 = arith.constant 0 : index
    %c0_40 = arith.constant 0 : index
    %27 = vector.load %arg3[%c0_37, %c2_38, %c0_39, %c0_40] : memref<1x3x54x256xf32, #tpu.memory_space<vmem>>, vector<1x1x54x256xf32>
    %28 = vector.shape_cast %27 : vector<1x1x54x256xf32> to vector<54x256xf32>
    %cst_41 = arith.constant dense<0.000000e+00> : vector<16x256xf32>
    %29 = tpu.matmul %26, %28, %cst_41 {dimension_numbers = #tpu.dot_dimension_numbers<[1], [0], [0], [1], [0, 0, 1, 1], [], []>} : vector<16x54xf32>, vector<54x256xf32>, vector<16x256xf32> -> vector<16x256xf32>
    %30 = arith.addf %24, %29 : vector<16x256xf32>
    %c0_42 = arith.constant 0 : index
    %c0_43 = arith.constant 0 : index
    %c0_44 = arith.constant 0 : index
    %31 = vector.load %arg4[%c0_42, %c0_43, %c0_44] : memref<1x1x256xf32, #tpu.memory_space<vmem>>, vector<1x1x256xf32>
    %32 = vector.shape_cast %31 : vector<1x1x256xf32> to vector<1x256xf32>
    %33 = vector.broadcast %32 : vector<1x256xf32> to vector<16x256xf32>
    %34 = arith.addf %30, %33 : vector<16x256xf32>
    %cst_45 = arith.constant 5.000000e-01 : f32
    %35 = vector.broadcast %cst_45 : f32 to vector<16x256xf32>
    %36 = arith.mulf %35, %34 : vector<16x256xf32>
    %37 = math.tanh %36 : vector<16x256xf32>
    %cst_46 = arith.constant 1.000000e+00 : f32
    %38 = vector.broadcast %cst_46 : f32 to vector<16x256xf32>
    %39 = arith.addf %37, %38 : vector<16x256xf32>
    %cst_47 = arith.constant 5.000000e-01 : f32
    %40 = vector.broadcast %cst_47 : f32 to vector<16x256xf32>
    %41 = arith.mulf %40, %39 : vector<16x256xf32>
    %42 = arith.mulf %34, %41 : vector<16x256xf32>
    %c1_48 = arith.constant 1 : index
    %c0_49 = arith.constant 0 : index
    %43 = vector.load %arg18[%c1_48, %c0_49] : memref<18x288xf32, #tpu.memory_space<vmem>>, vector<16x256xf32>
    tpu.vector_store %arg18[%c1_48, %c0_49], %42 {strides = array<i32>} : memref<18x288xf32, #tpu.memory_space<vmem>>, vector<16x256xf32>,
    %cst_50 = arith.constant 0.000000e+00 : f32
    %44 = vector.broadcast %cst_50 : f32 to vector<16x256xf32>
    %c0_51 = arith.constant 0 : index
    %c0_52 = arith.constant 0 : index
    %45 = vector.load %arg18[%c0_51, %c0_52] : memref<18x288xf32, #tpu.memory_space<vmem>>, vector<16x288xf32>
    %c0_53 = arith.constant 0 : index
    %c0_54 = arith.constant 0 : index
    %c0_55 = arith.constant 0 : index
    %c0_56 = arith.constant 0 : index
    %46 = vector.load %arg5[%c0_53, %c0_54, %c0_55, %c0_56] : memref<1x3x288x256xf32, #tpu.memory_space<vmem>>, vector<1x1x288x256xf32>
    %47 = vector.shape_cast %46 : vector<1x1x288x256xf32> to vector<288x256xf32>
    %cst_57 = arith.constant dense<0.000000e+00> : vector<16x256xf32>
    %48 = tpu.matmul %45, %47, %cst_57 {dimension_numbers = #tpu.dot_dimension_numbers<[1], [0], [0], [1], [0, 0, 1, 1], [], []>} : vector<16x288xf32>, vector<288x256xf32>, vector<16x256xf32> -> vector<16x256xf32>
    %49 = arith.addf %44, %48 : vector<16x256xf32>
    %c1_58 = arith.constant 1 : index
    %c0_59 = arith.constant 0 : index
    %50 = vector.load %arg18[%c1_58, %c0_59] : memref<18x288xf32, #tpu.memory_space<vmem>>, vector<16x288xf32>
    %c0_60 = arith.constant 0 : index
    %c1_61 = arith.constant 1 : index
    %c0_62 = arith.constant 0 : index
    %c0_63 = arith.constant 0 : index
    %51 = vector.load %arg5[%c0_60, %c1_61, %c0_62, %c0_63] : memref<1x3x288x256xf32, #tpu.memory_space<vmem>>, vector<1x1x288x256xf32>
    %52 = vector.shape_cast %51 : vector<1x1x288x256xf32> to vector<288x256xf32>
    %cst_64 = arith.constant dense<0.000000e+00> : vector<16x256xf32>
    %53 = tpu.matmul %50, %52, %cst_64 {dimension_numbers = #tpu.dot_dimension_numbers<[1], [0], [0], [1], [0, 0, 1, 1], [], []>} : vector<16x288xf32>, vector<288x256xf32>, vector<16x256xf32> -> vector<16x256xf32>
    %54 = arith.addf %49, %53 : vector<16x256xf32>
    %c2_65 = arith.constant 2 : index
    %c0_66 = arith.constant 0 : index
    %55 = vector.load %arg18[%c2_65, %c0_66] : memref<18x288xf32, #tpu.memory_space<vmem>>, vector<16x288xf32>
    %c0_67 = arith.constant 0 : index
    %c2_68 = arith.constant 2 : index
    %c0_69 = arith.constant 0 : index
    %c0_70 = arith.constant 0 : index
    %56 = vector.load %arg5[%c0_67, %c2_68, %c0_69, %c0_70] : memref<1x3x288x256xf32, #tpu.memory_space<vmem>>, vector<1x1x288x256xf32>
    %57 = vector.shape_cast %56 : vector<1x1x288x256xf32> to vector<288x256xf32>
    %cst_71 = arith.constant dense<0.000000e+00> : vector<16x256xf32>
    %58 = tpu.matmul %55, %57, %cst_71 {dimension_numbers = #tpu.dot_dimension_numbers<[1], [0], [0], [1], [0, 0, 1, 1], [], []>} : vector<16x288xf32>, vector<288x256xf32>, vector<16x256xf32> -> vector<16x256xf32>
    %59 = arith.addf %54, %58 : vector<16x256xf32>
    %c0_72 = arith.constant 0 : index
    %c0_73 = arith.constant 0 : index
    %c0_74 = arith.constant 0 : index
    %60 = vector.load %arg6[%c0_72, %c0_73, %c0_74] : memref<1x1x256xf32, #tpu.memory_space<vmem>>, vector<1x1x256xf32>
    %61 = vector.shape_cast %60 : vector<1x1x256xf32> to vector<1x256xf32>
    %62 = vector.broadcast %61 : vector<1x256xf32> to vector<16x256xf32>
    %63 = arith.addf %59, %62 : vector<16x256xf32>
    %cst_75 = arith.constant 5.000000e-01 : f32
    %64 = vector.broadcast %cst_75 : f32 to vector<16x256xf32>
    %65 = arith.mulf %64, %63 : vector<16x256xf32>
    %66 = math.tanh %65 : vector<16x256xf32>
    %cst_76 = arith.constant 1.000000e+00 : f32
    %67 = vector.broadcast %cst_76 : f32 to vector<16x256xf32>
    %68 = arith.addf %66, %67 : vector<16x256xf32>
    %cst_77 = arith.constant 5.000000e-01 : f32
    %69 = vector.broadcast %cst_77 : f32 to vector<16x256xf32>
    %70 = arith.mulf %69, %68 : vector<16x256xf32>
    %71 = arith.mulf %63, %70 : vector<16x256xf32>
    %c1_78 = arith.constant 1 : index
    %c0_79 = arith.constant 0 : index
    %72 = vector.load %arg19[%c1_78, %c0_79] : memref<18x288xf32, #tpu.memory_space<vmem>>, vector<16x256xf32>
    tpu.vector_store %arg19[%c1_78, %c0_79], %71 {strides = array<i32>} : memref<18x288xf32, #tpu.memory_space<vmem>>, vector<16x256xf32>,
    %c0_80 = arith.constant 0 : index
    %c0_81 = arith.constant 0 : index
    %73 = vector.load %arg19[%c0_80, %c0_81] : memref<18x288xf32, #tpu.memory_space<vmem>>, vector<18x288xf32>
    %74 = tpu.iota {dimensions = array<i32: 0>} : vector<8x18xi32>
    %75 = tpu.iota {dimensions = array<i32: 1>} : vector<8x18xi32>
    %cst_82 = arith.constant 0.000000e+00 : f32
    %76 = vector.broadcast %cst_82 : f32 to vector<8x256xf32>
    %c2_i32 = arith.constant 2 : i32
    %77 = vector.broadcast %c2_i32 : i32 to vector<8x18xi32>
    %78 = arith.muli %77, %74 : vector<8x18xi32>
    %c0_i32 = arith.constant 0 : i32
    %79 = vector.broadcast %c0_i32 : i32 to vector<8x18xi32>
    %80 = arith.addi %78, %79 : vector<8x18xi32>
    %81 = arith.cmpi eq, %75, %80 : vector<8x18xi32>
    %cst_83 = arith.constant 1.000000e+00 : f32
    %cst_84 = arith.constant 0.000000e+00 : f32
    %82 = vector.broadcast %cst_83 : f32 to vector<8x18xf32>
    %83 = vector.broadcast %cst_84 : f32 to vector<8x18xf32>
    %84 = arith.select %81, %82, %83 : vector<8x18xi1>, vector<8x18xf32>
    %cst_85 = arith.constant dense<0.000000e+00> : vector<8x288xf32>
    %85 = tpu.matmul %84, %73, %cst_85 {dimension_numbers = #tpu.dot_dimension_numbers<[1], [0], [0], [1], [0, 0, 1, 1], [], []>} : vector<8x18xf32>, vector<18x288xf32>, vector<8x288xf32> -> vector<8x288xf32>
    %c0_86 = arith.constant 0 : index
    %c0_87 = arith.constant 0 : index
    %c0_88 = arith.constant 0 : index
    %c0_89 = arith.constant 0 : index
    %86 = vector.load %arg7[%c0_86, %c0_87, %c0_88, %c0_89] : memref<1x3x288x256xf32, #tpu.memory_space<vmem>>, vector<1x1x288x256xf32>
    %87 = vector.shape_cast %86 : vector<1x1x288x256xf32> to vector<288x256xf32>
    %cst_90 = arith.constant dense<0.000000e+00> : vector<8x256xf32>
    %88 = tpu.matmul %85, %87, %cst_90 {dimension_numbers = #tpu.dot_dimension_numbers<[1], [0], [0], [1], [0, 0, 1, 1], [], []>} : vector<8x288xf32>, vector<288x256xf32>, vector<8x256xf32> -> vector<8x256xf32>
    %89 = arith.addf %76, %88 : vector<8x256xf32>
    %c2_i32_91 = arith.constant 2 : i32
    %90 = vector.broadcast %c2_i32_91 : i32 to vector<8x18xi32>
    %91 = arith.muli %90, %74 : vector<8x18xi32>
    %c1_i32 = arith.constant 1 : i32
    %92 = vector.broadcast %c1_i32 : i32 to vector<8x18xi32>
    %93 = arith.addi %91, %92 : vector<8x18xi32>
    %94 = arith.cmpi eq, %75, %93 : vector<8x18xi32>
    %cst_92 = arith.constant 1.000000e+00 : f32
    %cst_93 = arith.constant 0.000000e+00 : f32
    %95 = vector.broadcast %cst_92 : f32 to vector<8x18xf32>
    %96 = vector.broadcast %cst_93 : f32 to vector<8x18xf32>
    %97 = arith.select %94, %95, %96 : vector<8x18xi1>, vector<8x18xf32>
    %cst_94 = arith.constant dense<0.000000e+00> : vector<8x288xf32>
    %98 = tpu.matmul %97, %73, %cst_94 {dimension_numbers = #tpu.dot_dimension_numbers<[1], [0], [0], [1], [0, 0, 1, 1], [], []>} : vector<8x18xf32>, vector<18x288xf32>, vector<8x288xf32> -> vector<8x288xf32>
    %c0_95 = arith.constant 0 : index
    %c1_96 = arith.constant 1 : index
    %c0_97 = arith.constant 0 : index
    %c0_98 = arith.constant 0 : index
    %99 = vector.load %arg7[%c0_95, %c1_96, %c0_97, %c0_98] : memref<1x3x288x256xf32, #tpu.memory_space<vmem>>, vector<1x1x288x256xf32>
    %100 = vector.shape_cast %99 : vector<1x1x288x256xf32> to vector<288x256xf32>
    %cst_99 = arith.constant dense<0.000000e+00> : vector<8x256xf32>
    %101 = tpu.matmul %98, %100, %cst_99 {dimension_numbers = #tpu.dot_dimension_numbers<[1], [0], [0], [1], [0, 0, 1, 1], [], []>} : vector<8x288xf32>, vector<288x256xf32>, vector<8x256xf32> -> vector<8x256xf32>
    %102 = arith.addf %89, %101 : vector<8x256xf32>
    %c2_i32_100 = arith.constant 2 : i32
    %103 = vector.broadcast %c2_i32_100 : i32 to vector<8x18xi32>
    %104 = arith.muli %103, %74 : vector<8x18xi32>
    %c2_i32_101 = arith.constant 2 : i32
    %105 = vector.broadcast %c2_i32_101 : i32 to vector<8x18xi32>
    %106 = arith.addi %104, %105 : vector<8x18xi32>
    %107 = arith.cmpi eq, %75, %106 : vector<8x18xi32>
    %cst_102 = arith.constant 1.000000e+00 : f32
    %cst_103 = arith.constant 0.000000e+00 : f32
    %108 = vector.broadcast %cst_102 : f32 to vector<8x18xf32>
    %109 = vector.broadcast %cst_103 : f32 to vector<8x18xf32>
    %110 = arith.select %107, %108, %109 : vector<8x18xi1>, vector<8x18xf32>
    %cst_104 = arith.constant dense<0.000000e+00> : vector<8x288xf32>
    %111 = tpu.matmul %110, %73, %cst_104 {dimension_numbers = #tpu.dot_dimension_numbers<[1], [0], [0], [1], [0, 0, 1, 1], [], []>} : vector<8x18xf32>, vector<18x288xf32>, vector<8x288xf32> -> vector<8x288xf32>
    %c0_105 = arith.constant 0 : index
    %c2_106 = arith.constant 2 : index
    %c0_107 = arith.constant 0 : index
    %c0_108 = arith.constant 0 : index
    %112 = vector.load %arg7[%c0_105, %c2_106, %c0_107, %c0_108] : memref<1x3x288x256xf32, #tpu.memory_space<vmem>>, vector<1x1x288x256xf32>
    %113 = vector.shape_cast %112 : vector<1x1x288x256xf32> to vector<288x256xf32>
    %cst_109 = arith.constant dense<0.000000e+00> : vector<8x256xf32>
    %114 = tpu.matmul %111, %113, %cst_109 {dimension_numbers = #tpu.dot_dimension_numbers<[1], [0], [0], [1], [0, 0, 1, 1], [], []>} : vector<8x288xf32>, vector<288x256xf32>, vector<8x256xf32> -> vector<8x256xf32>
    %115 = arith.addf %102, %114 : vector<8x256xf32>
    %c0_110 = arith.constant 0 : index
    %c0_111 = arith.constant 0 : index
    %c0_112 = arith.constant 0 : index
    %116 = vector.load %arg8[%c0_110, %c0_111, %c0_112] : memref<1x1x256xf32, #tpu.memory_space<vmem>>, vector<1x1x256xf32>
    %117 = vector.shape_cast %116 : vector<1x1x256xf32> to vector<1x256xf32>
    %118 = vector.broadcast %117 : vector<1x256xf32> to vector<8x256xf32>
    %119 = arith.addf %115, %118 : vector<8x256xf32>
    %cst_113 = arith.constant 5.000000e-01 : f32
    %120 = vector.broadcast %cst_113 : f32 to vector<8x256xf32>
    %121 = arith.mulf %120, %119 : vector<8x256xf32>
    %122 = math.tanh %121 : vector<8x256xf32>
    %cst_114 = arith.constant 1.000000e+00 : f32
    %123 = vector.broadcast %cst_114 : f32 to vector<8x256xf32>
    %124 = arith.addf %122, %123 : vector<8x256xf32>
    %cst_115 = arith.constant 5.000000e-01 : f32
    %125 = vector.broadcast %cst_115 : f32 to vector<8x256xf32>
    %126 = arith.mulf %125, %124 : vector<8x256xf32>
    %127 = arith.mulf %119, %126 : vector<8x256xf32>
    %c1_116 = arith.constant 1 : index
    %c0_117 = arith.constant 0 : index
    %128 = vector.load %arg20[%c1_116, %c0_117] : memref<10x320xf32, #tpu.memory_space<vmem>>, vector<8x256xf32>
    tpu.vector_store %arg20[%c1_116, %c0_117], %127 {strides = array<i32>} : memref<10x320xf32, #tpu.memory_space<vmem>>, vector<8x256xf32>,
    %cst_118 = arith.constant 0.000000e+00 : f32
    %129 = vector.broadcast %cst_118 : f32 to vector<8x256xf32>
    %c0_119 = arith.constant 0 : index
    %c0_120 = arith.constant 0 : index
    %130 = vector.load %arg20[%c0_119, %c0_120] : memref<10x320xf32, #tpu.memory_space<vmem>>, vector<8x320xf32>
    %c0_121 = arith.constant 0 : index
    %c0_122 = arith.constant 0 : index
    %c0_123 = arith.constant 0 : index
    %c0_124 = arith.constant 0 : index
    %131 = vector.load %arg9[%c0_121, %c0_122, %c0_123, %c0_124] : memref<1x3x320x256xf32, #tpu.memory_space<vmem>>, vector<1x1x320x256xf32>
    %132 = vector.shape_cast %131 : vector<1x1x320x256xf32> to vector<320x256xf32>
    %cst_125 = arith.constant dense<0.000000e+00> : vector<8x256xf32>
    %133 = tpu.matmul %130, %132, %cst_125 {dimension_numbers = #tpu.dot_dimension_numbers<[1], [0], [0], [1], [0, 0, 1, 1], [], []>} : vector<8x320xf32>, vector<320x256xf32>, vector<8x256xf32> -> vector<8x256xf32>
    %134 = arith.addf %129, %133 : vector<8x256xf32>
    %c1_126 = arith.constant 1 : index
    %c0_127 = arith.constant 0 : index
    %135 = vector.load %arg20[%c1_126, %c0_127] : memref<10x320xf32, #tpu.memory_space<vmem>>, vector<8x320xf32>
    %c0_128 = arith.constant 0 : index
    %c1_129 = arith.constant 1 : index
    %c0_130 = arith.constant 0 : index
    %c0_131 = arith.constant 0 : index
    %136 = vector.load %arg9[%c0_128, %c1_129, %c0_130, %c0_131] : memref<1x3x320x256xf32, #tpu.memory_space<vmem>>, vector<1x1x320x256xf32>
    %137 = vector.shape_cast %136 : vector<1x1x320x256xf32> to vector<320x256xf32>
    %cst_132 = arith.constant dense<0.000000e+00> : vector<8x256xf32>
    %138 = tpu.matmul %135, %137, %cst_132 {dimension_numbers = #tpu.dot_dimension_numbers<[1], [0], [0], [1], [0, 0, 1, 1], [], []>} : vector<8x320xf32>, vector<320x256xf32>, vector<8x256xf32> -> vector<8x256xf32>
    %139 = arith.addf %134, %138 : vector<8x256xf32>
    %c2_133 = arith.constant 2 : index
    %c0_134 = arith.constant 0 : index
    %140 = vector.load %arg20[%c2_133, %c0_134] : memref<10x320xf32, #tpu.memory_space<vmem>>, vector<8x320xf32>
    %c0_135 = arith.constant 0 : index
    %c2_136 = arith.constant 2 : index
    %c0_137 = arith.constant 0 : index
    %c0_138 = arith.constant 0 : index
    %141 = vector.load %arg9[%c0_135, %c2_136, %c0_137, %c0_138] : memref<1x3x320x256xf32, #tpu.memory_space<vmem>>, vector<1x1x320x256xf32>
    %142 = vector.shape_cast %141 : vector<1x1x320x256xf32> to vector<320x256xf32>
    %cst_139 = arith.constant dense<0.000000e+00> : vector<8x256xf32>
    %143 = tpu.matmul %140, %142, %cst_139 {dimension_numbers = #tpu.dot_dimension_numbers<[1], [0], [0], [1], [0, 0, 1, 1], [], []>} : vector<8x320xf32>, vector<320x256xf32>, vector<8x256xf32> -> vector<8x256xf32>
    %144 = arith.addf %139, %143 : vector<8x256xf32>
    %c0_140 = arith.constant 0 : index
    %c0_141 = arith.constant 0 : index
    %c0_142 = arith.constant 0 : index
    %145 = vector.load %arg10[%c0_140, %c0_141, %c0_142] : memref<1x1x256xf32, #tpu.memory_space<vmem>>, vector<1x1x256xf32>
    %146 = vector.shape_cast %145 : vector<1x1x256xf32> to vector<1x256xf32>
    %147 = vector.broadcast %146 : vector<1x256xf32> to vector<8x256xf32>
    %148 = arith.addf %144, %147 : vector<8x256xf32>
    %cst_143 = arith.constant 5.000000e-01 : f32
    %149 = vector.broadcast %cst_143 : f32 to vector<8x256xf32>
    %150 = arith.mulf %149, %148 : vector<8x256xf32>
    %151 = math.tanh %150 : vector<8x256xf32>
    %cst_144 = arith.constant 1.000000e+00 : f32
    %152 = vector.broadcast %cst_144 : f32 to vector<8x256xf32>
    %153 = arith.addf %151, %152 : vector<8x256xf32>
    %cst_145 = arith.constant 5.000000e-01 : f32
    %154 = vector.broadcast %cst_145 : f32 to vector<8x256xf32>
    %155 = arith.mulf %154, %153 : vector<8x256xf32>
    %156 = arith.mulf %148, %155 : vector<8x256xf32>
    %c1_146 = arith.constant 1 : index
    %c0_147 = arith.constant 0 : index
    %157 = vector.load %arg21[%c1_146, %c0_147] : memref<10x320xf32, #tpu.memory_space<vmem>>, vector<8x256xf32>
    tpu.vector_store %arg21[%c1_146, %c0_147], %156 {strides = array<i32>} : memref<10x320xf32, #tpu.memory_space<vmem>>, vector<8x256xf32>,
    %c0_148 = arith.constant 0 : index
    %c0_149 = arith.constant 0 : index
    %158 = vector.load %arg21[%c0_148, %c0_149] : memref<10x320xf32, #tpu.memory_space<vmem>>, vector<10x320xf32>
    %159 = tpu.iota {dimensions = array<i32: 0>} : vector<4x10xi32>
    %160 = tpu.iota {dimensions = array<i32: 1>} : vector<4x10xi32>
    %cst_150 = arith.constant 0.000000e+00 : f32
    %161 = vector.broadcast %cst_150 : f32 to vector<4x384xf32>
    %c2_i32_151 = arith.constant 2 : i32
    %162 = vector.broadcast %c2_i32_151 : i32 to vector<4x10xi32>
    %163 = arith.muli %162, %159 : vector<4x10xi32>
    %c0_i32_152 = arith.constant 0 : i32
    %164 = vector.broadcast %c0_i32_152 : i32 to vector<4x10xi32>
    %165 = arith.addi %163, %164 : vector<4x10xi32>
    %166 = arith.cmpi eq, %160, %165 : vector<4x10xi32>
    %cst_153 = arith.constant 1.000000e+00 : f32
    %cst_154 = arith.constant 0.000000e+00 : f32
    %167 = vector.broadcast %cst_153 : f32 to vector<4x10xf32>
    %168 = vector.broadcast %cst_154 : f32 to vector<4x10xf32>
    %169 = arith.select %166, %167, %168 : vector<4x10xi1>, vector<4x10xf32>
    %cst_155 = arith.constant dense<0.000000e+00> : vector<4x320xf32>
    %170 = tpu.matmul %169, %158, %cst_155 {dimension_numbers = #tpu.dot_dimension_numbers<[1], [0], [0], [1], [0, 0, 1, 1], [], []>} : vector<4x10xf32>, vector<10x320xf32>, vector<4x320xf32> -> vector<4x320xf32>
    %c0_156 = arith.constant 0 : index
    %c0_157 = arith.constant 0 : index
    %c0_158 = arith.constant 0 : index
    %c0_159 = arith.constant 0 : index
    %171 = vector.load %arg11[%c0_156, %c0_157, %c0_158, %c0_159] : memref<1x3x320x384xf32, #tpu.memory_space<vmem>>, vector<1x1x320x384xf32>
    %172 = vector.shape_cast %171 : vector<1x1x320x384xf32> to vector<320x384xf32>
    %cst_160 = arith.constant dense<0.000000e+00> : vector<4x384xf32>
    %173 = tpu.matmul %170, %172, %cst_160 {dimension_numbers = #tpu.dot_dimension_numbers<[1], [0], [0], [1], [0, 0, 1, 1], [], []>} : vector<4x320xf32>, vector<320x384xf32>, vector<4x384xf32> -> vector<4x384xf32>
    %174 = arith.addf %161, %173 : vector<4x384xf32>
    %c2_i32_161 = arith.constant 2 : i32
    %175 = vector.broadcast %c2_i32_161 : i32 to vector<4x10xi32>
    %176 = arith.muli %175, %159 : vector<4x10xi32>
    %c1_i32_162 = arith.constant 1 : i32
    %177 = vector.broadcast %c1_i32_162 : i32 to vector<4x10xi32>
    %178 = arith.addi %176, %177 : vector<4x10xi32>
    %179 = arith.cmpi eq, %160, %178 : vector<4x10xi32>
    %cst_163 = arith.constant 1.000000e+00 : f32
    %cst_164 = arith.constant 0.000000e+00 : f32
    %180 = vector.broadcast %cst_163 : f32 to vector<4x10xf32>
    %181 = vector.broadcast %cst_164 : f32 to vector<4x10xf32>
    %182 = arith.select %179, %180, %181 : vector<4x10xi1>, vector<4x10xf32>
    %cst_165 = arith.constant dense<0.000000e+00> : vector<4x320xf32>
    %183 = tpu.matmul %182, %158, %cst_165 {dimension_numbers = #tpu.dot_dimension_numbers<[1], [0], [0], [1], [0, 0, 1, 1], [], []>} : vector<4x10xf32>, vector<10x320xf32>, vector<4x320xf32> -> vector<4x320xf32>
    %c0_166 = arith.constant 0 : index
    %c1_167 = arith.constant 1 : index
    %c0_168 = arith.constant 0 : index
    %c0_169 = arith.constant 0 : index
    %184 = vector.load %arg11[%c0_166, %c1_167, %c0_168, %c0_169] : memref<1x3x320x384xf32, #tpu.memory_space<vmem>>, vector<1x1x320x384xf32>
    %185 = vector.shape_cast %184 : vector<1x1x320x384xf32> to vector<320x384xf32>
    %cst_170 = arith.constant dense<0.000000e+00> : vector<4x384xf32>
    %186 = tpu.matmul %183, %185, %cst_170 {dimension_numbers = #tpu.dot_dimension_numbers<[1], [0], [0], [1], [0, 0, 1, 1], [], []>} : vector<4x320xf32>, vector<320x384xf32>, vector<4x384xf32> -> vector<4x384xf32>
    %187 = arith.addf %174, %186 : vector<4x384xf32>
    %c2_i32_171 = arith.constant 2 : i32
    %188 = vector.broadcast %c2_i32_171 : i32 to vector<4x10xi32>
    %189 = arith.muli %188, %159 : vector<4x10xi32>
    %c2_i32_172 = arith.constant 2 : i32
    %190 = vector.broadcast %c2_i32_172 : i32 to vector<4x10xi32>
    %191 = arith.addi %189, %190 : vector<4x10xi32>
    %192 = arith.cmpi eq, %160, %191 : vector<4x10xi32>
    %cst_173 = arith.constant 1.000000e+00 : f32
    %cst_174 = arith.constant 0.000000e+00 : f32
    %193 = vector.broadcast %cst_173 : f32 to vector<4x10xf32>
    %194 = vector.broadcast %cst_174 : f32 to vector<4x10xf32>
    %195 = arith.select %192, %193, %194 : vector<4x10xi1>, vector<4x10xf32>
    %cst_175 = arith.constant dense<0.000000e+00> : vector<4x320xf32>
    %196 = tpu.matmul %195, %158, %cst_175 {dimension_numbers = #tpu.dot_dimension_numbers<[1], [0], [0], [1], [0, 0, 1, 1], [], []>} : vector<4x10xf32>, vector<10x320xf32>, vector<4x320xf32> -> vector<4x320xf32>
    %c0_176 = arith.constant 0 : index
    %c2_177 = arith.constant 2 : index
    %c0_178 = arith.constant 0 : index
    %c0_179 = arith.constant 0 : index
    %197 = vector.load %arg11[%c0_176, %c2_177, %c0_178, %c0_179] : memref<1x3x320x384xf32, #tpu.memory_space<vmem>>, vector<1x1x320x384xf32>
    %198 = vector.shape_cast %197 : vector<1x1x320x384xf32> to vector<320x384xf32>
    %cst_180 = arith.constant dense<0.000000e+00> : vector<4x384xf32>
    %199 = tpu.matmul %196, %198, %cst_180 {dimension_numbers = #tpu.dot_dimension_numbers<[1], [0], [0], [1], [0, 0, 1, 1], [], []>} : vector<4x320xf32>, vector<320x384xf32>, vector<4x384xf32> -> vector<4x384xf32>
    %200 = arith.addf %187, %199 : vector<4x384xf32>
    %c0_181 = arith.constant 0 : index
    %c0_182 = arith.constant 0 : index
    %c0_183 = arith.constant 0 : index
    %201 = vector.load %arg12[%c0_181, %c0_182, %c0_183] : memref<1x1x384xf32, #tpu.memory_space<vmem>>, vector<1x1x384xf32>
    %202 = vector.shape_cast %201 : vector<1x1x384xf32> to vector<1x384xf32>
    %203 = vector.broadcast %202 : vector<1x384xf32> to vector<4x384xf32>
    %204 = arith.addf %200, %203 : vector<4x384xf32>
    %cst_184 = arith.constant 5.000000e-01 : f32
    %205 = vector.broadcast %cst_184 : f32 to vector<4x384xf32>
    %206 = arith.mulf %205, %204 : vector<4x384xf32>
    %207 = math.tanh %206 : vector<4x384xf32>
    %cst_185 = arith.constant 1.000000e+00 : f32
    %208 = vector.broadcast %cst_185 : f32 to vector<4x384xf32>
    %209 = arith.addf %207, %208 : vector<4x384xf32>
    %cst_186 = arith.constant 5.000000e-01 : f32
    %210 = vector.broadcast %cst_186 : f32 to vector<4x384xf32>
    %211 = arith.mulf %210, %209 : vector<4x384xf32>
    %212 = arith.mulf %204, %211 : vector<4x384xf32>
    %c1_187 = arith.constant 1 : index
    %c0_188 = arith.constant 0 : index
    %213 = vector.load %arg22[%c1_187, %c0_188] : memref<6x576xf32, #tpu.memory_space<vmem>>, vector<4x384xf32>
    tpu.vector_store %arg22[%c1_187, %c0_188], %212 {strides = array<i32>} : memref<6x576xf32, #tpu.memory_space<vmem>>, vector<4x384xf32>,
    %cst_189 = arith.constant 0.000000e+00 : f32
    %214 = vector.broadcast %cst_189 : f32 to vector<4x384xf32>
    %c0_190 = arith.constant 0 : index
    %c0_191 = arith.constant 0 : index
    %215 = vector.load %arg22[%c0_190, %c0_191] : memref<6x576xf32, #tpu.memory_space<vmem>>, vector<4x576xf32>
    %c0_192 = arith.constant 0 : index
    %c0_193 = arith.constant 0 : index
    %c0_194 = arith.constant 0 : index
    %c0_195 = arith.constant 0 : index
    %216 = vector.load %arg13[%c0_192, %c0_193, %c0_194, %c0_195] : memref<1x3x576x384xf32, #tpu.memory_space<vmem>>, vector<1x1x576x384xf32>
    %217 = vector.shape_cast %216 : vector<1x1x576x384xf32> to vector<576x384xf32>
    %cst_196 = arith.constant dense<0.000000e+00> : vector<4x384xf32>
    %218 = tpu.matmul %215, %217, %cst_196 {dimension_numbers = #tpu.dot_dimension_numbers<[1], [0], [0], [1], [0, 0, 1, 1], [], []>} : vector<4x576xf32>, vector<576x384xf32>, vector<4x384xf32> -> vector<4x384xf32>
    %219 = arith.addf %214, %218 : vector<4x384xf32>
    %c1_197 = arith.constant 1 : index
    %c0_198 = arith.constant 0 : index
    %220 = vector.load %arg22[%c1_197, %c0_198] : memref<6x576xf32, #tpu.memory_space<vmem>>, vector<4x576xf32>
    %c0_199 = arith.constant 0 : index
    %c1_200 = arith.constant 1 : index
    %c0_201 = arith.constant 0 : index
    %c0_202 = arith.constant 0 : index
    %221 = vector.load %arg13[%c0_199, %c1_200, %c0_201, %c0_202] : memref<1x3x576x384xf32, #tpu.memory_space<vmem>>, vector<1x1x576x384xf32>
    %222 = vector.shape_cast %221 : vector<1x1x576x384xf32> to vector<576x384xf32>
    %cst_203 = arith.constant dense<0.000000e+00> : vector<4x384xf32>
    %223 = tpu.matmul %220, %222, %cst_203 {dimension_numbers = #tpu.dot_dimension_numbers<[1], [0], [0], [1], [0, 0, 1, 1], [], []>} : vector<4x576xf32>, vector<576x384xf32>, vector<4x384xf32> -> vector<4x384xf32>
    %224 = arith.addf %219, %223 : vector<4x384xf32>
    %c2_204 = arith.constant 2 : index
    %c0_205 = arith.constant 0 : index
    %225 = vector.load %arg22[%c2_204, %c0_205] : memref<6x576xf32, #tpu.memory_space<vmem>>, vector<4x576xf32>
    %c0_206 = arith.constant 0 : index
    %c2_207 = arith.constant 2 : index
    %c0_208 = arith.constant 0 : index
    %c0_209 = arith.constant 0 : index
    %226 = vector.load %arg13[%c0_206, %c2_207, %c0_208, %c0_209] : memref<1x3x576x384xf32, #tpu.memory_space<vmem>>, vector<1x1x576x384xf32>
    %227 = vector.shape_cast %226 : vector<1x1x576x384xf32> to vector<576x384xf32>
    %cst_210 = arith.constant dense<0.000000e+00> : vector<4x384xf32>
    %228 = tpu.matmul %225, %227, %cst_210 {dimension_numbers = #tpu.dot_dimension_numbers<[1], [0], [0], [1], [0, 0, 1, 1], [], []>} : vector<4x576xf32>, vector<576x384xf32>, vector<4x384xf32> -> vector<4x384xf32>
    %229 = arith.addf %224, %228 : vector<4x384xf32>
    %c0_211 = arith.constant 0 : index
    %c0_212 = arith.constant 0 : index
    %c0_213 = arith.constant 0 : index
    %230 = vector.load %arg14[%c0_211, %c0_212, %c0_213] : memref<1x1x384xf32, #tpu.memory_space<vmem>>, vector<1x1x384xf32>
    %231 = vector.shape_cast %230 : vector<1x1x384xf32> to vector<1x384xf32>
    %232 = vector.broadcast %231 : vector<1x384xf32> to vector<4x384xf32>
    %233 = arith.addf %229, %232 : vector<4x384xf32>
    %cst_214 = arith.constant 5.000000e-01 : f32
    %234 = vector.broadcast %cst_214 : f32 to vector<4x384xf32>
    %235 = arith.mulf %234, %233 : vector<4x384xf32>
    %236 = math.tanh %235 : vector<4x384xf32>
    %cst_215 = arith.constant 1.000000e+00 : f32
    %237 = vector.broadcast %cst_215 : f32 to vector<4x384xf32>
    %238 = arith.addf %236, %237 : vector<4x384xf32>
    %cst_216 = arith.constant 5.000000e-01 : f32
    %239 = vector.broadcast %cst_216 : f32 to vector<4x384xf32>
    %240 = arith.mulf %239, %238 : vector<4x384xf32>
    %241 = arith.mulf %233, %240 : vector<4x384xf32>
    %c1_217 = arith.constant 1 : index
    %c0_218 = arith.constant 0 : index
    %242 = vector.load %arg23[%c1_217, %c0_218] : memref<6x576xf32, #tpu.memory_space<vmem>>, vector<4x384xf32>
    tpu.vector_store %arg23[%c1_217, %c0_218], %241 {strides = array<i32>} : memref<6x576xf32, #tpu.memory_space<vmem>>, vector<4x384xf32>,
    %c0_219 = arith.constant 0 : index
    %c0_220 = arith.constant 0 : index
    %243 = vector.load %arg23[%c0_219, %c0_220] : memref<6x576xf32, #tpu.memory_space<vmem>>, vector<6x576xf32>
    %244 = tpu.iota {dimensions = array<i32: 0>} : vector<2x6xi32>
    %245 = tpu.iota {dimensions = array<i32: 1>} : vector<2x6xi32>
    %cst_221 = arith.constant 0.000000e+00 : f32
    %246 = vector.broadcast %cst_221 : f32 to vector<2x512xf32>
    %c2_i32_222 = arith.constant 2 : i32
    %247 = vector.broadcast %c2_i32_222 : i32 to vector<2x6xi32>
    %248 = arith.muli %247, %244 : vector<2x6xi32>
    %c0_i32_223 = arith.constant 0 : i32
    %249 = vector.broadcast %c0_i32_223 : i32 to vector<2x6xi32>
    %250 = arith.addi %248, %249 : vector<2x6xi32>
    %251 = arith.cmpi eq, %245, %250 : vector<2x6xi32>
    %cst_224 = arith.constant 1.000000e+00 : f32
    %cst_225 = arith.constant 0.000000e+00 : f32
    %252 = vector.broadcast %cst_224 : f32 to vector<2x6xf32>
    %253 = vector.broadcast %cst_225 : f32 to vector<2x6xf32>
    %254 = arith.select %251, %252, %253 : vector<2x6xi1>, vector<2x6xf32>
    %cst_226 = arith.constant dense<0.000000e+00> : vector<2x576xf32>
    %255 = tpu.matmul %254, %243, %cst_226 {dimension_numbers = #tpu.dot_dimension_numbers<[1], [0], [0], [1], [0, 0, 1, 1], [], []>} : vector<2x6xf32>, vector<6x576xf32>, vector<2x576xf32> -> vector<2x576xf32>
    %c0_227 = arith.constant 0 : index
    %c0_228 = arith.constant 0 : index
    %c0_229 = arith.constant 0 : index
    %c0_230 = arith.constant 0 : index
    %256 = vector.load %arg15[%c0_227, %c0_228, %c0_229, %c0_230] : memref<1x3x576x512xf32, #tpu.memory_space<vmem>>, vector<1x1x576x512xf32>
    %257 = vector.shape_cast %256 : vector<1x1x576x512xf32> to vector<576x512xf32>
    %cst_231 = arith.constant dense<0.000000e+00> : vector<2x512xf32>
    %258 = tpu.matmul %255, %257, %cst_231 {dimension_numbers = #tpu.dot_dimension_numbers<[1], [0], [0], [1], [0, 0, 1, 1], [], []>} : vector<2x576xf32>, vector<576x512xf32>, vector<2x512xf32> -> vector<2x512xf32>
    %259 = arith.addf %246, %258 : vector<2x512xf32>
    %c2_i32_232 = arith.constant 2 : i32
    %260 = vector.broadcast %c2_i32_232 : i32 to vector<2x6xi32>
    %261 = arith.muli %260, %244 : vector<2x6xi32>
    %c1_i32_233 = arith.constant 1 : i32
    %262 = vector.broadcast %c1_i32_233 : i32 to vector<2x6xi32>
    %263 = arith.addi %261, %262 : vector<2x6xi32>
    %264 = arith.cmpi eq, %245, %263 : vector<2x6xi32>
    %cst_234 = arith.constant 1.000000e+00 : f32
    %cst_235 = arith.constant 0.000000e+00 : f32
    %265 = vector.broadcast %cst_234 : f32 to vector<2x6xf32>
    %266 = vector.broadcast %cst_235 : f32 to vector<2x6xf32>
    %267 = arith.select %264, %265, %266 : vector<2x6xi1>, vector<2x6xf32>
    %cst_236 = arith.constant dense<0.000000e+00> : vector<2x576xf32>
    %268 = tpu.matmul %267, %243, %cst_236 {dimension_numbers = #tpu.dot_dimension_numbers<[1], [0], [0], [1], [0, 0, 1, 1], [], []>} : vector<2x6xf32>, vector<6x576xf32>, vector<2x576xf32> -> vector<2x576xf32>
    %c0_237 = arith.constant 0 : index
    %c1_238 = arith.constant 1 : index
    %c0_239 = arith.constant 0 : index
    %c0_240 = arith.constant 0 : index
    %269 = vector.load %arg15[%c0_237, %c1_238, %c0_239, %c0_240] : memref<1x3x576x512xf32, #tpu.memory_space<vmem>>, vector<1x1x576x512xf32>
    %270 = vector.shape_cast %269 : vector<1x1x576x512xf32> to vector<576x512xf32>
    %cst_241 = arith.constant dense<0.000000e+00> : vector<2x512xf32>
    %271 = tpu.matmul %268, %270, %cst_241 {dimension_numbers = #tpu.dot_dimension_numbers<[1], [0], [0], [1], [0, 0, 1, 1], [], []>} : vector<2x576xf32>, vector<576x512xf32>, vector<2x512xf32> -> vector<2x512xf32>
    %272 = arith.addf %259, %271 : vector<2x512xf32>
    %c2_i32_242 = arith.constant 2 : i32
    %273 = vector.broadcast %c2_i32_242 : i32 to vector<2x6xi32>
    %274 = arith.muli %273, %244 : vector<2x6xi32>
    %c2_i32_243 = arith.constant 2 : i32
    %275 = vector.broadcast %c2_i32_243 : i32 to vector<2x6xi32>
    %276 = arith.addi %274, %275 : vector<2x6xi32>
    %277 = arith.cmpi eq, %245, %276 : vector<2x6xi32>
    %cst_244 = arith.constant 1.000000e+00 : f32
    %cst_245 = arith.constant 0.000000e+00 : f32
    %278 = vector.broadcast %cst_244 : f32 to vector<2x6xf32>
    %279 = vector.broadcast %cst_245 : f32 to vector<2x6xf32>
    %280 = arith.select %277, %278, %279 : vector<2x6xi1>, vector<2x6xf32>
    %cst_246 = arith.constant dense<0.000000e+00> : vector<2x576xf32>
    %281 = tpu.matmul %280, %243, %cst_246 {dimension_numbers = #tpu.dot_dimension_numbers<[1], [0], [0], [1], [0, 0, 1, 1], [], []>} : vector<2x6xf32>, vector<6x576xf32>, vector<2x576xf32> -> vector<2x576xf32>
    %c0_247 = arith.constant 0 : index
    %c2_248 = arith.constant 2 : index
    %c0_249 = arith.constant 0 : index
    %c0_250 = arith.constant 0 : index
    %282 = vector.load %arg15[%c0_247, %c2_248, %c0_249, %c0_250] : memref<1x3x576x512xf32, #tpu.memory_space<vmem>>, vector<1x1x576x512xf32>
    %283 = vector.shape_cast %282 : vector<1x1x576x512xf32> to vector<576x512xf32>
    %cst_251 = arith.constant dense<0.000000e+00> : vector<2x512xf32>
    %284 = tpu.matmul %281, %283, %cst_251 {dimension_numbers = #tpu.dot_dimension_numbers<[1], [0], [0], [1], [0, 0, 1, 1], [], []>} : vector<2x576xf32>, vector<576x512xf32>, vector<2x512xf32> -> vector<2x512xf32>
    %285 = arith.addf %272, %284 : vector<2x512xf32>
    %c0_252 = arith.constant 0 : index
    %c0_253 = arith.constant 0 : index
    %c0_254 = arith.constant 0 : index
    %286 = vector.load %arg16[%c0_252, %c0_253, %c0_254] : memref<1x1x512xf32, #tpu.memory_space<vmem>>, vector<1x1x512xf32>
    %287 = vector.shape_cast %286 : vector<1x1x512xf32> to vector<1x512xf32>
    %288 = vector.broadcast %287 : vector<1x512xf32> to vector<2x512xf32>
    %289 = arith.addf %285, %288 : vector<2x512xf32>
    %cst_255 = arith.constant 5.000000e-01 : f32
    %290 = vector.broadcast %cst_255 : f32 to vector<2x512xf32>
    %291 = arith.mulf %290, %289 : vector<2x512xf32>
    %292 = math.tanh %291 : vector<2x512xf32>
    %cst_256 = arith.constant 1.000000e+00 : f32
    %293 = vector.broadcast %cst_256 : f32 to vector<2x512xf32>
    %294 = arith.addf %292, %293 : vector<2x512xf32>
    %cst_257 = arith.constant 5.000000e-01 : f32
    %295 = vector.broadcast %cst_257 : f32 to vector<2x512xf32>
    %296 = arith.mulf %295, %294 : vector<2x512xf32>
    %297 = arith.mulf %289, %296 : vector<2x512xf32>
    %c0_258 = arith.constant 0 : index
    %c0_259 = arith.constant 0 : index
    %c0_260 = arith.constant 0 : index
    %c0_261 = arith.constant 0 : index
    %298 = vector.load %arg17[%c0_258, %c0_259, %c0_260, %c0_261] : memref<1x1x2x512xf32, #tpu.memory_space<vmem>>, vector<1x1x2x512xf32>
    %299 = vector.shape_cast %298 : vector<1x1x2x512xf32> to vector<2x512xf32>
    %300 = vector.shape_cast %297 : vector<2x512xf32> to vector<1x1x2x512xf32>
    tpu.vector_store %arg17[%c0_258, %c0_259, %c0_260, %c0_261], %300 {strides = array<i32>} : memref<1x1x2x512xf32, #tpu.memory_space<vmem>>, vector<1x1x2x512xf32>,
    return
  }
  func.func @transform_0(%arg0: i32, %arg1: i32) -> (i32, i32, i32, i32) {
    %c0_i32 = arith.constant 0 : i32
    %c0_i32_0 = arith.constant 0 : i32
    %c0_i32_1 = arith.constant 0 : i32
    return %arg0, %arg1, %c0_i32, %c0_i32_0 : i32, i32, i32, i32
  }
  func.func @transform_1(%arg0: i32, %arg1: i32) -> (i32, i32, i32, i32) {
    %c0_i32 = arith.constant 0 : i32
    %c0_i32_0 = arith.constant 0 : i32
    %c0_i32_1 = arith.constant 0 : i32
    %c0_i32_2 = arith.constant 0 : i32
    return %arg0, %c0_i32, %c0_i32_0, %c0_i32_1 : i32, i32, i32, i32
  }
  func.func @transform_2(%arg0: i32, %arg1: i32) -> (i32, i32, i32) {
    %c0_i32 = arith.constant 0 : i32
    %c0_i32_0 = arith.constant 0 : i32
    %c0_i32_1 = arith.constant 0 : i32
    return %arg0, %c0_i32, %c0_i32_0 : i32, i32, i32
  }
  func.func @transform_3(%arg0: i32, %arg1: i32) -> (i32, i32, i32, i32) {
    %c0_i32 = arith.constant 0 : i32
    %c0_i32_0 = arith.constant 0 : i32
    %c0_i32_1 = arith.constant 0 : i32
    %c0_i32_2 = arith.constant 0 : i32
    return %arg0, %c0_i32, %c0_i32_0, %c0_i32_1 : i32, i32, i32, i32
  }
  func.func @transform_4(%arg0: i32, %arg1: i32) -> (i32, i32, i32) {
    %c0_i32 = arith.constant 0 : i32
    %c0_i32_0 = arith.constant 0 : i32
    %c0_i32_1 = arith.constant 0 : i32
    return %arg0, %c0_i32, %c0_i32_0 : i32, i32, i32
  }
  func.func @transform_5(%arg0: i32, %arg1: i32) -> (i32, i32, i32, i32) {
    %c0_i32 = arith.constant 0 : i32
    %c0_i32_0 = arith.constant 0 : i32
    %c0_i32_1 = arith.constant 0 : i32
    %c0_i32_2 = arith.constant 0 : i32
    return %arg0, %c0_i32, %c0_i32_0, %c0_i32_1 : i32, i32, i32, i32
  }
  func.func @transform_6(%arg0: i32, %arg1: i32) -> (i32, i32, i32) {
    %c0_i32 = arith.constant 0 : i32
    %c0_i32_0 = arith.constant 0 : i32
    %c0_i32_1 = arith.constant 0 : i32
    return %arg0, %c0_i32, %c0_i32_0 : i32, i32, i32
  }
  func.func @transform_7(%arg0: i32, %arg1: i32) -> (i32, i32, i32, i32) {
    %c0_i32 = arith.constant 0 : i32
    %c0_i32_0 = arith.constant 0 : i32
    %c0_i32_1 = arith.constant 0 : i32
    %c0_i32_2 = arith.constant 0 : i32
    return %arg0, %c0_i32, %c0_i32_0, %c0_i32_1 : i32, i32, i32, i32
  }
  func.func @transform_8(%arg0: i32, %arg1: i32) -> (i32, i32, i32) {
    %c0_i32 = arith.constant 0 : i32
    %c0_i32_0 = arith.constant 0 : i32
    %c0_i32_1 = arith.constant 0 : i32
    return %arg0, %c0_i32, %c0_i32_0 : i32, i32, i32
  }
  func.func @transform_9(%arg0: i32, %arg1: i32) -> (i32, i32, i32, i32) {
    %c0_i32 = arith.constant 0 : i32
    %c0_i32_0 = arith.constant 0 : i32
    %c0_i32_1 = arith.constant 0 : i32
    %c0_i32_2 = arith.constant 0 : i32
    return %arg0, %c0_i32, %c0_i32_0, %c0_i32_1 : i32, i32, i32, i32
  }
  func.func @transform_10(%arg0: i32, %arg1: i32) -> (i32, i32, i32) {
    %c0_i32 = arith.constant 0 : i32
    %c0_i32_0 = arith.constant 0 : i32
    %c0_i32_1 = arith.constant 0 : i32
    return %arg0, %c0_i32, %c0_i32_0 : i32, i32, i32
  }
  func.func @transform_11(%arg0: i32, %arg1: i32) -> (i32, i32, i32, i32) {
    %c0_i32 = arith.constant 0 : i32
    %c0_i32_0 = arith.constant 0 : i32
    %c0_i32_1 = arith.constant 0 : i32
    %c0_i32_2 = arith.constant 0 : i32
    return %arg0, %c0_i32, %c0_i32_0, %c0_i32_1 : i32, i32, i32, i32
  }
  func.func @transform_12(%arg0: i32, %arg1: i32) -> (i32, i32, i32) {
    %c0_i32 = arith.constant 0 : i32
    %c0_i32_0 = arith.constant 0 : i32
    %c0_i32_1 = arith.constant 0 : i32
    return %arg0, %c0_i32, %c0_i32_0 : i32, i32, i32
  }
  func.func @transform_13(%arg0: i32, %arg1: i32) -> (i32, i32, i32, i32) {
    %c0_i32 = arith.constant 0 : i32
    %c0_i32_0 = arith.constant 0 : i32
    %c0_i32_1 = arith.constant 0 : i32
    %c0_i32_2 = arith.constant 0 : i32
    return %arg0, %c0_i32, %c0_i32_0, %c0_i32_1 : i32, i32, i32, i32
  }
  func.func @transform_14(%arg0: i32, %arg1: i32) -> (i32, i32, i32) {
    %c0_i32 = arith.constant 0 : i32
    %c0_i32_0 = arith.constant 0 : i32
    %c0_i32_1 = arith.constant 0 : i32
    return %arg0, %c0_i32, %c0_i32_0 : i32, i32, i32
  }
  func.func @transform_15(%arg0: i32, %arg1: i32) -> (i32, i32, i32, i32) {
    %c0_i32 = arith.constant 0 : i32
    %c0_i32_0 = arith.constant 0 : i32
    %c0_i32_1 = arith.constant 0 : i32
    return %arg0, %arg1, %c0_i32, %c0_i32_0 : i32, i32, i32, i32
  }
}

</mosaic_0001>

<bundles_post_ra>
// kernel: tpu_custom_call.1
= control target key start
LH: loop header
LB: loop body
LE: loop exit
PB: predicated region body
PF: predicated region fallthrough
CT: control target
= control target key end

     0   :  { %s16329_s0 = inlined_call_operand.vmem [shape: f32[1,2,18,54], index: 0, kind: input, shape index: {}]   ;;  %s16330_s1 = inlined_call_operand.vmem [shape: f32[1,3,54,256], index: 1, kind: input, shape index: {}]   ;;  %s16331_s2 = inlined_call_operand.hbm [shape: f32[1,1,256], index: 2, kind: input, shape index: {}]   ;;  %s16332_s3 = inlined_call_operand.hbm [shape: f32[1,3,288,256], index: 3, kind: input, shape index: {}]   ;;  %s16333_s4 = inlined_call_operand.hbm [shape: f32[1,1,256], index: 4, kind: input, shape index: {}]   ;;  %s16334_s5 = inlined_call_operand.hbm [shape: f32[1,3,288,256], index: 5, kind: input, shape index: {}]   ;;  %s16335_s6 = inlined_call_operand.hbm [shape: f32[1,1,256], index: 6, kind: input, shape index: {}]   ;;  %s16336_s7 = inlined_call_operand.hbm [shape: f32[1,3,320,256], index: 7, kind: input, shape index: {}]   ;;  %s16337_s8 = inlined_call_operand.hbm [shape: f32[1,1,256], index: 8, kind: input, shape index: {}]   ;;  %s16338_s9 = inlined_call_operand.hbm [shape: f32[1,3,320,384], index: 9, kind: input, shape index: {}]   ;;  %s16339_s10 = inlined_call_operand.hbm [shape: f32[1,1,384], index: 10, kind: input, shape index: {}]   ;;  %s16340_s11 = inlined_call_operand.hbm [shape: f32[1,3,576,384], index: 11, kind: input, shape index: {}]   ;;  %s16341_s12 = inlined_call_operand.hbm [shape: f32[1,1,384], index: 12, kind: input, shape index: {}]   ;;  %s16342_s13 = inlined_call_operand.hbm [shape: f32[1,3,576,512], index: 13, kind: input, shape index: {}]   ;;  %s16343_s14 = inlined_call_operand.hbm [shape: f32[1,1,512], index: 14, kind: input, shape index: {}]   ;;  %s16344_s15 = inlined_call_operand.hbm [shape: f32[1,2,2,512], index: 15, kind: output, shape index: {}]  }
   0x1   :  { %16362 = sst [smem:[#allocation48_spill]] %s16329_s0 }
   0x2   :  { %16363 = sst [smem:[#allocation49_spill]] %s16330_s1 }
   0x3   :  { %16364 = sst [smem:[#allocation50_spill]] %s16332_s3 }
   0x4   :  { %16365 = sst [smem:[#allocation51_spill]] %s16334_s5 }
   0x5   :  { %16366 = sst [smem:[#allocation52_spill]] %s16344_s15 }
   0x6   :  { %20 = vsyncpa [#allocation9], 0 }
   0x7   :  { %21 = vsyncpa [#allocation12], 0 }
   0x8   :  { %22 = vsyncpa [#allocation15], 0 }
   0x9   :  { %23 = vsyncpa [#allocation18], 0 }
   0xa   :  { %24 = vsyncpa [#allocation21], 0 }
   0xb   :  { %25 = vsyncpa [#allocation24], 0 }
   0xc   :  { %26 = vsyncpa [#allocation27], 0 }
   0xd   :  { %27 = vsyncpa [#allocation10], 0 }
   0xe   :  { %29 = vsyncpa [#allocation10 + $0x1], 0  ;;  %s15197_s18 = smov 0   ;;  %s15199_s19 = smov 0  }
   0xf   :  { %s15201_s20 = smov 0   ;;  %s15203_s21 = smov 0  }
  0x10   :  { %s15205_s22 = smov 0   ;;  %s15207_s23 = smov 0  }
  0x11 LB: > { %16367 = sst [smem:[#allocation38_spill]] %s15070_s18  ;;  %s10871_s24 = sadd.s32 4294967295, %s15090_s23   ;;  %s15090_s23 = sphi %s15207_s23, %s35_s23   ;;  %s15086_s22 = sphi %s15205_s22, %s16404_s22   ;;  %s15082_s21 = sphi %s15203_s21, %s16403_s21   ;;  %s15078_s20 = sphi %s15201_s20, %s16402_s20   ;;  %s15074_s19 = sphi %s15199_s19, %s16401_s19   ;;  %s15070_s18 = sphi %s15197_s18, %s16400_s18  }
  0x12   : > { %16368 = sst [smem:[#allocation39_spill]] %s15074_s19  ;;  %s10872_s25 = sadd.s32 4294967294, %s15090_s23  }
  0x13   : > { %16369 = sst [smem:[#allocation40_spill]] %s15078_s20  ;;  %s44_s26 = sadd.s32 1, %s15086_s22 }
  0x14   : > { %16370 = sst [smem:[#allocation41_spill]] %s15082_s21  ;;  %s448_s27 = sadd.s32 1, %s15078_s20 }
  0x15   : > { %16371 = sst [smem:[#allocation42_spill]] %s15086_s22  ;;  %p45_p0 = scmp.ge.s32.totalorder %s44_s26, 2 }
  0x16   : > { %16372 = sst [smem:[#allocation43_spill]] %s15090_s23  ;;  %p458_p1 = scmp.ne.s32.totalorder %s15078_s20, %s15074_s19 }
  0x17   : > { %p459_p2 = scmp.eq.s32.totalorder %s10871_s24, 1  ;;  %p464_p3 = scmp.ne.s32.totalorder %s15074_s19, %s15070_s18 }
  0x18   : > { %s16406_s26 = smov (%p45_p0, %s44_s26), 0  ;;  %p465_p5 = scmp.eq.s32.totalorder %s10872_s25, 1 }
  0x19   : > { %16373 = sst [smem:[#allocation44_spill]] %s16406_s26  ;;  %p15237_p4 = por %p459_p2, %p458_p1 }
  0x1a   : > { %s444_s29 = ssub.s32 %s15086_s22, %s16406_s26  ;;  %p10873_p6 = scmp.ge.s32.totalorder %s15090_s23, 1 }
  0x1b   : > { %s16374_s28 = scalar_select %p15237_p4, 1, 0 }
  0x1c   : > { %p446_p7 = scmp.eq.s32.totalorder %s444_s29, 0  ;;  %p15244_p8 = por %p465_p5, %p464_p3 }
  0x1d   : > { %16375 = sst [smem:[#allocation45_spill]] %s16374_s28  ;;  %p472_p9 = scmp.lt.s32.totalorder %s15090_s23, 3 }
  0x1e   : > { %s16376_s30 = scalar_select %p15244_p8, 1, 0 }
  0x1f   : > { %s15250_s16 = scalar_select %p446_p7, %s15078_s20, %s448_s27  }
  0x20   : > { %16377 = sst [smem:[#allocation46_spill]] %s16376_s30  ;;  %p15252_p10 = pnand %p10873_p6, %p472_p9 }
  0x21   : > { %16378 = sst [smem:[#allocation47_spill]] %s15250_s16  ;;  %p15256_p11 = scmp.eq.s32.totalorder %s10871_s24, 0 }
  0x22   : > { %s16379_s17 = scalar_select %p15252_p10, 1, 0 }
  0x23   : > { %s16380_s18 = scalar_select %p15256_p11, 1, 0 }
  0x24   : > { %p14424_p12 = pneg %p15252_p10  ;;  %s15092_s25 = smov [#allocation11]  }
  0x25   : > { %s509_s29 = sshll.u32 %s15092_s25, 4  ;;  %s15093_s27 = smov [#allocation14]   ;;  %s510_s29 = int_to_ptr.vmem [resolvable:$true] %s509_s29 }
  0x26   : > { %p15264_p13 = pnand %p15256_p11, %p14424_p12  ;;  %s539_s22 = sshll.u32 %s15093_s27, 4  ;;  %s15268_s22 = int_to_ptr.vmem [resolvable:$true] %s539_s22 }
  0x27   : > { %s16382_s3 = sld [smem:[#allocation50_spill]] }
  0x28   : > { %p15278_p1 = pneg %p15264_p13 }
  0x2d   : > { %s14620_s20 = scalar_lea.hbm %s16382_s3, 27648 }
  0x2e   : > { %p14621_p0 = scmp.ne.s32.totalorder %s16382_s3, %s14620_s20  ;;  %p14627_p5 = scmp.lt.u32.totalorder %s14620_s20, %s16382_s3 }
  0x30   : > { %p14623_p2 = pnand %p15278_p1, %p14621_p0 }
  0x32   : > { %p14624_p3 = pneg %p14623_p2 }
  0x34   : > { %p14629_p6 = pnand %p14627_p5, %p14624_p3 }
  0x36   : > { %14632 = shalt.err (!%p14629_p6)
}
  0x37   : > { %s14633_s16 = scalar_lea.vmem %s510_s29, 27648  ;;  %p14641_p8 = scmp.lt.s32.totalorder %s510_s29, %s510_s29 }
  0x38   : > { %p14634_p7 = scmp.ne.s32.totalorder %s510_s29, %s14633_s16  ;;  %p14642_p4 = scmp.lt.s32.totalorder %s14633_s16, %s14633_s16 }
  0x3a   : > { %p14636_p9 = pnand %p14634_p7, %p15278_p1  ;;  %p14643_p11 = por %p14642_p4, %p14641_p8 }
  0x3c   : > { %p14637_p12 = pneg %p14636_p9 }
  0x3e   : > { %p14644_p10 = pnand %p14643_p11, %p14637_p12 }
  0x40   : > { %14647 = shalt.err (!%p14644_p10)
}
  0x41   : > { %s15094_s23 = smov 256   ;;  %s15095_s30 = smov 16  }
  0x42   : > { %14430 = dma.hbm_to_vmem [thread:$0]  (!%p15264_p13), %s16382_s3, 27648, %s510_s29, [#allocation12], %s15094_s23, %s15094_s23, %s15095_s30  }
  0x43   : > { %s16384_s5 = sld [smem:[#allocation51_spill]] }
  0x49   : > { %s14648_s28 = scalar_lea.hbm %s16384_s5, 27648 }
  0x4a   : > { %p14649_p4 = scmp.ne.s32.totalorder %s16384_s5, %s14648_s28  ;;  %p14655_p11 = scmp.lt.u32.totalorder %s14648_s28, %s16384_s5 }
  0x4c   : > { %p14651_p8 = pnand %p14649_p4, %p15278_p1 }
  0x4e   : > { %p14652_p10 = pneg %p14651_p8 }
  0x50   : > { %p14657_p0 = pnand %p14655_p11, %p14652_p10 }
  0x52   : > { %14660 = shalt.err (!%p14657_p0)
}
  0x53   : > { %s14661_s29 = scalar_lea.vmem %s15268_s22, 27648  ;;  %p14669_p6 = scmp.lt.s32.totalorder %s15268_s22, %s15268_s22 }
  0x54   : > { %p14662_p2 = scmp.ne.s32.totalorder %s15268_s22, %s14661_s29  ;;  %p14670_p7 = scmp.lt.s32.totalorder %s14661_s29, %s14661_s29 }
  0x56   : > { %p14664_p3 = pnand %p14662_p2, %p15278_p1  ;;  %p14671_p9 = por %p14670_p7, %p14669_p6 }
  0x58   : > { %p14665_p5 = pneg %p14664_p3 }
  0x5a   : > { %p14672_p12 = pnand %p14671_p9, %p14665_p5 }
  0x5c   : > { %14675 = shalt.err (!%p14672_p12)
}
  0x5d   : > { %14436 = dma.hbm_to_vmem [thread:$0]  (!%p15264_p13), %s16384_s5, 27648, %s15268_s22, [#allocation15], %s15094_s23, %s15094_s23, %s15095_s30  }
  0x5e   : > { %s15096_s19 = smov [#allocation17]   ;;  %s15097_s15 = smov [#allocation20]  }
  0x5f   : > { %s569_s28 = sshll.u32 %s15096_s19, 4  ;;  %s599_s20 = sshll.u32 %s15097_s15, 4  ;;  %s570_s28 = int_to_ptr.vmem [resolvable:$true] %s569_s28  ;;  %s600_s20 = int_to_ptr.vmem [resolvable:$true] %s599_s20 }
  0x60   : > { %s14676_s16 = scalar_lea.hbm %s16336_s7, 30720 }
  0x61   : > { %p14677_p4 = scmp.ne.s32.totalorder %s16336_s7, %s14676_s16  ;;  %p14683_p11 = scmp.lt.u32.totalorder %s14676_s16, %s16336_s7 }
  0x63   : > { %p14679_p8 = pnand %p14677_p4, %p15278_p1 }
  0x65   : > { %p14680_p10 = pneg %p14679_p8 }
  0x67   : > { %p14685_p0 = pnand %p14683_p11, %p14680_p10 }
  0x69   : > { %14688 = shalt.err (!%p14685_p0)
}
  0x6a   : > { %s14689_s22 = scalar_lea.vmem %s570_s28, 30720  ;;  %p14697_p6 = scmp.lt.s32.totalorder %s570_s28, %s570_s28 }
  0x6b   : > { %p14690_p2 = scmp.ne.s32.totalorder %s570_s28, %s14689_s22  ;;  %p14698_p7 = scmp.lt.s32.totalorder %s14689_s22, %s14689_s22 }
  0x6d   : > { %p14692_p3 = pnand %p14690_p2, %p15278_p1  ;;  %p14699_p9 = por %p14698_p7, %p14697_p6 }
  0x6f   : > { %p14693_p5 = pneg %p14692_p3 }
  0x71   : > { %p14700_p12 = pnand %p14699_p9, %p14693_p5 }
  0x73   : > { %14703 = shalt.err (!%p14700_p12)
}
  0x74   : > { %14442 = dma.hbm_to_vmem [thread:$0]  (!%p15264_p13), %s16336_s7, 30720, %s570_s28, [#allocation18], %s15094_s23, %s15094_s23, %s15095_s30  }
  0x75   : > { %s14704_s15 = scalar_lea.hbm %s16338_s9, 46080 }
  0x76   : > { %p14705_p4 = scmp.ne.s32.totalorder %s16338_s9, %s14704_s15  ;;  %p14711_p11 = scmp.lt.u32.totalorder %s14704_s15, %s16338_s9 }
  0x78   : > { %p14707_p8 = pnand %p14705_p4, %p15278_p1 }
  0x7a   : > { %p14708_p10 = pneg %p14707_p8 }
  0x7c   : > { %p14713_p0 = pnand %p14711_p11, %p14708_p10 }
  0x7e   : > { %14716 = shalt.err (!%p14713_p0)
}
  0x7f   : > { %s14717_s0 = scalar_lea.vmem %s600_s20, 46080  ;;  %p14725_p6 = scmp.lt.s32.totalorder %s600_s20, %s600_s20 }
  0x80   : > { %p14718_p2 = scmp.ne.s32.totalorder %s600_s20, %s14717_s0  ;;  %p14726_p7 = scmp.lt.s32.totalorder %s14717_s0, %s14717_s0 }
  0x82   : > { %p14720_p3 = pnand %p14718_p2, %p15278_p1  ;;  %p14727_p9 = por %p14726_p7, %p14725_p6 }
  0x84   : > { %p14721_p5 = pneg %p14720_p3 }
  0x86   : > { %p14728_p12 = pnand %p14727_p9, %p14721_p5 }
  0x88   : > { %14731 = shalt.err (!%p14728_p12)
}
  0x89   : > { %s15098_s23 = smov 384   ;;  %s15099_s30 = smov 24  }
  0x8a   : > { %14448 = dma.hbm_to_vmem [thread:$0]  (!%p15264_p13), %s16338_s9, 46080, %s600_s20, [#allocation21], %s15098_s23, %s15098_s23, %s15099_s30  }
  0x8b   : > { %s15100_s3 = smov [#allocation23]   ;;  %s15101_s1 = smov [#allocation26]  }
  0x8c   : > { %s629_s21 = sshll.u32 %s15100_s3, 4  ;;  %s659_s19 = sshll.u32 %s15101_s1, 4  ;;  %s630_s21 = int_to_ptr.vmem [resolvable:$true] %s629_s21  ;;  %s660_s19 = int_to_ptr.vmem [resolvable:$true] %s659_s19 }
  0x8d   : > { %s14732_s27 = scalar_lea.hbm %s16340_s11, 82944 }
  0x8e   : > { %p14733_p4 = scmp.ne.s32.totalorder %s16340_s11, %s14732_s27  ;;  %p14739_p11 = scmp.lt.u32.totalorder %s14732_s27, %s16340_s11 }
  0x90   : > { %p14735_p8 = pnand %p14733_p4, %p15278_p1 }
  0x92   : > { %p14736_p10 = pneg %p14735_p8 }
  0x94   : > { %p14741_p0 = pnand %p14739_p11, %p14736_p10 }
  0x96   : > { %14744 = shalt.err (!%p14741_p0)
}
  0x97   : > { %s14745_s20 = scalar_lea.vmem %s630_s21, 82944  ;;  %p14753_p6 = scmp.lt.s32.totalorder %s630_s21, %s630_s21 }
  0x98   : > { %p14746_p2 = scmp.ne.s32.totalorder %s630_s21, %s14745_s20  ;;  %p14754_p7 = scmp.lt.s32.totalorder %s14745_s20, %s14745_s20 }
  0x9a   : > { %p14748_p3 = pnand %p14746_p2, %p15278_p1  ;;  %p14755_p9 = por %p14754_p7, %p14753_p6 }
  0x9c   : > { %p14749_p5 = pneg %p14748_p3 }
  0x9e   : > { %p14756_p12 = pnand %p14755_p9, %p14749_p5 }
  0xa0   : > { %14759 = shalt.err (!%p14756_p12)
}
  0xa1   : > { %14454 = dma.hbm_to_vmem [thread:$0]  (!%p15264_p13), %s16340_s11, 82944, %s630_s21, [#allocation24], %s15098_s23, %s15098_s23, %s15099_s30  }
  0xa2   : > { %s14760_s1 = scalar_lea.hbm %s16342_s13, 110592 }
  0xa3   : > { %p14761_p4 = scmp.ne.s32.totalorder %s16342_s13, %s14760_s1  ;;  %p14767_p11 = scmp.lt.u32.totalorder %s14760_s1, %s16342_s13 }
  0xa5   : > { %p14763_p8 = pnand %p14761_p4, %p15278_p1 }
  0xa7   : > { %p14764_p10 = pneg %p14763_p8 }
  0xa9   : > { %p14769_p0 = pnand %p14767_p11, %p14764_p10 }
  0xab   : > { %14772 = shalt.err (!%p14769_p0)
}
  0xac   : > { %s14773_s29 = scalar_lea.vmem %s660_s19, 110592  ;;  %p14781_p6 = scmp.lt.s32.totalorder %s660_s19, %s660_s19 }
  0xad   : > { %p14774_p2 = scmp.ne.s32.totalorder %s660_s19, %s14773_s29  ;;  %p14782_p7 = scmp.lt.s32.totalorder %s14773_s29, %s14773_s29 }
  0xaf   : > { %p14776_p3 = pnand %p14774_p2, %p15278_p1  ;;  %p14783_p9 = por %p14782_p7, %p14781_p6 }
  0xb1   : > { %p14777_p5 = pneg %p14776_p3 }
  0xb3   : > { %p14784_p12 = pnand %p14783_p9, %p14777_p5 }
  0xb5   : > { %14787 = shalt.err (!%p14784_p12)
}
  0xb6   : > { %s15102_s23 = smov 512   ;;  %s15103_s30 = smov 32  }
  0xb7   : > { %14460 = dma.hbm_to_vmem [thread:$0]  (!%p15264_p13), %s16342_s13, 110592, %s660_s19, [#allocation27], %s15102_s23, %s15102_s23, %s15103_s30  }
  0xb8   : > { %s15104_s20 = smov [#allocation8]   ;;  %s15105_s22 = smov [#allocation13]  }
  0xb9   : > { %s496_s28 = sshll.u32 %s15104_s20, 4  ;;  %s526_s5 = sshll.u32 %s15105_s22, 4  ;;  %s497_s28 = int_to_ptr.vmem [resolvable:$true] %s496_s28  ;;  %s527_s5 = int_to_ptr.vmem [resolvable:$true] %s526_s5 }
  0xba   : > { %s14788_s15 = scalar_lea.hbm %s16331_s2, 32 }
  0xbb   : > { %p14789_p4 = scmp.ne.s32.totalorder %s16331_s2, %s14788_s15  ;;  %p14795_p11 = scmp.lt.u32.totalorder %s14788_s15, %s16331_s2 }
  0xbd   : > { %p14791_p8 = pnand %p14789_p4, %p15278_p1 }
  0xbf   : > { %p14792_p10 = pneg %p14791_p8 }
  0xc1   : > { %p14797_p0 = pnand %p14795_p11, %p14792_p10 }
  0xc3   : > { %14800 = shalt.err (!%p14797_p0)
}
  0xc4   : > { %s14801_s19 = scalar_lea.vmem %s497_s28, 32  ;;  %p14809_p6 = scmp.lt.s32.totalorder %s497_s28, %s497_s28 }
  0xc5   : > { %p14802_p2 = scmp.ne.s32.totalorder %s497_s28, %s14801_s19  ;;  %p14810_p7 = scmp.lt.s32.totalorder %s14801_s19, %s14801_s19 }
  0xc7   : > { %p14804_p3 = pnand %p14802_p2, %p15278_p1  ;;  %p14811_p9 = por %p14810_p7, %p14809_p6 }
  0xc9   : > { %p14805_p5 = pneg %p14804_p3 }
  0xcb   : > { %p14812_p12 = pnand %p14811_p9, %p14805_p5 }
  0xcd   : > { %14815 = shalt.err (!%p14812_p12)
}
  0xce   : > { %14427 = dma.hbm_to_vmem [thread:$0]  (!%p15264_p13), %s16331_s2, 32, %s497_s28, [#allocation9]  }
  0xcf   : > { %s14816_s20 = scalar_lea.hbm %s16333_s4, 32 }
  0xd0   : > { %p14817_p4 = scmp.ne.s32.totalorder %s16333_s4, %s14816_s20  ;;  %p14823_p11 = scmp.lt.u32.totalorder %s14816_s20, %s16333_s4 }
  0xd2   : > { %p14819_p8 = pnand %p14817_p4, %p15278_p1 }
  0xd4   : > { %p14820_p10 = pneg %p14819_p8 }
  0xd6   : > { %p14825_p0 = pnand %p14823_p11, %p14820_p10 }
  0xd8   : > { %14828 = shalt.err (!%p14825_p0)
}
  0xd9   : > { %s14829_s24 = scalar_lea.vmem %s527_s5, 32  ;;  %p14837_p6 = scmp.lt.s32.totalorder %s527_s5, %s527_s5 }
  0xda   : > { %p14830_p2 = scmp.ne.s32.totalorder %s527_s5, %s14829_s24  ;;  %p14838_p7 = scmp.lt.s32.totalorder %s14829_s24, %s14829_s24 }
  0xdc   : > { %p14832_p3 = pnand %p14830_p2, %p15278_p1  ;;  %p14839_p9 = por %p14838_p7, %p14837_p6 }
  0xde   : > { %p14833_p5 = pneg %p14832_p3 }
  0xe0   : > { %p14840_p12 = pnand %p14839_p9, %p14833_p5 }
  0xe2   : > { %14843 = shalt.err (!%p14840_p12)
}
  0xe3   : > { %14433 = dma.hbm_to_vmem [thread:$0]  (!%p15264_p13), %s16333_s4, 32, %s527_s5, [#allocation12]  }
  0xe4   : > { %s15106_s16 = smov [#allocation16]   ;;  %s15107_s19 = smov [#allocation19]  }
  0xe5   : > { %s556_s29 = sshll.u32 %s15106_s16, 4  ;;  %s586_s23 = sshll.u32 %s15107_s19, 4  ;;  %s557_s29 = int_to_ptr.vmem [resolvable:$true] %s556_s29  ;;  %s587_s23 = int_to_ptr.vmem [resolvable:$true] %s586_s23 }
  0xe6   : > { %s14844_s0 = scalar_lea.hbm %s16335_s6, 32 }
  0xe7   : > { %p14845_p4 = scmp.ne.s32.totalorder %s16335_s6, %s14844_s0  ;;  %p14851_p11 = scmp.lt.u32.totalorder %s14844_s0, %s16335_s6 }
  0xe9   : > { %p14847_p8 = pnand %p14845_p4, %p15278_p1 }
  0xeb   : > { %p14848_p10 = pneg %p14847_p8 }
  0xed   : > { %p14853_p0 = pnand %p14851_p11, %p14848_p10 }
  0xef   : > { %14856 = shalt.err (!%p14853_p0)
}
  0xf0   : > { %s14857_s5 = scalar_lea.vmem %s557_s29, 32  ;;  %p14865_p6 = scmp.lt.s32.totalorder %s557_s29, %s557_s29 }
  0xf1   : > { %p14858_p2 = scmp.ne.s32.totalorder %s557_s29, %s14857_s5  ;;  %p14866_p7 = scmp.lt.s32.totalorder %s14857_s5, %s14857_s5 }
  0xf3   : > { %p14860_p3 = pnand %p14858_p2, %p15278_p1  ;;  %p14867_p9 = por %p14866_p7, %p14865_p6 }
  0xf5   : > { %p14861_p5 = pneg %p14860_p3 }
  0xf7   : > { %p14868_p12 = pnand %p14867_p9, %p14861_p5 }
  0xf9   : > { %14871 = shalt.err (!%p14868_p12)
}
  0xfa   : > { %14439 = dma.hbm_to_vmem [thread:$0]  (!%p15264_p13), %s16335_s6, 32, %s557_s29, [#allocation15]  }
  0xfb   : > { %s14872_s16 = scalar_lea.hbm %s16337_s8, 32 }
  0xfc   : > { %p14873_p4 = scmp.ne.s32.totalorder %s16337_s8, %s14872_s16  ;;  %p14879_p11 = scmp.lt.u32.totalorder %s14872_s16, %s16337_s8 }
  0xfe   : > { %p14875_p8 = pnand %p14873_p4, %p15278_p1 }
 0x100   : > { %p14876_p10 = pneg %p14875_p8 }
 0x102   : > { %p14881_p0 = pnand %p14879_p11, %p14876_p10 }
 0x104   : > { %14884 = shalt.err (!%p14881_p0)
}
 0x105   : > { %s14885_s20 = scalar_lea.vmem %s587_s23, 32  ;;  %p14893_p6 = scmp.lt.s32.totalorder %s587_s23, %s587_s23 }
 0x106   : > { %p14886_p2 = scmp.ne.s32.totalorder %s587_s23, %s14885_s20  ;;  %p14894_p7 = scmp.lt.s32.totalorder %s14885_s20, %s14885_s20 }
 0x108   : > { %p14888_p3 = pnand %p14886_p2, %p15278_p1  ;;  %p14895_p9 = por %p14894_p7, %p14893_p6 }
 0x10a   : > { %p14889_p5 = pneg %p14888_p3 }
 0x10c   : > { %p14896_p12 = pnand %p14895_p9, %p14889_p5 }
 0x10e   : > { %14899 = shalt.err (!%p14896_p12)
}
 0x10f   : > { %14445 = dma.hbm_to_vmem [thread:$0]  (!%p15264_p13), %s16337_s8, 32, %s587_s23, [#allocation18]  }
 0x110   : > { %s15108_s3 = smov [#allocation22]   ;;  %s15109_s5 = smov [#allocation25]  }
 0x111   : > { %s616_s1 = sshll.u32 %s15108_s3, 4  ;;  %s646_s15 = sshll.u32 %s15109_s5, 4  ;;  %s617_s1 = int_to_ptr.vmem [resolvable:$true] %s616_s1  ;;  %s647_s15 = int_to_ptr.vmem [resolvable:$true] %s646_s15 }
 0x112   : > { %s14900_s27 = scalar_lea.hbm %s16339_s10, 48 }
 0x113   : > { %p14901_p4 = scmp.ne.s32.totalorder %s16339_s10, %s14900_s27  ;;  %p14907_p11 = scmp.lt.u32.totalorder %s14900_s27, %s16339_s10 }
 0x115   : > { %p14903_p8 = pnand %p14901_p4, %p15278_p1 }
 0x117   : > { %p14904_p10 = pneg %p14903_p8 }
 0x119   : > { %p14909_p0 = pnand %p14907_p11, %p14904_p10 }
 0x11b   : > { %14912 = shalt.err (!%p14909_p0)
}
 0x11c   : > { %s14913_s23 = scalar_lea.vmem %s617_s1, 48  ;;  %s14920_s0 = scalar_lea.vmem %s617_s1, 64 }
 0x11d   : > { %p14914_p2 = scmp.ne.s32.totalorder %s617_s1, %s14913_s23  ;;  %p14921_p6 = scmp.lt.s32.totalorder %s617_s1, %s617_s1 }
 0x11e   : > { %p14922_p7 = scmp.lt.s32.totalorder %s14920_s0, %s14913_s23 }
 0x11f   : > { %p14916_p3 = pnand %p14914_p2, %p15278_p1 }
 0x120   : > { %p14923_p9 = por %p14922_p7, %p14921_p6 }
 0x121   : > { %p14917_p5 = pneg %p14916_p3 }
 0x123   : > { %p14924_p12 = pnand %p14923_p9, %p14917_p5 }
 0x125   : > { %14927 = shalt.err (!%p14924_p12)
}
 0x126   : > { %14451 = dma.hbm_to_vmem [thread:$0]  (!%p15264_p13), %s16339_s10, 48, %s617_s1, [#allocation21]  }
 0x127   : > { %s14928_s5 = scalar_lea.hbm %s16341_s12, 48 }
 0x128   : > { %p14929_p4 = scmp.ne.s32.totalorder %s16341_s12, %s14928_s5  ;;  %p14935_p11 = scmp.lt.u32.totalorder %s14928_s5, %s16341_s12 }
 0x12a   : > { %p14931_p8 = pnand %p14929_p4, %p15278_p1 }
 0x12c   : > { %p14932_p10 = pneg %p14931_p8 }
 0x12e   : > { %p14937_p0 = pnand %p14935_p11, %p14932_p10 }
 0x130   : > { %14940 = shalt.err (!%p14937_p0)
}
 0x131   : > { %s14941_s19 = scalar_lea.vmem %s647_s15, 48  ;;  %s14948_s1 = scalar_lea.vmem %s647_s15, 64 }
 0x132   : > { %p14942_p2 = scmp.ne.s32.totalorder %s647_s15, %s14941_s19  ;;  %p14949_p6 = scmp.lt.s32.totalorder %s647_s15, %s647_s15 }
 0x133   : > { %p14950_p7 = scmp.lt.s32.totalorder %s14948_s1, %s14941_s19 }
 0x134   : > { %p14944_p3 = pnand %p14942_p2, %p15278_p1 }
 0x135   : > { %p14951_p9 = por %p14950_p7, %p14949_p6 }
 0x136   : > { %p14945_p5 = pneg %p14944_p3 }
 0x138   : > { %p14952_p12 = pnand %p14951_p9, %p14945_p5 }
 0x13a   : > { %14955 = shalt.err (!%p14952_p12)
}
 0x13b   : > { %14457 = dma.hbm_to_vmem [thread:$0]  (!%p15264_p13), %s16341_s12, 48, %s647_s15, [#allocation24]  }
 0x13c   : > { %s15110_s23 = smov [#allocation28]   ;;  %s14956_s22 = scalar_lea.hbm %s16343_s14, 64 }
 0x13d   : > { %s676_s0 = sshll.u32 %s15110_s23, 4  ;;  %p14957_p4 = scmp.ne.s32.totalorder %s16343_s14, %s14956_s22  ;;  %s677_s0 = int_to_ptr.vmem [resolvable:$true] %s676_s0 }
 0x13e   : > { %p14963_p11 = scmp.lt.u32.totalorder %s14956_s22, %s16343_s14 }
 0x13f   : > { %p14959_p8 = pnand %p14957_p4, %p15278_p1 }
 0x141   : > { %p14960_p10 = pneg %p14959_p8 }
 0x143   : > { %p14965_p0 = pnand %p14963_p11, %p14960_p10 }
 0x145   : > { %14968 = shalt.err (!%p14965_p0)
}
 0x146   : > { %s14969_s15 = scalar_lea.vmem %s677_s0, 64  ;;  %p14977_p6 = scmp.lt.s32.totalorder %s677_s0, %s677_s0 }
 0x147   : > { %p14970_p2 = scmp.ne.s32.totalorder %s677_s0, %s14969_s15  ;;  %p14978_p7 = scmp.lt.s32.totalorder %s14969_s15, %s14969_s15 }
 0x149   : > { %p14972_p3 = pnand %p14970_p2, %p15278_p1  ;;  %p14979_p9 = por %p14978_p7, %p14977_p6 }
 0x14b   : > { %p14973_p5 = pneg %p14972_p3 }
 0x14d   : > { %p14980_p12 = pnand %p14979_p9, %p14973_p5 }
 0x14f   : > { %14983 = shalt.err (!%p14980_p12)
}
 0x150   : > { %14463 = dma.hbm_to_vmem [thread:$0]  (!%p15264_p13), %s16343_s14, 64, %s677_s0, [#allocation27]  }
 0x151   : > { %p16385_p4 = scmp.ne.s32.totalorder %s16379_s17, 0 }
 0x152   : > { %p16386_p8 = scmp.ne.s32.totalorder (!%p16385_p4), %s16380_s18, 0 }
 0x153   : > { %701 = sbr.rel (%p16385_p4) target bundleno = 4515 (0x11a3), region = 80 }
 0x15a   : > { %15037 = dma.done.wait (%p16386_p8), [#allocation9], 32  }
 0x15b   : > { %15039 = vsyncadd (%p16386_p8), [#allocation9], 4294967264 }
 0x15c   : > { %15041 = dma.done.wait (%p16386_p8), [#allocation12], 27680  }
 0x15d   : > { %15043 = vsyncadd (%p16386_p8), [#allocation12], 4294939616 }
 0x15e   : > { %15045 = dma.done.wait (%p16386_p8), [#allocation15], 27680  }
 0x15f   : > { %15047 = vsyncadd (%p16386_p8), [#allocation15], 4294939616 }
 0x160   : > { %15049 = dma.done.wait (%p16386_p8), [#allocation18], 30752  }
 0x161   : > { %15051 = vsyncadd (%p16386_p8), [#allocation18], 4294936544 }
 0x162   : > { %15053 = dma.done.wait (%p16386_p8), [#allocation21], 46128  }
 0x163   : > { %15055 = vsyncadd (%p16386_p8), [#allocation21], 4294921168 }
 0x164   : > { %15057 = dma.done.wait (%p16386_p8), [#allocation24], 82992  }
 0x165   : > { %15059 = vsyncadd (%p16386_p8), [#allocation24], 4294884304 }
 0x166   : > { %15061 = dma.done.wait (%p16386_p8), [#allocation27], 110656  }
 0x167   : > { %15063 = vsyncadd (%p16386_p8), [#allocation27], 4294856640  ;;  %v15111_v0 = vmov 0.0   ;;  %s16387_s18 = sld [smem:[#allocation41_spill]]  ;;  %vm822_vm0 = vcmask 261120   ;;  %s16388_s25 = sld [smem:[#allocation49_spill]] }
 0x168   : > { %976 = vmatprep.mubr.f32.mxu0 %v15111_v0  ;;  %820 = vst [vmem:[#allocation2] sm:$0xff] %v15111_v0  ;;  %821 = vst [vmem:[#allocation2 + $0x8] sm:$0xff] %v15111_v0  ;;  %1578 = vmatprep.mubr.f32.mxu1 %v15111_v0  ;;  %vm905_vm1 = vcmask 1045504   ;;  %s16389_s27 = sld [smem:[#allocation48_spill]]  ;;  %vm898_vm2 = vcmask 441344   ;;  %v1397_v36 = vld [vmem:[#allocation11 + $0x448] sm:$0xff] }
 0x169   : > { %827 = vst [vmem:[#allocation2 + $0x30] sm:$0x3] %v15111_v0  ;;  %828 = vst [vmem:[#allocation2 + $0x38] sm:$0x3] %v15111_v0  ;;  %v1399_v37 = vld [vmem:[#allocation11 + $0x458] sm:$0xff]  ;;  %v1396_v38 = vld [vmem:[#allocation11 + $0x440] sm:$0xff] }
 0x16a   : > { %831 = vst [vmem:[#allocation3] sm:$0xff] %v15111_v0  ;;  %832 = vst [vmem:[#allocation3 + $0x8] sm:$0xff] %v15111_v0  ;;  %v11708_v41 = vpack.c.bf16 %v1399_v37, %v1397_v36  ;;  %v1398_v42 = vld [vmem:[#allocation11 + $0x450] sm:$0xff]  ;;  %v1401_v43 = vld [vmem:[#allocation11 + $0x468] sm:$0xff]  ;;  %vm1413_vm3 = vcmask 1046528   ;;  %vm829_vm4 = vcmask 254976  }
 0x16b   : > { %837 = vst [vmem:[#allocation3 + $0x30] sm:$0x3] %v15111_v0  ;;  %838 = vst [vmem:[#allocation3 + $0x38] sm:$0x3] %v15111_v0  ;;  %v1403_v44 = vld [vmem:[#allocation11 + $0x478] sm:$0xff]  ;;  %v11710_v46 = vpack.c.bf16 %v1398_v42, %v1396_v38  ;;  %v1400_v48 = vld [vmem:[#allocation11 + $0x460] sm:$0xff] }
 0x16c   : > { %840 = vst [vmem:[#allocation4] sm:$0xff] %v15111_v0  ;;  %841 = vst [vmem:[#allocation4 + $0x8] sm:$0xff] %v15111_v0  ;;  %v11712_v47 = vpack.c.bf16 %v1403_v44, %v1401_v43  ;;  %v1402_v49 = vld [vmem:[#allocation11 + $0x470] sm:$0xff]  ;;  %v1254_v50 = vld [vmem:[#allocation11 + $0x8] sm:$0xff]  ;;  %11709 = vmatprep.subr.bf16.mxu1 %v11708_v41  ;;  %vm1228_vm5 = vcmask 1040384   ;;  %vm2094_vm6 = vcmask 1041408  }
 0x16d   : > { %844 = vst [vmem:[#allocation4 + $0x18] sm:$0x3] %v15111_v0  ;;  %845 = vst [vmem:[#allocation4 + $0x20] sm:$0x3] %v15111_v0  ;;  %p808_p13 = scmp.lt.s32.totalorder %s16387_s18, 1  ;;  %v10906_v1 = vld [vmem:[%s16388_s25 + $0x78] sm:$0xff]  ;;  %11711 = vmatpush1.bf16.msra.mxu1 %v11710_v46  ;;  %v11714_v55 = vpack.c.bf16 %v1402_v49, %v1400_v48 }
 0x16e   : > { %848 = vst [vmem:[#allocation5] sm:$0xff] %v15111_v0  ;;  %849 = vst [vmem:[#allocation5 + $0x8] sm:$0xff] %v15111_v0  ;;  %v10908_v2 = vld [vmem:[%s16388_s25 + $0x88] sm:$0xff]  ;;  %v10905_v3 = vld [vmem:[%s16388_s25 + $0x70] sm:$0xff]  ;;  %11713 = vmatprep.subr.bf16.mxu1 %v11712_v47  ;;  %vm15113_vm7 = vmmov 0   ;;  %vm2090_vm9 = vcmask 146432  }
 0x16f   : > { %851 = vst [vmem:[#allocation5 + $0x18] sm:$0x3] %v15111_v0  ;;  %852 = vst [vmem:[#allocation5 + $0x20] sm:$0x3] %v15111_v0  ;;  %v11608_v4 = vpack.c.bf16 %v10908_v2, %v10906_v1  ;;  %v10907_v5 = vld [vmem:[%s16388_s25 + $0x80] sm:$0xff]  ;;  %v10910_v6 = vld [vmem:[%s16388_s25 + $0x98] sm:$0xff] }
 0x170   : > { %854 = vst [vmem:[#allocation6] sm:$0x3f] %v15111_v0  ;;  %855 = vst [vmem:[#allocation6 + $0x8] sm:$0x3f] %v15111_v0  ;;  %v10912_v7 = vld [vmem:[%s16388_s25 + $0xa8] sm:$0xff]  ;;  %v11610_v8 = vpack.c.bf16 %v10907_v5, %v10905_v3  ;;  %v10909_v10 = vld [vmem:[%s16388_s25 + $0x90] sm:$0xff] }
 0x171   : > { %856 = vst [vmem:[#allocation6 + $0x10] sm:$0x3f] %v15111_v0  ;;  %857 = vst [vmem:[#allocation6 + $0x18] sm:$0x3f] %v15111_v0  ;;  %v11612_v9 = vpack.c.bf16 %v10912_v7, %v10910_v6  ;;  %v10911_v11 = vld [vmem:[%s16388_s25 + $0xa0] sm:$0xff]  ;;  %v10914_v12 = vld [vmem:[%s16388_s25 + $0xb8] sm:$0xff]  ;;  %11609 = vmatprep.subr.bf16.mxu0 %v11608_v4  ;;  %11715 = vmatpush1.bf16.msra.mxu1 %v11714_v55 }
 0x172   : > { %860 = vst [vmem:[#allocation7] sm:$0x3f] %v15111_v0  ;;  %861 = vst [vmem:[#allocation7 + $0x8] sm:$0x3f] %v15111_v0  ;;  %v10916_v13 = vld [vmem:[%s16388_s25 + $0xc8] sm:$0xff]  ;;  %s809_s19 = scalar_select %p808_p13, %s16387_s18, 1  ;;  %11611 = vmatpush1.bf16.msra.mxu0 %v11610_v8  ;;  %v11614_v14 = vpack.c.bf16 %v10911_v11, %v10909_v10 }
 0x173   : > { %862 = vst [vmem:[#allocation7 + $0x10] sm:$0x3f] %v15111_v0  ;;  %863 = vst [vmem:[#allocation7 + $0x18] sm:$0x3f] %v15111_v0  ;;  %11613 = vmatprep.subr.bf16.mxu0 %v11612_v9  ;;  %v11616_v15 = vpack.c.bf16 %v10916_v13, %v10914_v12  ;;  %v10913_v16 = vld [vmem:[%s16388_s25 + $0xb0] sm:$0xff]  ;;  %v10915_v17 = vld [vmem:[%s16388_s25 + $0xc0] sm:$0xff] }
 0x174   : > { %823 = vst.msk [vmem:[#allocation2 + $0x10] sm:$0xff] %vm822_vm0, %v15111_v0  ;;  %826 = vst.msk [vmem:[#allocation2 + $0x28] sm:$0xff] %vm822_vm0, %v15111_v0  ;;  %s14369_s0 = smul.u32 24, %s809_s19  ;;  %v11618_v18 = vpack.c.bf16 %v10915_v17, %v10913_v16  ;;  %v10918_v19 = vld [vmem:[%s16388_s25 + $0xd8] sm:$0x3f]  ;;  %v868_v20 = vld [vmem:[%s16388_s25 + $0x8] sm:$0xff] }
 0x175   : > { %833 = vst.msk [vmem:[#allocation3 + $0x10] sm:$0xff] %vm822_vm0, %v15111_v0  ;;  %836 = vst.msk [vmem:[#allocation3 + $0x28] sm:$0xff] %vm822_vm0, %v15111_v0  ;;  %v870_v21 = vld [vmem:[%s16388_s25 + $0x18] sm:$0xff]  ;;  %v867_v22 = vld [vmem:[%s16388_s25] sm:$0xff]  ;;  %vm842_vm12 = vcmask 523264   ;;  %vm846_vm13 = vcmask 517120  }
 0x176   : > { %11615 = vmatpush1.bf16.msra.mxu0 %v11614_v14  ;;  %s15640_s16 = scalar_lea.vmem %s16389_s27, %s14369_s0  ;;  %v869_v23 = vld [vmem:[%s16388_s25 + $0x10] sm:$0xff]  ;;  %v872_v24 = vld [vmem:[%s16388_s25 + $0x28] sm:$0xff]  ;;  %v874_v25 = vld [vmem:[%s16388_s25 + $0x38] sm:$0xff]  ;;  %v11620_v27 = vpack.c.bf16 %v870_v21, %v868_v20  ;;  %830 = vst.msk [vmem:[#allocation2 + $0x40] sm:$0x3] %vm829_vm4, %v15111_v0  ;;  %vm15114_vm14 = vmmov 1  }
 0x177   : > { %11617 = vmatprep.subr.bf16.mxu0 %v11616_v15  ;;  %v10917_v26 = vld [vmem:[%s16388_s25 + $0xd0] sm:$0x3f]  ;;  %v881_v28 = vld [vmem:[%s15640_s16 + $0x1] sm:$0xff]  ;;  %v11622_v29 = vpack.c.bf16 %v869_v23, %v867_v22  ;;  %v11624_v31 = vpack.c.bf16 %v874_v25, %v872_v24  ;;  %v878_v34 = vld [vmem:[%s16388_s25 + $0x58] sm:$0xff]  ;;  %839 = vst.msk [vmem:[#allocation3 + $0x40] sm:$0x3] %vm829_vm4, %v15111_v0 }
 0x178   : > { %v871_v30 = vld [vmem:[%s16388_s25 + $0x20] sm:$0xff]  ;;  %v873_v32 = vld [vmem:[%s16388_s25 + $0x30] sm:$0xff]  ;;  %v876_v33 = vld [vmem:[%s16388_s25 + $0x48] sm:$0xff]  ;;  %s16393_s21 = sld [smem:[#allocation45_spill]]  ;;  %s11034_s23 = sshll.u32 %s16387_s18, 7 }
 0x179   : > { %v882_v35 = vld [vmem:[%s15640_s16 + $0x9] sm:$0xff]  ;;  %v875_v39 = vld [vmem:[%s16388_s25 + $0x40] sm:$0xff]  ;;  %v11626_v45 = vpack.c.bf16 %v873_v32, %v871_v30  ;;  %v11628_v51 = vpack.c.bf16 %v878_v34, %v876_v33  ;;  %v1253_v59 = vld [vmem:[#allocation11] sm:$0xff]  ;;  %s16394_s3 = sld [smem:[#allocation52_spill]]  ;;  %s15116_s18 = smov [#allocation29]  }
 0x17a   : > { %11619 = vmatpush1.bf16.msra.mxu0 %v11618_v18  ;;  %v877_v40 = vld [vmem:[%s16388_s25 + $0x50] sm:$0xff]  ;;  %v1255_v60 = vld [vmem:[#allocation11 + $0x10] sm:$0xff]  ;;  %v1258_v62 = vld [vmem:[#allocation11 + $0x28] sm:$0xff]  ;;  %s14988_s15 = sshll.u32 %s15116_s18, 4  ;;  %s14989_s15 = int_to_ptr.vmem [resolvable:$false] %s14988_s15 }
 0x17b   : > { %10919 = vmatprep.subr.msk.mxu0 %vm905_vm1, %v10918_v19  ;;  %v1256_v52 = vld [vmem:[#allocation11 + $0x18] sm:$0xff]  ;;  %v15681_v53 = vld [vmem:[#allocation2 + $0x28] sm:$0xff]  ;;  %v1327_v54 = vld [vmem:[#allocation2 + $0x10] sm:$0xfe]  ;;  %v11630_v61 = vpack.c.bf16 %v877_v40, %v875_v39  ;;  %v11718_v5 = vpack.c.bf16 %v1255_v60, %v1253_v59  ;;  %s14990_s27 = scalar_lea.vmem %s14989_s15, 256 }
 0x17c   : > { %v1420_v56 = vrot.slane %v1327_v54, 1  ;;  %v1421_v57 = vrot.slane %v15681_v53, 1  ;;  %v11716_v58 = vpack.c.bf16 %v1256_v52, %v1254_v50  ;;  %v1260_v63 = vld [vmem:[#allocation11 + $0x38] sm:$0xff]  ;;  %v10930_v3 = vld [vmem:[%s16388_s25 + $0xf8] sm:$0xff]  ;;  %v10927_v6 = vld [vmem:[%s16388_s25 + $0xe0] sm:$0xff] }
 0x17d   : > { %v880_v1 = vld [vmem:[%s16388_s25 + $0x68] sm:$0x3f]  ;;  %v10929_v7 = vld [vmem:[%s16388_s25 + $0xf0] sm:$0xff]  ;;  %v11720_v9 = vpack.c.bf16 %v1260_v63, %v1258_v62  ;;  %v10934_v10 = vld [vmem:[%s16388_s25 + $0x118] sm:$0xff] }
 0x17e   : > { %10920 = vmatpush1.msk.msra.mxu0 %vm905_vm1, %v10917_v26  ;;  %v10928_v2 = vld [vmem:[%s16388_s25 + $0xe8] sm:$0xff]  ;;  %v1422_v4 = vsel %vm1413_vm3, %v1420_v56, %v1421_v57  ;;  %11717 = vmatprep.subr.bf16.mxu1 %v11716_v58  ;;  %v1257_v11 = vld [vmem:[#allocation11 + $0x20] sm:$0xff]  ;;  %v879_v13 = vld [vmem:[%s16388_s25 + $0x60] sm:$0x3f]  ;;  %v11634_v18 = vpack.c.bf16 %v10929_v7, %v10927_v6  ;;  %p16395_p10 = scmp.ne.s32.totalorder %s16393_s21, 0 }
 0x17f   : > { %11621 = vmatprep.subr.bf16.mxu0 %v11620_v27  ;;  %10921 = vmatmul.mubr.msk.f32.vlgmr.msra.gmra.mrb[0].mxu0 %vm898_vm2, %v881_v28  ;;  %v10932_v8 = vld [vmem:[%s16388_s25 + $0x108] sm:$0xff]  ;;  %v11632_v14 = vpack.c.bf16 %v10930_v3, %v10928_v2  ;;  %v1262_v15 = vld [vmem:[#allocation11 + $0x48] sm:$0xff]  ;;  %v10933_v21 = vld [vmem:[%s16388_s25 + $0x110] sm:$0xff]  ;;  %s16282_s5 = scalar_lea.hbm %s16394_s3, %s11034_s23 }
 0x180   : > { %11623 = vmatpush1.bf16.msra.mxu0 %v11622_v29  ;;  %982 = vmatprep.mubr.f32.mxu0 %v15111_v0  ;;  %v1259_v12 = vld [vmem:[#allocation11 + $0x30] sm:$0xff]  ;;  %v1264_v16 = vld [vmem:[#allocation11 + $0x58] sm:$0xff]  ;;  %v11636_v19 = vpack.c.bf16 %v10934_v10, %v10932_v8  ;;  %v10938_v24 = vld [vmem:[%s16388_s25 + $0x138] sm:$0xff] }
 0x181   : > { %11625 = vmatprep.subr.bf16.mxu0 %v11624_v31  ;;  %10945 = vmatmul.mubr.msk.f32.vlgmr.msra.gmra.mrb[0].mxu1 %vm822_vm0, %v1422_v4  ;;  %v865_v17 = vld [vmem:[%s15640_s16] sm:$0xff]  ;;  %v10936_v22 = vld [vmem:[%s16388_s25 + $0x128] sm:$0xff]  ;;  %v11722_v23 = vpack.c.bf16 %v1259_v12, %v1257_v11  ;;  %v11724_v25 = vpack.c.bf16 %v1264_v16, %v1262_v15  ;;  %v1261_v26 = vld [vmem:[#allocation11 + $0x40] sm:$0xff] }
 0x182   : > { %11719 = vmatpush1.bf16.msra.mxu1 %v11718_v5  ;;  %1584 = vmatprep.mubr.f32.mxu1 %v15111_v0  ;;  %v10931_v20 = vld [vmem:[%s16388_s25 + $0x100] sm:$0xff]  ;;  %v1268_v29 = vld [vmem:[#allocation11 + $0x78] sm:$0xff]  ;;  %v11640_v32 = vpack.c.bf16 %v10938_v24, %v10936_v22  ;;  %v1265_v37 = vld [vmem:[#allocation11 + $0x60] sm:$0xff] }
 0x183   : > { %10922 = vmatmul.mubr.msk.f32.gmra.mrb[2].mxu0 %vm898_vm2, %v882_v35  ;;  %11721 = vmatprep.subr.bf16.mxu1 %v11720_v9  ;;  %v1263_v27 = vld [vmem:[#allocation11 + $0x50] sm:$0xff]  ;;  %v1266_v28 = vld [vmem:[#allocation11 + $0x68] sm:$0xff]  ;;  %v11638_v30 = vpack.c.bf16 %v10933_v21, %v10931_v20  ;;  %v10937_v34 = vld [vmem:[%s16388_s25 + $0x130] sm:$0xff] }
 0x184   : > { %11627 = vmatpush1.bf16.msra.mxu0 %v11626_v45  ;;  %1065 = vmatprep.mubr.f32.mxu0 %v15111_v0  ;;  %v866_v31 = vld [vmem:[%s15640_s16 + $0x8] sm:$0xff]  ;;  %v10935_v33 = vld [vmem:[%s16388_s25 + $0x120] sm:$0xff]  ;;  %v11726_v35 = vpack.c.bf16 %v1263_v27, %v1261_v26  ;;  %v11728_v36 = vpack.c.bf16 %v1268_v29, %v1266_v28  ;;  %v1332_v47 = vld [vmem:[#allocation11 + $0x240] sm:$0xff] }
 0x185   : > { %11629 = vmatprep.subr.bf16.mxu0 %v11628_v51  ;;  %v1267_v38 = vld [vmem:[#allocation11 + $0x70] sm:$0xff]  ;;  %v1270_v39 = vld [vmem:[#allocation11 + $0x88] sm:$0xff]  ;;  %v1272_v40 = vld [vmem:[#allocation11 + $0x98] sm:$0xff]  ;;  %v11642_v41 = vpack.c.bf16 %v10937_v34, %v10935_v33 }
 0x186   : > { %11723 = vmatpush1.bf16.msra.mxu1 %v11722_v23  ;;  %v11730_v42 = vpack.c.bf16 %v1267_v38, %v1265_v37  ;;  %v10940_v43 = vld [vmem:[%s16388_s25 + $0x148] sm:$0x3f]  ;;  %v1333_v44 = vld [vmem:[#allocation11 + $0x248] sm:$0xff]  ;;  %v11732_v46 = vpack.c.bf16 %v1272_v40, %v1270_v39  ;;  %v1269_v51 = vld [vmem:[#allocation11 + $0x80] sm:$0xff] }
 0x187   : > { %11725 = vmatprep.subr.bf16.mxu1 %v11724_v25  ;;  %v1335_v45 = vld [vmem:[#allocation11 + $0x258] sm:$0xff]  ;;  %v1334_v48 = vld [vmem:[#allocation11 + $0x250] sm:$0xff]  ;;  %v1337_v49 = vld [vmem:[#allocation11 + $0x268] sm:$0xff] }
 0x188   : > { %11631 = vmatpush1.bf16.msra.mxu0 %v11630_v61  ;;  %v1339_v50 = vld [vmem:[#allocation11 + $0x278] sm:$0xff]  ;;  %v1271_v52 = vld [vmem:[#allocation11 + $0x90] sm:$0xff]  ;;  %v11644_v55 = vpack.c.bf16 %v1335_v45, %v1333_v44  ;;  %v1274_v56 = vld [vmem:[#allocation11 + $0xa8] sm:$0xff]  ;;  %v11646_v60 = vpack.c.bf16 %v1334_v48, %v1332_v47 }
 0x189   : > { %10923 = vmatprep.subr.msk.mxu0 %vm905_vm1, %v880_v1  ;;  %v10939_v54 = vld [vmem:[%s16388_s25 + $0x140] sm:$0x3f]  ;;  %v1276_v58 = vld [vmem:[#allocation11 + $0xb8] sm:$0xff]  ;;  %v11648_v61 = vpack.c.bf16 %v1339_v50, %v1337_v49  ;;  %v1336_v62 = vld [vmem:[#allocation11 + $0x260] sm:$0xff]  ;;  %v11734_v2 = vpack.c.bf16 %v1271_v52, %v1269_v51 }
 0x18a   : > { %11727 = vmatpush1.bf16.msra.mxu1 %v11726_v35  ;;  %v1078_v59 = vld [vmem:[%s15640_s16 + $0x2] sm:$0xff]  ;;  %v1341_v1 = vld [vmem:[#allocation11 + $0x288] sm:$0xff]  ;;  %v1343_v3 = vld [vmem:[#allocation11 + $0x298] sm:$0xff]  ;;  %v11736_v4 = vpack.c.bf16 %v1276_v58, %v1274_v56 }
 0x18b   : > { %11729 = vmatprep.subr.bf16.mxu1 %v11728_v36  ;;  %v1338_v63 = vld [vmem:[#allocation11 + $0x270] sm:$0xff]  ;;  %v1273_v5 = vld [vmem:[#allocation11 + $0xa0] sm:$0xff]  ;;  %v1278_v7 = vld [vmem:[#allocation11 + $0xc8] sm:$0xff]  ;;  %v11652_v11 = vpack.c.bf16 %v1343_v3, %v1341_v1 }
 0x18c   : > { %10924 = vmatpush1.msk.msra.mxu0 %vm905_vm1, %v879_v13  ;;  %v1275_v6 = vld [vmem:[#allocation11 + $0xb0] sm:$0xff]  ;;  %v1280_v8 = vld [vmem:[#allocation11 + $0xd8] sm:$0xff]  ;;  %v11650_v10 = vpack.c.bf16 %v1338_v63, %v1336_v62  ;;  %v1340_v12 = vld [vmem:[#allocation11 + $0x280] sm:$0xff] }
 0x18d   : > { %11633 = vmatprep.subr.bf16.mxu0 %v11632_v14  ;;  %10925 = vmatmul.mubr.msk.f32.vlgmr.msra.gmra.mrb[0].mxu0 %vm898_vm2, %v865_v17  ;;  %v1079_v9 = vld [vmem:[%s15640_s16 + $0xa] sm:$0xff]  ;;  %v1342_v13 = vld [vmem:[#allocation11 + $0x290] sm:$0xff]  ;;  %v1345_v14 = vld [vmem:[#allocation11 + $0x2a8] sm:$0xff]  ;;  %v11738_v15 = vpack.c.bf16 %v1275_v6, %v1273_v5  ;;  %v11740_v17 = vpack.c.bf16 %v1280_v8, %v1278_v7  ;;  %s16392_s16 = sld [smem:[#allocation39_spill]] }
 0x18e   : > { %11635 = vmatpush1.bf16.msra.mxu0 %v11634_v18  ;;  %1071 = vmatprep.mubr.f32.mxu0 %v15111_v0  ;;  %v1347_v16 = vld [vmem:[#allocation11 + $0x2b8] sm:$0xff]  ;;  %v1277_v18 = vld [vmem:[#allocation11 + $0xc0] sm:$0xff]  ;;  %v1282_v20 = vld [vmem:[#allocation11 + $0xe8] sm:$0xff]  ;;  %v11654_v22 = vpack.c.bf16 %v1342_v13, %v1340_v12 }
 0x18f   : > { %11637 = vmatprep.subr.bf16.mxu0 %v11636_v19  ;;  %11731 = vmatpush1.bf16.msra.mxu1 %v11730_v42  ;;  %v1279_v19 = vld [vmem:[#allocation11 + $0xd0] sm:$0xff]  ;;  %v1284_v21 = vld [vmem:[#allocation11 + $0xf8] sm:$0xff]  ;;  %v11656_v23 = vpack.c.bf16 %v1347_v16, %v1345_v14  ;;  %v1344_v24 = vld [vmem:[#allocation11 + $0x2a0] sm:$0xff] }
 0x190   : > { %11733 = vmatprep.subr.bf16.mxu1 %v11732_v46  ;;  %v1346_v25 = vld [vmem:[#allocation11 + $0x2b0] sm:$0xff]  ;;  %v1349_v26 = vld [vmem:[#allocation11 + $0x2c8] sm:$0xff]  ;;  %v11742_v27 = vpack.c.bf16 %v1279_v19, %v1277_v18  ;;  %v1351_v28 = vld [vmem:[#allocation11 + $0x2d8] sm:$0xff]  ;;  %v11744_v29 = vpack.c.bf16 %v1284_v21, %v1282_v20 }
 0x191   : > { %10926 = vmatmul.mubr.msk.f32.gmra.mrb[2].mxu0 %vm898_vm2, %v866_v31  ;;  %v1283_v31 = vld [vmem:[#allocation11 + $0xf0] sm:$0xff]  ;;  %v11660_v33 = vpack.c.bf16 %v1351_v28, %v1349_v26  ;;  %v1348_v34 = vld [vmem:[#allocation11 + $0x2c0] sm:$0xff]  ;;  %v1353_v37 = vld [vmem:[#allocation11 + $0x2e8] sm:$0xff] }
 0x192   : > { %11639 = vmatpush1.bf16.msra.mxu0 %v11638_v30  ;;  %1171 = vmatprep.mubr.f32.mxu0 %v15111_v0  ;;  %v1281_v30 = vld [vmem:[#allocation11 + $0xe0] sm:$0xff]  ;;  %v1350_v35 = vld [vmem:[#allocation11 + $0x2d0] sm:$0xff]  ;;  %v1355_v38 = vld [vmem:[#allocation11 + $0x2f8] sm:$0xff] }
 0x193   : > { %11641 = vmatprep.subr.bf16.mxu0 %v11640_v32  ;;  %11735 = vmatpush1.bf16.msra.mxu1 %v11734_v2  ;;  %v11658_v32 = vpack.c.bf16 %v1346_v25, %v1344_v24  ;;  %v11746_v36 = vpack.c.bf16 %v1283_v31, %v1281_v30  ;;  %v11662_v39 = vpack.c.bf16 %v1350_v35, %v1348_v34  ;;  %v1354_v42 = vld [vmem:[#allocation11 + $0x2f0] sm:$0xff]  ;;  %v1357_v44 = vld [vmem:[#allocation11 + $0x308] sm:$0xff]  ;;  %v1359_v45 = vld [vmem:[#allocation11 + $0x318] sm:$0xff]  ;;  %s803_s1 = sand.u32 1, %s16392_s16  }
 0x194   : > { %11737 = vmatprep.subr.bf16.mxu1 %v11736_v4  ;;  %v11664_v40 = vpack.c.bf16 %v1355_v38, %v1353_v37  ;;  %v11668_v46 = vpack.c.bf16 %v1359_v45, %v1357_v44  ;;  %v1356_v47 = vld [vmem:[#allocation11 + $0x300] sm:$0xff]  ;;  %v1358_v48 = vld [vmem:[#allocation11 + $0x310] sm:$0xff]  ;;  %v1286_v50 = vld [vmem:[#allocation11 + $0x108] sm:$0xff]  ;;  %s10903_s30 = sshll.u32 %s803_s1, 3  ;;  %s10609_s24 = scalar_lea.sflag [#allocation10], %s803_s1 }
 0x195   : > { %v11670_v49 = vpack.c.bf16 %v1358_v48, %v1356_v47  ;;  %v1288_v51 = vld [vmem:[#allocation11 + $0x118] sm:$0xff]  ;;  %v1361_v56 = vld [vmem:[#allocation11 + $0x328] sm:$0xff]  ;;  %v1289_v5 = vld [vmem:[#allocation11 + $0x120] sm:$0xff]  ;;  %s805_s20 = scalar_lea.vmem [#allocation29], %s10903_s30 }
 0x196   : > { %11643 = vmatpush1.bf16.msra.mxu0 %v11642_v41  ;;  %v1352_v41 = vld [vmem:[#allocation11 + $0x2e0] sm:$0xff]  ;;  %v11748_v52 = vpack.c.bf16 %v1288_v51, %v1286_v50  ;;  %v1290_v1 = vld [vmem:[#allocation11 + $0x128] sm:$0xff]  ;;  %v1292_v2 = vld [vmem:[#allocation11 + $0x138] sm:$0xff]  ;;  %s10625_s0 = sshll.u32 %s805_s20, 4  ;;  %s16284_s0 = int_to_ptr.vmem [resolvable:$true] %s10625_s0 }
 0x197   : > { %10941 = vmatprep.subr.msk.mxu0 %vm905_vm1, %v10940_v43  ;;  %11739 = vmatpush1.bf16.msra.mxu1 %v11738_v15  ;;  %v11666_v43 = vpack.c.bf16 %v1354_v42, %v1352_v41  ;;  %v1365_v3 = vld [vmem:[#allocation11 + $0x348] sm:$0xff]  ;;  %v11752_v4 = vpack.c.bf16 %v1292_v2, %v1290_v1  ;;  %v1291_v6 = vld [vmem:[#allocation11 + $0x130] sm:$0xff]  ;;  %v1367_v7 = vld [vmem:[#allocation11 + $0x358] sm:$0xff]  ;;  %s14984_s28 = scalar_lea.vmem %s16284_s0, 128  ;;  %p14991_p2 = scmp.lt.s32.totalorder %s16284_s0, %s14989_s15 }
 0x198   : > { %11741 = vmatprep.subr.bf16.mxu1 %v11740_v17  ;;  %v11754_v8 = vpack.c.bf16 %v1291_v6, %v1289_v5  ;;  %v1294_v13 = vld [vmem:[#allocation11 + $0x148] sm:$0xff]  ;;  %v1296_v14 = vld [vmem:[#allocation11 + $0x158] sm:$0xff]  ;;  %v1293_v17 = vld [vmem:[#allocation11 + $0x140] sm:$0xff]  ;;  %p14985_p1 = scmp.ne.s32.totalorder %s16284_s0, %s14984_s28  ;;  %p14992_p3 = scmp.lt.s32.totalorder %s14990_s27, %s14984_s28 }
 0x199   : > { %v1369_v15 = vld [vmem:[#allocation11 + $0x368] sm:$0xff]  ;;  %v11756_v16 = vpack.c.bf16 %v1296_v14, %v1294_v13  ;;  %v1295_v18 = vld [vmem:[#allocation11 + $0x150] sm:$0xff]  ;;  %v1371_v19 = vld [vmem:[#allocation11 + $0x378] sm:$0xff] }
 0x19a   : > { %10942 = vmatpush1.msk.msra.mxu0 %vm905_vm1, %v10939_v54  ;;  %v1285_v54 = vld [vmem:[#allocation11 + $0x100] sm:$0xff]  ;;  %v11758_v20 = vpack.c.bf16 %v1295_v18, %v1293_v17  ;;  %v11680_v21 = vpack.c.bf16 %v1371_v19, %v1369_v15  ;;  %v1298_v25 = vld [vmem:[#allocation11 + $0x168] sm:$0xff]  ;;  %v1300_v26 = vld [vmem:[#allocation11 + $0x178] sm:$0xff]  ;;  %p14986_p11 = pnand %p14985_p1, %p16395_p10  ;;  %p14993_p5 = por %p14992_p3, %p14991_p2 }
 0x19b   : > { %10943 = vmatmul.mubr.msk.f32.vlgmr.msra.gmra.mrb[0].mxu0 %vm898_vm2, %v1078_v59  ;;  %11645 = vmatprep.subr.bf16.mxu0 %v11644_v55  ;;  %v1287_v55 = vld [vmem:[#allocation11 + $0x110] sm:$0xff]  ;;  %v1363_v59 = vld [vmem:[#allocation11 + $0x338] sm:$0xff]  ;;  %v11760_v28 = vpack.c.bf16 %v1300_v26, %v1298_v25  ;;  %v1372_v34 = vld [vmem:[#allocation11 + $0x380] sm:$0xff] }
 0x19c   : > { %1177 = vmatprep.mubr.f32.mxu0 %v15111_v0  ;;  %11647 = vmatpush1.bf16.msra.mxu0 %v11646_v60  ;;  %v11750_v58 = vpack.c.bf16 %v1287_v55, %v1285_v54  ;;  %v1360_v60 = vld [vmem:[#allocation11 + $0x320] sm:$0xff]  ;;  %v11672_v62 = vpack.c.bf16 %v1363_v59, %v1361_v56  ;;  %v1299_v30 = vld [vmem:[#allocation11 + $0x170] sm:$0xff]  ;;  %v1375_v31 = vld [vmem:[#allocation11 + $0x398] sm:$0xff]  ;;  %p14987_p0 = pneg %p14986_p11 }
 0x19d   : > { %11649 = vmatprep.subr.bf16.mxu0 %v11648_v61  ;;  %11743 = vmatpush1.bf16.msra.mxu1 %v11742_v27  ;;  %v1362_v61 = vld [vmem:[#allocation11 + $0x330] sm:$0xff]  ;;  %v1373_v27 = vld [vmem:[#allocation11 + $0x388] sm:$0xff]  ;;  %v1304_v38 = vld [vmem:[#allocation11 + $0x198] sm:$0xff] }
 0x19e   : > { %11745 = vmatprep.subr.bf16.mxu1 %v11744_v29  ;;  %v11674_v63 = vpack.c.bf16 %v1362_v61, %v1360_v60  ;;  %v1297_v29 = vld [vmem:[#allocation11 + $0x160] sm:$0xff]  ;;  %v1374_v35 = vld [vmem:[#allocation11 + $0x390] sm:$0xff]  ;;  %v1302_v37 = vld [vmem:[#allocation11 + $0x188] sm:$0xff]  ;;  %p14994_p6 = pnand %p14993_p5, %p14987_p0 }
 0x19f   : > { %10944 = vmatmul.mubr.msk.f32.gmra.mrb[2].mxu0 %vm898_vm2, %v1079_v9  ;;  %v11676_v9 = vpack.c.bf16 %v1367_v7, %v1365_v3  ;;  %v1301_v41 = vld [vmem:[#allocation11 + $0x180] sm:$0xff]  ;;  %v1303_v42 = vld [vmem:[#allocation11 + $0x190] sm:$0xff]  ;;  %v1308_v50 = vld [vmem:[#allocation11 + $0x1b8] sm:$0xff]  ;;  %vm858_vm2 = vcmask 521216  }
 0x1a0   : > { %11651 = vmatpush1.bf16.msra.mxu0 %v11650_v10  ;;  %v1364_v10 = vld [vmem:[#allocation11 + $0x340] sm:$0xff]  ;;  %v11766_v44 = vpack.c.bf16 %v1303_v42, %v1301_v41  ;;  %v1378_v47 = vld [vmem:[#allocation11 + $0x3b0] sm:$0xff]  ;;  %v1381_v51 = vld [vmem:[#allocation11 + $0x3c8] sm:$0xff] }
 0x1a1   : > { %11653 = vmatprep.subr.bf16.mxu0 %v11652_v11  ;;  %11747 = vmatpush1.bf16.msra.mxu1 %v11746_v36  ;;  %v1366_v11 = vld [vmem:[#allocation11 + $0x350] sm:$0xff]  ;;  %v11686_v36 = vpack.c.bf16 %v1374_v35, %v1372_v34  ;;  %v1305_v54 = vld [vmem:[#allocation11 + $0x1a0] sm:$0xff]  ;;  %v1383_v56 = vld [vmem:[#allocation11 + $0x3d8] sm:$0xff] }
 0x1a2   : > { %11749 = vmatprep.subr.bf16.mxu1 %v11748_v52  ;;  %v11678_v12 = vpack.c.bf16 %v1366_v11, %v1364_v10  ;;  %v1307_v55 = vld [vmem:[#allocation11 + $0x1b0] sm:$0xff]  ;;  %v11692_v59 = vpack.c.bf16 %v1383_v56, %v1381_v51  ;;  %v1380_v60 = vld [vmem:[#allocation11 + $0x3c0] sm:$0xff]  ;;  %v1312_v1 = vld [vmem:[#allocation11 + $0x1d8] sm:$0xff] }
 0x1a3   : > { %v1382_v61 = vld [vmem:[#allocation11 + $0x3d0] sm:$0xff]  ;;  %v1385_v2 = vld [vmem:[#allocation11 + $0x3e8] sm:$0xff]  ;;  %v1387_v6 = vld [vmem:[#allocation11 + $0x3f8] sm:$0xff] }
 0x1a4   : > { %11655 = vmatpush1.bf16.msra.mxu0 %v11654_v22  ;;  %v1368_v22 = vld [vmem:[#allocation11 + $0x360] sm:$0xff]  ;;  %v1311_v5 = vld [vmem:[#allocation11 + $0x1d0] sm:$0xff]  ;;  %v1330_v11 = vld [vmem:[#allocation2 + $0x40] sm:$0x1] }
 0x1a5   : > { %11657 = vmatprep.subr.bf16.mxu0 %v11656_v23  ;;  %11751 = vmatpush1.bf16.msra.mxu1 %v11750_v58  ;;  %v1370_v23 = vld [vmem:[#allocation11 + $0x370] sm:$0xff]  ;;  %v11770_v58 = vpack.c.bf16 %v1307_v55, %v1305_v54  ;;  %v1384_v0 = vld [vmem:[#allocation11 + $0x3e0] sm:$0xff]  ;;  %v1316_v13 = vld [vmem:[#allocation11 + $0x1f8] sm:$0xff]  ;;  %v1427_v14 = vrot.slane %v1330_v11, 1 }
 0x1a6   : > { %11753 = vmatprep.subr.bf16.mxu1 %v11752_v4  ;;  %v11682_v24 = vpack.c.bf16 %v1370_v23, %v1368_v22  ;;  %v1309_v4 = vld [vmem:[#allocation11 + $0x1c0] sm:$0xff]  ;;  %v1315_v17 = vld [vmem:[#allocation11 + $0x1f0] sm:$0xff]  ;;  %v1389_v18 = vld [vmem:[#allocation11 + $0x408] sm:$0xff] }
 0x1a7   : > { %v11774_v7 = vpack.c.bf16 %v1311_v5, %v1309_v4  ;;  %v1390_v22 = vld [vmem:[#allocation11 + $0x410] sm:$0xff]  ;;  %v1428_v23 = vsel %vm1413_vm3, %v1421_v57, %v1427_v14  ;;  %v1318_v26 = vld [vmem:[#allocation11 + $0x208] sm:$0xff]  ;;  %v1190_v57 = vlaneseq  ;;  %vm15940_vm15 = vmpackc.low %vm2094_vm6, %vm15114_vm14 }
 0x1a8   : > { %11659 = vmatpush1.bf16.msra.mxu0 %v11658_v32  ;;  %v11762_v32 = vpack.c.bf16 %v1299_v30, %v1297_v29  ;;  %10946 = vmatmul.mubr.msk.f32.gmra.mrb[2].mxu1 %vm822_vm0, %v1428_v23  ;;  %v1393_v29 = vld [vmem:[#allocation11 + $0x428] sm:$0xff]  ;;  %v1395_v30 = vld [vmem:[#allocation11 + $0x438] sm:$0xff] }
 0x1a9   : > { %11661 = vmatprep.subr.bf16.mxu0 %v11660_v33  ;;  %11755 = vmatpush1.bf16.msra.mxu1 %v11754_v8  ;;  %v11684_v33 = vpack.c.bf16 %v1375_v31, %v1373_v27  ;;  %v11696_v8 = vpack.c.bf16 %v1387_v6, %v1385_v2  ;;  %v1320_v27 = vld [vmem:[#allocation11 + $0x218] sm:$0xff]  ;;  %v1392_v31 = vld [vmem:[#allocation11 + $0x420] sm:$0xff]  ;;  %v15761_v35 = vshrl.u32 %v1190_v57, 7 }
 0x1aa   : > { %11757 = vmatprep.subr.bf16.mxu1 %v11756_v16  ;;  %v1313_v16 = vld [vmem:[#allocation11 + $0x1e0] sm:$0xff] }
 0x1ab   : > { %v11778_v19 = vpack.c.bf16 %v1315_v17, %v1313_v16  ;;  %v1324_v16 = vld [vmem:[#allocation11 + $0x238] sm:$0xff] }
 0x1ac   : > { %11663 = vmatpush1.bf16.msra.mxu0 %v11662_v39  ;;  %v1377_v39 = vld [vmem:[#allocation11 + $0x3a8] sm:$0xff] }
 0x1ad   : > { %11665 = vmatprep.subr.bf16.mxu0 %v11664_v40  ;;  %11759 = vmatpush1.bf16.msra.mxu1 %v11758_v20  ;;  %v11764_v40 = vpack.c.bf16 %v1304_v38, %v1302_v37  ;;  %v1391_v20 = vld [vmem:[#allocation11 + $0x418] sm:$0xff]  ;;  %v15767_v38 = vsub.s32 1, %v15761_v35 }
 0x1ae   : > { %11761 = vmatprep.subr.bf16.mxu1 %v11760_v28  ;;  %v11780_v28 = vpack.c.bf16 %v1320_v27, %v1318_v26  ;;  %v1188_v37 = vld [vmem:[#allocation8] sm:$0x3] }
 0x1b0   : > { %11667 = vmatpush1.bf16.msra.mxu0 %v11666_v43  ;;  %v1379_v43 = vld [vmem:[#allocation11 + $0x3b8] sm:$0xff] }
 0x1b1   : > { %11669 = vmatprep.subr.bf16.mxu0 %v11668_v46  ;;  %11763 = vmatpush1.bf16.msra.mxu1 %v11762_v32  ;;  %v11688_v45 = vpack.c.bf16 %v1379_v43, %v1377_v39  ;;  %v1376_v46 = vld [vmem:[#allocation11 + $0x3a0] sm:$0xff]  ;;  %v1394_v32 = vld [vmem:[#allocation11 + $0x430] sm:$0xff] }
 0x1b2   : > { %11765 = vmatprep.subr.bf16.mxu1 %v11764_v40  ;;  %v11690_v48 = vpack.c.bf16 %v1378_v47, %v1376_v46  ;;  %v11706_v34 = vpack.c.bf16 %v1394_v32, %v1392_v31  ;;  %v1197_v40 = vrot.slane %v1188_v37, %v15767_v38 }
 0x1b4   : > { %11671 = vmatpush1.bf16.msra.mxu0 %v11670_v49  ;;  %v1306_v49 = vld [vmem:[#allocation11 + $0x1a8] sm:$0xff] }
 0x1b5   : > { %11673 = vmatprep.subr.bf16.mxu0 %v11672_v62  ;;  %11767 = vmatpush1.bf16.msra.mxu1 %v11766_v44  ;;  %v11768_v52 = vpack.c.bf16 %v1308_v50, %v1306_v49  ;;  %v11694_v62 = vpack.c.bf16 %v1382_v61, %v1380_v60 }
 0x1b7   : > { %11769 = vmatprep.subr.bf16.mxu1 %v11768_v52 }
 0x1b8   : > { %11675 = vmatpush1.bf16.msra.mxu0 %v11674_v63  ;;  %v1310_v63 = vld [vmem:[#allocation11 + $0x1c8] sm:$0xff] }
 0x1b9   : > { %11677 = vmatprep.subr.bf16.mxu0 %v11676_v9  ;;  %11771 = vmatpush1.bf16.msra.mxu1 %v11770_v58  ;;  %v11772_v3 = vpack.c.bf16 %v1312_v1, %v1310_v63  ;;  %v1386_v9 = vld [vmem:[#allocation11 + $0x3f0] sm:$0xff] }
 0x1ba   : > { %v11698_v10 = vpack.c.bf16 %v1386_v9, %v1384_v0 }
 0x1bb   : > { %11773 = vmatprep.subr.bf16.mxu1 %v11772_v3 }
 0x1bc   : > { %11679 = vmatpush1.bf16.msra.mxu0 %v11678_v12  ;;  %v1314_v12 = vld [vmem:[#allocation11 + $0x1e8] sm:$0xff] }
 0x1bd   : > { %11681 = vmatprep.subr.bf16.mxu0 %v11680_v21  ;;  %11775 = vmatpush1.bf16.msra.mxu1 %v11774_v7  ;;  %v11776_v15 = vpack.c.bf16 %v1316_v13, %v1314_v12  ;;  %v1388_v21 = vld [vmem:[#allocation11 + $0x400] sm:$0xff]  ;;  %v1319_v13 = vld [vmem:[#allocation11 + $0x210] sm:$0xff] }
 0x1be   : > { %v11702_v25 = vpack.c.bf16 %v1390_v22, %v1388_v21  ;;  %v1317_v12 = vld [vmem:[#allocation11 + $0x200] sm:$0xff]  ;;  %v1323_v22 = vld [vmem:[#allocation11 + $0x230] sm:$0xff] }
 0x1bf   : > { %11777 = vmatprep.subr.bf16.mxu1 %v11776_v15  ;;  %v1322_v15 = vld [vmem:[#allocation11 + $0x228] sm:$0xff]  ;;  %v11782_v17 = vpack.c.bf16 %v1319_v13, %v1317_v12  ;;  %v1773_v13 = vld [vmem:[#allocation11 + $0x500] sm:$0xff] }
 0x1c0   : > { %11683 = vmatpush1.bf16.msra.mxu0 %v11682_v24  ;;  %v11700_v24 = vpack.c.bf16 %v1391_v20, %v1389_v18  ;;  %v1321_v18 = vld [vmem:[#allocation11 + $0x220] sm:$0xff]  ;;  %v11784_v21 = vpack.c.bf16 %v1324_v16, %v1322_v15  ;;  %v1775_v15 = vld [vmem:[#allocation11 + $0x510] sm:$0xff]  ;;  %v1780_v16 = vld [vmem:[#allocation11 + $0x538] sm:$0xff] }
 0x1c1   : > { %11685 = vmatprep.subr.bf16.mxu0 %v11684_v33  ;;  %11779 = vmatpush1.bf16.msra.mxu1 %v11778_v19  ;;  %v11704_v33 = vpack.c.bf16 %v1395_v30, %v1393_v29  ;;  %v1760_v29 = vld [vmem:[#allocation11 + $0x498] sm:$0xff]  ;;  %v11786_v31 = vpack.c.bf16 %v1323_v22, %v1321_v18 }
 0x1c2   : > { %11781 = vmatprep.subr.bf16.mxu1 %v11780_v28  ;;  %v1758_v28 = vld [vmem:[#allocation11 + $0x488] sm:$0xff]  ;;  %v1784_v22 = vld [vmem:[#allocation11 + $0x558] sm:$0xff] }
 0x1c4   : > { %11687 = vmatpush1.bf16.msra.mxu0 %v11686_v36  ;;  %v15764_v36 = vsub.s32 0, %v15761_v35 }
 0x1c5   : > { %11689 = vmatprep.subr.bf16.mxu0 %v11688_v45 }
 0x1c6   : > { %v1193_v39 = vrot.slane %v1188_v37, %v15764_v36  ;;  %v11788_v37 = vpack.c.bf16 %v1760_v29, %v1758_v28  ;;  %v1788_v28 = vld [vmem:[#allocation11 + $0x578] sm:$0xff] }
 0x1c8   : > { %11691 = vmatpush1.bf16.msra.mxu0 %v11690_v48 }
 0x1c9   : > { %11693 = vmatprep.subr.bf16.mxu0 %v11692_v59 }
 0x1cc   : > { %11695 = vmatpush1.bf16.msra.mxu0 %v11694_v62 }
 0x1cd   : > { %11697 = vmatprep.subr.bf16.mxu0 %v11696_v8 }
 0x1d0   : > { %11699 = vmatpush1.bf16.msra.mxu0 %v11698_v10 }
 0x1d1   : > { %11701 = vmatprep.subr.bf16.mxu0 %v11700_v24 }
 0x1d4   : > { %11703 = vmatpush1.bf16.msra.mxu0 %v11702_v25 }
 0x1d5   : > { %11705 = vmatprep.subr.bf16.mxu0 %v11704_v33 }
 0x1d8   : > { %11707 = vmatpush1.bf16.msra.mxu0 %v11706_v34 }
 0x26e   : > { %v1173_v41 = vpop.f32.mrb[0].mxu0 }
 0x26f   : > { %v1200_v42 = vadd.f32 %v1193_v39, %v1173_v41  ;;  %v1175_v43 = vpop.f32.mrb[1].mxu0  ;;  %v1759_v41 = vld [vmem:[#allocation11 + $0x490] sm:$0xff] }
 0x270   : > { %v1201_v44 = vadd.f32 %v1197_v40, %v1175_v43 }
 0x271   : > { %v1204_v45 = vmul.f32 0.5, %v1200_v42 }
 0x272   : > { %v1205_v46 = vmul.f32 0.5, %v1201_v44  ;;  %v1179_v47 = vpop.f32.mrb[2].mxu0 }
 0x273   : > { %14567 = vtanh.f32 %v1204_v45  ;;  %v1202_v48 = vadd.f32 %v1193_v39, %v1179_v47  ;;  %v1181_v49 = vpop.f32.mrb[3].mxu0  ;;  %v1764_v45 = vld [vmem:[#allocation11 + $0x4b8] sm:$0xff] }
 0x274   : > { %14569 = vtanh.f32 %v1205_v46  ;;  %v1203_v50 = vadd.f32 %v1197_v40, %v1181_v49  ;;  %v1757_v40 = vld [vmem:[#allocation11 + $0x480] sm:$0xff] }
 0x275   : > { %v1206_v51 = vmul.f32 0.5, %v1202_v48  ;;  %v15783_v46 = vld [vmem:[#allocation3] sm:$0xff]  ;;  %v11790_v49 = vpack.c.bf16 %v1759_v41, %v1757_v40  ;;  %v1791_v41 = vld [vmem:[#allocation11 + $0x590] sm:$0xff] }
 0x276   : > { %v1207_v52 = vmul.f32 0.5, %v1203_v50  ;;  %v1789_v40 = vld [vmem:[#allocation11 + $0x580] sm:$0xff] }
 0x277   : > { %14571 = vtanh.f32 %v1206_v51 }
 0x278   : > { %14573 = vtanh.f32 %v1207_v52 }
 0x27d   : > { %v14568_v54 = vpop.eup %14567 }
 0x27e   : > { %v14570_v55 = vpop.eup %14569  ;;  %v1212_v56 = vadd.f32 1.0, %v14568_v54  ;;  %v1761_v54 = vld [vmem:[#allocation11 + $0x4a0] sm:$0xff] }
 0x27f   : > { %v1213_v58 = vadd.f32 1.0, %v14570_v55  ;;  %v1763_v55 = vld [vmem:[#allocation11 + $0x4b0] sm:$0xff] }
 0x280   : > { %v1216_v59 = vmul.f32 0.5, %v1212_v56  ;;  %v1766_v56 = vld [vmem:[#allocation11 + $0x4c8] sm:$0xff] }
 0x281   : > { %v14572_v60 = vpop.eup %14571  ;;  %v1217_v61 = vmul.f32 0.5, %v1213_v58  ;;  %v1768_v58 = vld [vmem:[#allocation11 + $0x4d8] sm:$0xff] }
 0x282   : > { %v14574_v62 = vpop.eup %14573  ;;  %v1220_v63 = vmul.f32 %v1216_v59, %v1200_v42  ;;  %v1214_v1 = vadd.f32 1.0, %v14572_v60  ;;  %v11794_v60 = vpack.c.bf16 %v1763_v55, %v1761_v54  ;;  %v1797_v54 = vld [vmem:[#allocation11 + $0x5c0] sm:$0xff]  ;;  %v1799_v55 = vld [vmem:[#allocation11 + $0x5d0] sm:$0xff] }
 0x283   : > { %v1221_v2 = vmul.f32 %v1217_v61, %v1201_v44  ;;  %v1215_v3 = vadd.f32 1.0, %v14574_v62  ;;  %v1762_v44 = vld [vmem:[#allocation11 + $0x4a8] sm:$0xff]  ;;  %v11796_v62 = vpack.c.bf16 %v1768_v58, %v1766_v56  ;;  %v1804_v58 = vld [vmem:[#allocation11 + $0x5f8] sm:$0xff] }
 0x284   : > { %v1229_v4 = vrot.slane %v1220_v63, 7  ;;  %v1218_v5 = vmul.f32 0.5, %v1214_v1  ;;  %v11792_v52 = vpack.c.bf16 %v1764_v45, %v1762_v44  ;;  %v1765_v63 = vld [vmem:[#allocation11 + $0x4c0] sm:$0xff]  ;;  %v1767_v1 = vld [vmem:[#allocation11 + $0x4d0] sm:$0xff]  ;;  %v11822_v44 = vpack.c.bf16 %v1791_v41, %v1789_v40  ;;  %v1802_v56 = vld [vmem:[#allocation11 + $0x5e8] sm:$0xff] }
 0x285   : > { %v1230_v6 = vrot.slane %v1221_v2, 7  ;;  %v1219_v7 = vmul.f32 0.5, %v1215_v3  ;;  %v1770_v2 = vld [vmem:[#allocation11 + $0x4e8] sm:$0xff]  ;;  %v1772_v3 = vld [vmem:[#allocation11 + $0x4f8] sm:$0xff] }
 0x286   : > { %1241 = vst [vmem:[#allocation2] sm:$0xfe] %v1229_v4  ;;  %v1222_v8 = vmul.f32 %v1218_v5, %v1202_v48  ;;  %v1249_v48 = vld [vmem:[#allocation2 + $0x10] sm:$0xff]  ;;  %v11798_v5 = vpack.c.bf16 %v1767_v1, %v1765_v63 }
 0x287   : > { %1242 = vst [vmem:[#allocation2 + $0x8] sm:$0xfe] %v1230_v6  ;;  %v1223_v0 = vmul.f32 %v1219_v7, %v1203_v50  ;;  %v1769_v7 = vld [vmem:[#allocation11 + $0x4e0] sm:$0xff]  ;;  %v1803_v63 = vld [vmem:[#allocation11 + $0x5f0] sm:$0xff]  ;;  %v1806_v1 = vld [vmem:[#allocation11 + $0x608] sm:$0xff] }
 0x288   : > { %v1231_v9 = vrot.slane %v1222_v8, 7  ;;  %v1771_v8 = vld [vmem:[#allocation11 + $0x4f0] sm:$0xff] }
 0x289   : > { %v1233_v10 = vrot.slane %v1223_v0, 7  ;;  %v1774_v0 = vld [vmem:[#allocation11 + $0x508] sm:$0xff] }
 0x28a   : > { %v15772_v11 = vsel %vm1228_vm5, %v1229_v4, %v1231_v9  ;;  %1245 = vst [vmem:[#allocation2 + $0x30] sm:$0x1] %v1231_v9  ;;  %v1776_v9 = vld [vmem:[#allocation11 + $0x518] sm:$0xff] }
 0x28b   : > { %v15775_v14 = vsel %vm1228_vm5, %v1230_v6, %v1233_v10  ;;  %1246 = vst [vmem:[#allocation2 + $0x38] sm:$0x1] %v1233_v10  ;;  %v1415_v30 = vrot.slane %v15772_v11, 1  ;;  %v11800_v6 = vpack.c.bf16 %v1772_v3, %v1770_v2  ;;  %v11802_v10 = vpack.c.bf16 %v1771_v8, %v1769_v7  ;;  %v1808_v2 = vld [vmem:[#allocation11 + $0x618] sm:$0xff]  ;;  %v1810_v7 = vld [vmem:[#allocation11 + $0x628] sm:$0xff] }
 0x28c   : > { %v1418_v26 = vrot.slane %v15775_v14, 1  ;;  %v1839_v61 = vrot.slane %v15775_v14, 2  ;;  %v11804_v12 = vpack.c.bf16 %v1776_v9, %v1774_v0  ;;  %v1812_v8 = vld [vmem:[#allocation11 + $0x638] sm:$0xff]  ;;  %v1836_v41 = vrot.slane %v15772_v11, 2 }
 0x28d   : > { %v1325_v19 = vld [vmem:[#allocation2] sm:$0xfe]  ;;  %v11840_v9 = vpack.c.bf16 %v1812_v8, %v1810_v7 }
 0x28e   : > { %v1248_v20 = vld [vmem:[#allocation2 + $0x8] sm:$0xff]  ;;  %v1414_v24 = vrot.slane %v1325_v19, 1  ;;  %v1247_v25 = vld [vmem:[#allocation2] sm:$0xff] }
 0x28f   : > { %v1326_v23 = vld [vmem:[#allocation2 + $0x8] sm:$0xfe]  ;;  %1660 = vmatprep.mubr.f32.mxu1 %v1248_v20  ;;  %v1779_v20 = vld [vmem:[#allocation11 + $0x530] sm:$0xff]  ;;  %v2016_v8 = vld [vmem:[#allocation13] sm:$0x3] }
 0x290   : > { %v1417_v27 = vrot.slane %v1326_v23, 1  ;;  %1661 = vmatmul.mubr.f32.vlgmr.msra.gmra.mrb[0].mxu1 %v1247_v25  ;;  %v1416_v34 = vsel %vm1413_vm3, %v1414_v24, %v1415_v30  ;;  %v1751_v50 = vld [vmem:[#allocation2 + $0x8] sm:$0xfc]  ;;  %v1777_v19 = vld [vmem:[#allocation11 + $0x520] sm:$0xff] }
 0x291   : > { %11783 = vmatpush1.bf16.msra.mxu1 %v11782_v17  ;;  %1666 = vmatprep.mubr.f32.mxu1 %v15775_v14  ;;  %v1328_v33 = vld [vmem:[#allocation2 + $0x30] sm:$0x1]  ;;  %v1838_v59 = vrot.slane %v1751_v50, 2  ;;  %v11806_v17 = vpack.c.bf16 %v1775_v15, %v1773_v13  ;;  %v11810_v23 = vpack.c.bf16 %v1779_v20, %v1777_v19  ;;  %v1781_v25 = vld [vmem:[#allocation11 + $0x540] sm:$0xff]  ;;  %v1800_v50 = vld [vmem:[#allocation11 + $0x5d8] sm:$0xff] }
 0x292   : > { %v1419_v32 = vsel %vm1413_vm3, %v1417_v27, %v1418_v26  ;;  %11785 = vmatprep.subr.bf16.mxu1 %v11784_v21  ;;  %v1329_v39 = vld [vmem:[#allocation2 + $0x38] sm:$0x1]  ;;  %v1423_v42 = vrot.slane %v1328_v33, 1  ;;  %v1782_v21 = vld [vmem:[#allocation11 + $0x548] sm:$0xff]  ;;  %v1816_v15 = vld [vmem:[#allocation11 + $0x658] sm:$0xff] }
 0x293   : > { %1501 = vmatprep.mubr.f32.mxu0 %v1419_v32  ;;  %v1425_v43 = vrot.slane %v1329_v39, 1  ;;  %v1840_v4 = vsel %vm905_vm1, %v1838_v59, %v1839_v61  ;;  %v11812_v24 = vpack.c.bf16 %v1784_v22, %v1782_v21  ;;  %v1786_v27 = vld [vmem:[#allocation11 + $0x568] sm:$0xff]  ;;  %v1787_v32 = vld [vmem:[#allocation11 + $0x570] sm:$0xff]  ;;  %v11830_v59 = vpack.c.bf16 %v1799_v55, %v1797_v54  ;;  %v1820_v20 = vld [vmem:[#allocation11 + $0x678] sm:$0xff] }
 0x294   : > { %1502 = vmatmul.mubr.f32.vlgmr.msra.gmra.mrb[4].mxu0 %v1416_v34  ;;  %1667 = vmatmul.mubr.f32.gmra.mrb[2].mxu1 %v15772_v11  ;;  %v1424_v51 = vsel %vm1413_vm3, %v1415_v30, %v1423_v42  ;;  %v11816_v30 = vpack.c.bf16 %v1788_v28, %v1786_v27  ;;  %v1790_v33 = vld [vmem:[#allocation11 + $0x588] sm:$0xff]  ;;  %v1792_v34 = vld [vmem:[#allocation11 + $0x598] sm:$0xff]  ;;  %v1750_v27 = vld [vmem:[#allocation2] sm:$0xfc] }
 0x295   : > { %11787 = vmatpush1.bf16.msra.mxu1 %v11786_v31  ;;  %1737 = vmatprep.mubr.f32.mxu1 %v15783_v46  ;;  %v1426_v47 = vsel %vm1413_vm3, %v1418_v26, %v1425_v43  ;;  %v1783_v26 = vld [vmem:[#allocation11 + $0x550] sm:$0xff]  ;;  %v1785_v31 = vld [vmem:[#allocation11 + $0x560] sm:$0xff]  ;;  %v11820_v39 = vpack.c.bf16 %v1792_v34, %v1790_v33  ;;  %v1794_v42 = vld [vmem:[#allocation11 + $0x5a8] sm:$0xff]  ;;  %v1835_v33 = vrot.slane %v1750_v27, 2 }
 0x296   : > { %11789 = vmatprep.subr.bf16.mxu1 %v11788_v37  ;;  %1507 = vmatprep.mubr.f32.mxu0 %v1426_v47  ;;  %v11814_v29 = vpack.c.bf16 %v1783_v26, %v1781_v25  ;;  %v11818_v37 = vpack.c.bf16 %v1787_v32, %v1785_v31  ;;  %v1796_v43 = vld [vmem:[#allocation11 + $0x5b8] sm:$0xff]  ;;  %v1793_v47 = vld [vmem:[#allocation11 + $0x5a0] sm:$0xff]  ;;  %v1814_v13 = vld [vmem:[#allocation11 + $0x648] sm:$0xff] }
 0x297   : > { %v11824_v45 = vpack.c.bf16 %v1796_v43, %v1794_v42  ;;  %v1818_v19 = vld [vmem:[#allocation11 + $0x668] sm:$0xff]  ;;  %v1824_v26 = vld [vmem:[#allocation11 + $0x698] sm:$0xff]  ;;  %v1821_v31 = vld [vmem:[#allocation11 + $0x680] sm:$0xff] }
 0x298   : > { %1508 = vmatmul.mubr.f32.gmra.mrb[6].mxu0 %v1424_v51  ;;  %10947 = vmatmul.mubr.msk.f32.vlgmr.msra.gmra.mrb[0].mxu1 %vm822_vm0, %v1249_v48  ;;  %v1795_v48 = vld [vmem:[#allocation11 + $0x5b0] sm:$0xff]  ;;  %v11848_v22 = vpack.c.bf16 %v1820_v20, %v1818_v19  ;;  %v1822_v25 = vld [vmem:[#allocation11 + $0x688] sm:$0xff]  ;;  %v1755_v55 = vld [vmem:[#allocation2 + $0x40] sm:$0x3] }
 0x299   : > { %11791 = vmatpush1.bf16.msra.mxu1 %v11790_v49  ;;  %1743 = vmatprep.mubr.f32.mxu1 %v15783_v46  ;;  %v1798_v49 = vld [vmem:[#allocation11 + $0x5c8] sm:$0xff]  ;;  %v11826_v51 = vpack.c.bf16 %v1795_v48, %v1793_v47  ;;  %v1823_v32 = vld [vmem:[#allocation11 + $0x690] sm:$0xff]  ;;  %v1837_v48 = vsel %vm905_vm1, %v1835_v33, %v1836_v41 }
 0x29a   : > { %11793 = vmatprep.subr.bf16.mxu1 %v11792_v52  ;;  %v11828_v52 = vpack.c.bf16 %v1800_v50, %v1798_v49  ;;  %v1826_v34 = vld [vmem:[#allocation11 + $0x6a8] sm:$0xff]  ;;  %v11854_v42 = vpack.c.bf16 %v1823_v32, %v1821_v31  ;;  %v1752_v47 = vld [vmem:[#allocation2 + $0x10] sm:$0xfc]  ;;  %11437 = vmatprep.mubr.msk.f32.mxu0 %vm15113_vm7, %v15783_v46 }
 0x29b   : > { %v1753_v40 = vld [vmem:[#allocation2 + $0x30] sm:$0x3]  ;;  %v1841_v54 = vrot.slane %v1752_v47, 2 }
 0x29c   : > { %10948 = vmatmul.mubr.msk.f32.gmra.mrb[2].mxu1 %vm822_vm0, %v15681_v53  ;;  %v1778_v53 = vld [vmem:[#allocation11 + $0x528] sm:$0xff]  ;;  %v1844_v49 = vrot.slane %v1753_v40, 2 }
 0x29d   : > { %11795 = vmatpush1.bf16.msra.mxu1 %v11794_v60  ;;  %1922 = vmatprep.mubr.f32.mxu1 %v1840_v4  ;;  %v11808_v18 = vpack.c.bf16 %v1780_v16, %v1778_v53  ;;  %v11832_v60 = vpack.c.bf16 %v1804_v58, %v1802_v56  ;;  %v11836_v4 = vpack.c.bf16 %v1808_v2, %v1806_v1  ;;  %v15814_v1 = vld [vmem:[#allocation3 + $0x40] sm:$0x3]  ;;  %v15819_v2 = vand.u32 127, %v1190_v57 }
 0x29e   : > { %11797 = vmatprep.subr.bf16.mxu1 %v11796_v62  ;;  %v1801_v62 = vld [vmem:[#allocation11 + $0x5e0] sm:$0xff]  ;;  %v11844_v16 = vpack.c.bf16 %v1816_v15, %v1814_v13  ;;  %v1845_v56 = vsel %vm905_vm1, %v1836_v41, %v1844_v49 }
 0x29f   : > { %v11834_v3 = vpack.c.bf16 %v1803_v63, %v1801_v62  ;;  %v15112_v63 = vmov 0.0|0.0  }
 0x2a0   : > { %11864 = vmatprep.subr.bf16.mxu0 %v15112_v63 }
 0x2a1   : > { %11799 = vmatpush1.bf16.msra.mxu1 %v11798_v5  ;;  %v1805_v5 = vld [vmem:[#allocation11 + $0x600] sm:$0xff] }
 0x2a2   : > { %11801 = vmatprep.subr.bf16.mxu1 %v11800_v6  ;;  %v1807_v6 = vld [vmem:[#allocation11 + $0x610] sm:$0xff] }
 0x2a3   : > { %v11838_v0 = vpack.c.bf16 %v1807_v6, %v1805_v5 }
 0x2a5   : > { %11803 = vmatpush1.bf16.msra.mxu1 %v11802_v10  ;;  %v1809_v10 = vld [vmem:[#allocation11 + $0x620] sm:$0xff] }
 0x2a6   : > { %11805 = vmatprep.subr.bf16.mxu1 %v11804_v12  ;;  %v1811_v12 = vld [vmem:[#allocation11 + $0x630] sm:$0xff] }
 0x2a7   : > { %v11842_v53 = vpack.c.bf16 %v1811_v12, %v1809_v10  ;;  %v2025_v10 = vrot.slane %v2016_v8, %v15767_v38 }
 0x2a9   : > { %11807 = vmatpush1.bf16.msra.mxu1 %v11806_v17  ;;  %v1813_v17 = vld [vmem:[#allocation11 + $0x640] sm:$0xff] }
 0x2aa   : > { %11809 = vmatprep.subr.bf16.mxu1 %v11808_v18  ;;  %v1815_v18 = vld [vmem:[#allocation11 + $0x650] sm:$0xff] }
 0x2ab   : > { %v11846_v21 = vpack.c.bf16 %v1815_v18, %v1813_v17 }
 0x2ad   : > { %11811 = vmatpush1.bf16.msra.mxu1 %v11810_v23  ;;  %v1817_v23 = vld [vmem:[#allocation11 + $0x660] sm:$0xff] }
 0x2ae   : > { %11813 = vmatprep.subr.bf16.mxu1 %v11812_v24  ;;  %v1819_v24 = vld [vmem:[#allocation11 + $0x670] sm:$0xff] }
 0x2af   : > { %v11850_v28 = vpack.c.bf16 %v1819_v24, %v1817_v23 }
 0x2b1   : > { %11815 = vmatpush1.bf16.msra.mxu1 %v11814_v29  ;;  %v1754_v29 = vld [vmem:[#allocation2 + $0x38] sm:$0x3] }
 0x2b2   : > { %11817 = vmatprep.subr.bf16.mxu1 %v11816_v30  ;;  %v11852_v30 = vpack.c.bf16 %v1824_v26, %v1822_v25 }
 0x2b5   : > { %11819 = vmatpush1.bf16.msra.mxu1 %v11818_v37  ;;  %v1828_v37 = vld [vmem:[#allocation11 + $0x6b8] sm:$0xff] }
 0x2b6   : > { %11821 = vmatprep.subr.bf16.mxu1 %v11820_v39  ;;  %v1846_v39 = vrot.slane %v1754_v29, 2  ;;  %v11856_v43 = vpack.c.bf16 %v1828_v37, %v1826_v34 }
 0x2b8   : > { %v1847_v50 = vsel %vm905_vm1, %v1839_v61, %v1846_v39  ;;  %v2076_v61 = vld [vmem:[#allocation3 + $0x10] sm:$0xff] }
 0x2b9   : > { %11823 = vmatpush1.bf16.msra.mxu1 %v11822_v44  ;;  %v1825_v44 = vld [vmem:[#allocation11 + $0x6a0] sm:$0xff] }
 0x2ba   : > { %11825 = vmatprep.subr.bf16.mxu1 %v11824_v45  ;;  %v1827_v45 = vld [vmem:[#allocation11 + $0x6b0] sm:$0xff] }
 0x2bb   : > { %v11858_v11 = vpack.c.bf16 %v1827_v45, %v1825_v44 }
 0x2bd   : > { %11827 = vmatpush1.bf16.msra.mxu1 %v11826_v51  ;;  %v14612_v51 = vld [vmem:[#allocation2 + $0x28] sm:$0xff] }
 0x2be   : > { %11829 = vmatprep.subr.bf16.mxu1 %v11828_v52  ;;  %v1842_v52 = vrot.slane %v14612_v51, 2 }
 0x2c0   : > { %v1843_v58 = vsel %vm905_vm1, %v1841_v54, %v1842_v52 }
 0x2c1   : > { %11831 = vmatpush1.bf16.msra.mxu1 %v11830_v59  ;;  %v1848_v59 = vrot.slane %v1755_v55, 2 }
 0x2c2   : > { %11833 = vmatprep.subr.bf16.mxu1 %v11832_v60  ;;  %v2079_v60 = vld [vmem:[#allocation3 + $0x28] sm:$0xff] }
 0x2c3   : > { %v1849_v14 = vsel %vm905_vm1, %v1842_v52, %v1848_v59  ;;  %v15809_v62 = vpack.c.bf16 %v2079_v60, %v2076_v61  ;;  %v2466_v60 = vld [vmem:[#allocation14 + $0x248] sm:$0xff] }
 0x2c5   : > { %11835 = vmatpush1.bf16.msra.mxu1 %v11834_v3  ;;  %11866 = vmatpush3.bf16.msra.mxu0 %v15809_v62  ;;  %v15822_v3 = vmul.u32 2, %v15761_v35 }
 0x2c6   : > { %11837 = vmatprep.subr.bf16.mxu1 %v11836_v4  ;;  %11435 = vmatprep.subr.mxu0 %v15783_v46 }
 0x2c7   : > { %vm2088_vm8 = vcmp.eq.s32.totalorder %v15819_v2, %v15822_v3  ;;  %v2317_v54 = vadd.s32 1, %v15822_v3 }
 0x2c8   : > { %v15829_v4 = vsel %vm2088_vm8, 1.0, %v15783_v46 }
 0x2c9   : > { %11839 = vmatpush1.bf16.msra.mxu1 %v11838_v0  ;;  %11436 = vmatpush3.msk.msra.mxu0 %vm2094_vm6, %v15814_v1  ;;  %v2021_v0 = vrot.slane %v2016_v8, %v15764_v36  ;;  %vm2318_vm10 = vcmp.eq.s32.totalorder %v15819_v2, %v2317_v54  ;;  %v2472_v8 = vld [vmem:[#allocation14 + $0x278] sm:$0xff]  ;;  %v2498_v54 = vld [vmem:[#allocation14 + $0x348] sm:$0xff] }
 0x2ca   : > { %11841 = vmatprep.subr.bf16.mxu1 %v11840_v9  ;;  %11438 = vmatmul.mubr.msk.f32.vlgmr.msra.gmra.mrb[8].mxu0 %vm2090_vm9, %v15829_v4 }
 0x2cb   : > { %2387 = vmatprep.mubr.f32.mxu0 %v15783_v46 }
 0x2cd   : > { %11843 = vmatpush1.bf16.msra.mxu1 %v11842_v53 }
 0x2ce   : > { %11845 = vmatprep.subr.bf16.mxu1 %v11844_v16 }
 0x2d1   : > { %11847 = vmatpush1.bf16.msra.mxu1 %v11846_v21 }
 0x2d2   : > { %11849 = vmatprep.subr.bf16.mxu1 %v11848_v22 }
 0x2d5   : > { %11851 = vmatpush1.bf16.msra.mxu1 %v11850_v28 }
 0x2d6   : > { %11853 = vmatprep.subr.bf16.mxu1 %v11852_v30 }
 0x2d8   : > { %1923 = vmatmul.mubr.f32.vlgmr.msra.gmra.mrb[0].mxu1 %v1837_v48 }
 0x2d9   : > { %1928 = vmatprep.mubr.f32.mxu1 %v1847_v50  ;;  %11855 = vmatpush1.bf16.msra.mxu1 %v11854_v42 }
 0x2da   : > { %11857 = vmatprep.subr.bf16.mxu1 %v11856_v43 }
 0x2dc   : > { %1929 = vmatmul.mubr.f32.gmra.mrb[2].mxu1 %v1845_v56 }
 0x2dd   : > { %11859 = vmatpush1.bf16.msra.mxu1 %v11858_v11  ;;  %1999 = vmatprep.mubr.f32.mxu1 %v15783_v46 }
 0x2e0   : > { %10949 = vmatmul.mubr.msk.f32.vlgmr.msra.gmra.mrb[0].mxu1 %vm822_vm0, %v1843_v58 }
 0x2e1   : > { %2005 = vmatprep.mubr.f32.mxu1 %v15783_v46 }
 0x2e4   : > { %10950 = vmatmul.mubr.msk.f32.gmra.mrb[2].mxu1 %vm822_vm0, %v1849_v14  ;;  %v15855_v14 = vsel %vm2318_vm10, 1.0, %v15783_v46 }
 0x2e5   : > { %2168 = vmatprep.mubr.f32.mxu1 %v15783_v46 }
 0x367   : > { %v1503_v57 = vpop.f32.mrb[4].mxu0 }
 0x368   : > { %v1505_v5 = vpop.f32.mrb[5].mxu0 }
 0x36b   : > { %v1509_v6 = vpop.f32.mrb[6].mxu0 }
 0x36c   : > { %v1511_v7 = vpop.f32.mrb[7].mxu0 }
 0x3b3   : > { %v2001_v9 = vpop.f32.mrb[0].mxu1 }
 0x3b4   : > { %v14263_v12 = vadd.f32 %v2001_v9, %v1503_v57  ;;  %v2003_v13 = vpop.f32.mrb[1].mxu1  ;;  %v2468_v57 = vld [vmem:[#allocation14 + $0x258] sm:$0xff] }
 0x3b5   : > { %v14264_v15 = vadd.f32 %v2003_v13, %v1505_v5  ;;  %v2465_v5 = vld [vmem:[#allocation14 + $0x240] sm:$0xff]  ;;  %v2471_v13 = vld [vmem:[#allocation14 + $0x270] sm:$0xff] }
 0x3b6   : > { %v2028_v53 = vadd.f32 %v14263_v12, %v2021_v0  ;;  %v2469_v12 = vld [vmem:[#allocation14 + $0x260] sm:$0xff] }
 0x3b7   : > { %v2029_v16 = vadd.f32 %v14264_v15, %v2025_v10  ;;  %v2007_v17 = vpop.f32.mrb[2].mxu1  ;;  %v2474_v15 = vld [vmem:[#allocation14 + $0x288] sm:$0xff] }
 0x3b8   : > { %v2032_v18 = vmul.f32 0.5, %v2028_v53  ;;  %v14265_v19 = vadd.f32 %v2007_v17, %v1509_v6  ;;  %v2009_v20 = vpop.f32.mrb[3].mxu1  ;;  %v2467_v6 = vld [vmem:[#allocation14 + $0x250] sm:$0xff] }
 0x3b9   : > { %v2033_v21 = vmul.f32 0.5, %v2029_v16  ;;  %v14266_v22 = vadd.f32 %v2009_v20, %v1511_v7  ;;  %v2470_v7 = vld [vmem:[#allocation14 + $0x268] sm:$0xff]  ;;  %v11876_v9 = vpack.c.bf16 %v2467_v6, %v2465_v5  ;;  %v2497_v5 = vld [vmem:[#allocation14 + $0x340] sm:$0xff]  ;;  %v2499_v6 = vld [vmem:[#allocation14 + $0x350] sm:$0xff] }
 0x3ba   : > { %14575 = vtanh.f32 %v2032_v18  ;;  %v2030_v23 = vadd.f32 %v14265_v19, %v2021_v0  ;;  %v11874_v0 = vpack.c.bf16 %v2468_v57, %v2466_v60  ;;  %v2473_v18 = vld [vmem:[#allocation14 + $0x280] sm:$0xff]  ;;  %v2475_v19 = vld [vmem:[#allocation14 + $0x290] sm:$0xff]  ;;  %v2478_v20 = vld [vmem:[#allocation14 + $0x2a8] sm:$0xff] }
 0x3bb   : > { %14577 = vtanh.f32 %v2033_v21  ;;  %v2031_v24 = vadd.f32 %v14266_v22, %v2025_v10  ;;  %v11878_v10 = vpack.c.bf16 %v2472_v8, %v2470_v7  ;;  %v2480_v21 = vld [vmem:[#allocation14 + $0x2b8] sm:$0xff]  ;;  %v11884_v22 = vpack.c.bf16 %v2475_v19, %v2473_v18  ;;  %v2502_v7 = vld [vmem:[#allocation14 + $0x368] sm:$0xff]  ;;  %v2507_v18 = vld [vmem:[#allocation14 + $0x390] sm:$0xff] }
 0x3bc   : > { %v2034_v25 = vmul.f32 0.5, %v2030_v23  ;;  %v2504_v8 = vld [vmem:[#allocation14 + $0x378] sm:$0xff]  ;;  %v2510_v19 = vld [vmem:[#allocation14 + $0x3a8] sm:$0xff] }
 0x3bd   : > { %v2035_v26 = vmul.f32 0.5, %v2031_v24 }
 0x3be   : > { %14579 = vtanh.f32 %v2034_v25  ;;  %v2479_v25 = vld [vmem:[#allocation14 + $0x2b0] sm:$0xff] }
 0x3bf   : > { %14581 = vtanh.f32 %v2035_v26  ;;  %v2482_v26 = vld [vmem:[#allocation14 + $0x2c8] sm:$0xff] }
 0x3c4   : > { %v14576_v27 = vpop.eup %14575 }
 0x3c5   : > { %v14578_v28 = vpop.eup %14577  ;;  %v2040_v29 = vadd.f32 1.0, %v14576_v27  ;;  %v2484_v27 = vld [vmem:[#allocation14 + $0x2d8] sm:$0xff] }
 0x3c6   : > { %v2041_v30 = vadd.f32 1.0, %v14578_v28 }
 0x3c7   : > { %v2044_v31 = vmul.f32 0.5, %v2040_v29  ;;  %v11890_v29 = vpack.c.bf16 %v2484_v27, %v2482_v26  ;;  %v2516_v26 = vld [vmem:[#allocation14 + $0x3d8] sm:$0xff] }
 0x3c8   : > { %v14580_v32 = vpop.eup %14579  ;;  %v2045_v33 = vmul.f32 0.5, %v2041_v30  ;;  %v2481_v30 = vld [vmem:[#allocation14 + $0x2c0] sm:$0xff] }
 0x3c9   : > { %v14582_v34 = vpop.eup %14581  ;;  %v2048_v37 = vmul.f32 %v2044_v31, %v2028_v53  ;;  %v2042_v39 = vadd.f32 1.0, %v14580_v32  ;;  %v2476_v53 = vld [vmem:[#allocation14 + $0x298] sm:$0xff]  ;;  %v2483_v31 = vld [vmem:[#allocation14 + $0x2d0] sm:$0xff]  ;;  %v2486_v32 = vld [vmem:[#allocation14 + $0x2e8] sm:$0xff] }
 0x3ca   : > { %v2049_v40 = vmul.f32 %v2045_v33, %v2029_v16  ;;  %v2043_v41 = vadd.f32 1.0, %v14582_v34  ;;  %v11880_v16 = vpack.c.bf16 %v2471_v13, %v2469_v12  ;;  %v11882_v17 = vpack.c.bf16 %v2476_v53, %v2474_v15  ;;  %v2488_v33 = vld [vmem:[#allocation14 + $0x2f8] sm:$0xff]  ;;  %v2503_v12 = vld [vmem:[#allocation14 + $0x370] sm:$0xff]  ;;  %v2506_v13 = vld [vmem:[#allocation14 + $0x388] sm:$0xff] }
 0x3cb   : > { %v2056_v42 = vrot.slane %v2048_v37, 7  ;;  %v2046_v43 = vmul.f32 0.5, %v2042_v39  ;;  %v11892_v34 = vpack.c.bf16 %v2483_v31, %v2481_v30  ;;  %v11894_v37 = vpack.c.bf16 %v2488_v33, %v2486_v32  ;;  %v2485_v39 = vld [vmem:[#allocation14 + $0x2e0] sm:$0xff]  ;;  %v2508_v15 = vld [vmem:[#allocation14 + $0x398] sm:$0xff]  ;;  %v2515_v30 = vld [vmem:[#allocation14 + $0x3d0] sm:$0xff] }
 0x3cc   : > { %v2057_v44 = vrot.slane %v2049_v40, 7  ;;  %v2047_v45 = vmul.f32 0.5, %v2043_v41  ;;  %v2487_v40 = vld [vmem:[#allocation14 + $0x2f0] sm:$0xff]  ;;  %v2490_v41 = vld [vmem:[#allocation14 + $0x308] sm:$0xff]  ;;  %v2520_v32 = vld [vmem:[#allocation14 + $0x3f8] sm:$0xff] }
 0x3cd   : > { %2068 = vst [vmem:[#allocation3] sm:$0xfe] %v2056_v42  ;;  %v2050_v47 = vmul.f32 %v2046_v43, %v2030_v23  ;;  %v11886_v23 = vpack.c.bf16 %v2480_v21, %v2478_v20  ;;  %v11896_v43 = vpack.c.bf16 %v2487_v40, %v2485_v39  ;;  %v2512_v20 = vld [vmem:[#allocation14 + $0x3b8] sm:$0xff]  ;;  %v2518_v31 = vld [vmem:[#allocation14 + $0x3e8] sm:$0xff]  ;;  %v2519_v39 = vld [vmem:[#allocation14 + $0x3f0] sm:$0xff] }
 0x3ce   : > { %2069 = vst [vmem:[#allocation3 + $0x8] sm:$0xfe] %v2057_v44  ;;  %v2051_v48 = vmul.f32 %v2047_v45, %v2031_v24  ;;  %v2477_v24 = vld [vmem:[#allocation14 + $0x2a0] sm:$0xff]  ;;  %v2522_v40 = vld [vmem:[#allocation14 + $0x408] sm:$0xff] }
 0x3cf   : > { %v2058_v49 = vrot.slane %v2050_v47, 7  ;;  %v11888_v28 = vpack.c.bf16 %v2479_v25, %v2477_v24  ;;  %v2489_v45 = vld [vmem:[#allocation14 + $0x300] sm:$0xff]  ;;  %v2491_v47 = vld [vmem:[#allocation14 + $0x310] sm:$0xff]  ;;  %v2514_v25 = vld [vmem:[#allocation14 + $0x3c8] sm:$0xff] }
 0x3d0   : > { %v2060_v50 = vrot.slane %v2051_v48, 7  ;;  %v2494_v48 = vld [vmem:[#allocation14 + $0x328] sm:$0xff]  ;;  %v2511_v24 = vld [vmem:[#allocation14 + $0x3b0] sm:$0xff] }
 0x3d1   : > { %v2059_v51 = vsel %vm1228_vm5, %v2056_v42, %v2058_v49  ;;  %2072 = vst [vmem:[#allocation3 + $0x30] sm:$0x1] %v2058_v49  ;;  %v2492_v42 = vld [vmem:[#allocation14 + $0x318] sm:$0xff] }
 0x3d2   : > { %v2061_v52 = vsel %vm1228_vm5, %v2057_v44, %v2060_v50  ;;  %2073 = vst [vmem:[#allocation3 + $0x38] sm:$0x1] %v2060_v50  ;;  %v11898_v44 = vpack.c.bf16 %v2492_v42, %v2490_v41  ;;  %v2496_v49 = vld [vmem:[#allocation14 + $0x338] sm:$0xff]  ;;  %v11900_v50 = vpack.c.bf16 %v2491_v47, %v2489_v45  ;;  %v2523_v45 = vld [vmem:[#allocation14 + $0x410] sm:$0xff]  ;;  %v2526_v47 = vld [vmem:[#allocation14 + $0x428] sm:$0xff] }
 0x3d3   : > { %v2524_v41 = vld [vmem:[#allocation14 + $0x418] sm:$0xff] }
 0x3d4   : > { %v2074_v11 = vld [vmem:[#allocation3] sm:$0xff] }
 0x3d5   : > { %v2075_v55 = vld [vmem:[#allocation3 + $0x8] sm:$0xff]  ;;  %v15841_v58 = vpack.c.bf16 %v2059_v51, %v2074_v11  ;;  %v11902_v51 = vpack.c.bf16 %v2496_v49, %v2494_v48  ;;  %v2528_v48 = vld [vmem:[#allocation14 + $0x438] sm:$0xff] }
 0x3d6   : > { %v15839_v56 = vpack.c.bf16 %v2061_v52, %v2075_v55  ;;  %v2493_v52 = vld [vmem:[#allocation14 + $0x320] sm:$0xff]  ;;  %v2495_v11 = vld [vmem:[#allocation14 + $0x330] sm:$0xff]  ;;  %v2500_v55 = vld [vmem:[#allocation14 + $0x358] sm:$0xff] }
 0x3d7   : > { %v11904_v60 = vpack.c.bf16 %v2495_v11, %v2493_v52  ;;  %v11906_v57 = vpack.c.bf16 %v2500_v55, %v2498_v54  ;;  %v2527_v52 = vld [vmem:[#allocation14 + $0x430] sm:$0xff]  ;;  %v15876_v54 = vpop.f32.mrb[8].mxu0 }
 0x3d8   : > { %11861 = vmatprep.subr.bf16.mxu1 %v15839_v56  ;;  %11868 = vmatprep.subr.bf16.mxu0 %v15839_v56  ;;  %v15857_v61 = vld [vmem:[#allocation3 + $0x30] sm:$0x3]  ;;  %v11439_v55 = vpop.f32.mrb[9].mxu0 }
 0x3d9   : > { %11863 = vmatpush1.bf16.msra.mxu1 %v15841_v58  ;;  %11870 = vmatpush1.bf16.msra.mxu0 %v15841_v58  ;;  %v15848_v59 = vld [vmem:[#allocation3 + $0x38] sm:$0x3] }
 0x3da   : > { %10951 = vmatprep.subr.msk.mxu1 %vm2094_vm6, %v15848_v59  ;;  %10956 = vmatprep.subr.msk.mxu0 %vm2094_vm6, %v15848_v59  ;;  %v2268_v55 = vld [vmem:[#allocation14 + $0xb8] sm:$0xff] }
 0x3dd   : > { %10952 = vmatpush1.msk.msra.mxu1 %vm2094_vm6, %v15857_v61  ;;  %10957 = vmatpush1.msk.msra.mxu0 %vm2094_vm6, %v15857_v61 }
 0x3de   : > { %10958 = vmatmul.mubr.msk.f32.vlgmr.msra.gmra.mrb[10].mxu0 %vm2090_vm9, %v15855_v14  ;;  %11871 = vmatprep.subr.bf16.mxu0 %v15112_v63 }
 0x3df   : > { %11873 = vmatpush3.bf16.msra.mxu0 %v15809_v62  ;;  %11446 = vmatprep.mubr.msk.f32.mxu0 %vm15113_vm7, %v15783_v46 }
 0x3e0   : > { %11444 = vmatprep.subr.mxu0 %v15783_v46  ;;  %10953 = vmatmul.mubr.msk.f32.vlgmr.msra.gmra.mrb[4].mxu1 %vm2090_vm9, %v15829_v4 }
 0x3e3   : > { %11445 = vmatpush3.msk.msra.mxu0 %vm2094_vm6, %v15814_v1 }
 0x3e4   : > { %11447 = vmatmul.mubr.msk.f32.vlgmr.msra.gmra.mrb[12].mxu0 %vm2090_vm9, %v15855_v14  ;;  %11875 = vmatprep.subr.bf16.mxu0 %v11874_v0  ;;  %v11908_v0 = vpack.c.bf16 %v2499_v6, %v2497_v5  ;;  %v2529_v6 = vld [vmem:[#allocation14 + $0x440] sm:$0xff] }
 0x3e5   : > { %11877 = vmatpush1.bf16.msra.mxu0 %v11876_v9  ;;  %v11910_v9 = vpack.c.bf16 %v2504_v8, %v2502_v7  ;;  %v2531_v7 = vld [vmem:[#allocation14 + $0x450] sm:$0xff]  ;;  %v2534_v8 = vld [vmem:[#allocation14 + $0x468] sm:$0xff] }
 0x3e6   : > { %11879 = vmatprep.subr.bf16.mxu0 %v11878_v10  ;;  %v2501_v10 = vld [vmem:[#allocation14 + $0x360] sm:$0xff] }
 0x3e7   : > { %v11912_v53 = vpack.c.bf16 %v2503_v12, %v2501_v10  ;;  %v11940_v10 = vpack.c.bf16 %v2531_v7, %v2529_v6  ;;  %v2267_v6 = vld [vmem:[#allocation14 + $0xb0] sm:$0xff]  ;;  %v2270_v7 = vld [vmem:[#allocation14 + $0xc8] sm:$0xff] }
 0x3e9   : > { %11881 = vmatpush1.bf16.msra.mxu0 %v11880_v16  ;;  %v11914_v16 = vpack.c.bf16 %v2508_v15, %v2506_v13  ;;  %v2533_v15 = vld [vmem:[#allocation14 + $0x460] sm:$0xff] }
 0x3ea   : > { %11883 = vmatprep.subr.bf16.mxu0 %v11882_v17  ;;  %v2505_v17 = vld [vmem:[#allocation14 + $0x380] sm:$0xff] }
 0x3eb   : > { %v11916_v21 = vpack.c.bf16 %v2507_v18, %v2505_v17  ;;  %v2248_v17 = vld [vmem:[#allocation14 + $0x18] sm:$0xff] }
 0x3ed   : > { %11885 = vmatpush1.bf16.msra.mxu0 %v11884_v22  ;;  %v11918_v22 = vpack.c.bf16 %v2512_v20, %v2510_v19 }
 0x3ee   : > { %11887 = vmatprep.subr.bf16.mxu0 %v11886_v23  ;;  %v2509_v23 = vld [vmem:[#allocation14 + $0x3a0] sm:$0xff] }
 0x3ef   : > { %v11920_v27 = vpack.c.bf16 %v2511_v24, %v2509_v23  ;;  %v2247_v23 = vld [vmem:[#allocation14 + $0x10] sm:$0xff] }
 0x3f1   : > { %11889 = vmatpush1.bf16.msra.mxu0 %v11888_v28  ;;  %v11922_v28 = vpack.c.bf16 %v2516_v26, %v2514_v25  ;;  %v2250_v25 = vld [vmem:[#allocation14 + $0x28] sm:$0xff]  ;;  %v2252_v26 = vld [vmem:[#allocation14 + $0x38] sm:$0xff] }
 0x3f2   : > { %11891 = vmatprep.subr.bf16.mxu0 %v11890_v29  ;;  %v2513_v29 = vld [vmem:[#allocation14 + $0x3c0] sm:$0xff] }
 0x3f3   : > { %v11924_v33 = vpack.c.bf16 %v2515_v30, %v2513_v29  ;;  %v11950_v29 = vpack.c.bf16 %v2252_v26, %v2250_v25  ;;  %v2249_v30 = vld [vmem:[#allocation14 + $0x20] sm:$0xff]  ;;  %v2279_v25 = vld [vmem:[#allocation14 + $0x110] sm:$0xff]  ;;  %v2282_v26 = vld [vmem:[#allocation14 + $0x128] sm:$0xff] }
 0x3f5   : > { %11893 = vmatpush1.bf16.msra.mxu0 %v11892_v34  ;;  %v11926_v34 = vpack.c.bf16 %v2520_v32, %v2518_v31  ;;  %v2251_v31 = vld [vmem:[#allocation14 + $0x30] sm:$0xff]  ;;  %v2254_v32 = vld [vmem:[#allocation14 + $0x48] sm:$0xff] }
 0x3f6   : > { %11895 = vmatprep.subr.bf16.mxu0 %v11894_v37  ;;  %v2517_v37 = vld [vmem:[#allocation14 + $0x3e0] sm:$0xff] }
 0x3f7   : > { %v11928_v42 = vpack.c.bf16 %v2519_v39, %v2517_v37  ;;  %v2253_v37 = vld [vmem:[#allocation14 + $0x40] sm:$0xff]  ;;  %v2255_v39 = vld [vmem:[#allocation14 + $0x50] sm:$0xff] }
 0x3f9   : > { %11897 = vmatpush1.bf16.msra.mxu0 %v11896_v43  ;;  %v11930_v43 = vpack.c.bf16 %v2524_v41, %v2522_v40  ;;  %v2258_v40 = vld [vmem:[#allocation14 + $0x68] sm:$0xff]  ;;  %v2260_v41 = vld [vmem:[#allocation14 + $0x78] sm:$0xff] }
 0x3fa   : > { %11899 = vmatprep.subr.bf16.mxu0 %v11898_v44  ;;  %v2521_v44 = vld [vmem:[#allocation14 + $0x400] sm:$0xff] }
 0x3fb   : > { %v11932_v49 = vpack.c.bf16 %v2523_v45, %v2521_v44  ;;  %v2257_v44 = vld [vmem:[#allocation14 + $0x60] sm:$0xff]  ;;  %v2259_v45 = vld [vmem:[#allocation14 + $0x70] sm:$0xff] }
 0x3fd   : > { %11901 = vmatpush1.bf16.msra.mxu0 %v11900_v50  ;;  %v11934_v50 = vpack.c.bf16 %v2528_v48, %v2526_v47  ;;  %v2262_v47 = vld [vmem:[#allocation14 + $0x88] sm:$0xff]  ;;  %v2264_v48 = vld [vmem:[#allocation14 + $0x98] sm:$0xff] }
 0x3fe   : > { %11903 = vmatprep.subr.bf16.mxu0 %v11902_v51  ;;  %v2525_v51 = vld [vmem:[#allocation14 + $0x420] sm:$0xff] }
 0x3ff   : > { %v11936_v11 = vpack.c.bf16 %v2527_v52, %v2525_v51  ;;  %v2261_v51 = vld [vmem:[#allocation14 + $0x80] sm:$0xff]  ;;  %v2263_v52 = vld [vmem:[#allocation14 + $0x90] sm:$0xff] }
 0x401   : > { %11905 = vmatpush1.bf16.msra.mxu0 %v11904_v60  ;;  %v2530_v60 = vld [vmem:[#allocation14 + $0x448] sm:$0xff] }
 0x402   : > { %11907 = vmatprep.subr.bf16.mxu0 %v11906_v57  ;;  %v2532_v57 = vld [vmem:[#allocation14 + $0x458] sm:$0xff] }
 0x403   : > { %v11938_v5 = vpack.c.bf16 %v2532_v57, %v2530_v60  ;;  %v11964_v60 = vpack.c.bf16 %v2263_v52, %v2261_v51  ;;  %v2293_v51 = vld [vmem:[#allocation14 + $0x180] sm:$0xff]  ;;  %v2295_v52 = vld [vmem:[#allocation14 + $0x190] sm:$0xff] }
 0x405   : > { %11909 = vmatpush1.bf16.msra.mxu0 %v11908_v0  ;;  %v2536_v0 = vld [vmem:[#allocation14 + $0x478] sm:$0xff] }
 0x406   : > { %11911 = vmatprep.subr.bf16.mxu0 %v11910_v9  ;;  %v11942_v13 = vpack.c.bf16 %v2536_v0, %v2534_v8  ;;  %v2272_v8 = vld [vmem:[#allocation14 + $0xd8] sm:$0xff] }
 0x409   : > { %11913 = vmatpush1.bf16.msra.mxu0 %v11912_v53  ;;  %v2535_v53 = vld [vmem:[#allocation14 + $0x470] sm:$0xff] }
 0x40a   : > { %11915 = vmatprep.subr.bf16.mxu0 %v11914_v16  ;;  %v2246_v16 = vld [vmem:[#allocation14 + $0x8] sm:$0xff]  ;;  %v11944_v20 = vpack.c.bf16 %v2535_v53, %v2533_v15  ;;  %v2276_v15 = vld [vmem:[#allocation14 + $0xf8] sm:$0xff] }
 0x40d   : > { %11917 = vmatpush1.bf16.msra.mxu0 %v11916_v21  ;;  %v11946_v21 = vpack.c.bf16 %v2248_v17, %v2246_v16  ;;  %v2273_v17 = vld [vmem:[#allocation14 + $0xe0] sm:$0xff] }
 0x40e   : > { %11919 = vmatprep.subr.bf16.mxu0 %v11918_v22  ;;  %v2245_v22 = vld [vmem:[#allocation14] sm:$0xff] }
 0x411   : > { %11921 = vmatpush1.bf16.msra.mxu0 %v11920_v27 }
 0x412   : > { %11923 = vmatprep.subr.bf16.mxu0 %v11922_v28  ;;  %v11948_v28 = vpack.c.bf16 %v2247_v23, %v2245_v22 }
 0x415   : > { %11925 = vmatpush1.bf16.msra.mxu0 %v11924_v33  ;;  %v2256_v33 = vld [vmem:[#allocation14 + $0x58] sm:$0xff] }
 0x416   : > { %11927 = vmatprep.subr.bf16.mxu0 %v11926_v34  ;;  %v11954_v34 = vpack.c.bf16 %v2256_v33, %v2254_v32  ;;  %v2286_v32 = vld [vmem:[#allocation14 + $0x148] sm:$0xff]  ;;  %v2288_v33 = vld [vmem:[#allocation14 + $0x158] sm:$0xff] }
 0x419   : > { %11929 = vmatpush1.bf16.msra.mxu0 %v11928_v42  ;;  %v11956_v42 = vpack.c.bf16 %v2255_v39, %v2253_v37  ;;  %v2285_v37 = vld [vmem:[#allocation14 + $0x140] sm:$0xff]  ;;  %v2287_v39 = vld [vmem:[#allocation14 + $0x150] sm:$0xff] }
 0x41a   : > { %11931 = vmatprep.subr.bf16.mxu0 %v11930_v43  ;;  %v11958_v43 = vpack.c.bf16 %v2260_v41, %v2258_v40  ;;  %v2290_v40 = vld [vmem:[#allocation14 + $0x168] sm:$0xff]  ;;  %v2292_v41 = vld [vmem:[#allocation14 + $0x178] sm:$0xff] }
 0x41d   : > { %11933 = vmatpush1.bf16.msra.mxu0 %v11932_v49  ;;  %v11960_v49 = vpack.c.bf16 %v2259_v45, %v2257_v44  ;;  %v2289_v44 = vld [vmem:[#allocation14 + $0x160] sm:$0xff]  ;;  %v2291_v45 = vld [vmem:[#allocation14 + $0x170] sm:$0xff] }
 0x41e   : > { %11935 = vmatprep.subr.bf16.mxu0 %v11934_v50  ;;  %v11962_v50 = vpack.c.bf16 %v2264_v48, %v2262_v47  ;;  %v2294_v47 = vld [vmem:[#allocation14 + $0x188] sm:$0xff]  ;;  %v2296_v48 = vld [vmem:[#allocation14 + $0x198] sm:$0xff] }
 0x421   : > { %11937 = vmatpush1.bf16.msra.mxu0 %v11936_v11  ;;  %v2266_v11 = vld [vmem:[#allocation14 + $0xa8] sm:$0xff] }
 0x422   : > { %11939 = vmatprep.subr.bf16.mxu0 %v11938_v5  ;;  %v11966_v57 = vpack.c.bf16 %v2268_v55, %v2266_v11  ;;  %v2265_v5 = vld [vmem:[#allocation14 + $0xa0] sm:$0xff]  ;;  %v2298_v11 = vld [vmem:[#allocation14 + $0x1a8] sm:$0xff]  ;;  %v2300_v55 = vld [vmem:[#allocation14 + $0x1b8] sm:$0xff] }
 0x423   : > { %v11968_v0 = vpack.c.bf16 %v2267_v6, %v2265_v5  ;;  %v2297_v5 = vld [vmem:[#allocation14 + $0x1a0] sm:$0xff]  ;;  %v2299_v6 = vld [vmem:[#allocation14 + $0x1b0] sm:$0xff] }
 0x4b1   : > { %v2389_v9 = vpop.f32.mrb[10].mxu0 }
 0x4b2   : > { %v2391_v12 = vpop.f32.mrb[11].mxu0 }
 0x4b3   : > { %2604 = vmatprep.mubr.f32.mxu0 %v2391_v12  ;;  %v15878_v18 = vpop.f32.mrb[4].mxu1  ;;  %v2271_v12 = vld [vmem:[#allocation14 + $0xd0] sm:$0xff] }
 0x4b4   : > { %2605 = vmatmul.mubr.f32.vlgmr.msra.gmra.mrb[14].mxu0 %v2389_v9  ;;  %v2172_v19 = vpop.f32.mrb[5].mxu1  ;;  %v11970_v9 = vpack.c.bf16 %v2272_v8, %v2270_v7  ;;  %v2302_v7 = vld [vmem:[#allocation14 + $0x1c8] sm:$0xff]  ;;  %v2304_v8 = vld [vmem:[#allocation14 + $0x1d8] sm:$0xff] }
 0x4b5   : > { %11941 = vmatpush1.bf16.msra.mxu0 %v11940_v10  ;;  %2675 = vmatprep.mubr.f32.mxu0 %v15783_v46  ;;  %v11952_v46 = vpack.c.bf16 %v2251_v31, %v2249_v30  ;;  %v2269_v10 = vld [vmem:[#allocation14 + $0xc0] sm:$0xff]  ;;  %v2283_v31 = vld [vmem:[#allocation14 + $0x130] sm:$0xff] }
 0x4b6   : > { %11943 = vmatprep.subr.bf16.mxu0 %v11942_v13  ;;  %v2274_v13 = vld [vmem:[#allocation14 + $0xe8] sm:$0xff]  ;;  %v11972_v53 = vpack.c.bf16 %v2271_v12, %v2269_v10  ;;  %v2281_v30 = vld [vmem:[#allocation14 + $0x120] sm:$0xff]  ;;  %v2303_v12 = vld [vmem:[#allocation14 + $0x1d0] sm:$0xff] }
 0x4b7   : > { %v2460_v24 = vpop.f32.mrb[12].mxu0  ;;  %v11974_v16 = vpack.c.bf16 %v2276_v15, %v2274_v13  ;;  %v2301_v10 = vld [vmem:[#allocation14 + $0x1c0] sm:$0xff]  ;;  %v2306_v13 = vld [vmem:[#allocation14 + $0x1e8] sm:$0xff]  ;;  %v2308_v15 = vld [vmem:[#allocation14 + $0x1f8] sm:$0xff] }
 0x4b8   : > { %v11448_v27 = vpop.f32.mrb[13].mxu0 }
 0x4b9   : > { %11945 = vmatpush1.bf16.msra.mxu0 %v11944_v20  ;;  %v2278_v20 = vld [vmem:[#allocation14 + $0x108] sm:$0xff]  ;;  %v2284_v27 = vld [vmem:[#allocation14 + $0x138] sm:$0xff] }
 0x4ba   : > { %11947 = vmatprep.subr.bf16.mxu0 %v11946_v21  ;;  %v2280_v21 = vld [vmem:[#allocation14 + $0x118] sm:$0xff] }
 0x4bb   : > { %v11978_v23 = vpack.c.bf16 %v2280_v21, %v2278_v20  ;;  %v2310_v20 = vld [vmem:[#allocation14 + $0x208] sm:$0xff]  ;;  %v2312_v21 = vld [vmem:[#allocation14 + $0x218] sm:$0xff] }
 0x4bc   : > { %10961 = vmatmul.mubr.msk.f32.vlgmr.msra.gmra.mrb[14].mxu0 %vm822_vm0, %v2460_v24  ;;  %v2277_v24 = vld [vmem:[#allocation14 + $0x100] sm:$0xff] }
 0x4bd   : > { %11949 = vmatpush1.bf16.msra.mxu0 %v11948_v28  ;;  %2749 = vmatprep.mubr.f32.mxu0 %v2172_v19  ;;  %v2275_v19 = vld [vmem:[#allocation14 + $0xf0] sm:$0xff]  ;;  %v11980_v28 = vpack.c.bf16 %v2279_v25, %v2277_v24  ;;  %v2309_v24 = vld [vmem:[#allocation14 + $0x200] sm:$0xff] }
 0x4be   : > { %11951 = vmatprep.subr.bf16.mxu0 %v11950_v29  ;;  %v11976_v22 = vpack.c.bf16 %v2275_v19, %v2273_v17  ;;  %v11982_v29 = vpack.c.bf16 %v2284_v27, %v2282_v26  ;;  %v2305_v17 = vld [vmem:[#allocation14 + $0x1e0] sm:$0xff]  ;;  %v2307_v19 = vld [vmem:[#allocation14 + $0x1f0] sm:$0xff]  ;;  %v2314_v26 = vld [vmem:[#allocation14 + $0x228] sm:$0xff] }
 0x4bf   : > { %v2311_v25 = vld [vmem:[#allocation14 + $0x210] sm:$0xff]  ;;  %v2316_v27 = vld [vmem:[#allocation14 + $0x238] sm:$0xff] }
 0x4c1   : > { %11953 = vmatpush1.bf16.msra.mxu0 %v11952_v46  ;;  %v11984_v46 = vpack.c.bf16 %v2283_v31, %v2281_v30  ;;  %v2313_v30 = vld [vmem:[#allocation14 + $0x220] sm:$0xff]  ;;  %v2315_v31 = vld [vmem:[#allocation14 + $0x230] sm:$0xff] }
 0x4c2   : > { %11955 = vmatprep.subr.bf16.mxu0 %v11954_v34  ;;  %v11986_v34 = vpack.c.bf16 %v2288_v33, %v2286_v32  ;;  %v12016_v32 = vpack.c.bf16 %v2315_v31, %v2313_v30  ;;  %v15883_v33 = vld [vmem:[#allocation4] sm:$0xff] }
 0x4c3   : > { %v3009_v30 = vld [vmem:[#allocation14 + $0x590] sm:$0xff]  ;;  %v3012_v31 = vld [vmem:[#allocation14 + $0x5a8] sm:$0xff]  ;;  %843 = vst.msk [vmem:[#allocation4 + $0x10] sm:$0xff] %vm842_vm12, %v15883_v33  ;;  %850 = vst.msk [vmem:[#allocation5 + $0x10] sm:$0xff] %vm842_vm12, %v15883_v33 }
 0x4c4   : > { %847 = vst.msk [vmem:[#allocation4 + $0x28] sm:$0x3] %vm846_vm13, %v15883_v33  ;;  %853 = vst.msk [vmem:[#allocation5 + $0x28] sm:$0x3] %vm846_vm13, %v15883_v33 }
 0x4c5   : > { %11957 = vmatpush1.bf16.msra.mxu0 %v11956_v42  ;;  %v11988_v42 = vpack.c.bf16 %v2287_v39, %v2285_v37  ;;  %v2979_v39 = vld [vmem:[#allocation14 + $0x4a0] sm:$0xff] }
 0x4c6   : > { %11959 = vmatprep.subr.bf16.mxu0 %v11958_v43  ;;  %v11990_v43 = vpack.c.bf16 %v2292_v41, %v2290_v40  ;;  %v2981_v40 = vld [vmem:[#allocation14 + $0x4b0] sm:$0xff]  ;;  %v2984_v41 = vld [vmem:[#allocation14 + $0x4c8] sm:$0xff] }
 0x4c9   : > { %11961 = vmatpush1.bf16.msra.mxu0 %v11960_v49  ;;  %v11992_v49 = vpack.c.bf16 %v2291_v45, %v2289_v44  ;;  %v2983_v44 = vld [vmem:[#allocation14 + $0x4c0] sm:$0xff]  ;;  %v2985_v45 = vld [vmem:[#allocation14 + $0x4d0] sm:$0xff] }
 0x4ca   : > { %11963 = vmatprep.subr.bf16.mxu0 %v11962_v50  ;;  %v11994_v50 = vpack.c.bf16 %v2296_v48, %v2294_v47  ;;  %v2988_v47 = vld [vmem:[#allocation14 + $0x4e8] sm:$0xff]  ;;  %v2990_v48 = vld [vmem:[#allocation14 + $0x4f8] sm:$0xff] }
 0x4cd   : > { %11965 = vmatpush1.bf16.msra.mxu0 %v11964_v60  ;;  %v11996_v60 = vpack.c.bf16 %v2295_v52, %v2293_v51  ;;  %v2987_v51 = vld [vmem:[#allocation14 + $0x4e0] sm:$0xff]  ;;  %v2992_v52 = vld [vmem:[#allocation14 + $0x508] sm:$0xff] }
 0x4ce   : > { %11967 = vmatprep.subr.bf16.mxu0 %v11966_v57  ;;  %v11998_v57 = vpack.c.bf16 %v2300_v55, %v2298_v11  ;;  %v2994_v11 = vld [vmem:[#allocation14 + $0x518] sm:$0xff] }
 0x4d1   : > { %11969 = vmatpush1.bf16.msra.mxu0 %v11968_v0  ;;  %v12000_v0 = vpack.c.bf16 %v2299_v6, %v2297_v5  ;;  %v2993_v5 = vld [vmem:[#allocation14 + $0x510] sm:$0xff]  ;;  %v2996_v6 = vld [vmem:[#allocation14 + $0x528] sm:$0xff] }
 0x4d2   : > { %11971 = vmatprep.subr.bf16.mxu0 %v11970_v9  ;;  %v12002_v9 = vpack.c.bf16 %v2304_v8, %v2302_v7  ;;  %v2998_v7 = vld [vmem:[#allocation14 + $0x538] sm:$0xff] }
 0x4d5   : > { %11973 = vmatpush1.bf16.msra.mxu0 %v11972_v53  ;;  %v12004_v53 = vpack.c.bf16 %v2303_v12, %v2301_v10  ;;  %v2997_v10 = vld [vmem:[#allocation14 + $0x530] sm:$0xff]  ;;  %v3000_v12 = vld [vmem:[#allocation14 + $0x548] sm:$0xff] }
 0x4d6   : > { %11975 = vmatprep.subr.bf16.mxu0 %v11974_v16  ;;  %v12006_v16 = vpack.c.bf16 %v2308_v15, %v2306_v13  ;;  %v3002_v13 = vld [vmem:[#allocation14 + $0x558] sm:$0xff] }
 0x4d9   : > { %11977 = vmatpush1.bf16.msra.mxu0 %v11976_v22  ;;  %v12008_v22 = vpack.c.bf16 %v2307_v19, %v2305_v17  ;;  %v3001_v17 = vld [vmem:[#allocation14 + $0x550] sm:$0xff]  ;;  %v3004_v19 = vld [vmem:[#allocation14 + $0x568] sm:$0xff] }
 0x4da   : > { %11979 = vmatprep.subr.bf16.mxu0 %v11978_v23  ;;  %v12010_v23 = vpack.c.bf16 %v2312_v21, %v2310_v20  ;;  %v3006_v20 = vld [vmem:[#allocation14 + $0x578] sm:$0xff] }
 0x4dd   : > { %11981 = vmatpush1.bf16.msra.mxu0 %v11980_v28  ;;  %v12012_v28 = vpack.c.bf16 %v2311_v25, %v2309_v24  ;;  %v3005_v24 = vld [vmem:[#allocation14 + $0x570] sm:$0xff]  ;;  %v3008_v25 = vld [vmem:[#allocation14 + $0x588] sm:$0xff] }
 0x4de   : > { %11983 = vmatprep.subr.bf16.mxu0 %v11982_v29  ;;  %v12014_v29 = vpack.c.bf16 %v2316_v27, %v2314_v26  ;;  %v3010_v26 = vld [vmem:[#allocation14 + $0x598] sm:$0xff] }
 0x4e1   : > { %11985 = vmatpush1.bf16.msra.mxu0 %v11984_v46  ;;  %v2827_v46 = vadd.s32 2, %v15822_v3  ;;  %v2976_v3 = vld [vmem:[#allocation14 + $0x488] sm:$0xff] }
 0x4e2   : > { %11987 = vmatprep.subr.bf16.mxu0 %v11986_v34 }
 0x4e3   : > { %vm2828_vm11 = vcmp.eq.s32.totalorder %v15819_v2, %v2827_v46  ;;  %v2975_v2 = vld [vmem:[#allocation14 + $0x480] sm:$0xff] }
 0x4e5   : > { %11989 = vmatpush1.bf16.msra.mxu0 %v11988_v42  ;;  %v2986_v42 = vld [vmem:[#allocation14 + $0x4d8] sm:$0xff] }
 0x4e6   : > { %11991 = vmatprep.subr.bf16.mxu0 %v11990_v43  ;;  %v12033_v43 = vpack.c.bf16 %v2986_v42, %v2984_v41 }
 0x4e9   : > { %11993 = vmatpush1.bf16.msra.mxu0 %v11992_v49  ;;  %v12035_v49 = vpack.c.bf16 %v2985_v45, %v2983_v44  ;;  %v3024_v44 = vld [vmem:[#allocation14 + $0x608] sm:$0xff]  ;;  %v3026_v45 = vld [vmem:[#allocation14 + $0x618] sm:$0xff] }
 0x4ea   : > { %11995 = vmatprep.subr.bf16.mxu0 %v11994_v50  ;;  %v12037_v50 = vpack.c.bf16 %v2990_v48, %v2988_v47  ;;  %v12073_v48 = vpack.c.bf16 %v3026_v45, %v3024_v44  ;;  %v3336_v44 = vld [vmem:[#allocation17 + $0x310] sm:$0xff]  ;;  %v3339_v45 = vld [vmem:[#allocation17 + $0x328] sm:$0xff] }
 0x4ed   : > { %11997 = vmatpush1.bf16.msra.mxu0 %v11996_v60  ;;  %v12041_v60 = vpack.c.bf16 %v2994_v11, %v2992_v52 }
 0x4ee   : > { %11999 = vmatprep.subr.bf16.mxu0 %v11998_v57  ;;  %v2991_v57 = vld [vmem:[#allocation14 + $0x500] sm:$0xff] }
 0x4ef   : > { %v12043_v8 = vpack.c.bf16 %v2993_v5, %v2991_v57  ;;  %v3032_v57 = vld [vmem:[#allocation14 + $0x648] sm:$0xff]  ;;  %v3034_v5 = vld [vmem:[#allocation14 + $0x658] sm:$0xff] }
 0x4f1   : > { %12001 = vmatpush1.bf16.msra.mxu0 %v12000_v0  ;;  %v12045_v0 = vpack.c.bf16 %v2998_v7, %v2996_v6  ;;  %v12081_v7 = vpack.c.bf16 %v3034_v5, %v3032_v57  ;;  %v3344_v57 = vld [vmem:[#allocation17 + $0x350] sm:$0xff] }
 0x4f2   : > { %12003 = vmatprep.subr.bf16.mxu0 %v12002_v9  ;;  %v2995_v9 = vld [vmem:[#allocation14 + $0x520] sm:$0xff] }
 0x4f3   : > { %v12047_v15 = vpack.c.bf16 %v2997_v10, %v2995_v9  ;;  %v3036_v9 = vld [vmem:[#allocation14 + $0x668] sm:$0xff]  ;;  %v3038_v10 = vld [vmem:[#allocation14 + $0x678] sm:$0xff] }
 0x4f5   : > { %12005 = vmatpush1.bf16.msra.mxu0 %v12004_v53  ;;  %v12049_v53 = vpack.c.bf16 %v3002_v13, %v3000_v12  ;;  %v12085_v13 = vpack.c.bf16 %v3038_v10, %v3036_v9 }
 0x4f6   : > { %12007 = vmatprep.subr.bf16.mxu0 %v12006_v16  ;;  %v2999_v16 = vld [vmem:[#allocation14 + $0x540] sm:$0xff] }
 0x4f7   : > { %v12051_v21 = vpack.c.bf16 %v3001_v17, %v2999_v16  ;;  %v3040_v17 = vld [vmem:[#allocation14 + $0x688] sm:$0xff] }
 0x4f9   : > { %12009 = vmatpush1.bf16.msra.mxu0 %v12008_v22  ;;  %v12053_v22 = vpack.c.bf16 %v3006_v20, %v3004_v19  ;;  %v3042_v19 = vld [vmem:[#allocation14 + $0x698] sm:$0xff] }
 0x4fa   : > { %12011 = vmatprep.subr.bf16.mxu0 %v12010_v23  ;;  %v3003_v23 = vld [vmem:[#allocation14 + $0x560] sm:$0xff]  ;;  %v12089_v20 = vpack.c.bf16 %v3042_v19, %v3040_v17 }
 0x4fb   : > { %v12055_v27 = vpack.c.bf16 %v3005_v24, %v3003_v23  ;;  %v3318_v23 = vld [vmem:[#allocation17 + $0x280] sm:$0xff] }
 0x4fc   : > { %2750 = vmatmul.mubr.f32.vlgmr.msra.gmra.mrb[14].mxu0 %v15878_v18  ;;  %v15896_v18 = vsel %vm2828_vm11, 1.0, %v15883_v33 }
 0x4fd   : > { %12013 = vmatpush1.bf16.msra.mxu0 %v12012_v28  ;;  %2820 = vmatprep.mubr.f32.mxu0 %v15883_v33  ;;  %v12057_v28 = vpack.c.bf16 %v3010_v26, %v3008_v25  ;;  %v3320_v25 = vld [vmem:[#allocation17 + $0x290] sm:$0xff]  ;;  %v3323_v26 = vld [vmem:[#allocation17 + $0x2a8] sm:$0xff] }
 0x4fe   : > { %12015 = vmatprep.subr.bf16.mxu0 %v12014_v29  ;;  %v3007_v29 = vld [vmem:[#allocation14 + $0x580] sm:$0xff] }
 0x4ff   : > { %v12059_v46 = vpack.c.bf16 %v3009_v30, %v3007_v29  ;;  %v3322_v30 = vld [vmem:[#allocation17 + $0x2a0] sm:$0xff] }
 0x501   : > { %12017 = vmatpush1.bf16.msra.mxu0 %v12016_v32  ;;  %v3014_v32 = vld [vmem:[#allocation14 + $0x5b8] sm:$0xff] }
 0x502   : > { %12019 = vmatprep.subr.bf16.mxu0 %v15839_v56  ;;  %v2978_v56 = vld [vmem:[#allocation14 + $0x498] sm:$0xff] }
 0x503   : > { %v12025_v34 = vpack.c.bf16 %v2978_v56, %v2976_v3  ;;  %v12061_v3 = vpack.c.bf16 %v3014_v32, %v3012_v31  ;;  %v3011_v56 = vld [vmem:[#allocation14 + $0x5a0] sm:$0xff]  ;;  %v3324_v31 = vld [vmem:[#allocation17 + $0x2b0] sm:$0xff]  ;;  %v3327_v32 = vld [vmem:[#allocation17 + $0x2c8] sm:$0xff] }
 0x504   : > { %10962 = vmatmul.mubr.msk.f32.vlgmr.msra.gmra.mrb[14].mxu0 %vm822_vm0, %v15876_v54  ;;  %v2982_v54 = vld [vmem:[#allocation14 + $0x4b8] sm:$0xff] }
 0x505   : > { %12021 = vmatpush1.bf16.msra.mxu0 %v15841_v58  ;;  %2897 = vmatprep.mubr.f32.mxu0 %v15883_v33  ;;  %v2977_v58 = vld [vmem:[#allocation14 + $0x490] sm:$0xff] }
 0x506   : > { %10963 = vmatprep.subr.msk.mxu0 %vm2094_vm6, %v15848_v59  ;;  %v2980_v59 = vld [vmem:[#allocation14 + $0x4a8] sm:$0xff] }
 0x507   : > { %v12029_v37 = vpack.c.bf16 %v2982_v54, %v2980_v59  ;;  %v3018_v59 = vld [vmem:[#allocation14 + $0x5d8] sm:$0xff] }
 0x509   : > { %10964 = vmatpush1.msk.msra.mxu0 %vm2094_vm6, %v15857_v61  ;;  %v12027_v61 = vpack.c.bf16 %v2977_v58, %v2975_v2  ;;  %v3013_v2 = vld [vmem:[#allocation14 + $0x5b0] sm:$0xff]  ;;  %v3016_v58 = vld [vmem:[#allocation14 + $0x5c8] sm:$0xff] }
 0x50a   : > { %10965 = vmatmul.mubr.msk.f32.vlgmr.msra.gmra.mrb[16].mxu0 %vm2090_vm9, %v15896_v18  ;;  %12022 = vmatprep.subr.bf16.mxu0 %v15112_v63  ;;  %v12063_v54 = vpack.c.bf16 %v3013_v2, %v3011_v56  ;;  %v3326_v2 = vld [vmem:[#allocation17 + $0x2c0] sm:$0xff] }
 0x50b   : > { %12024 = vmatpush3.bf16.msra.mxu0 %v15809_v62  ;;  %11455 = vmatprep.mubr.msk.f32.mxu0 %vm15113_vm7, %v15883_v33  ;;  %v12031_v62 = vpack.c.bf16 %v2981_v40, %v2979_v39  ;;  %v3020_v39 = vld [vmem:[#allocation14 + $0x5e8] sm:$0xff]  ;;  %v3022_v40 = vld [vmem:[#allocation14 + $0x5f8] sm:$0xff] }
 0x50c   : > { %11453 = vmatprep.subr.mxu0 %v15883_v33  ;;  %v12069_v42 = vpack.c.bf16 %v3022_v40, %v3020_v39  ;;  %v3332_v39 = vld [vmem:[#allocation17 + $0x2f0] sm:$0xff]  ;;  %v3335_v40 = vld [vmem:[#allocation17 + $0x308] sm:$0xff] }
 0x50f   : > { %11454 = vmatpush3.msk.msra.mxu0 %vm2094_vm6, %v15814_v1  ;;  %v2989_v1 = vld [vmem:[#allocation14 + $0x4f0] sm:$0xff] }
 0x510   : > { %11456 = vmatmul.mubr.msk.f32.vlgmr.msra.gmra.mrb[18].mxu0 %vm2090_vm9, %v15896_v18  ;;  %12026 = vmatprep.subr.bf16.mxu0 %v12025_v34  ;;  %v12039_v55 = vpack.c.bf16 %v2989_v1, %v2987_v51  ;;  %v12065_v34 = vpack.c.bf16 %v3018_v59, %v3016_v58  ;;  %v3028_v51 = vld [vmem:[#allocation14 + $0x628] sm:$0xff]  ;;  %v3030_v1 = vld [vmem:[#allocation14 + $0x638] sm:$0xff] }
 0x511   : > { %12028 = vmatpush1.bf16.msra.mxu0 %v12027_v61  ;;  %v3015_v61 = vld [vmem:[#allocation14 + $0x5c0] sm:$0xff]  ;;  %v12077_v11 = vpack.c.bf16 %v3030_v1, %v3028_v51  ;;  %v3328_v58 = vld [vmem:[#allocation17 + $0x2d0] sm:$0xff]  ;;  %v3331_v59 = vld [vmem:[#allocation17 + $0x2e8] sm:$0xff] }
 0x512   : > { %12030 = vmatprep.subr.bf16.mxu0 %v12029_v37  ;;  %v3017_v37 = vld [vmem:[#allocation14 + $0x5d0] sm:$0xff] }
 0x513   : > { %v12067_v41 = vpack.c.bf16 %v3017_v37, %v3015_v61  ;;  %v3330_v37 = vld [vmem:[#allocation17 + $0x2e0] sm:$0xff]  ;;  %v3340_v51 = vld [vmem:[#allocation17 + $0x330] sm:$0xff]  ;;  %v3343_v1 = vld [vmem:[#allocation17 + $0x348] sm:$0xff] }
 0x515   : > { %12032 = vmatpush1.bf16.msra.mxu0 %v12031_v62  ;;  %v3019_v62 = vld [vmem:[#allocation14 + $0x5e0] sm:$0xff] }
 0x516   : > { %12034 = vmatprep.subr.bf16.mxu0 %v12033_v43  ;;  %v3021_v43 = vld [vmem:[#allocation14 + $0x5f0] sm:$0xff] }
 0x517   : > { %v12071_v47 = vpack.c.bf16 %v3021_v43, %v3019_v62  ;;  %v3334_v43 = vld [vmem:[#allocation17 + $0x300] sm:$0xff] }
 0x519   : > { %12036 = vmatpush1.bf16.msra.mxu0 %v12035_v49  ;;  %v3023_v49 = vld [vmem:[#allocation14 + $0x600] sm:$0xff] }
 0x51a   : > { %12038 = vmatprep.subr.bf16.mxu0 %v12037_v50  ;;  %v3025_v50 = vld [vmem:[#allocation14 + $0x610] sm:$0xff] }
 0x51b   : > { %v12075_v52 = vpack.c.bf16 %v3025_v50, %v3023_v49  ;;  %v3338_v50 = vld [vmem:[#allocation17 + $0x320] sm:$0xff] }
 0x51d   : > { %12040 = vmatpush1.bf16.msra.mxu0 %v12039_v55  ;;  %v3027_v55 = vld [vmem:[#allocation14 + $0x620] sm:$0xff] }
 0x51e   : > { %12042 = vmatprep.subr.bf16.mxu0 %v12041_v60  ;;  %v3029_v60 = vld [vmem:[#allocation14 + $0x630] sm:$0xff] }
 0x51f   : > { %v12079_v6 = vpack.c.bf16 %v3029_v60, %v3027_v55  ;;  %v3342_v60 = vld [vmem:[#allocation17 + $0x340] sm:$0xff] }
 0x520   : > { %v12123_v5 = vpack.c.bf16 %v3344_v57, %v3342_v60  ;;  %v3372_v60 = vld [vmem:[#allocation17 + $0x430] sm:$0xff] }
 0x521   : > { %12044 = vmatpush1.bf16.msra.mxu0 %v12043_v8  ;;  %v3031_v8 = vld [vmem:[#allocation14 + $0x640] sm:$0xff] }
 0x522   : > { %12046 = vmatprep.subr.bf16.mxu0 %v12045_v0  ;;  %v3033_v0 = vld [vmem:[#allocation14 + $0x650] sm:$0xff] }
 0x523   : > { %v12083_v12 = vpack.c.bf16 %v3033_v0, %v3031_v8  ;;  %v3044_v8 = vld [vmem:[#allocation14 + $0x6a8] sm:$0xff]  ;;  %v3046_v0 = vld [vmem:[#allocation14 + $0x6b8] sm:$0xff] }
 0x525   : > { %12048 = vmatpush1.bf16.msra.mxu0 %v12047_v15  ;;  %v3035_v15 = vld [vmem:[#allocation14 + $0x660] sm:$0xff] }
 0x526   : > { %12050 = vmatprep.subr.bf16.mxu0 %v12049_v53  ;;  %v3037_v53 = vld [vmem:[#allocation14 + $0x670] sm:$0xff] }
 0x527   : > { %v12087_v16 = vpack.c.bf16 %v3037_v53, %v3035_v15  ;;  %v3043_v15 = vld [vmem:[#allocation14 + $0x6a0] sm:$0xff]  ;;  %v3045_v53 = vld [vmem:[#allocation14 + $0x6b0] sm:$0xff] }
 0x529   : > { %12052 = vmatpush1.bf16.msra.mxu0 %v12051_v21  ;;  %v3319_v21 = vld [vmem:[#allocation17 + $0x288] sm:$0xff] }
 0x52a   : > { %12054 = vmatprep.subr.bf16.mxu0 %v12053_v22  ;;  %v3321_v22 = vld [vmem:[#allocation17 + $0x298] sm:$0xff] }
 0x52b   : > { %v12097_v24 = vpack.c.bf16 %v3321_v22, %v3319_v21  ;;  %v3349_v21 = vld [vmem:[#allocation17 + $0x378] sm:$0xff] }
 0x52d   : > { %12056 = vmatpush1.bf16.msra.mxu0 %v12055_v27  ;;  %v3325_v27 = vld [vmem:[#allocation17 + $0x2b8] sm:$0xff]  ;;  %12098 = vmatprep.subr.bf16.mxu1 %v12097_v24  ;;  %v3348_v24 = vld [vmem:[#allocation17 + $0x370] sm:$0xff] }
 0x52e   : > { %12058 = vmatprep.subr.bf16.mxu0 %v12057_v28  ;;  %v12099_v28 = vpack.c.bf16 %v3320_v25, %v3318_v23  ;;  %v12101_v29 = vpack.c.bf16 %v3325_v27, %v3323_v26  ;;  %v3346_v23 = vld [vmem:[#allocation17 + $0x360] sm:$0xff]  ;;  %v3351_v26 = vld [vmem:[#allocation17 + $0x388] sm:$0xff]  ;;  %v3353_v27 = vld [vmem:[#allocation17 + $0x398] sm:$0xff] }
 0x52f   : > { %v12127_v25 = vpack.c.bf16 %v3348_v24, %v3346_v23 }
 0x530   : > { %12100 = vmatpush1.bf16.msra.mxu1 %v12099_v28  ;;  %v12129_v28 = vpack.c.bf16 %v3353_v27, %v3351_v26 }
 0x531   : > { %12060 = vmatpush1.bf16.msra.mxu0 %v12059_v46  ;;  %v3329_v46 = vld [vmem:[#allocation17 + $0x2d8] sm:$0xff]  ;;  %12102 = vmatprep.subr.bf16.mxu1 %v12101_v29  ;;  %v3350_v29 = vld [vmem:[#allocation17 + $0x380] sm:$0xff] }
 0x532   : > { %12062 = vmatprep.subr.bf16.mxu0 %v12061_v3  ;;  %v12103_v3 = vpack.c.bf16 %v3324_v31, %v3322_v30  ;;  %v12105_v56 = vpack.c.bf16 %v3329_v46, %v3327_v32  ;;  %v3352_v30 = vld [vmem:[#allocation17 + $0x390] sm:$0xff]  ;;  %v3355_v32 = vld [vmem:[#allocation17 + $0x3a8] sm:$0xff]  ;;  %v3357_v46 = vld [vmem:[#allocation17 + $0x3b8] sm:$0xff] }
 0x533   : > { %v12131_v31 = vpack.c.bf16 %v3352_v30, %v3350_v29 }
 0x534   : > { %12104 = vmatpush1.bf16.msra.mxu1 %v12103_v3  ;;  %v12133_v3 = vpack.c.bf16 %v3357_v46, %v3355_v32 }
 0x535   : > { %12064 = vmatpush1.bf16.msra.mxu0 %v12063_v54  ;;  %v3333_v54 = vld [vmem:[#allocation17 + $0x2f8] sm:$0xff]  ;;  %12106 = vmatprep.subr.bf16.mxu1 %v12105_v56  ;;  %v3354_v56 = vld [vmem:[#allocation17 + $0x3a0] sm:$0xff] }
 0x536   : > { %12066 = vmatprep.subr.bf16.mxu0 %v12065_v34  ;;  %v12107_v34 = vpack.c.bf16 %v3328_v58, %v3326_v2  ;;  %v12109_v61 = vpack.c.bf16 %v3333_v54, %v3331_v59  ;;  %v3356_v2 = vld [vmem:[#allocation17 + $0x3b0] sm:$0xff]  ;;  %v3359_v59 = vld [vmem:[#allocation17 + $0x3c8] sm:$0xff]  ;;  %v3361_v54 = vld [vmem:[#allocation17 + $0x3d8] sm:$0xff] }
 0x537   : > { %v12135_v58 = vpack.c.bf16 %v3356_v2, %v3354_v56 }
 0x538   : > { %12108 = vmatpush1.bf16.msra.mxu1 %v12107_v34  ;;  %v12137_v34 = vpack.c.bf16 %v3361_v54, %v3359_v59 }
 0x539   : > { %12068 = vmatpush1.bf16.msra.mxu0 %v12067_v41  ;;  %v3337_v41 = vld [vmem:[#allocation17 + $0x318] sm:$0xff]  ;;  %12110 = vmatprep.subr.bf16.mxu1 %v12109_v61  ;;  %v3358_v61 = vld [vmem:[#allocation17 + $0x3c0] sm:$0xff] }
 0x53a   : > { %12070 = vmatprep.subr.bf16.mxu0 %v12069_v42  ;;  %v12111_v42 = vpack.c.bf16 %v3332_v39, %v3330_v37  ;;  %v12113_v62 = vpack.c.bf16 %v3337_v41, %v3335_v40  ;;  %v3360_v37 = vld [vmem:[#allocation17 + $0x3d0] sm:$0xff]  ;;  %v3363_v40 = vld [vmem:[#allocation17 + $0x3e8] sm:$0xff]  ;;  %v3365_v41 = vld [vmem:[#allocation17 + $0x3f8] sm:$0xff] }
 0x53b   : > { %v12139_v39 = vpack.c.bf16 %v3360_v37, %v3358_v61  ;;  %v3384_v61 = vld [vmem:[#allocation17 + $0x490] sm:$0xff]  ;;  %v3387_v37 = vld [vmem:[#allocation17 + $0x4a8] sm:$0xff] }
 0x53c   : > { %12112 = vmatpush1.bf16.msra.mxu1 %v12111_v42  ;;  %v12141_v42 = vpack.c.bf16 %v3365_v41, %v3363_v40  ;;  %v3389_v41 = vld [vmem:[#allocation17 + $0x4b8] sm:$0xff] }
 0x53d   : > { %12072 = vmatpush1.bf16.msra.mxu0 %v12071_v47  ;;  %v3341_v47 = vld [vmem:[#allocation17 + $0x338] sm:$0xff]  ;;  %12114 = vmatprep.subr.bf16.mxu1 %v12113_v62  ;;  %v3362_v62 = vld [vmem:[#allocation17 + $0x3e0] sm:$0xff] }
 0x53e   : > { %12074 = vmatprep.subr.bf16.mxu0 %v12073_v48  ;;  %v12115_v48 = vpack.c.bf16 %v3336_v44, %v3334_v43  ;;  %v12117_v49 = vpack.c.bf16 %v3341_v47, %v3339_v45  ;;  %v3364_v43 = vld [vmem:[#allocation17 + $0x3f0] sm:$0xff]  ;;  %v3367_v45 = vld [vmem:[#allocation17 + $0x408] sm:$0xff]  ;;  %v3369_v47 = vld [vmem:[#allocation17 + $0x418] sm:$0xff] }
 0x53f   : > { %v12143_v44 = vpack.c.bf16 %v3364_v43, %v3362_v62 }
 0x540   : > { %12116 = vmatpush1.bf16.msra.mxu1 %v12115_v48  ;;  %v12145_v48 = vpack.c.bf16 %v3369_v47, %v3367_v45 }
 0x541   : > { %12076 = vmatpush1.bf16.msra.mxu0 %v12075_v52  ;;  %v3345_v52 = vld [vmem:[#allocation17 + $0x358] sm:$0xff]  ;;  %12118 = vmatprep.subr.bf16.mxu1 %v12117_v49  ;;  %v3366_v49 = vld [vmem:[#allocation17 + $0x400] sm:$0xff] }
 0x542   : > { %12078 = vmatprep.subr.bf16.mxu0 %v12077_v11  ;;  %v12119_v11 = vpack.c.bf16 %v3340_v51, %v3338_v50  ;;  %v12121_v55 = vpack.c.bf16 %v3345_v52, %v3343_v1  ;;  %v3368_v50 = vld [vmem:[#allocation17 + $0x410] sm:$0xff]  ;;  %v3371_v1 = vld [vmem:[#allocation17 + $0x428] sm:$0xff]  ;;  %v3373_v52 = vld [vmem:[#allocation17 + $0x438] sm:$0xff] }
 0x543   : > { %v12147_v51 = vpack.c.bf16 %v3368_v50, %v3366_v49  ;;  %v12165_v50 = vpack.c.bf16 %v3389_v41, %v3387_v37  ;;  %v3245_v37 = vld [vmem:[#allocation17 + $0x70] sm:$0xff] }
 0x544   : > { %12120 = vmatpush1.bf16.msra.mxu1 %v12119_v11  ;;  %v12149_v11 = vpack.c.bf16 %v3373_v52, %v3371_v1  ;;  %v3388_v1 = vld [vmem:[#allocation17 + $0x4b0] sm:$0xff] }
 0x545   : > { %12080 = vmatpush1.bf16.msra.mxu0 %v12079_v6  ;;  %12122 = vmatprep.subr.bf16.mxu1 %v12121_v55  ;;  %v3039_v6 = vld [vmem:[#allocation14 + $0x680] sm:$0xff] }
 0x546   : > { %12082 = vmatprep.subr.bf16.mxu0 %v12081_v7  ;;  %v3041_v7 = vld [vmem:[#allocation14 + $0x690] sm:$0xff]  ;;  %v3370_v55 = vld [vmem:[#allocation17 + $0x420] sm:$0xff] }
 0x547   : > { %v12091_v10 = vpack.c.bf16 %v3041_v7, %v3039_v6  ;;  %v12151_v57 = vpack.c.bf16 %v3372_v60, %v3370_v55  ;;  %v3377_v6 = vld [vmem:[#allocation17 + $0x458] sm:$0xff]  ;;  %v3374_v7 = vld [vmem:[#allocation17 + $0x440] sm:$0xff] }
 0x548   : > { %12124 = vmatpush1.bf16.msra.mxu1 %v12123_v5  ;;  %v3375_v5 = vld [vmem:[#allocation17 + $0x448] sm:$0xff]  ;;  %v3393_v55 = vld [vmem:[#allocation17 + $0x4d8] sm:$0xff] }
 0x549   : > { %12084 = vmatpush1.bf16.msra.mxu0 %v12083_v12 }
 0x54a   : > { %12086 = vmatprep.subr.bf16.mxu0 %v12085_v13  ;;  %v12093_v13 = vpack.c.bf16 %v3046_v0, %v3044_v8  ;;  %v12153_v8 = vpack.c.bf16 %v3377_v6, %v3375_v5  ;;  %v3376_v0 = vld [vmem:[#allocation17 + $0x450] sm:$0xff]  ;;  %v3390_v5 = vld [vmem:[#allocation17 + $0x4c0] sm:$0xff] }
 0x54b   : > { %v3392_v6 = vld [vmem:[#allocation17 + $0x4d0] sm:$0xff] }
 0x54d   : > { %12088 = vmatpush1.bf16.msra.mxu0 %v12087_v16  ;;  %v12095_v16 = vpack.c.bf16 %v3045_v53, %v3043_v15  ;;  %v3378_v15 = vld [vmem:[#allocation17 + $0x460] sm:$0xff]  ;;  %v3380_v53 = vld [vmem:[#allocation17 + $0x470] sm:$0xff] }
 0x54e   : > { %12090 = vmatprep.subr.bf16.mxu0 %v12089_v20  ;;  %v3347_v20 = vld [vmem:[#allocation17 + $0x368] sm:$0xff] }
 0x54f   : > { %v12125_v22 = vpack.c.bf16 %v3349_v21, %v3347_v20  ;;  %v3194_v21 = vld [vmem:[#allocation16] sm:$0x3] }
 0x550   : > { %v3203_v23 = vrot.slane %v3194_v21, %v15767_v38 }
 0x551   : > { %12126 = vmatprep.subr.bf16.mxu1 %v12125_v22  ;;  %v3199_v22 = vrot.slane %v3194_v21, %v15764_v36  ;;  %v3231_v21 = vld [vmem:[#allocation17] sm:$0xff] }
 0x552   : > { %12128 = vmatpush1.bf16.msra.mxu1 %v12127_v25 }
 0x553   : > { %12130 = vmatprep.subr.bf16.mxu1 %v12129_v28 }
 0x556   : > { %12132 = vmatpush1.bf16.msra.mxu1 %v12131_v31 }
 0x557   : > { %12134 = vmatprep.subr.bf16.mxu1 %v12133_v3 }
 0x55a   : > { %12136 = vmatpush1.bf16.msra.mxu1 %v12135_v58 }
 0x55b   : > { %12138 = vmatprep.subr.bf16.mxu1 %v12137_v34  ;;  %v3382_v34 = vld [vmem:[#allocation17 + $0x480] sm:$0xff] }
 0x55e   : > { %12140 = vmatpush1.bf16.msra.mxu1 %v12139_v39 }
 0x55f   : > { %12142 = vmatprep.subr.bf16.mxu1 %v12141_v42 }
 0x562   : > { %12144 = vmatpush1.bf16.msra.mxu1 %v12143_v44 }
 0x563   : > { %12146 = vmatprep.subr.bf16.mxu1 %v12145_v48  ;;  %v12163_v48 = vpack.c.bf16 %v3384_v61, %v3382_v34  ;;  %v3243_v61 = vld [vmem:[#allocation17 + $0x60] sm:$0xff] }
 0x564   : > { %v12191_v41 = vpack.c.bf16 %v3245_v37, %v3243_v61  ;;  %v3286_v61 = vld [vmem:[#allocation17 + $0x1b8] sm:$0xff] }
 0x566   : > { %12148 = vmatpush1.bf16.msra.mxu1 %v12147_v51  ;;  %v3386_v51 = vld [vmem:[#allocation17 + $0x4a0] sm:$0xff] }
 0x567   : > { %12150 = vmatprep.subr.bf16.mxu1 %v12149_v11  ;;  %v3391_v11 = vld [vmem:[#allocation17 + $0x4c8] sm:$0xff]  ;;  %v12167_v60 = vpack.c.bf16 %v3388_v1, %v3386_v51  ;;  %v3258_v1 = vld [vmem:[#allocation17 + $0xd8] sm:$0xff] }
 0x568   : > { %v3256_v51 = vld [vmem:[#allocation17 + $0xc8] sm:$0xff] }
 0x56a   : > { %12152 = vmatpush1.bf16.msra.mxu1 %v12151_v57  ;;  %v12169_v57 = vpack.c.bf16 %v3393_v55, %v3391_v11  ;;  %v12201_v11 = vpack.c.bf16 %v3258_v1, %v3256_v51  ;;  %v3255_v55 = vld [vmem:[#allocation17 + $0xc0] sm:$0xff] }
 0x56b   : > { %12154 = vmatprep.subr.bf16.mxu1 %v12153_v8  ;;  %v3397_v8 = vld [vmem:[#allocation17 + $0x4f8] sm:$0xff]  ;;  %v3291_v1 = vld [vmem:[#allocation17 + $0x1e0] sm:$0xff] }
 0x5dd   : > { %v2899_v9 = vpop.f32.mrb[16].mxu0 }
 0x5de   : > { %v2901_v12 = vpop.f32.mrb[17].mxu0 }
 0x5df   : > { %3114 = vmatprep.mubr.f32.mxu0 %v2901_v12  ;;  %v12155_v12 = vpack.c.bf16 %v3376_v0, %v3374_v7  ;;  %v3395_v7 = vld [vmem:[#allocation17 + $0x4e8] sm:$0xff]  ;;  %v12171_v0 = vpack.c.bf16 %v3392_v6, %v3390_v5  ;;  %v3262_v5 = vld [vmem:[#allocation17 + $0xf8] sm:$0xff] }
 0x5e0   : > { %3115 = vmatmul.mubr.f32.vlgmr.msra.gmra.mrb[14].mxu0 %v2899_v9  ;;  %v3379_v9 = vld [vmem:[#allocation17 + $0x468] sm:$0xff] }
 0x5e1   : > { %12092 = vmatpush1.bf16.msra.mxu0 %v12091_v10  ;;  %3185 = vmatprep.mubr.f32.mxu0 %v15883_v33  ;;  %v3381_v10 = vld [vmem:[#allocation17 + $0x478] sm:$0xff] }
 0x5e2   : > { %12094 = vmatprep.subr.bf16.mxu0 %v12093_v13  ;;  %v12157_v13 = vpack.c.bf16 %v3381_v10, %v3379_v9  ;;  %12156 = vmatpush1.bf16.msra.mxu1 %v12155_v12  ;;  %v3394_v9 = vld [vmem:[#allocation17 + $0x4e0] sm:$0xff]  ;;  %v12173_v10 = vpack.c.bf16 %v3397_v8, %v3395_v7  ;;  %v3396_v12 = vld [vmem:[#allocation17 + $0x4f0] sm:$0xff] }
 0x5e3   : > { %v2970_v17 = vpop.f32.mrb[18].mxu0  ;;  %v3259_v8 = vld [vmem:[#allocation17 + $0xe0] sm:$0xff] }
 0x5e4   : > { %v11457_v19 = vpop.f32.mrb[19].mxu0  ;;  %12158 = vmatprep.subr.bf16.mxu1 %v12157_v13  ;;  %v3313_v13 = vld [vmem:[#allocation4 + $0x10] sm:$0xfe] }
 0x5e5   : > { %12096 = vmatpush1.bf16.msra.mxu0 %v12095_v16  ;;  %v12159_v16 = vpack.c.bf16 %v3380_v53, %v3378_v15  ;;  %v3385_v19 = vld [vmem:[#allocation17 + $0x498] sm:$0xff]  ;;  %v3316_v15 = vld [vmem:[#allocation4 + $0x28] sm:$0x1]  ;;  %v3232_v53 = vld [vmem:[#allocation17 + $0x8] sm:$0xff] }
 0x5e7   : > { %12160 = vmatpush1.bf16.msra.mxu1 %v12159_v16  ;;  %v3234_v16 = vld [vmem:[#allocation17 + $0x18] sm:$0xff] }
 0x5e8   : > { %10968 = vmatmul.mubr.msk.f32.vlgmr.msra.gmra.mrb[14].mxu0 %vm822_vm0, %v2970_v17  ;;  %v3383_v17 = vld [vmem:[#allocation17 + $0x488] sm:$0xff]  ;;  %vm3994_vm0 = vcmask 80896  }
 0x5e9   : > { %4070 = vmatprep.mubr.f32.mxu0 %v15883_v33  ;;  %v12161_v20 = vpack.c.bf16 %v3385_v19, %v3383_v17  ;;  %v12175_v17 = vpack.c.bf16 %v3396_v12, %v3394_v9  ;;  %v3410_v19 = vrot.slane %v3313_v13, 1  ;;  %v3264_v9 = vld [vmem:[#allocation17 + $0x108] sm:$0xff] }
 0x5eb   : > { %12162 = vmatprep.subr.bf16.mxu1 %v12161_v20  ;;  %v12177_v20 = vpack.c.bf16 %v3234_v16, %v3232_v53  ;;  %v3265_v53 = vld [vmem:[#allocation17 + $0x110] sm:$0xff]  ;;  %v3268_v16 = vld [vmem:[#allocation17 + $0x128] sm:$0xff] }
 0x6bb   : > { %v3187_v24 = vpop.f32.mrb[14].mxu0 }
 0x6bc   : > { %v3206_v25 = vadd.f32 %v3199_v22, %v3187_v24  ;;  %v3189_v26 = vpop.f32.mrb[15].mxu0  ;;  %v3233_v22 = vld [vmem:[#allocation17 + $0x10] sm:$0xff]  ;;  %v3238_v24 = vld [vmem:[#allocation17 + $0x38] sm:$0xff] }
 0x6bd   : > { %v3207_v27 = vadd.f32 %v3203_v23, %v3189_v26  ;;  %v3236_v23 = vld [vmem:[#allocation17 + $0x28] sm:$0xff]  ;;  %v12179_v26 = vpack.c.bf16 %v3233_v22, %v3231_v21  ;;  %v3269_v21 = vld [vmem:[#allocation17 + $0x130] sm:$0xff] }
 0x6be   : > { %v3208_v28 = vmul.f32 0.5, %v3206_v25  ;;  %v3272_v22 = vld [vmem:[#allocation17 + $0x148] sm:$0xff] }
 0x6bf   : > { %v3209_v29 = vmul.f32 0.5, %v3207_v27 }
 0x6c0   : > { %14583 = vtanh.f32 %v3208_v28  ;;  %v3235_v28 = vld [vmem:[#allocation17 + $0x20] sm:$0xff] }
 0x6c1   : > { %14585 = vtanh.f32 %v3209_v29  ;;  %v3237_v29 = vld [vmem:[#allocation17 + $0x30] sm:$0xff] }
 0x6ca   : > { %v14584_v30 = vpop.eup %14583 }
 0x6cb   : > { %v14586_v31 = vpop.eup %14585  ;;  %v3212_v32 = vadd.f32 1.0, %v14584_v30  ;;  %v3240_v30 = vld [vmem:[#allocation17 + $0x48] sm:$0xff] }
 0x6cc   : > { %v3213_v46 = vadd.f32 1.0, %v14586_v31  ;;  %v3242_v31 = vld [vmem:[#allocation17 + $0x58] sm:$0xff] }
 0x6cd   : > { %v3214_v3 = vmul.f32 0.5, %v3212_v32 }
 0x6ce   : > { %v3215_v56 = vmul.f32 0.5, %v3213_v46  ;;  %v12183_v46 = vpack.c.bf16 %v3237_v29, %v3235_v28  ;;  %v3276_v28 = vld [vmem:[#allocation17 + $0x168] sm:$0xff]  ;;  %v3278_v29 = vld [vmem:[#allocation17 + $0x178] sm:$0xff] }
 0x6cf   : > { %v3216_v2 = vmul.f32 %v3214_v3, %v3206_v25  ;;  %v12185_v3 = vpack.c.bf16 %v3242_v31, %v3240_v30  ;;  %v12221_v31 = vpack.c.bf16 %v3278_v29, %v3276_v28  ;;  %v3714_v28 = vld [vmem:[#allocation17 + $0x518] sm:$0xff] }
 0x6d0   : > { %v3217_v58 = vmul.f32 %v3215_v56, %v3207_v27  ;;  %v12181_v27 = vpack.c.bf16 %v3238_v24, %v3236_v23  ;;  %v3239_v56 = vld [vmem:[#allocation17 + $0x40] sm:$0xff]  ;;  %v3274_v23 = vld [vmem:[#allocation17 + $0x158] sm:$0xff] }
 0x6d1   : > { %v3220_v59 = vrot.slane %v3216_v2, 7  ;;  %v3241_v2 = vld [vmem:[#allocation17 + $0x50] sm:$0xff] }
 0x6d2   : > { %v3221_v54 = vrot.slane %v3217_v58, 7  ;;  %v3244_v58 = vld [vmem:[#allocation17 + $0x68] sm:$0xff] }
 0x6d3   : > { %3224 = vst [vmem:[#allocation4] sm:$0xfe] %v3220_v59  ;;  %3226 = vst [vmem:[#allocation4 + $0x18] sm:$0x1] %v3220_v59  ;;  %v3246_v59 = vld [vmem:[#allocation17 + $0x78] sm:$0xff] }
 0x6d4   : > { %3225 = vst [vmem:[#allocation4 + $0x8] sm:$0xfe] %v3221_v54  ;;  %3227 = vst [vmem:[#allocation4 + $0x20] sm:$0x1] %v3221_v54  ;;  %v12187_v54 = vpack.c.bf16 %v3241_v2, %v3239_v56  ;;  %v12189_v34 = vpack.c.bf16 %v3246_v59, %v3244_v58  ;;  %v3282_v56 = vld [vmem:[#allocation17 + $0x198] sm:$0xff]  ;;  %v3279_v59 = vld [vmem:[#allocation17 + $0x180] sm:$0xff] }
 0x6da   : > { %v3311_v39 = vld [vmem:[#allocation4] sm:$0xfe]  ;;  %v3314_v40 = vld [vmem:[#allocation4 + $0x18] sm:$0x1] }
 0x6db   : > { %v3312_v42 = vld [vmem:[#allocation4 + $0x8] sm:$0xfe]  ;;  %v3315_v62 = vld [vmem:[#allocation4 + $0x20] sm:$0x1]  ;;  %v3404_v43 = vrot.slane %v3311_v39, 1  ;;  %v3405_v44 = vrot.slane %v3314_v40, 1 }
 0x6dc   : > { %v3407_v45 = vrot.slane %v3312_v42, 1  ;;  %v3408_v47 = vrot.slane %v3315_v62, 1  ;;  %v3229_v32 = vld [vmem:[#allocation4 + $0x8] sm:$0xff]  ;;  %v3248_v39 = vld [vmem:[#allocation17 + $0x88] sm:$0xff]  ;;  %v3247_v62 = vld [vmem:[#allocation17 + $0x80] sm:$0xff] }
 0x6dd   : > { %v3406_v52 = vsel %vm1413_vm3, %v3404_v43, %v3405_v44  ;;  %v3250_v40 = vld [vmem:[#allocation17 + $0x98] sm:$0xff]  ;;  %v3249_v43 = vld [vmem:[#allocation17 + $0x90] sm:$0xff]  ;;  %v3252_v44 = vld [vmem:[#allocation17 + $0xa8] sm:$0xff] }
 0x6de   : > { %v3409_v49 = vsel %vm1413_vm3, %v3407_v45, %v3408_v47  ;;  %v12193_v42 = vpack.c.bf16 %v3250_v40, %v3248_v39  ;;  %v3254_v45 = vld [vmem:[#allocation17 + $0xb8] sm:$0xff]  ;;  %v12195_v47 = vpack.c.bf16 %v3249_v43, %v3247_v62  ;;  %v3283_v40 = vld [vmem:[#allocation17 + $0x1a0] sm:$0xff] }
 0x6df   : > { %3481 = vmatprep.mubr.f32.mxu1 %v3409_v49  ;;  %v3251_v49 = vld [vmem:[#allocation17 + $0xa0] sm:$0xff]  ;;  %v3290_v62 = vld [vmem:[#allocation17 + $0x1d8] sm:$0xff] }
 0x6e0   : > { %3482 = vmatmul.mubr.f32.vlgmr.msra.gmra.mrb[6].mxu1 %v3406_v52 }
 0x6e1   : > { %12164 = vmatpush1.bf16.msra.mxu1 %v12163_v48  ;;  %3552 = vmatprep.mubr.f32.mxu1 %v15883_v33  ;;  %v3411_v33 = vrot.slane %v3316_v15, 1  ;;  %v12197_v48 = vpack.c.bf16 %v3254_v45, %v3252_v44  ;;  %v3263_v15 = vld [vmem:[#allocation17 + $0x100] sm:$0xff] }
 0x6e2   : > { %12166 = vmatprep.subr.bf16.mxu1 %v12165_v50  ;;  %v3253_v50 = vld [vmem:[#allocation17 + $0xb0] sm:$0xff]  ;;  %v3287_v45 = vld [vmem:[#allocation17 + $0x1c0] sm:$0xff] }
 0x6e3   : > { %v3412_v25 = vsel %vm1413_vm3, %v3410_v19, %v3411_v33  ;;  %v12199_v52 = vpack.c.bf16 %v3253_v50, %v3251_v49  ;;  %v12211_v19 = vpack.c.bf16 %v3265_v53, %v3263_v15  ;;  %v3294_v49 = vld [vmem:[#allocation17 + $0x1f8] sm:$0xff]  ;;  %v3304_v15 = vld [vmem:[#allocation17 + $0x248] sm:$0xff]  ;;  %vm7724_vm3 = vcmask 48128  }
 0x6e4   : > { %v3306_v53 = vld [vmem:[#allocation17 + $0x258] sm:$0xff] }
 0x6e5   : > { %12168 = vmatpush1.bf16.msra.mxu1 %v12167_v60  ;;  %v3257_v60 = vld [vmem:[#allocation17 + $0xd0] sm:$0xff] }
 0x6e6   : > { %12170 = vmatprep.subr.bf16.mxu1 %v12169_v57  ;;  %v3260_v57 = vld [vmem:[#allocation17 + $0xe8] sm:$0xff]  ;;  %v12203_v6 = vpack.c.bf16 %v3257_v60, %v3255_v55  ;;  %v3298_v55 = vld [vmem:[#allocation17 + $0x218] sm:$0xff] }
 0x6e7   : > { %v12205_v7 = vpack.c.bf16 %v3262_v5, %v3260_v57  ;;  %v3295_v5 = vld [vmem:[#allocation17 + $0x200] sm:$0xff] }
 0x6e9   : > { %12172 = vmatpush1.bf16.msra.mxu1 %v12171_v0  ;;  %v3261_v0 = vld [vmem:[#allocation17 + $0xf0] sm:$0xff] }
 0x6ea   : > { %12174 = vmatprep.subr.bf16.mxu1 %v12173_v10  ;;  %v3266_v10 = vld [vmem:[#allocation17 + $0x118] sm:$0xff]  ;;  %v12207_v12 = vpack.c.bf16 %v3261_v0, %v3259_v8 }
 0x6eb   : > { %v12209_v13 = vpack.c.bf16 %v3266_v10, %v3264_v9  ;;  %v3302_v8 = vld [vmem:[#allocation17 + $0x238] sm:$0xff]  ;;  %v3299_v10 = vld [vmem:[#allocation17 + $0x220] sm:$0xff] }
 0x6ed   : > { %12176 = vmatpush1.bf16.msra.mxu1 %v12175_v17  ;;  %v3270_v17 = vld [vmem:[#allocation17 + $0x138] sm:$0xff] }
 0x6ee   : > { %12178 = vmatprep.subr.bf16.mxu1 %v12177_v20  ;;  %v12213_v33 = vpack.c.bf16 %v3270_v17, %v3268_v16  ;;  %v3267_v20 = vld [vmem:[#allocation17 + $0x120] sm:$0xff] }
 0x6ef   : > { %v12215_v24 = vpack.c.bf16 %v3269_v21, %v3267_v20  ;;  %v15927_v17 = vld [vmem:[#allocation5] sm:$0xff]  ;;  %v3305_v20 = vld [vmem:[#allocation17 + $0x250] sm:$0xff]  ;;  %v3308_v21 = vld [vmem:[#allocation17 + $0x268] sm:$0xff] }
 0x6f0   : > { %10969 = vmatmul.mubr.msk.f32.vlgmr.msra.gmra.mrb[6].mxu1 %vm842_vm12, %v3412_v25  ;;  %v12217_v25 = vpack.c.bf16 %v3274_v23, %v3272_v22  ;;  %v3310_v22 = vld [vmem:[#allocation17 + $0x278] sm:$0xff]  ;;  %859 = vst.msk [vmem:[#allocation6 + $0x20] sm:$0x3f] %vm858_vm2, %v15927_v17  ;;  %864 = vst.msk [vmem:[#allocation7 + $0x20] sm:$0x3f] %vm858_vm2, %v15927_v17 }
 0x6f1   : > { %12180 = vmatpush1.bf16.msra.mxu1 %v12179_v26  ;;  %3626 = vmatprep.mubr.f32.mxu1 %v3229_v32  ;;  %v3271_v26 = vld [vmem:[#allocation17 + $0x140] sm:$0xff] }
 0x6f2   : > { %12182 = vmatprep.subr.bf16.mxu1 %v12181_v27  ;;  %v3273_v27 = vld [vmem:[#allocation17 + $0x150] sm:$0xff]  ;;  %v3275_v32 = vld [vmem:[#allocation17 + $0x160] sm:$0xff] }
 0x6f3   : > { %v12219_v30 = vpack.c.bf16 %v3273_v27, %v3271_v26  ;;  %v3309_v26 = vld [vmem:[#allocation17 + $0x270] sm:$0xff]  ;;  %v3712_v27 = vld [vmem:[#allocation17 + $0x508] sm:$0xff] }
 0x6f5   : > { %12184 = vmatpush1.bf16.msra.mxu1 %v12183_v46  ;;  %v3277_v46 = vld [vmem:[#allocation17 + $0x170] sm:$0xff] }
 0x6f6   : > { %12186 = vmatprep.subr.bf16.mxu1 %v12185_v3  ;;  %v3280_v3 = vld [vmem:[#allocation17 + $0x188] sm:$0xff]  ;;  %v12223_v2 = vpack.c.bf16 %v3277_v46, %v3275_v32  ;;  %v12257_v32 = vpack.c.bf16 %v3714_v28, %v3712_v27  ;;  %v3711_v46 = vld [vmem:[#allocation17 + $0x500] sm:$0xff] }
 0x6f7   : > { %v12225_v58 = vpack.c.bf16 %v3282_v56, %v3280_v3  ;;  %v3713_v3 = vld [vmem:[#allocation17 + $0x510] sm:$0xff]  ;;  %v3716_v56 = vld [vmem:[#allocation17 + $0x528] sm:$0xff] }
 0x6f9   : > { %12188 = vmatpush1.bf16.msra.mxu1 %v12187_v54  ;;  %v3281_v54 = vld [vmem:[#allocation17 + $0x190] sm:$0xff] }
 0x6fa   : > { %12190 = vmatprep.subr.bf16.mxu1 %v12189_v34  ;;  %v3284_v34 = vld [vmem:[#allocation17 + $0x1a8] sm:$0xff]  ;;  %v12227_v37 = vpack.c.bf16 %v3281_v54, %v3279_v59  ;;  %v3230_v54 = vld [vmem:[#allocation4 + $0x10] sm:$0xff] }
 0x6fb   : > { %v12229_v39 = vpack.c.bf16 %v3286_v61, %v3284_v34  ;;  %v12259_v34 = vpack.c.bf16 %v3713_v3, %v3711_v46 }
 0x6fd   : > { %12192 = vmatpush1.bf16.msra.mxu1 %v12191_v41  ;;  %v3285_v41 = vld [vmem:[#allocation17 + $0x1b0] sm:$0xff] }
 0x6fe   : > { %12194 = vmatprep.subr.bf16.mxu1 %v12193_v42  ;;  %v3288_v42 = vld [vmem:[#allocation17 + $0x1c8] sm:$0xff]  ;;  %v12231_v43 = vpack.c.bf16 %v3285_v41, %v3283_v40  ;;  %v3722_v41 = vld [vmem:[#allocation17 + $0x558] sm:$0xff] }
 0x6ff   : > { %v12233_v44 = vpack.c.bf16 %v3290_v62, %v3288_v42  ;;  %v3720_v40 = vld [vmem:[#allocation17 + $0x548] sm:$0xff] }
 0x701   : > { %12196 = vmatpush1.bf16.msra.mxu1 %v12195_v47  ;;  %v3289_v47 = vld [vmem:[#allocation17 + $0x1d0] sm:$0xff] }
 0x702   : > { %12198 = vmatprep.subr.bf16.mxu1 %v12197_v48  ;;  %v3292_v48 = vld [vmem:[#allocation17 + $0x1e8] sm:$0xff]  ;;  %v12235_v50 = vpack.c.bf16 %v3289_v47, %v3287_v45  ;;  %v3721_v45 = vld [vmem:[#allocation17 + $0x550] sm:$0xff] }
 0x703   : > { %v12237_v51 = vpack.c.bf16 %v3294_v49, %v3292_v48  ;;  %v3724_v47 = vld [vmem:[#allocation17 + $0x568] sm:$0xff]  ;;  %v3726_v48 = vld [vmem:[#allocation17 + $0x578] sm:$0xff] }
 0x705   : > { %12200 = vmatpush1.bf16.msra.mxu1 %v12199_v52  ;;  %v3293_v52 = vld [vmem:[#allocation17 + $0x1f0] sm:$0xff] }
 0x706   : > { %12202 = vmatprep.subr.bf16.mxu1 %v12201_v11  ;;  %v3296_v11 = vld [vmem:[#allocation17 + $0x208] sm:$0xff]  ;;  %v12239_v60 = vpack.c.bf16 %v3293_v52, %v3291_v1  ;;  %v3725_v1 = vld [vmem:[#allocation17 + $0x570] sm:$0xff] }
 0x707   : > { %v12241_v57 = vpack.c.bf16 %v3298_v55, %v3296_v11  ;;  %v3728_v52 = vld [vmem:[#allocation17 + $0x588] sm:$0xff]  ;;  %v3730_v11 = vld [vmem:[#allocation17 + $0x598] sm:$0xff] }
 0x709   : > { %12204 = vmatpush1.bf16.msra.mxu1 %v12203_v6  ;;  %v3297_v6 = vld [vmem:[#allocation17 + $0x210] sm:$0xff] }
 0x70a   : > { %12206 = vmatprep.subr.bf16.mxu1 %v12205_v7  ;;  %v3300_v7 = vld [vmem:[#allocation17 + $0x228] sm:$0xff]  ;;  %v12243_v0 = vpack.c.bf16 %v3297_v6, %v3295_v5  ;;  %v3729_v5 = vld [vmem:[#allocation17 + $0x590] sm:$0xff] }
 0x70b   : > { %v12245_v9 = vpack.c.bf16 %v3302_v8, %v3300_v7  ;;  %v3732_v6 = vld [vmem:[#allocation17 + $0x5a8] sm:$0xff]  ;;  %v3734_v7 = vld [vmem:[#allocation17 + $0x5b8] sm:$0xff] }
 0x70d   : > { %12208 = vmatpush1.bf16.msra.mxu1 %v12207_v12  ;;  %v3301_v12 = vld [vmem:[#allocation17 + $0x230] sm:$0xff] }
 0x70e   : > { %12210 = vmatprep.subr.bf16.mxu1 %v12209_v13  ;;  %v3228_v13 = vld [vmem:[#allocation4] sm:$0xff]  ;;  %v12247_v16 = vpack.c.bf16 %v3301_v12, %v3299_v10 }
 0x70f   : > { %v3733_v10 = vld [vmem:[#allocation17 + $0x5b0] sm:$0xff]  ;;  %v3736_v12 = vld [vmem:[#allocation17 + $0x5c8] sm:$0xff] }
 0x711   : > { %12212 = vmatpush1.bf16.msra.mxu1 %v12211_v19  ;;  %v12249_v19 = vpack.c.bf16 %v3306_v53, %v3304_v15 }
 0x712   : > { %12214 = vmatprep.subr.bf16.mxu1 %v12213_v33  ;;  %v3303_v33 = vld [vmem:[#allocation17 + $0x240] sm:$0xff] }
 0x713   : > { %v12251_v23 = vpack.c.bf16 %v3305_v20, %v3303_v33  ;;  %v3740_v33 = vld [vmem:[#allocation17 + $0x5e8] sm:$0xff]  ;;  %v3742_v20 = vld [vmem:[#allocation17 + $0x5f8] sm:$0xff] }
 0x715   : > { %12216 = vmatpush1.bf16.msra.mxu1 %v12215_v24  ;;  %v12253_v24 = vpack.c.bf16 %v3310_v22, %v3308_v21  ;;  %v12285_v22 = vpack.c.bf16 %v3742_v20, %v3740_v33  ;;  %v3704_v33 = vld [vmem:[#allocation4] sm:$0xfc]  ;;  %v3707_v20 = vld [vmem:[#allocation4 + $0x18] sm:$0x3] }
 0x716   : > { %12218 = vmatprep.subr.bf16.mxu1 %v12217_v25  ;;  %v3307_v25 = vld [vmem:[#allocation17 + $0x260] sm:$0xff] }
 0x717   : > { %v12255_v29 = vpack.c.bf16 %v3309_v26, %v3307_v25  ;;  %v3744_v25 = vld [vmem:[#allocation17 + $0x608] sm:$0xff]  ;;  %v3746_v26 = vld [vmem:[#allocation17 + $0x618] sm:$0xff] }
 0x718   : > { %v12289_v28 = vpack.c.bf16 %v3746_v26, %v3744_v25  ;;  %v3797_v25 = vrot.slane %v3704_v33, 2  ;;  %v3798_v26 = vrot.slane %v3707_v20, 2  ;;  %v4221_v20 = vld [vmem:[#allocation20 + $0x250] sm:$0xff] }
 0x719   : > { %12220 = vmatpush1.bf16.msra.mxu1 %v12219_v30  ;;  %v3705_v30 = vld [vmem:[#allocation4 + $0x8] sm:$0xfc] }
 0x71a   : > { %12222 = vmatprep.subr.bf16.mxu1 %v12221_v31  ;;  %v3708_v31 = vld [vmem:[#allocation4 + $0x20] sm:$0x3] }
 0x71b   : > { %v3801_v59 = vrot.slane %v3708_v31, 2  ;;  %v3748_v31 = vld [vmem:[#allocation17 + $0x628] sm:$0xff] }
 0x71d   : > { %12224 = vmatpush1.bf16.msra.mxu1 %v12223_v2  ;;  %v3718_v2 = vld [vmem:[#allocation17 + $0x538] sm:$0xff] }
 0x71e   : > { %12226 = vmatprep.subr.bf16.mxu1 %v12225_v58  ;;  %v3800_v58 = vrot.slane %v3705_v30, 2  ;;  %v12261_v61 = vpack.c.bf16 %v3718_v2, %v3716_v56  ;;  %v3745_v30 = vld [vmem:[#allocation17 + $0x610] sm:$0xff]  ;;  %v3747_v56 = vld [vmem:[#allocation17 + $0x620] sm:$0xff] }
 0x71f   : > { %v3749_v2 = vld [vmem:[#allocation17 + $0x630] sm:$0xff] }
 0x720   : > { %v3802_v42 = vsel %vm905_vm1, %v3800_v58, %v3801_v59  ;;  %v3752_v58 = vld [vmem:[#allocation17 + $0x648] sm:$0xff]  ;;  %v3754_v59 = vld [vmem:[#allocation17 + $0x658] sm:$0xff] }
 0x721   : > { %12228 = vmatpush1.bf16.msra.mxu1 %v12227_v37  ;;  %v3715_v37 = vld [vmem:[#allocation17 + $0x520] sm:$0xff] }
 0x722   : > { %12230 = vmatprep.subr.bf16.mxu1 %v12229_v39  ;;  %v3717_v39 = vld [vmem:[#allocation17 + $0x530] sm:$0xff] }
 0x723   : > { %v12263_v62 = vpack.c.bf16 %v3717_v39, %v3715_v37  ;;  %v3753_v37 = vld [vmem:[#allocation17 + $0x650] sm:$0xff]  ;;  %v3756_v39 = vld [vmem:[#allocation17 + $0x668] sm:$0xff] }
 0x725   : > { %12232 = vmatpush1.bf16.msra.mxu1 %v12231_v43  ;;  %v12265_v43 = vpack.c.bf16 %v3722_v41, %v3720_v40  ;;  %v3758_v40 = vld [vmem:[#allocation17 + $0x678] sm:$0xff] }
 0x726   : > { %12234 = vmatprep.subr.bf16.mxu1 %v12233_v44  ;;  %v3719_v44 = vld [vmem:[#allocation17 + $0x540] sm:$0xff] }
 0x727   : > { %v12267_v49 = vpack.c.bf16 %v3721_v45, %v3719_v44  ;;  %v3760_v44 = vld [vmem:[#allocation17 + $0x688] sm:$0xff]  ;;  %v3762_v45 = vld [vmem:[#allocation17 + $0x698] sm:$0xff] }
 0x729   : > { %12236 = vmatpush1.bf16.msra.mxu1 %v12235_v50  ;;  %v12269_v50 = vpack.c.bf16 %v3726_v48, %v3724_v47  ;;  %v12305_v48 = vpack.c.bf16 %v3762_v45, %v3760_v44 }
 0x72a   : > { %12238 = vmatprep.subr.bf16.mxu1 %v12237_v51  ;;  %v3723_v51 = vld [vmem:[#allocation17 + $0x560] sm:$0xff] }
 0x72b   : > { %v12271_v55 = vpack.c.bf16 %v3725_v1, %v3723_v51  ;;  %v3764_v51 = vld [vmem:[#allocation17 + $0x6a8] sm:$0xff]  ;;  %v3766_v1 = vld [vmem:[#allocation17 + $0x6b8] sm:$0xff] }
 0x72d   : > { %12240 = vmatpush1.bf16.msra.mxu1 %v12239_v60  ;;  %v12273_v60 = vpack.c.bf16 %v3730_v11, %v3728_v52  ;;  %v12309_v11 = vpack.c.bf16 %v3766_v1, %v3764_v51  ;;  %v4149_v51 = vld [vmem:[#allocation20 + $0x10] sm:$0xff]  ;;  %v4152_v1 = vld [vmem:[#allocation20 + $0x28] sm:$0xff] }
 0x72e   : > { %12242 = vmatprep.subr.bf16.mxu1 %v12241_v57  ;;  %v3727_v57 = vld [vmem:[#allocation17 + $0x580] sm:$0xff] }
 0x72f   : > { %v12275_v8 = vpack.c.bf16 %v3729_v5, %v3727_v57  ;;  %v3768_v57 = vld [vmem:[#allocation17 + $0x6c8] sm:$0xff]  ;;  %v3770_v5 = vld [vmem:[#allocation17 + $0x6d8] sm:$0xff] }
 0x730   : > { %3627 = vmatmul.mubr.f32.vlgmr.msra.gmra.mrb[6].mxu1 %v3228_v13  ;;  %v3738_v13 = vld [vmem:[#allocation17 + $0x5d8] sm:$0xff] }
 0x731   : > { %12244 = vmatpush1.bf16.msra.mxu1 %v12243_v0  ;;  %3697 = vmatprep.mubr.f32.mxu1 %v15927_v17  ;;  %v12277_v0 = vpack.c.bf16 %v3734_v7, %v3732_v6  ;;  %v12281_v53 = vpack.c.bf16 %v3738_v13, %v3736_v12  ;;  %v12313_v7 = vpack.c.bf16 %v3770_v5, %v3768_v57  ;;  %v4155_v57 = vld [vmem:[#allocation20 + $0x40] sm:$0xff]  ;;  %v4158_v5 = vld [vmem:[#allocation20 + $0x58] sm:$0xff] }
 0x732   : > { %12246 = vmatprep.subr.bf16.mxu1 %v12245_v9  ;;  %v3731_v9 = vld [vmem:[#allocation17 + $0x5a0] sm:$0xff] }
 0x733   : > { %v12279_v15 = vpack.c.bf16 %v3733_v10, %v3731_v9  ;;  %v3772_v9 = vld [vmem:[#allocation17 + $0x6e8] sm:$0xff]  ;;  %v3774_v10 = vld [vmem:[#allocation17 + $0x6f8] sm:$0xff] }
 0x734   : > { %v12317_v13 = vpack.c.bf16 %v3774_v10, %v3772_v9  ;;  %v4161_v9 = vld [vmem:[#allocation20 + $0x70] sm:$0xff]  ;;  %v4164_v10 = vld [vmem:[#allocation20 + $0x88] sm:$0xff] }
 0x735   : > { %12248 = vmatpush1.bf16.msra.mxu1 %v12247_v16  ;;  %v3735_v16 = vld [vmem:[#allocation17 + $0x5c0] sm:$0xff] }
 0x736   : > { %12250 = vmatprep.subr.bf16.mxu1 %v12249_v19  ;;  %v3737_v19 = vld [vmem:[#allocation17 + $0x5d0] sm:$0xff] }
 0x737   : > { %v12283_v21 = vpack.c.bf16 %v3737_v19, %v3735_v16  ;;  %v3776_v16 = vld [vmem:[#allocation17 + $0x708] sm:$0xff]  ;;  %v3778_v19 = vld [vmem:[#allocation17 + $0x718] sm:$0xff] }
 0x739   : > { %12252 = vmatpush1.bf16.msra.mxu1 %v12251_v23  ;;  %v3739_v23 = vld [vmem:[#allocation17 + $0x5e0] sm:$0xff] }
 0x73a   : > { %12254 = vmatprep.subr.bf16.mxu1 %v12253_v24  ;;  %v3741_v24 = vld [vmem:[#allocation17 + $0x5f0] sm:$0xff] }
 0x73b   : > { %v12287_v27 = vpack.c.bf16 %v3741_v24, %v3739_v23  ;;  %v3775_v23 = vld [vmem:[#allocation17 + $0x700] sm:$0xff]  ;;  %v3777_v24 = vld [vmem:[#allocation17 + $0x710] sm:$0xff] }
 0x73d   : > { %12256 = vmatpush1.bf16.msra.mxu1 %v12255_v29  ;;  %v3743_v29 = vld [vmem:[#allocation17 + $0x600] sm:$0xff] }
 0x73e   : > { %12258 = vmatprep.subr.bf16.mxu1 %v12257_v32  ;;  %v3750_v32 = vld [vmem:[#allocation17 + $0x638] sm:$0xff]  ;;  %v12291_v46 = vpack.c.bf16 %v3745_v30, %v3743_v29  ;;  %v12323_v29 = vpack.c.bf16 %v3777_v24, %v3775_v23  ;;  %v4176_v24 = vld [vmem:[#allocation20 + $0xe8] sm:$0xff] }
 0x73f   : > { %v12293_v3 = vpack.c.bf16 %v3750_v32, %v3748_v31  ;;  %v3779_v31 = vld [vmem:[#allocation17 + $0x720] sm:$0xff]  ;;  %v3781_v32 = vld [vmem:[#allocation17 + $0x730] sm:$0xff] }
 0x740   : > { %10970 = vmatmul.mubr.msk.f32.vlgmr.msra.gmra.mrb[6].mxu1 %vm842_vm12, %v3230_v54  ;;  %v12295_v54 = vpack.c.bf16 %v3749_v2, %v3747_v56  ;;  %v3786_v56 = vld [vmem:[#allocation17 + $0x758] sm:$0xff]  ;;  %v12327_v2 = vpack.c.bf16 %v3781_v32, %v3779_v31 }
 0x741   : > { %12260 = vmatpush1.bf16.msra.mxu1 %v12259_v34  ;;  %3874 = vmatprep.mubr.f32.mxu1 %v3802_v42  ;;  %v12297_v34 = vpack.c.bf16 %v3754_v59, %v3752_v58  ;;  %v12301_v42 = vpack.c.bf16 %v3758_v40, %v3756_v39  ;;  %v3783_v59 = vld [vmem:[#allocation17 + $0x740] sm:$0xff]  ;;  %v4173_v23 = vld [vmem:[#allocation20 + $0xd0] sm:$0xff] }
 0x742   : > { %12262 = vmatprep.subr.bf16.mxu1 %v12261_v61  ;;  %v3751_v61 = vld [vmem:[#allocation17 + $0x640] sm:$0xff]  ;;  %v4233_v32 = vld [vmem:[#allocation20 + $0x2b0] sm:$0xff] }
 0x743   : > { %v12299_v41 = vpack.c.bf16 %v3753_v37, %v3751_v61  ;;  %v3790_v61 = vld [vmem:[#allocation17 + $0x778] sm:$0xff]  ;;  %v3787_v39 = vld [vmem:[#allocation17 + $0x760] sm:$0xff] }
 0x745   : > { %12264 = vmatpush1.bf16.msra.mxu1 %v12263_v62  ;;  %v3755_v62 = vld [vmem:[#allocation17 + $0x660] sm:$0xff] }
 0x746   : > { %12266 = vmatprep.subr.bf16.mxu1 %v12265_v43  ;;  %v3757_v43 = vld [vmem:[#allocation17 + $0x670] sm:$0xff] }
 0x747   : > { %v12303_v47 = vpack.c.bf16 %v3757_v43, %v3755_v62  ;;  %v3709_v62 = vld [vmem:[#allocation4 + $0x28] sm:$0x3] }
 0x748   : > { %v3804_v45 = vrot.slane %v3709_v62, 2 }
 0x749   : > { %12268 = vmatpush1.bf16.msra.mxu1 %v12267_v49  ;;  %v3759_v49 = vld [vmem:[#allocation17 + $0x680] sm:$0xff] }
 0x74a   : > { %12270 = vmatprep.subr.bf16.mxu1 %v12269_v50  ;;  %v3761_v50 = vld [vmem:[#allocation17 + $0x690] sm:$0xff] }
 0x74b   : > { %v12307_v52 = vpack.c.bf16 %v3761_v50, %v3759_v49  ;;  %v4200_v49 = vld [vmem:[#allocation20 + $0x1a8] sm:$0xff] }
 0x74d   : > { %12272 = vmatpush1.bf16.msra.mxu1 %v12271_v55  ;;  %v3763_v55 = vld [vmem:[#allocation17 + $0x6a0] sm:$0xff] }
 0x74e   : > { %12274 = vmatprep.subr.bf16.mxu1 %v12273_v60  ;;  %v3765_v60 = vld [vmem:[#allocation17 + $0x6b0] sm:$0xff] }
 0x74f   : > { %v12311_v6 = vpack.c.bf16 %v3765_v60, %v3763_v55  ;;  %v4206_v55 = vld [vmem:[#allocation20 + $0x1d8] sm:$0xff] }
 0x751   : > { %12276 = vmatpush1.bf16.msra.mxu1 %v12275_v8  ;;  %v3767_v8 = vld [vmem:[#allocation17 + $0x6c0] sm:$0xff] }
 0x752   : > { %12278 = vmatprep.subr.bf16.mxu1 %v12277_v0  ;;  %v3769_v0 = vld [vmem:[#allocation17 + $0x6d0] sm:$0xff] }
 0x753   : > { %v12315_v12 = vpack.c.bf16 %v3769_v0, %v3767_v8  ;;  %v4212_v8 = vld [vmem:[#allocation20 + $0x208] sm:$0xff] }
 0x755   : > { %12280 = vmatpush1.bf16.msra.mxu1 %v12279_v15  ;;  %v3771_v15 = vld [vmem:[#allocation17 + $0x6e0] sm:$0xff] }
 0x756   : > { %12282 = vmatprep.subr.bf16.mxu1 %v12281_v53  ;;  %v3773_v53 = vld [vmem:[#allocation17 + $0x6f0] sm:$0xff] }
 0x759   : > { %12284 = vmatpush1.bf16.msra.mxu1 %v12283_v21  ;;  %v12319_v21 = vpack.c.bf16 %v3773_v53, %v3771_v15  ;;  %v4218_v15 = vld [vmem:[#allocation20 + $0x238] sm:$0xff] }
 0x75a   : > { %12286 = vmatprep.subr.bf16.mxu1 %v12285_v22  ;;  %v12321_v22 = vpack.c.bf16 %v3778_v19, %v3776_v16  ;;  %v4167_v16 = vld [vmem:[#allocation20 + $0xa0] sm:$0xff]  ;;  %v4170_v19 = vld [vmem:[#allocation20 + $0xb8] sm:$0xff] }
 0x75b   : > { %v12575_v33 = vpack.c.bf16 %v4170_v19, %v4167_v16  ;;  %v4412_v16 = vld [vmem:[#allocation20 + $0x3c8] sm:$0xff]  ;;  %v4415_v19 = vld [vmem:[#allocation20 + $0x3e0] sm:$0xff] }
 0x75d   : > { %12288 = vmatpush1.bf16.msra.mxu1 %v12287_v27  ;;  %v3780_v27 = vld [vmem:[#allocation17 + $0x728] sm:$0xff] }
 0x75e   : > { %12290 = vmatprep.subr.bf16.mxu1 %v12289_v28  ;;  %v3782_v28 = vld [vmem:[#allocation17 + $0x738] sm:$0xff] }
 0x75f   : > { %v12325_v30 = vpack.c.bf16 %v3782_v28, %v3780_v27  ;;  %v4230_v27 = vld [vmem:[#allocation20 + $0x298] sm:$0xff] }
 0x761   : > { %12292 = vmatpush1.bf16.msra.mxu1 %v12291_v46  ;;  %v3799_v46 = vsel %vm905_vm1, %v3797_v25, %v3798_v26  ;;  %v12579_v25 = vpack.c.bf16 %v4176_v24, %v4173_v23  ;;  %v4227_v26 = vld [vmem:[#allocation20 + $0x280] sm:$0xff]  ;;  %v4421_v23 = vld [vmem:[#allocation20 + $0x410] sm:$0xff] }
 0x762   : > { %12294 = vmatprep.subr.bf16.mxu1 %v12293_v3  ;;  %v3784_v3 = vld [vmem:[#allocation17 + $0x748] sm:$0xff]  ;;  %v12581_v28 = vpack.c.bf16 %v4230_v27, %v4227_v26  ;;  %v4417_v26 = vld [vmem:[#allocation20 + $0x3f0] sm:$0xff] }
 0x763   : > { %v12329_v58 = vpack.c.bf16 %v3786_v56, %v3784_v3  ;;  %v4185_v56 = vld [vmem:[#allocation20 + $0x130] sm:$0xff]  ;;  %v4420_v27 = vld [vmem:[#allocation20 + $0x408] sm:$0xff] }
 0x765   : > { %12296 = vmatpush1.bf16.msra.mxu1 %v12295_v54  ;;  %v3785_v54 = vld [vmem:[#allocation17 + $0x750] sm:$0xff] }
 0x766   : > { %12298 = vmatprep.subr.bf16.mxu1 %v12297_v34  ;;  %v3788_v34 = vld [vmem:[#allocation17 + $0x768] sm:$0xff]  ;;  %v12331_v37 = vpack.c.bf16 %v3785_v54, %v3783_v59  ;;  %v4242_v54 = vld [vmem:[#allocation20 + $0x2f8] sm:$0xff] }
 0x767   : > { %v12333_v40 = vpack.c.bf16 %v3790_v61, %v3788_v34  ;;  %v4239_v59 = vld [vmem:[#allocation20 + $0x2e0] sm:$0xff] }
 0x768   : > { %v12589_v34 = vpack.c.bf16 %v4242_v54, %v4239_v59  ;;  %v4191_v61 = vld [vmem:[#allocation20 + $0x160] sm:$0xff]  ;;  %v4429_v59 = vld [vmem:[#allocation20 + $0x450] sm:$0xff]  ;;  %v4432_v54 = vld [vmem:[#allocation20 + $0x468] sm:$0xff] }
 0x769   : > { %12300 = vmatpush1.bf16.msra.mxu1 %v12299_v41  ;;  %v3789_v41 = vld [vmem:[#allocation17 + $0x770] sm:$0xff] }
 0x76a   : > { %12302 = vmatprep.subr.bf16.mxu1 %v12301_v42  ;;  %v3706_v42 = vld [vmem:[#allocation4 + $0x10] sm:$0xfc]  ;;  %v12335_v43 = vpack.c.bf16 %v3789_v41, %v3787_v39 }
 0x76b   : > { %v3803_v44 = vrot.slane %v3706_v42, 2 }
 0x76d   : > { %12304 = vmatpush1.bf16.msra.mxu1 %v12303_v47  ;;  %v3805_v47 = vsel %vm905_vm1, %v3803_v44, %v3804_v45 }
 0x76e   : > { %12306 = vmatprep.subr.bf16.mxu1 %v12305_v48  ;;  %v4197_v48 = vld [vmem:[#allocation20 + $0x190] sm:$0xff] }
 0x76f   : > { %v12561_v50 = vpack.c.bf16 %v4200_v49, %v4197_v48 }
 0x771   : > { %12308 = vmatpush1.bf16.msra.mxu1 %v12307_v52  ;;  %v12563_v52 = vpack.c.bf16 %v4152_v1, %v4149_v51 }
 0x772   : > { %12310 = vmatprep.subr.bf16.mxu1 %v12309_v11  ;;  %v4203_v11 = vld [vmem:[#allocation20 + $0x1c0] sm:$0xff] }
 0x773   : > { %v12565_v60 = vpack.c.bf16 %v4206_v55, %v4203_v11 }
 0x775   : > { %12312 = vmatpush1.bf16.msra.mxu1 %v12311_v6  ;;  %v12567_v6 = vpack.c.bf16 %v4158_v5, %v4155_v57 }
 0x776   : > { %12314 = vmatprep.subr.bf16.mxu1 %v12313_v7  ;;  %v4209_v7 = vld [vmem:[#allocation20 + $0x1f0] sm:$0xff] }
 0x777   : > { %v12569_v0 = vpack.c.bf16 %v4212_v8, %v4209_v7 }
 0x779   : > { %12316 = vmatpush1.bf16.msra.mxu1 %v12315_v12  ;;  %v12571_v12 = vpack.c.bf16 %v4164_v10, %v4161_v9 }
 0x77a   : > { %12318 = vmatprep.subr.bf16.mxu1 %v12317_v13  ;;  %v4215_v13 = vld [vmem:[#allocation20 + $0x220] sm:$0xff] }
 0x77b   : > { %v12573_v53 = vpack.c.bf16 %v4218_v15, %v4215_v13  ;;  %v3993_v13 = vld [vmem:[#allocation5 + $0x28] sm:$0x3] }
 0x77d   : > { %12320 = vmatpush1.bf16.msra.mxu1 %v12319_v21  ;;  %v4224_v21 = vld [vmem:[#allocation20 + $0x268] sm:$0xff] }
 0x77e   : > { %12322 = vmatprep.subr.bf16.mxu1 %v12321_v22  ;;  %v12577_v22 = vpack.c.bf16 %v4224_v21, %v4221_v20  ;;  %v4411_v20 = vld [vmem:[#allocation20 + $0x3c0] sm:$0xff]  ;;  %v4414_v21 = vld [vmem:[#allocation20 + $0x3d8] sm:$0xff] }
 0x77f   : > { %v12359_v24 = vpack.c.bf16 %v4414_v21, %v4411_v20 }
 0x780   : > { %3875 = vmatmul.mubr.f32.vlgmr.msra.gmra.mrb[6].mxu1 %v3799_v46  ;;  %v4236_v46 = vld [vmem:[#allocation20 + $0x2c8] sm:$0xff] }
 0x781   : > { %12324 = vmatpush1.bf16.msra.mxu1 %v12323_v29  ;;  %3945 = vmatprep.mubr.f32.mxu1 %v15927_v17  ;;  %v4179_v29 = vld [vmem:[#allocation20 + $0x100] sm:$0xff]  ;;  %v12585_v3 = vpack.c.bf16 %v4236_v46, %v4233_v32  ;;  %v4426_v46 = vld [vmem:[#allocation20 + $0x438] sm:$0xff] }
 0x782   : > { %12326 = vmatprep.subr.bf16.mxu1 %v12325_v30  ;;  %v4182_v30 = vld [vmem:[#allocation20 + $0x118] sm:$0xff]  ;;  %v4423_v32 = vld [vmem:[#allocation20 + $0x420] sm:$0xff] }
 0x783   : > { %v12583_v31 = vpack.c.bf16 %v4182_v30, %v4179_v29  ;;  %v4427_v29 = vld [vmem:[#allocation20 + $0x440] sm:$0xff]  ;;  %v12363_v30 = vpack.c.bf16 %v4420_v27, %v4417_v26 }
 0x785   : > { %12328 = vmatpush1.bf16.msra.mxu1 %v12327_v2  ;;  %v4188_v2 = vld [vmem:[#allocation20 + $0x148] sm:$0xff] }
 0x786   : > { %12330 = vmatprep.subr.bf16.mxu1 %v12329_v58  ;;  %v12587_v58 = vpack.c.bf16 %v4188_v2, %v4185_v56  ;;  %v4433_v56 = vld [vmem:[#allocation20 + $0x470] sm:$0xff]  ;;  %v12367_v2 = vpack.c.bf16 %v4426_v46, %v4423_v32 }
 0x789   : > { %12332 = vmatpush1.bf16.msra.mxu1 %v12331_v37  ;;  %v4194_v37 = vld [vmem:[#allocation20 + $0x178] sm:$0xff] }
 0x78a   : > { %12334 = vmatprep.subr.bf16.mxu1 %v12333_v40  ;;  %v12591_v39 = vpack.c.bf16 %v4194_v37, %v4191_v61  ;;  %v3954_v40 = vld [vmem:[#allocation19] sm:$0x3]  ;;  %v4439_v61 = vld [vmem:[#allocation20 + $0x4a0] sm:$0xff]  ;;  %v12371_v37 = vpack.c.bf16 %v4432_v54, %v4429_v59 }
 0x78b   : > { %v3959_v41 = vrot.slane %v3954_v40, %v15764_v36  ;;  %v3963_v42 = vrot.slane %v3954_v40, %v15767_v38  ;;  %v4435_v40 = vld [vmem:[#allocation20 + $0x480] sm:$0xff] }
 0x78d   : > { %12336 = vmatpush1.bf16.msra.mxu1 %v12335_v43 }
 0x78e   : > { %12562 = vmatprep.subr.bf16.mxu1 %v12561_v50 }
 0x790   : > { %10971 = vmatmul.mubr.msk.f32.vlgmr.msra.gmra.mrb[6].mxu1 %vm842_vm12, %v3805_v47 }
 0x791   : > { %12564 = vmatpush3.bf16.msra.mxu1 %v12563_v52 }
 0x792   : > { %12566 = vmatprep.subr.bf16.mxu1 %v12565_v60 }
 0x795   : > { %12568 = vmatpush3.bf16.msra.mxu1 %v12567_v6 }
 0x796   : > { %12570 = vmatprep.subr.bf16.mxu1 %v12569_v0 }
 0x799   : > { %12572 = vmatpush3.bf16.msra.mxu1 %v12571_v12  ;;  %v3990_v12 = vld [vmem:[#allocation5 + $0x10] sm:$0xff] }
 0x79a   : > { %12574 = vmatprep.subr.bf16.mxu1 %v12573_v53  ;;  %v15954_v53 = vpack.c.bf16 %v3993_v13, %v3990_v12  ;;  %v4459_v13 = vld [vmem:[#allocation20 + $0x540] sm:$0xff] }
 0x79d   : > { %12576 = vmatpush3.bf16.msra.mxu1 %v12575_v33  ;;  %v12357_v33 = vpack.c.bf16 %v4415_v19, %v4412_v16  ;;  %v4462_v16 = vld [vmem:[#allocation20 + $0x558] sm:$0xff] }
 0x79e   : > { %12578 = vmatprep.subr.bf16.mxu1 %v12577_v22  ;;  %v4418_v22 = vld [vmem:[#allocation20 + $0x3f8] sm:$0xff]  ;;  %v12391_v20 = vpack.c.bf16 %v4462_v16, %v4459_v13  ;;  %v4251_v16 = vld [vmem:[#allocation20 + $0x340] sm:$0xff] }
 0x79f   : > { %v4466_v19 = vld [vmem:[#allocation20 + $0x578] sm:$0xff] }
 0x7a1   : > { %12580 = vmatpush3.bf16.msra.mxu1 %v12579_v25  ;;  %v12361_v25 = vpack.c.bf16 %v4421_v23, %v4418_v22  ;;  %v4465_v22 = vld [vmem:[#allocation20 + $0x570] sm:$0xff]  ;;  %v4468_v23 = vld [vmem:[#allocation20 + $0x588] sm:$0xff] }
 0x7a2   : > { %12582 = vmatprep.subr.bf16.mxu1 %v12581_v28  ;;  %v4424_v28 = vld [vmem:[#allocation20 + $0x428] sm:$0xff]  ;;  %v12395_v26 = vpack.c.bf16 %v4468_v23, %v4465_v22  ;;  %v4510_v23 = vld [vmem:[#allocation20 + $0x6d8] sm:$0xff] }
 0x7a5   : > { %12584 = vmatpush3.bf16.msra.mxu1 %v12583_v31  ;;  %v12365_v31 = vpack.c.bf16 %v4427_v29, %v4424_v28  ;;  %v4471_v28 = vld [vmem:[#allocation20 + $0x5a0] sm:$0xff]  ;;  %v4474_v29 = vld [vmem:[#allocation20 + $0x5b8] sm:$0xff] }
 0x7a6   : > { %12586 = vmatprep.subr.bf16.mxu1 %v12585_v3  ;;  %v4430_v3 = vld [vmem:[#allocation20 + $0x458] sm:$0xff]  ;;  %v12399_v32 = vpack.c.bf16 %v4474_v29, %v4471_v28 }
 0x7a9   : > { %12588 = vmatpush3.bf16.msra.mxu1 %v12587_v58  ;;  %v12369_v58 = vpack.c.bf16 %v4433_v56, %v4430_v3  ;;  %v4477_v3 = vld [vmem:[#allocation20 + $0x5d0] sm:$0xff]  ;;  %v4480_v56 = vld [vmem:[#allocation20 + $0x5e8] sm:$0xff] }
 0x7aa   : > { %12590 = vmatprep.subr.bf16.mxu1 %v12589_v34  ;;  %v4436_v34 = vld [vmem:[#allocation20 + $0x488] sm:$0xff]  ;;  %v12403_v59 = vpack.c.bf16 %v4480_v56, %v4477_v3  ;;  %v4263_v56 = vld [vmem:[#allocation20 + $0x3a0] sm:$0xff] }
 0x7ab   : > { %v4516_v3 = vld [vmem:[#allocation20 + $0x708] sm:$0xff] }
 0x7ad   : > { %12592 = vmatpush3.bf16.msra.mxu1 %v12591_v39  ;;  %v12373_v39 = vpack.c.bf16 %v4439_v61, %v4436_v34  ;;  %v4483_v34 = vld [vmem:[#allocation20 + $0x600] sm:$0xff]  ;;  %v4486_v61 = vld [vmem:[#allocation20 + $0x618] sm:$0xff] }
 0x7ae   : > { %12593 = vmatprep.subr.bf16.mxu1 %v15112_v63 }
 0x863   : > { %v3947_v62 = vpop.f32.mrb[6].mxu1 }
 0x864   : > { %v3966_v43 = vadd.f32 %v3959_v41, %v3947_v62  ;;  %v3949_v44 = vpop.f32.mrb[7].mxu1  ;;  %v4438_v41 = vld [vmem:[#allocation20 + $0x498] sm:$0xff]  ;;  %v4445_v62 = vld [vmem:[#allocation20 + $0x4d0] sm:$0xff] }
 0x865   : > { %v3967_v45 = vadd.f32 %v3963_v42, %v3949_v44  ;;  %v4442_v42 = vld [vmem:[#allocation20 + $0x4b8] sm:$0xff] }
 0x866   : > { %v3968_v47 = vmul.f32 0.5, %v3966_v43  ;;  %v12377_v44 = vpack.c.bf16 %v4445_v62, %v4442_v42  ;;  %v4489_v42 = vld [vmem:[#allocation20 + $0x630] sm:$0xff]  ;;  %v4492_v62 = vld [vmem:[#allocation20 + $0x648] sm:$0xff] }
 0x867   : > { %v3969_v48 = vmul.f32 0.5, %v3967_v45 }
 0x868   : > { %14587 = vtanh.f32 %v3968_v47  ;;  %v4444_v47 = vld [vmem:[#allocation20 + $0x4c8] sm:$0xff] }
 0x869   : > { %14589 = vtanh.f32 %v3969_v48  ;;  %v4448_v48 = vld [vmem:[#allocation20 + $0x4e8] sm:$0xff] }
 0x872   : > { %v14588_v49 = vpop.eup %14587 }
 0x873   : > { %v14590_v50 = vpop.eup %14589  ;;  %v3972_v51 = vadd.f32 1.0, %v14588_v49  ;;  %v4451_v49 = vld [vmem:[#allocation20 + $0x500] sm:$0xff] }
 0x874   : > { %v3973_v1 = vadd.f32 1.0, %v14590_v50 }
 0x875   : > { %v3974_v52 = vmul.f32 0.5, %v3972_v51  ;;  %v12381_v51 = vpack.c.bf16 %v4451_v49, %v4448_v48  ;;  %v4495_v48 = vld [vmem:[#allocation20 + $0x660] sm:$0xff]  ;;  %v4498_v49 = vld [vmem:[#allocation20 + $0x678] sm:$0xff] }
 0x876   : > { %v3975_v11 = vmul.f32 0.5, %v3973_v1  ;;  %v4447_v1 = vld [vmem:[#allocation20 + $0x4e0] sm:$0xff] }
 0x877   : > { %v3976_v55 = vmul.f32 %v3974_v52, %v3966_v43  ;;  %v12375_v43 = vpack.c.bf16 %v4438_v41, %v4435_v40  ;;  %v4450_v52 = vld [vmem:[#allocation20 + $0x4f8] sm:$0xff]  ;;  %v12407_v40 = vpack.c.bf16 %v4486_v61, %v4483_v34 }
 0x878   : > { %v3977_v60 = vmul.f32 %v3975_v11, %v3967_v45  ;;  %v4441_v45 = vld [vmem:[#allocation20 + $0x4b0] sm:$0xff]  ;;  %v4454_v11 = vld [vmem:[#allocation20 + $0x518] sm:$0xff] }
 0x879   : > { %v3980_v57 = vrot.slane %v3976_v55, 7  ;;  %v12379_v50 = vpack.c.bf16 %v4444_v47, %v4441_v45  ;;  %v4457_v55 = vld [vmem:[#allocation20 + $0x530] sm:$0xff]  ;;  %v4499_v45 = vld [vmem:[#allocation20 + $0x680] sm:$0xff] }
 0x87a   : > { %v3981_v5 = vrot.slane %v3977_v60, 7  ;;  %v12383_v60 = vpack.c.bf16 %v4450_v52, %v4447_v1  ;;  %v4505_v1 = vld [vmem:[#allocation20 + $0x6b0] sm:$0xff] }
 0x87b   : > { %3984 = vst [vmem:[#allocation5] sm:$0xfe] %v3980_v57  ;;  %3986 = vst [vmem:[#allocation5 + $0x18] sm:$0x1] %v3980_v57  ;;  %v12385_v57 = vpack.c.bf16 %v4457_v55, %v4454_v11  ;;  %v4501_v11 = vld [vmem:[#allocation20 + $0x690] sm:$0xff]  ;;  %v4504_v55 = vld [vmem:[#allocation20 + $0x6a8] sm:$0xff] }
 0x87c   : > { %3985 = vst [vmem:[#allocation5 + $0x8] sm:$0xfe] %v3981_v5  ;;  %3987 = vst [vmem:[#allocation5 + $0x20] sm:$0x1] %v3981_v5  ;;  %v4453_v5 = vld [vmem:[#allocation20 + $0x510] sm:$0xff] }
 0x882   : > { %v3988_v6 = vld [vmem:[#allocation5] sm:$0xff]  ;;  %v3991_v7 = vld [vmem:[#allocation5 + $0x18] sm:$0x3] }
 0x883   : > { %v3989_v8 = vld [vmem:[#allocation5 + $0x8] sm:$0xff]  ;;  %v3992_v0 = vld [vmem:[#allocation5 + $0x20] sm:$0x3]  ;;  %v15946_v15 = vpack.c.bf16 %v3991_v7, %v3988_v6  ;;  %v4456_v6 = vld [vmem:[#allocation20 + $0x528] sm:$0xff] }
 0x884   : > { %v15944_v10 = vpack.c.bf16 %v3992_v0, %v3989_v8  ;;  %v4460_v7 = vld [vmem:[#allocation20 + $0x548] sm:$0xff]  ;;  %v4463_v8 = vld [vmem:[#allocation20 + $0x560] sm:$0xff]  ;;  %v12387_v0 = vpack.c.bf16 %v4456_v6, %v4453_v5 }
 0x885   : > { %v12389_v12 = vpack.c.bf16 %v4463_v8, %v4460_v7  ;;  %v4511_v5 = vld [vmem:[#allocation20 + $0x6e0] sm:$0xff]  ;;  %v4245_v7 = vld [vmem:[#allocation20 + $0x310] sm:$0xff]  ;;  %v4248_v8 = vld [vmem:[#allocation20 + $0x328] sm:$0xff] }
 0x886   : > { %12339 = vmatprep.subr.msk.bf16.mxu0 %vm15940_vm15, %v15944_v10 }
 0x887   : > { %12342 = vmatpush1.bf16.msk.msra.mxu0 %vm15940_vm15, %v15946_v15 }
 0x888   : > { %12343 = vmatprep.subr.bf16.mxu0 %v15112_v63 }
 0x88a   : > { %10974 = vmatmul.mubr.msk.f32.vlgmr.msra.gmra.mrb[20].mxu0 %vm3994_vm0, %v15829_v4 }
 0x88b   : > { %12346 = vmatpush3.bf16.msk.msra.mxu0 %vm15940_vm15, %v15954_v53  ;;  %11462 = vmatprep.mubr.msk.f32.mxu0 %vm15113_vm7, %v15927_v17 }
 0x88c   : > { %12349 = vmatprep.subr.msk.bf16.mxu0 %vm15940_vm15, %v15944_v10 }
 0x88e   : > { %11463 = vmatmul.mubr.msk.f32.vlgmr.msra.gmra.mrb[22].mxu0 %vm3994_vm0, %v15829_v4 }
 0x88f   : > { %12352 = vmatpush1.bf16.msk.msra.mxu0 %vm15940_vm15, %v15946_v15  ;;  %4333 = vmatprep.mubr.f32.mxu0 %v15927_v17 }
 0x890   : > { %12353 = vmatprep.subr.bf16.mxu0 %v15112_v63 }
 0x892   : > { %10979 = vmatmul.mubr.msk.f32.vlgmr.msra.gmra.mrb[24].mxu0 %vm3994_vm0, %v15855_v14 }
 0x893   : > { %12356 = vmatpush3.bf16.msk.msra.mxu0 %vm15940_vm15, %v15954_v53  ;;  %11469 = vmatprep.mubr.msk.f32.mxu0 %vm15113_vm7, %v15927_v17 }
 0x894   : > { %12358 = vmatprep.subr.bf16.mxu0 %v12357_v33  ;;  %v4469_v33 = vld [vmem:[#allocation20 + $0x590] sm:$0xff] }
 0x895   : > { %v12393_v21 = vpack.c.bf16 %v4469_v33, %v4466_v19  ;;  %v4254_v19 = vld [vmem:[#allocation20 + $0x358] sm:$0xff] }
 0x896   : > { %11470 = vmatmul.mubr.msk.f32.vlgmr.msra.gmra.mrb[26].mxu0 %vm3994_vm0, %v15855_v14 }
 0x897   : > { %12360 = vmatpush1.bf16.msra.mxu0 %v12359_v24  ;;  %v4472_v24 = vld [vmem:[#allocation20 + $0x5a8] sm:$0xff] }
 0x898   : > { %12362 = vmatprep.subr.bf16.mxu0 %v12361_v25  ;;  %v4475_v25 = vld [vmem:[#allocation20 + $0x5c0] sm:$0xff] }
 0x899   : > { %v12397_v27 = vpack.c.bf16 %v4475_v25, %v4472_v24  ;;  %v4257_v24 = vld [vmem:[#allocation20 + $0x370] sm:$0xff]  ;;  %v4260_v25 = vld [vmem:[#allocation20 + $0x388] sm:$0xff] }
 0x89b   : > { %12364 = vmatpush1.bf16.msra.mxu0 %v12363_v30  ;;  %v4478_v30 = vld [vmem:[#allocation20 + $0x5d8] sm:$0xff] }
 0x89c   : > { %12366 = vmatprep.subr.bf16.mxu0 %v12365_v31  ;;  %v4481_v31 = vld [vmem:[#allocation20 + $0x5f0] sm:$0xff] }
 0x89d   : > { %v12401_v46 = vpack.c.bf16 %v4481_v31, %v4478_v30  ;;  %v12600_v30 = vpack.c.bf16 %v4260_v25, %v4257_v24  ;;  %v4513_v31 = vld [vmem:[#allocation20 + $0x6f0] sm:$0xff]  ;;  %v4488_v24 = vld [vmem:[#allocation20 + $0x628] sm:$0xff] }
 0x89f   : > { %12368 = vmatpush1.bf16.msra.mxu0 %v12367_v2  ;;  %v4484_v2 = vld [vmem:[#allocation20 + $0x608] sm:$0xff] }
 0x8a0   : > { %12370 = vmatprep.subr.bf16.mxu0 %v12369_v58  ;;  %v4487_v58 = vld [vmem:[#allocation20 + $0x620] sm:$0xff] }
 0x8a1   : > { %v12405_v54 = vpack.c.bf16 %v4487_v58, %v4484_v2  ;;  %v4266_v2 = vld [vmem:[#allocation20 + $0x3b8] sm:$0xff]  ;;  %v4520_v58 = vld [vmem:[#allocation20 + $0x728] sm:$0xff] }
 0x8a2   : > { %v12603_v34 = vpack.c.bf16 %v4266_v2, %v4263_v56  ;;  %v4446_v56 = vld [vmem:[#allocation20 + $0x4d8] sm:$0xff]  ;;  %v4497_v2 = vld [vmem:[#allocation20 + $0x670] sm:$0xff] }
 0x8a3   : > { %12372 = vmatpush1.bf16.msra.mxu0 %v12371_v37  ;;  %v4490_v37 = vld [vmem:[#allocation20 + $0x638] sm:$0xff] }
 0x8a4   : > { %12374 = vmatprep.subr.bf16.mxu0 %v12373_v39  ;;  %v4493_v39 = vld [vmem:[#allocation20 + $0x650] sm:$0xff] }
 0x8a5   : > { %v12409_v41 = vpack.c.bf16 %v4493_v39, %v4490_v37  ;;  %v4519_v39 = vld [vmem:[#allocation20 + $0x720] sm:$0xff] }
 0x8a7   : > { %12376 = vmatpush1.bf16.msra.mxu0 %v12375_v43  ;;  %v12411_v43 = vpack.c.bf16 %v4492_v62, %v4489_v42  ;;  %v4526_v42 = vld [vmem:[#allocation20 + $0x758] sm:$0xff]  ;;  %v4529_v62 = vld [vmem:[#allocation20 + $0x770] sm:$0xff] }
 0x8a8   : > { %12378 = vmatprep.subr.bf16.mxu0 %v12377_v44  ;;  %v4496_v44 = vld [vmem:[#allocation20 + $0x668] sm:$0xff] }
 0x8a9   : > { %v12413_v47 = vpack.c.bf16 %v4499_v45, %v4496_v44  ;;  %v12433_v44 = vpack.c.bf16 %v4529_v62, %v4526_v42  ;;  %v4525_v45 = vld [vmem:[#allocation20 + $0x750] sm:$0xff]  ;;  %v4455_v62 = vld [vmem:[#allocation20 + $0x520] sm:$0xff] }
 0x8ab   : > { %12380 = vmatpush1.bf16.msra.mxu0 %v12379_v50  ;;  %v12415_v50 = vpack.c.bf16 %v4498_v49, %v4495_v48  ;;  %v4461_v48 = vld [vmem:[#allocation20 + $0x550] sm:$0xff]  ;;  %v4464_v49 = vld [vmem:[#allocation20 + $0x568] sm:$0xff] }
 0x8ac   : > { %12382 = vmatprep.subr.bf16.mxu0 %v12381_v51  ;;  %v4502_v51 = vld [vmem:[#allocation20 + $0x698] sm:$0xff] }
 0x8ad   : > { %v12417_v52 = vpack.c.bf16 %v4505_v1, %v4502_v51  ;;  %v12437_v51 = vpack.c.bf16 %v4464_v49, %v4461_v48  ;;  %v4416_v1 = vld [vmem:[#allocation20 + $0x3e8] sm:$0xff]  ;;  %v4515_v49 = vld [vmem:[#allocation20 + $0x700] sm:$0xff] }
 0x8af   : > { %12384 = vmatpush1.bf16.msra.mxu0 %v12383_v60  ;;  %v12419_v60 = vpack.c.bf16 %v4504_v55, %v4501_v11  ;;  %v4470_v11 = vld [vmem:[#allocation20 + $0x598] sm:$0xff] }
 0x8b0   : > { %12386 = vmatprep.subr.bf16.mxu0 %v12385_v57  ;;  %v4508_v57 = vld [vmem:[#allocation20 + $0x6c8] sm:$0xff] }
 0x8b1   : > { %v12421_v6 = vpack.c.bf16 %v4511_v5, %v4508_v57  ;;  %v4422_v57 = vld [vmem:[#allocation20 + $0x418] sm:$0xff]  ;;  %v4473_v5 = vld [vmem:[#allocation20 + $0x5b0] sm:$0xff] }
 0x8b3   : > { %12388 = vmatpush1.bf16.msra.mxu0 %v12387_v0 }
 0x8b4   : > { %12390 = vmatprep.subr.bf16.mxu0 %v12389_v12  ;;  %v12594_v12 = vpack.c.bf16 %v4248_v8, %v4245_v7  ;;  %v4428_v8 = vld [vmem:[#allocation20 + $0x448] sm:$0xff] }
 0x8b7   : > { %12392 = vmatpush1.bf16.msra.mxu0 %v12391_v20  ;;  %v12597_v20 = vpack.c.bf16 %v4254_v19, %v4251_v16  ;;  %v4482_v16 = vld [vmem:[#allocation20 + $0x5f8] sm:$0xff] }
 0x8b8   : > { %12394 = vmatprep.subr.bf16.mxu0 %v12393_v21  ;;  %v4507_v21 = vld [vmem:[#allocation20 + $0x6c0] sm:$0xff] }
 0x8b9   : > { %v12423_v29 = vpack.c.bf16 %v4510_v23, %v4507_v21  ;;  %v4431_v21 = vld [vmem:[#allocation20 + $0x460] sm:$0xff]  ;;  %v4485_v23 = vld [vmem:[#allocation20 + $0x610] sm:$0xff] }
 0x8bb   : > { %12396 = vmatpush1.bf16.msra.mxu0 %v12395_v26  ;;  %v4514_v26 = vld [vmem:[#allocation20 + $0x6f8] sm:$0xff] }
 0x8bc   : > { %12398 = vmatprep.subr.bf16.mxu0 %v12397_v27  ;;  %v4517_v27 = vld [vmem:[#allocation20 + $0x710] sm:$0xff] }
 0x8bf   : > { %12400 = vmatpush1.bf16.msra.mxu0 %v12399_v32 }
 0x8c0   : > { %12402 = vmatprep.subr.bf16.mxu0 %v12401_v46  ;;  %v12425_v46 = vpack.c.bf16 %v4517_v27, %v4514_v26  ;;  %v12453_v26 = vpack.c.bf16 %v4488_v24, %v4485_v23  ;;  %v4437_v27 = vld [vmem:[#allocation20 + $0x490] sm:$0xff] }
 0x8c3   : > { %12404 = vmatpush1.bf16.msra.mxu0 %v12403_v59  ;;  %v4523_v59 = vld [vmem:[#allocation20 + $0x740] sm:$0xff] }
 0x8c4   : > { %12406 = vmatprep.subr.bf16.mxu0 %v12405_v54  ;;  %v12427_v54 = vpack.c.bf16 %v4516_v3, %v4513_v31  ;;  %v12429_v37 = vpack.c.bf16 %v4523_v59, %v4520_v58  ;;  %v4494_v31 = vld [vmem:[#allocation20 + $0x658] sm:$0xff]  ;;  %v4443_v3 = vld [vmem:[#allocation20 + $0x4c0] sm:$0xff]  ;;  %v4500_v58 = vld [vmem:[#allocation20 + $0x688] sm:$0xff] }
 0x8c5   : > { %v12459_v59 = vpack.c.bf16 %v4446_v56, %v4443_v3 }
 0x8c7   : > { %12408 = vmatpush1.bf16.msra.mxu0 %v12407_v40  ;;  %v4522_v40 = vld [vmem:[#allocation20 + $0x738] sm:$0xff] }
 0x8c8   : > { %12410 = vmatprep.subr.bf16.mxu0 %v12409_v41 }
 0x8cb   : > { %12412 = vmatpush1.bf16.msra.mxu0 %v12411_v43  ;;  %v12431_v43 = vpack.c.bf16 %v4522_v40, %v4519_v39  ;;  %v4503_v39 = vld [vmem:[#allocation20 + $0x6a0] sm:$0xff]  ;;  %v4506_v40 = vld [vmem:[#allocation20 + $0x6b8] sm:$0xff] }
 0x8cc   : > { %12414 = vmatprep.subr.bf16.mxu0 %v12413_v47  ;;  %v4528_v47 = vld [vmem:[#allocation20 + $0x768] sm:$0xff]  ;;  %v12465_v42 = vpack.c.bf16 %v4506_v40, %v4503_v39  ;;  %v4159_v39 = vld [vmem:[#allocation20 + $0x60] sm:$0xff]  ;;  %v4162_v40 = vld [vmem:[#allocation20 + $0x78] sm:$0xff] }
 0x8cf   : > { %12416 = vmatpush1.bf16.msra.mxu0 %v12415_v50  ;;  %v12435_v50 = vpack.c.bf16 %v4528_v47, %v4525_v45  ;;  %v4509_v45 = vld [vmem:[#allocation20 + $0x6d0] sm:$0xff]  ;;  %v4512_v47 = vld [vmem:[#allocation20 + $0x6e8] sm:$0xff] }
 0x8d0   : > { %12418 = vmatprep.subr.bf16.mxu0 %v12417_v52  ;;  %v4467_v52 = vld [vmem:[#allocation20 + $0x580] sm:$0xff]  ;;  %v12470_v48 = vpack.c.bf16 %v4512_v47, %v4509_v45  ;;  %v4168_v45 = vld [vmem:[#allocation20 + $0xa8] sm:$0xff] }
 0x8d1   : > { %v4172_v47 = vld [vmem:[#allocation20 + $0xc8] sm:$0xff] }
 0x8d3   : > { %12420 = vmatpush1.bf16.msra.mxu0 %v12419_v60  ;;  %v4419_v60 = vld [vmem:[#allocation20 + $0x400] sm:$0xff] }
 0x8d4   : > { %12422 = vmatprep.subr.bf16.mxu0 %v12421_v6  ;;  %v4476_v6 = vld [vmem:[#allocation20 + $0x5c8] sm:$0xff]  ;;  %v12443_v7 = vpack.c.bf16 %v4422_v57, %v4419_v60 }
 0x8d5   : > { %v12445_v9 = vpack.c.bf16 %v4476_v6, %v4473_v5  ;;  %v4524_v60 = vld [vmem:[#allocation20 + $0x748] sm:$0xff]  ;;  %v5301_v5 = vld [vmem:[#allocation20 + $0x940] sm:$0xff]  ;;  %v5304_v6 = vld [vmem:[#allocation20 + $0x958] sm:$0xff] }
 0x95d   : > { %v15983_v0 = vpop.f32.mrb[20].mxu0 }
 0x95e   : > { %v15985_v13 = vpop.f32.mrb[21].mxu0 }
 0x95f   : > { %5025 = vmatprep.mubr.f32.mxu1 %v15985_v13 }
 0x960   : > { %5026 = vmatmul.mubr.f32.vlgmr.msra.gmra.mrb[8].mxu1 %v15983_v0 }
 0x961   : > { %12595 = vmatpush3.bf16.msra.mxu1 %v12594_v12  ;;  %v15989_v33 = vpop.f32.mrb[22].mxu0  ;;  %11507 = vmatprep.mubr.msk.f32.mxu1 %vm15113_vm7, %v15927_v17  ;;  %v4479_v12 = vld [vmem:[#allocation20 + $0x5e0] sm:$0xff] }
 0x962   : > { %12596 = vmatprep.subr.bf16.mxu1 %v15112_v63  ;;  %v11464_v22 = vpop.f32.mrb[23].mxu0 }
 0x963   : > { %v4434_v22 = vld [vmem:[#allocation20 + $0x478] sm:$0xff] }
 0x964   : > { %v12451_v25 = vpack.c.bf16 %v4434_v22, %v4431_v21  ;;  %v4148_v21 = vld [vmem:[#allocation20 + $0x8] sm:$0xff]  ;;  %v4151_v22 = vld [vmem:[#allocation20 + $0x20] sm:$0xff] }
 0x965   : > { %12598 = vmatpush3.bf16.msra.mxu1 %v12597_v20  ;;  %v15994_v28 = vpop.f32.mrb[24].mxu0  ;;  %v12449_v20 = vpack.c.bf16 %v4482_v16, %v4479_v12  ;;  %v4530_v12 = vld [vmem:[#allocation20 + $0x778] sm:$0xff] }
 0x966   : > { %v4337_v32 = vpop.f32.mrb[25].mxu0  ;;  %12599 = vmatprep.subr.bf16.mxu1 %v15112_v63 }
 0x967   : > { %4598 = vmatprep.mubr.f32.mxu0 %v4337_v32 }
 0x968   : > { %4599 = vmatmul.mubr.f32.vlgmr.msra.gmra.mrb[28].mxu0 %v15994_v28 }
 0x969   : > { %12424 = vmatpush1.bf16.msra.mxu0 %v12423_v29  ;;  %12601 = vmatpush3.bf16.msra.mxu1 %v12600_v30  ;;  %v15998_v61 = vpop.f32.mrb[26].mxu0  ;;  %v4440_v29 = vld [vmem:[#allocation20 + $0x4a8] sm:$0xff]  ;;  %v4491_v30 = vld [vmem:[#allocation20 + $0x640] sm:$0xff] }
 0x96a   : > { %12426 = vmatprep.subr.bf16.mxu0 %v12425_v46  ;;  %12602 = vmatprep.subr.bf16.mxu1 %v15112_v63  ;;  %v11471_v41 = vpop.f32.mrb[27].mxu0  ;;  %v12457_v46 = vpack.c.bf16 %v4494_v31, %v4491_v30  ;;  %v4150_v30 = vld [vmem:[#allocation20 + $0x18] sm:$0xff] }
 0x96b   : > { %4669 = vmatprep.mubr.f32.mxu0 %v15927_v17 }
 0x96d   : > { %12428 = vmatpush1.bf16.msra.mxu0 %v12427_v54  ;;  %12604 = vmatpush3.bf16.msra.mxu1 %v12603_v34  ;;  %v12461_v54 = vpack.c.bf16 %v4500_v58, %v4497_v2  ;;  %v4449_v34 = vld [vmem:[#allocation20 + $0x4f0] sm:$0xff]  ;;  %v4156_v58 = vld [vmem:[#allocation20 + $0x48] sm:$0xff] }
 0x96e   : > { %12607 = vmatprep.subr.msk.bf16.mxu1 %vm15940_vm15, %v15944_v10  ;;  %12430 = vmatprep.subr.bf16.mxu0 %v12429_v37  ;;  %v4413_v10 = vld [vmem:[#allocation20 + $0x3d0] sm:$0xff]  ;;  %v4452_v37 = vld [vmem:[#allocation20 + $0x508] sm:$0xff] }
 0x96f   : > { %v12439_v55 = vpack.c.bf16 %v4416_v1, %v4413_v10  ;;  %v12463_v41 = vpack.c.bf16 %v4452_v37, %v4449_v34  ;;  %v5298_v10 = vld [vmem:[#allocation20 + $0x928] sm:$0xff]  ;;  %v4153_v2 = vld [vmem:[#allocation20 + $0x30] sm:$0xff] }
 0x970   : > { %11508 = vmatmul.mubr.msk.f32.vlgmr.msra.gmra.mrb[10].mxu1 %vm842_vm12, %v15989_v33  ;;  %v12487_v34 = vpack.c.bf16 %v4156_v58, %v4153_v2  ;;  %v4192_v58 = vld [vmem:[#allocation20 + $0x168] sm:$0xff] }
 0x971   : > { %12432 = vmatpush1.bf16.msra.mxu0 %v12431_v43  ;;  %12610 = vmatpush1.bf16.msk.msra.mxu1 %vm15940_vm15, %v15946_v15  ;;  %v12441_v15 = vpack.c.bf16 %v4470_v11, %v4467_v52  ;;  %v4458_v43 = vld [vmem:[#allocation20 + $0x538] sm:$0xff]  ;;  %v4521_v11 = vld [vmem:[#allocation20 + $0x730] sm:$0xff] }
 0x972   : > { %5167 = vmatprep.mubr.f32.mxu1 %v15927_v17  ;;  %12434 = vmatprep.subr.bf16.mxu0 %v12433_v44  ;;  %v12467_v44 = vpack.c.bf16 %v4458_v43, %v4455_v62  ;;  %v12491_v62 = vpack.c.bf16 %v4162_v40, %v4159_v39  ;;  %v5283_v40 = vld [vmem:[#allocation20 + $0x8b0] sm:$0xff] }
 0x973   : > { %12611 = vmatprep.subr.bf16.mxu1 %v15112_v63 }
 0x974   : > { %10988 = vmatmul.mubr.msk.f32.vlgmr.msra.gmra.mrb[12].mxu1 %vm3994_vm0, %v15896_v18 }
 0x975   : > { %12436 = vmatpush1.bf16.msra.mxu0 %v12435_v50  ;;  %12614 = vmatpush3.bf16.msk.msra.mxu1 %vm15940_vm15, %v15954_v53  ;;  %v4425_v53 = vld [vmem:[#allocation20 + $0x430] sm:$0xff]  ;;  %v4518_v50 = vld [vmem:[#allocation20 + $0x718] sm:$0xff] }
 0x976   : > { %12438 = vmatprep.subr.bf16.mxu0 %v12437_v51  ;;  %11514 = vmatprep.mubr.msk.f32.mxu1 %vm15113_vm7, %v15927_v17  ;;  %v12447_v19 = vpack.c.bf16 %v4428_v8, %v4425_v53  ;;  %v5295_v51 = vld [vmem:[#allocation20 + $0x910] sm:$0xff]  ;;  %v12473_v52 = vpack.c.bf16 %v4518_v50, %v4515_v49  ;;  %v5253_v53 = vld [vmem:[#allocation20 + $0x7c0] sm:$0xff]  ;;  %v5256_v8 = vld [vmem:[#allocation20 + $0x7d8] sm:$0xff] }
 0x977   : > { %v12695_v1 = vpack.c.bf16 %v5298_v10, %v5295_v51  ;;  %v12701_v16 = vpack.c.bf16 %v5256_v8, %v5253_v53  ;;  %v4174_v50 = vld [vmem:[#allocation20 + $0xd8] sm:$0xff]  ;;  %v4181_v10 = vld [vmem:[#allocation20 + $0x110] sm:$0xff]  ;;  %v5322_v8 = vld [vmem:[#allocation20 + $0x9e8] sm:$0xff] }
 0x978   : > { %10982 = vmatmul.mubr.msk.f32.vlgmr.msra.gmra.mrb[28].mxu0 %vm842_vm12, %v15998_v61  ;;  %11515 = vmatmul.mubr.msk.f32.vlgmr.msra.gmra.mrb[14].mxu1 %vm3994_vm0, %v15896_v18  ;;  %v4178_v51 = vld [vmem:[#allocation20 + $0xf8] sm:$0xff]  ;;  %v5319_v53 = vld [vmem:[#allocation20 + $0x9d0] sm:$0xff] }
 0x979   : > { %12440 = vmatpush3.bf16.msra.mxu0 %v12439_v55  ;;  %4740 = vmatprep.mubr.f32.mxu0 %v4337_v32  ;;  %v12455_v32 = vpack.c.bf16 %v4440_v29, %v4437_v27  ;;  %v5247_v55 = vld [vmem:[#allocation20 + $0x790] sm:$0xff]  ;;  %v12481_v27 = vpack.c.bf16 %v4151_v22, %v4148_v21  ;;  %v4147_v29 = vld [vmem:[#allocation20] sm:$0xff]  ;;  %v4186_v22 = vld [vmem:[#allocation20 + $0x138] sm:$0xff] }
 0x97a   : > { %12442 = vmatprep.subr.bf16.mxu0 %v12441_v15  ;;  %v5250_v15 = vld [vmem:[#allocation20 + $0x7a8] sm:$0xff]  ;;  %12696 = vmatprep.subr.bf16.mxu1 %v12695_v1  ;;  %v12483_v3 = vpack.c.bf16 %v4150_v30, %v4147_v29  ;;  %v5328_v29 = vld [vmem:[#allocation20 + $0xa18] sm:$0xff] }
 0x97b   : > { %v12697_v57 = vpack.c.bf16 %v5250_v15, %v5247_v55  ;;  %v12501_v55 = vpack.c.bf16 %v4181_v10, %v4178_v51  ;;  %v4180_v15 = vld [vmem:[#allocation20 + $0x108] sm:$0xff] }
 0x97c   : > { %v4204_v10 = vld [vmem:[#allocation20 + $0x1c8] sm:$0xff] }
 0x97d   : > { %12444 = vmatpush3.bf16.msra.mxu0 %v12443_v7  ;;  %v12699_v7 = vpack.c.bf16 %v5304_v6, %v5301_v5  ;;  %12698 = vmatpush3.bf16.msra.mxu1 %v12697_v57  ;;  %v5316_v57 = vld [vmem:[#allocation20 + $0x9b8] sm:$0xff]  ;;  %v4187_v5 = vld [vmem:[#allocation20 + $0x140] sm:$0xff] }
 0x97e   : > { %12446 = vmatprep.subr.bf16.mxu0 %v12445_v9  ;;  %v12476_v9 = vpack.c.bf16 %v4524_v60, %v4521_v11  ;;  %v5313_v11 = vld [vmem:[#allocation20 + $0x9a0] sm:$0xff]  ;;  %v4184_v60 = vld [vmem:[#allocation20 + $0x128] sm:$0xff] }
 0x97f   : > { %12700 = vmatprep.subr.bf16.mxu1 %v12699_v7  ;;  %v12707_v6 = vpack.c.bf16 %v5316_v57, %v5313_v11  ;;  %v5265_v7 = vld [vmem:[#allocation20 + $0x820] sm:$0xff]  ;;  %v12505_v21 = vpack.c.bf16 %v4187_v5, %v4184_v60  ;;  %v5292_v11 = vld [vmem:[#allocation20 + $0x8f8] sm:$0xff] }
 0x981   : > { %12448 = vmatpush3.bf16.msra.mxu0 %v12447_v19  ;;  %v5307_v19 = vld [vmem:[#allocation20 + $0x970] sm:$0xff]  ;;  %12702 = vmatpush3.bf16.msra.mxu1 %v12701_v16  ;;  %v4183_v16 = vld [vmem:[#allocation20 + $0x120] sm:$0xff] }
 0x982   : > { %12450 = vmatprep.subr.bf16.mxu0 %v12449_v20  ;;  %v5310_v20 = vld [vmem:[#allocation20 + $0x988] sm:$0xff] }
 0x983   : > { %v12703_v23 = vpack.c.bf16 %v5310_v20, %v5307_v19  ;;  %v12711_v19 = vpack.c.bf16 %v5322_v8, %v5319_v53  ;;  %v5271_v20 = vld [vmem:[#allocation20 + $0x850] sm:$0xff] }
 0x985   : > { %12452 = vmatpush3.bf16.msra.mxu0 %v12451_v25  ;;  %12704 = vmatprep.subr.bf16.mxu1 %v12703_v23  ;;  %v5259_v25 = vld [vmem:[#allocation20 + $0x7f0] sm:$0xff]  ;;  %v4190_v23 = vld [vmem:[#allocation20 + $0x158] sm:$0xff] }
 0x986   : > { %12454 = vmatprep.subr.bf16.mxu0 %v12453_v26  ;;  %v5262_v26 = vld [vmem:[#allocation20 + $0x808] sm:$0xff] }
 0x987   : > { %v12705_v31 = vpack.c.bf16 %v5262_v26, %v5259_v25  ;;  %v4193_v25 = vld [vmem:[#allocation20 + $0x170] sm:$0xff] }
 0x988   : > { %v12509_v2 = vpack.c.bf16 %v4193_v25, %v4190_v23  ;;  %v4219_v23 = vld [vmem:[#allocation20 + $0x240] sm:$0xff]  ;;  %v4226_v25 = vld [vmem:[#allocation20 + $0x278] sm:$0xff] }
 0x989   : > { %12456 = vmatpush3.bf16.msra.mxu0 %v12455_v32  ;;  %v4154_v32 = vld [vmem:[#allocation20 + $0x38] sm:$0xff]  ;;  %12706 = vmatpush3.bf16.msra.mxu1 %v12705_v31  ;;  %v5277_v31 = vld [vmem:[#allocation20 + $0x880] sm:$0xff] }
 0x98a   : > { %12458 = vmatprep.subr.bf16.mxu0 %v12457_v46  ;;  %v4157_v46 = vld [vmem:[#allocation20 + $0x50] sm:$0xff]  ;;  %12708 = vmatprep.subr.bf16.mxu1 %v12707_v6  ;;  %v4207_v6 = vld [vmem:[#allocation20 + $0x1e0] sm:$0xff] }
 0x98b   : > { %v12485_v56 = vpack.c.bf16 %v4157_v46, %v4154_v32  ;;  %v5280_v32 = vld [vmem:[#allocation20 + $0x898] sm:$0xff]  ;;  %v12507_v46 = vpack.c.bf16 %v4186_v22, %v4183_v16  ;;  %v4216_v16 = vld [vmem:[#allocation20 + $0x228] sm:$0xff] }
 0x98d   : > { %12460 = vmatpush3.bf16.msra.mxu0 %v12459_v59  ;;  %v4160_v59 = vld [vmem:[#allocation20 + $0x68] sm:$0xff] }
 0x98e   : > { %12462 = vmatprep.subr.bf16.mxu0 %v12461_v54  ;;  %v4163_v54 = vld [vmem:[#allocation20 + $0x80] sm:$0xff] }
 0x98f   : > { %v12489_v37 = vpack.c.bf16 %v4163_v54, %v4160_v59  ;;  %v4196_v59 = vld [vmem:[#allocation20 + $0x188] sm:$0xff]  ;;  %v12717_v54 = vpack.c.bf16 %v5280_v32, %v5277_v31 }
 0x990   : > { %v4228_v31 = vld [vmem:[#allocation20 + $0x288] sm:$0xff] }
 0x991   : > { %12464 = vmatpush3.bf16.msra.mxu0 %v12463_v41  ;;  %v4166_v41 = vld [vmem:[#allocation20 + $0x98] sm:$0xff]  ;;  %v4232_v32 = vld [vmem:[#allocation20 + $0x2a8] sm:$0xff] }
 0x992   : > { %12466 = vmatprep.subr.bf16.mxu0 %v12465_v42  ;;  %v4169_v42 = vld [vmem:[#allocation20 + $0xb0] sm:$0xff] }
 0x993   : > { %v12493_v43 = vpack.c.bf16 %v4169_v42, %v4166_v41  ;;  %v5286_v41 = vld [vmem:[#allocation20 + $0x8c8] sm:$0xff] }
 0x995   : > { %12468 = vmatpush3.bf16.msra.mxu0 %v12467_v44  ;;  %v4165_v44 = vld [vmem:[#allocation20 + $0x90] sm:$0xff] }
 0x996   : > { %12469 = vmatprep.subr.bf16.mxu0 %v15112_v63 }
 0x998   : > { %4741 = vmatmul.mubr.f32.vlgmr.msra.gmra.mrb[30].mxu0 %v15994_v28  ;;  %v4527_v28 = vld [vmem:[#allocation20 + $0x760] sm:$0xff] }
 0x999   : > { %12471 = vmatpush3.bf16.msra.mxu0 %v12470_v48  ;;  %11488 = vmatprep.mubr.msk.f32.mxu0 %vm15113_vm7, %v15927_v17  ;;  %v12479_v24 = vpack.c.bf16 %v4530_v12, %v4527_v28  ;;  %v4175_v48 = vld [vmem:[#allocation20 + $0xe0] sm:$0xff] }
 0x99a   : > { %12472 = vmatprep.subr.bf16.mxu0 %v15112_v63  ;;  %v12497_v49 = vpack.c.bf16 %v4175_v48, %v4172_v47  ;;  %v4202_v47 = vld [vmem:[#allocation20 + $0x1b8] sm:$0xff]  ;;  %v4205_v48 = vld [vmem:[#allocation20 + $0x1d0] sm:$0xff] }
 0x99b   : > { %v12517_v51 = vpack.c.bf16 %v4205_v48, %v4202_v47  ;;  %v4250_v47 = vld [vmem:[#allocation20 + $0x338] sm:$0xff]  ;;  %v4253_v48 = vld [vmem:[#allocation20 + $0x350] sm:$0xff] }
 0x99d   : > { %12474 = vmatpush3.bf16.msra.mxu0 %v12473_v52  ;;  %v4177_v52 = vld [vmem:[#allocation20 + $0xf0] sm:$0xff] }
 0x99e   : > { %12475 = vmatprep.subr.bf16.mxu0 %v15112_v63  ;;  %v12503_v12 = vpack.c.bf16 %v4180_v15, %v4177_v52  ;;  %v5289_v52 = vld [vmem:[#allocation20 + $0x8e0] sm:$0xff] }
 0x99f   : > { %v4211_v15 = vld [vmem:[#allocation20 + $0x200] sm:$0xff]  ;;  %v12725_v60 = vpack.c.bf16 %v5292_v11, %v5289_v52 }
 0x9a0   : > { %v4255_v11 = vld [vmem:[#allocation20 + $0x360] sm:$0xff] }
 0x9a1   : > { %12477 = vmatpush3.bf16.msra.mxu0 %v12476_v9  ;;  %v5268_v9 = vld [vmem:[#allocation20 + $0x838] sm:$0xff] }
 0x9a2   : > { %12478 = vmatprep.subr.bf16.mxu0 %v15112_v63  ;;  %v12709_v28 = vpack.c.bf16 %v5268_v9, %v5265_v7  ;;  %v4210_v7 = vld [vmem:[#allocation20 + $0x1f8] sm:$0xff] }
 0x9a3   : > { %v4214_v9 = vld [vmem:[#allocation20 + $0x218] sm:$0xff]  ;;  %v12523_v53 = vpack.c.bf16 %v4210_v7, %v4207_v6  ;;  %v4261_v6 = vld [vmem:[#allocation20 + $0x390] sm:$0xff]  ;;  %v4264_v7 = vld [vmem:[#allocation20 + $0x3a8] sm:$0xff] }
 0x9a4   : > { %12710 = vmatpush3.bf16.msra.mxu1 %v12709_v28  ;;  %v4217_v28 = vld [vmem:[#allocation20 + $0x230] sm:$0xff] }
 0x9a5   : > { %12480 = vmatpush3.bf16.msra.mxu0 %v12479_v24  ;;  %v5274_v24 = vld [vmem:[#allocation20 + $0x868] sm:$0xff]  ;;  %12712 = vmatprep.subr.bf16.mxu1 %v12711_v19  ;;  %v12525_v8 = vpack.c.bf16 %v4217_v28, %v4214_v9  ;;  %v5249_v28 = vld [vmem:[#allocation20 + $0x7a0] sm:$0xff] }
 0x9a6   : > { %12482 = vmatprep.subr.bf16.mxu0 %v12481_v27  ;;  %v12713_v26 = vpack.c.bf16 %v5274_v24, %v5271_v20  ;;  %v5325_v27 = vld [vmem:[#allocation20 + $0xa00] sm:$0xff]  ;;  %v4220_v19 = vld [vmem:[#allocation20 + $0x248] sm:$0xff]  ;;  %v4222_v24 = vld [vmem:[#allocation20 + $0x258] sm:$0xff] }
 0x9a7   : > { %v12715_v30 = vpack.c.bf16 %v5328_v29, %v5325_v27  ;;  %v4223_v20 = vld [vmem:[#allocation20 + $0x260] sm:$0xff]  ;;  %v12531_v27 = vpack.c.bf16 %v4222_v24, %v4219_v23  ;;  %v5246_v9 = vld [vmem:[#allocation20 + $0x788] sm:$0xff] }
 0x9a8   : > { %11489 = vmatmul.mubr.msk.f32.vlgmr.msra.gmra.mrb[32].mxu0 %vm842_vm12, %v15998_v61  ;;  %v12495_v61 = vpack.c.bf16 %v4168_v45, %v4165_v44  ;;  %12714 = vmatpush3.bf16.msra.mxu1 %v12713_v26  ;;  %v4198_v44 = vld [vmem:[#allocation20 + $0x198] sm:$0xff]  ;;  %v12721_v45 = vpack.c.bf16 %v5286_v41, %v5283_v40  ;;  %v12529_v22 = vpack.c.bf16 %v4223_v20, %v4220_v19  ;;  %v4229_v26 = vld [vmem:[#allocation20 + $0x290] sm:$0xff]  ;;  %v4240_v40 = vld [vmem:[#allocation20 + $0x2e8] sm:$0xff] }
 0x9a9   : > { %12484 = vmatpush1.bf16.msra.mxu0 %v12483_v3  ;;  %4883 = vmatprep.mubr.f32.mxu0 %v15985_v13  ;;  %v4171_v13 = vld [vmem:[#allocation20 + $0xc0] sm:$0xff]  ;;  %v4189_v3 = vld [vmem:[#allocation20 + $0x150] sm:$0xff]  ;;  %v12533_v29 = vpack.c.bf16 %v4229_v26, %v4226_v25  ;;  %v4244_v41 = vld [vmem:[#allocation20 + $0x308] sm:$0xff] }
 0x9aa   : > { %12486 = vmatprep.subr.bf16.mxu0 %v12485_v56  ;;  %v12499_v1 = vpack.c.bf16 %v4174_v50, %v4171_v13  ;;  %v5331_v56 = vld [vmem:[#allocation20 + $0xa30] sm:$0xff]  ;;  %12716 = vmatprep.subr.bf16.mxu1 %v12715_v30  ;;  %v12511_v42 = vpack.c.bf16 %v4192_v58, %v4189_v3  ;;  %v5340_v50 = vld [vmem:[#allocation20 + $0xa78] sm:$0xff]  ;;  %v5254_v23 = vld [vmem:[#allocation20 + $0x7c8] sm:$0xff] }
 0x9ab   : > { %v4201_v13 = vld [vmem:[#allocation20 + $0x1b0] sm:$0xff]  ;;  %v4234_v58 = vld [vmem:[#allocation20 + $0x2b8] sm:$0xff]  ;;  %v5258_v24 = vld [vmem:[#allocation20 + $0x7e8] sm:$0xff] }
 0x9ac   : > { %12718 = vmatpush3.bf16.msra.mxu1 %v12717_v54  ;;  %v12519_v57 = vpack.c.bf16 %v4204_v10, %v4201_v13  ;;  %v4225_v30 = vld [vmem:[#allocation20 + $0x270] sm:$0xff]  ;;  %v4259_v10 = vld [vmem:[#allocation20 + $0x380] sm:$0xff] }
 0x9ad   : > { %12488 = vmatpush1.bf16.msra.mxu0 %v12487_v34  ;;  %v5334_v34 = vld [vmem:[#allocation20 + $0xa48] sm:$0xff]  ;;  %v12535_v3 = vpack.c.bf16 %v4228_v31, %v4225_v30  ;;  %v4241_v54 = vld [vmem:[#allocation20 + $0x2f0] sm:$0xff]  ;;  %v5261_v25 = vld [vmem:[#allocation20 + $0x800] sm:$0xff] }
 0x9ae   : > { %12490 = vmatprep.subr.bf16.mxu0 %v12489_v37  ;;  %v4199_v37 = vld [vmem:[#allocation20 + $0x1a0] sm:$0xff]  ;;  %v12719_v39 = vpack.c.bf16 %v5334_v34, %v5331_v56  ;;  %v4249_v13 = vld [vmem:[#allocation20 + $0x330] sm:$0xff]  ;;  %v5260_v30 = vld [vmem:[#allocation20 + $0x7f8] sm:$0xff] }
 0x9af   : > { %v5255_v19 = vld [vmem:[#allocation20 + $0x7d0] sm:$0xff]  ;;  %v5264_v31 = vld [vmem:[#allocation20 + $0x818] sm:$0xff] }
 0x9b0   : > { %12720 = vmatprep.subr.bf16.mxu1 %v12719_v39  ;;  %v4237_v39 = vld [vmem:[#allocation20 + $0x2d0] sm:$0xff] }
 0x9b1   : > { %12492 = vmatpush1.bf16.msra.mxu0 %v12491_v62  ;;  %v12513_v62 = vpack.c.bf16 %v4199_v37, %v4196_v59  ;;  %12722 = vmatpush3.bf16.msra.mxu1 %v12721_v45  ;;  %v4238_v59 = vld [vmem:[#allocation20 + $0x2d8] sm:$0xff] }
 0x9b2   : > { %12494 = vmatprep.subr.bf16.mxu0 %v12493_v43  ;;  %v4195_v43 = vld [vmem:[#allocation20 + $0x180] sm:$0xff]  ;;  %v12541_v37 = vpack.c.bf16 %v4241_v54, %v4238_v59  ;;  %v4246_v45 = vld [vmem:[#allocation20 + $0x318] sm:$0xff] }
 0x9b3   : > { %v5273_v59 = vld [vmem:[#allocation20 + $0x860] sm:$0xff] }
 0x9b5   : > { %12496 = vmatpush1.bf16.msra.mxu0 %v12495_v61  ;;  %v5337_v61 = vld [vmem:[#allocation20 + $0xa60] sm:$0xff] }
 0x9b6   : > { %12498 = vmatprep.subr.bf16.mxu0 %v12497_v49  ;;  %v12515_v49 = vpack.c.bf16 %v4198_v44, %v4195_v43  ;;  %v4243_v44 = vld [vmem:[#allocation20 + $0x300] sm:$0xff] }
 0x9b9   : > { %12500 = vmatpush1.bf16.msra.mxu0 %v12499_v1  ;;  %v12723_v1 = vpack.c.bf16 %v5340_v50, %v5337_v61  ;;  %v12547_v61 = vpack.c.bf16 %v4246_v45, %v4243_v44  ;;  %v4252_v50 = vld [vmem:[#allocation20 + $0x348] sm:$0xff]  ;;  %v5285_v45 = vld [vmem:[#allocation20 + $0x8c0] sm:$0xff] }
 0x9ba   : > { %12502 = vmatprep.subr.bf16.mxu0 %v12501_v55  ;;  %v4208_v55 = vld [vmem:[#allocation20 + $0x1e8] sm:$0xff] }
 0x9bb   : > { %12724 = vmatprep.subr.bf16.mxu1 %v12723_v1  ;;  %v12521_v5 = vpack.c.bf16 %v4211_v15, %v4208_v55  ;;  %v12551_v1 = vpack.c.bf16 %v4252_v50, %v4249_v13  ;;  %v4258_v55 = vld [vmem:[#allocation20 + $0x378] sm:$0xff]  ;;  %v5282_v44 = vld [vmem:[#allocation20 + $0x8a8] sm:$0xff]  ;;  %v5291_v50 = vld [vmem:[#allocation20 + $0x8f0] sm:$0xff] }
 0x9bc   : > { %12726 = vmatpush3.bf16.msra.mxu1 %v12725_v60  ;;  %v4262_v15 = vld [vmem:[#allocation20 + $0x398] sm:$0xff]  ;;  %v4265_v60 = vld [vmem:[#allocation20 + $0x3b0] sm:$0xff] }
 0x9bd   : > { %12504 = vmatpush1.bf16.msra.mxu0 %v12503_v12  ;;  %12727 = vmatprep.subr.bf16.mxu1 %v15112_v63  ;;  %v4213_v12 = vld [vmem:[#allocation20 + $0x210] sm:$0xff]  ;;  %v5288_v13 = vld [vmem:[#allocation20 + $0x8d8] sm:$0xff] }
 0x9be   : > { %12506 = vmatprep.subr.bf16.mxu0 %v12505_v21  ;;  %v12527_v21 = vpack.c.bf16 %v4216_v16, %v4213_v12  ;;  %v5248_v12 = vld [vmem:[#allocation20 + $0x798] sm:$0xff] }
 0x9bf   : > { %v5252_v16 = vld [vmem:[#allocation20 + $0x7b8] sm:$0xff] }
 0x9c1   : > { %12508 = vmatpush1.bf16.msra.mxu0 %v12507_v46  ;;  %v4235_v46 = vld [vmem:[#allocation20 + $0x2c0] sm:$0xff] }
 0x9c2   : > { %12510 = vmatprep.subr.bf16.mxu0 %v12509_v2  ;;  %v12537_v56 = vpack.c.bf16 %v4235_v46, %v4232_v32  ;;  %v4231_v2 = vld [vmem:[#allocation20 + $0x2a0] sm:$0xff]  ;;  %v5267_v32 = vld [vmem:[#allocation20 + $0x830] sm:$0xff] }
 0x9c3   : > { %v12539_v34 = vpack.c.bf16 %v4234_v58, %v4231_v2  ;;  %v5266_v2 = vld [vmem:[#allocation20 + $0x828] sm:$0xff] }
 0x9c4   : > { %v5270_v58 = vld [vmem:[#allocation20 + $0x848] sm:$0xff] }
 0x9c5   : > { %12512 = vmatpush1.bf16.msra.mxu0 %v12511_v42  ;;  %v4247_v42 = vld [vmem:[#allocation20 + $0x320] sm:$0xff] }
 0x9c6   : > { %12514 = vmatprep.subr.bf16.mxu0 %v12513_v62  ;;  %v12543_v62 = vpack.c.bf16 %v4240_v40, %v4237_v39  ;;  %v12545_v43 = vpack.c.bf16 %v4247_v42, %v4244_v41  ;;  %v5276_v39 = vld [vmem:[#allocation20 + $0x878] sm:$0xff]  ;;  %v5279_v40 = vld [vmem:[#allocation20 + $0x890] sm:$0xff] }
 0x9c7   : > { %v12635_v42 = vpack.c.bf16 %v5279_v40, %v5276_v39 }
 0x9c9   : > { %12516 = vmatpush1.bf16.msra.mxu0 %v12515_v49  ;;  %v12549_v49 = vpack.c.bf16 %v4253_v48, %v4250_v47  ;;  %v12639_v48 = vpack.c.bf16 %v5285_v45, %v5282_v44 }
 0x9ca   : > { %12518 = vmatprep.subr.bf16.mxu0 %v12517_v51  ;;  %v4256_v51 = vld [vmem:[#allocation20 + $0x368] sm:$0xff] }
 0x9cb   : > { %v12553_v52 = vpack.c.bf16 %v4259_v10, %v4256_v51  ;;  %v12643_v10 = vpack.c.bf16 %v5291_v50, %v5288_v13 }
 0x9cd   : > { %12520 = vmatpush1.bf16.msra.mxu0 %v12519_v57  ;;  %v12555_v57 = vpack.c.bf16 %v4258_v55, %v4255_v11  ;;  %v5294_v11 = vld [vmem:[#allocation20 + $0x908] sm:$0xff]  ;;  %v5297_v55 = vld [vmem:[#allocation20 + $0x920] sm:$0xff] }
 0x9ce   : > { %12522 = vmatprep.subr.bf16.mxu0 %v12521_v5  ;;  %v12557_v5 = vpack.c.bf16 %v4265_v60, %v4262_v15  ;;  %v12647_v60 = vpack.c.bf16 %v5297_v55, %v5294_v11  ;;  %v5341_v11 = vld [vmem:[#allocation20 + $0xa80] sm:$0xff] }
 0x9d1   : > { %12524 = vmatpush1.bf16.msra.mxu0 %v12523_v53  ;;  %v12615_v53 = vpack.c.bf16 %v5249_v28, %v5246_v9 }
 0x9d2   : > { %12526 = vmatprep.subr.bf16.mxu0 %v12525_v8  ;;  %v5245_v8 = vld [vmem:[#allocation20 + $0x780] sm:$0xff] }
 0x9d3   : > { %v12617_v20 = vpack.c.bf16 %v5248_v12, %v5245_v8  ;;  %v5306_v8 = vld [vmem:[#allocation20 + $0x968] sm:$0xff]  ;;  %v5309_v12 = vld [vmem:[#allocation20 + $0x980] sm:$0xff] }
 0x9d5   : > { %12528 = vmatpush1.bf16.msra.mxu0 %v12527_v21  ;;  %v12619_v21 = vpack.c.bf16 %v5255_v19, %v5252_v16  ;;  %v12655_v19 = vpack.c.bf16 %v5309_v12, %v5306_v8  ;;  %v5350_v12 = vld [vmem:[#allocation20 + $0xac8] sm:$0xff] }
 0x9d6   : > { %12530 = vmatprep.subr.bf16.mxu0 %v12529_v22  ;;  %v5251_v22 = vld [vmem:[#allocation20 + $0x7b0] sm:$0xff] }
 0x9d7   : > { %v12621_v26 = vpack.c.bf16 %v5254_v23, %v5251_v22  ;;  %v5312_v22 = vld [vmem:[#allocation20 + $0x998] sm:$0xff]  ;;  %v5315_v23 = vld [vmem:[#allocation20 + $0x9b0] sm:$0xff] }
 0x9d9   : > { %12532 = vmatpush1.bf16.msra.mxu0 %v12531_v27  ;;  %v12623_v27 = vpack.c.bf16 %v5261_v25, %v5258_v24  ;;  %v12659_v25 = vpack.c.bf16 %v5315_v23, %v5312_v22 }
 0x9da   : > { %12534 = vmatprep.subr.bf16.mxu0 %v12533_v29  ;;  %v5257_v29 = vld [vmem:[#allocation20 + $0x7e0] sm:$0xff] }
 0x9db   : > { %v12625_v46 = vpack.c.bf16 %v5260_v30, %v5257_v29  ;;  %v5318_v29 = vld [vmem:[#allocation20 + $0x9c8] sm:$0xff]  ;;  %v5321_v30 = vld [vmem:[#allocation20 + $0x9e0] sm:$0xff] }
 0x9dd   : > { %12536 = vmatpush1.bf16.msra.mxu0 %v12535_v3  ;;  %v12627_v3 = vpack.c.bf16 %v5267_v32, %v5264_v31  ;;  %v12663_v32 = vpack.c.bf16 %v5321_v30, %v5318_v29  ;;  %v5355_v29 = vld [vmem:[#allocation20 + $0xaf0] sm:$0xff]  ;;  %v5358_v30 = vld [vmem:[#allocation20 + $0xb08] sm:$0xff] }
 0x9de   : > { %12538 = vmatprep.subr.bf16.mxu0 %v12537_v56  ;;  %v5263_v56 = vld [vmem:[#allocation20 + $0x810] sm:$0xff] }
 0x9df   : > { %v12629_v54 = vpack.c.bf16 %v5266_v2, %v5263_v56  ;;  %v5324_v56 = vld [vmem:[#allocation20 + $0x9f8] sm:$0xff]  ;;  %v5327_v2 = vld [vmem:[#allocation20 + $0xa10] sm:$0xff] }
 0x9e1   : > { %12540 = vmatpush1.bf16.msra.mxu0 %v12539_v34  ;;  %v5269_v34 = vld [vmem:[#allocation20 + $0x840] sm:$0xff] }
 0x9e2   : > { %12542 = vmatprep.subr.bf16.mxu0 %v12541_v37  ;;  %v5272_v37 = vld [vmem:[#allocation20 + $0x858] sm:$0xff] }
 0x9e3   : > { %v12633_v41 = vpack.c.bf16 %v5272_v37, %v5269_v34  ;;  %v5330_v34 = vld [vmem:[#allocation20 + $0xa28] sm:$0xff]  ;;  %v5333_v37 = vld [vmem:[#allocation20 + $0xa40] sm:$0xff] }
 0x9e4   : > { %v12671_v40 = vpack.c.bf16 %v5333_v37, %v5330_v34  ;;  %v5928_v34 = vld [vmem:[#allocation23 + $0x6c8] sm:$0xff]  ;;  %v5931_v37 = vld [vmem:[#allocation23 + $0x6e0] sm:$0xff] }
 0x9e5   : > { %12544 = vmatpush1.bf16.msra.mxu0 %v12543_v62  ;;  %v5275_v62 = vld [vmem:[#allocation20 + $0x870] sm:$0xff] }
 0x9e6   : > { %12546 = vmatprep.subr.bf16.mxu0 %v12545_v43  ;;  %v5278_v43 = vld [vmem:[#allocation20 + $0x888] sm:$0xff] }
 0x9e7   : > { %v12637_v47 = vpack.c.bf16 %v5278_v43, %v5275_v62  ;;  %v5336_v62 = vld [vmem:[#allocation20 + $0xa58] sm:$0xff]  ;;  %v5339_v43 = vld [vmem:[#allocation20 + $0xa70] sm:$0xff] }
 0x9e8   : > { %4884 = vmatmul.mubr.f32.vlgmr.msra.gmra.mrb[28].mxu0 %v15983_v0  ;;  %v12559_v0 = vpack.c.bf16 %v4264_v7, %v4261_v6  ;;  %v5300_v6 = vld [vmem:[#allocation20 + $0x938] sm:$0xff]  ;;  %v5303_v7 = vld [vmem:[#allocation20 + $0x950] sm:$0xff]  ;;  %v12675_v45 = vpack.c.bf16 %v5339_v43, %v5336_v62 }
 0x9e9   : > { %12548 = vmatpush1.bf16.msra.mxu0 %v12547_v61  ;;  %4954 = vmatprep.mubr.f32.mxu0 %v15927_v17  ;;  %v5281_v61 = vld [vmem:[#allocation20 + $0x8a0] sm:$0xff]  ;;  %v12651_v28 = vpack.c.bf16 %v5303_v7, %v5300_v6  ;;  %v5351_v6 = vld [vmem:[#allocation20 + $0xad0] sm:$0xff] }
 0x9ea   : > { %12550 = vmatprep.subr.bf16.mxu0 %v12549_v49  ;;  %v5284_v49 = vld [vmem:[#allocation20 + $0x8b8] sm:$0xff] }
 0x9eb   : > { %v12641_v51 = vpack.c.bf16 %v5284_v49, %v5281_v61  ;;  %v5342_v61 = vld [vmem:[#allocation20 + $0xa88] sm:$0xff]  ;;  %v5345_v49 = vld [vmem:[#allocation20 + $0xaa0] sm:$0xff] }
 0x9ec   : > { %v12679_v50 = vpack.c.bf16 %v5345_v49, %v5342_v61  ;;  %v5930_v62 = vld [vmem:[#allocation23 + $0x6d8] sm:$0xff]  ;;  %v5936_v61 = vld [vmem:[#allocation23 + $0x708] sm:$0xff] }
 0x9ed   : > { %12552 = vmatpush1.bf16.msra.mxu0 %v12551_v1  ;;  %v5287_v1 = vld [vmem:[#allocation20 + $0x8d0] sm:$0xff]  ;;  %v5934_v43 = vld [vmem:[#allocation23 + $0x6f8] sm:$0xff] }
 0x9ee   : > { %12554 = vmatprep.subr.bf16.mxu0 %v12553_v52  ;;  %v5290_v52 = vld [vmem:[#allocation20 + $0x8e8] sm:$0xff] }
 0x9ef   : > { %v12645_v15 = vpack.c.bf16 %v5290_v52, %v5287_v1  ;;  %v5940_v49 = vld [vmem:[#allocation23 + $0x728] sm:$0xff] }
 0x9f1   : > { %12556 = vmatpush1.bf16.msra.mxu0 %v12555_v57  ;;  %v5293_v57 = vld [vmem:[#allocation20 + $0x900] sm:$0xff] }
 0x9f2   : > { %12558 = vmatprep.subr.bf16.mxu0 %v12557_v5  ;;  %v5296_v5 = vld [vmem:[#allocation20 + $0x918] sm:$0xff] }
 0x9f3   : > { %v12649_v9 = vpack.c.bf16 %v5296_v5, %v5293_v57  ;;  %v5346_v57 = vld [vmem:[#allocation20 + $0xaa8] sm:$0xff]  ;;  %v5348_v5 = vld [vmem:[#allocation20 + $0xab8] sm:$0xff] }
 0x9f4   : > { %v12683_v8 = vpack.c.bf16 %v5351_v6, %v5348_v5  ;;  %v5945_v5 = vld [vmem:[#allocation23 + $0x750] sm:$0xff]  ;;  %v5948_v6 = vld [vmem:[#allocation23 + $0x768] sm:$0xff] }
 0x9f5   : > { %12560 = vmatpush1.bf16.msra.mxu0 %v12559_v0  ;;  %v5299_v0 = vld [vmem:[#allocation20 + $0x930] sm:$0xff] }
 0x9f6   : > { %12616 = vmatprep.subr.bf16.mxu0 %v12615_v53  ;;  %v5302_v53 = vld [vmem:[#allocation20 + $0x948] sm:$0xff] }
 0x9f7   : > { %v12653_v16 = vpack.c.bf16 %v5302_v53, %v5299_v0  ;;  %v5347_v0 = vld [vmem:[#allocation20 + $0xab0] sm:$0xff] }
 0x9f8   : > { %10984 = vmatmul.mubr.msk.f32.vlgmr.msra.gmra.mrb[28].mxu0 %vm842_vm12, %v15989_v33  ;;  %v12631_v33 = vpack.c.bf16 %v5273_v59, %v5270_v58  ;;  %v12667_v59 = vpack.c.bf16 %v5327_v2, %v5324_v56  ;;  %v12685_v22 = vpack.c.bf16 %v5350_v12, %v5347_v0  ;;  %v12734_v56 = vpack.c.bf16 %v5358_v30, %v5355_v29  ;;  %v5359_v2 = vld [vmem:[#allocation20 + $0xb10] sm:$0xff] }
 0x9f9   : > { %12618 = vmatpush1.bf16.msra.mxu0 %v12617_v20  ;;  %v5305_v20 = vld [vmem:[#allocation20 + $0x960] sm:$0xff]  ;;  %v5957_v30 = vld [vmem:[#allocation23 + $0x7b0] sm:$0xff] }
 0x9fa   : > { %12620 = vmatprep.subr.bf16.mxu0 %v12619_v21  ;;  %v5308_v21 = vld [vmem:[#allocation20 + $0x978] sm:$0xff] }
 0x9fb   : > { %v12657_v24 = vpack.c.bf16 %v5308_v21, %v5305_v20  ;;  %v5354_v20 = vld [vmem:[#allocation20 + $0xae8] sm:$0xff]  ;;  %v5357_v21 = vld [vmem:[#allocation20 + $0xb00] sm:$0xff] }
 0x9fd   : > { %12622 = vmatpush1.bf16.msra.mxu0 %v12621_v26  ;;  %v5311_v26 = vld [vmem:[#allocation20 + $0x990] sm:$0xff] }
 0x9fe   : > { %12624 = vmatprep.subr.bf16.mxu0 %v12623_v27  ;;  %v5314_v27 = vld [vmem:[#allocation20 + $0x9a8] sm:$0xff] }
 0x9ff   : > { %v12661_v31 = vpack.c.bf16 %v5314_v27, %v5311_v26  ;;  %v12687_v26 = vpack.c.bf16 %v5357_v21, %v5354_v20  ;;  %v5356_v27 = vld [vmem:[#allocation20 + $0xaf8] sm:$0xff]  ;;  %v5952_v20 = vld [vmem:[#allocation23 + $0x788] sm:$0xff]  ;;  %v5955_v21 = vld [vmem:[#allocation23 + $0x7a0] sm:$0xff] }
 0xa01   : > { %12626 = vmatpush1.bf16.msra.mxu0 %v12625_v46  ;;  %v5317_v46 = vld [vmem:[#allocation20 + $0x9c0] sm:$0xff] }
 0xa02   : > { %12628 = vmatprep.subr.bf16.mxu0 %v12627_v3  ;;  %v5320_v3 = vld [vmem:[#allocation20 + $0x9d8] sm:$0xff] }
 0xa03   : > { %v12665_v58 = vpack.c.bf16 %v5320_v3, %v5317_v46  ;;  %v5363_v46 = vld [vmem:[#allocation20 + $0xb30] sm:$0xff] }
 0xa05   : > { %12630 = vmatpush1.bf16.msra.mxu0 %v12629_v54  ;;  %v5323_v54 = vld [vmem:[#allocation20 + $0x9f0] sm:$0xff] }
 0xa06   : > { %12632 = vmatprep.subr.bf16.mxu0 %v12631_v33  ;;  %v5326_v33 = vld [vmem:[#allocation20 + $0xa08] sm:$0xff] }
 0xa07   : > { %v12669_v39 = vpack.c.bf16 %v5326_v33, %v5323_v54  ;;  %v5361_v54 = vld [vmem:[#allocation20 + $0xb20] sm:$0xff]  ;;  %v5364_v33 = vld [vmem:[#allocation20 + $0xb38] sm:$0xff] }
 0xa09   : > { %12634 = vmatpush1.bf16.msra.mxu0 %v12633_v41  ;;  %v5329_v41 = vld [vmem:[#allocation20 + $0xa20] sm:$0xff] }
 0xa0a   : > { %12636 = vmatprep.subr.bf16.mxu0 %v12635_v42  ;;  %v5332_v42 = vld [vmem:[#allocation20 + $0xa38] sm:$0xff] }
 0xa0b   : > { %v12673_v44 = vpack.c.bf16 %v5332_v42, %v5329_v41  ;;  %v12739_v41 = vpack.c.bf16 %v5931_v37, %v5928_v34  ;;  %v5927_v42 = vld [vmem:[#allocation23 + $0x6c0] sm:$0xff]  ;;  %v5972_v34 = vld [vmem:[#allocation23 + $0x828] sm:$0xff] }
 0xa0d   : > { %12638 = vmatpush1.bf16.msra.mxu0 %v12637_v47  ;;  %v5335_v47 = vld [vmem:[#allocation20 + $0xa50] sm:$0xff] }
 0xa0e   : > { %12640 = vmatprep.subr.bf16.mxu0 %v12639_v48  ;;  %v5338_v48 = vld [vmem:[#allocation20 + $0xa68] sm:$0xff] }
 0xa0f   : > { %v12677_v13 = vpack.c.bf16 %v5338_v48, %v5335_v47  ;;  %v5933_v48 = vld [vmem:[#allocation23 + $0x6f0] sm:$0xff] }
 0xa11   : > { %12642 = vmatpush1.bf16.msra.mxu0 %v12641_v51 }
 0xa12   : > { %12644 = vmatprep.subr.bf16.mxu0 %v12643_v10 }
 0xa15   : > { %12646 = vmatpush1.bf16.msra.mxu0 %v12645_v15  ;;  %v5344_v15 = vld [vmem:[#allocation20 + $0xa98] sm:$0xff] }
 0xa16   : > { %12648 = vmatprep.subr.bf16.mxu0 %v12647_v60  ;;  %v5343_v60 = vld [vmem:[#allocation20 + $0xa90] sm:$0xff] }
 0xa19   : > { %12650 = vmatpush1.bf16.msra.mxu0 %v12649_v9  ;;  %v12681_v9 = vpack.c.bf16 %v5344_v15, %v5341_v11  ;;  %v5942_v11 = vld [vmem:[#allocation23 + $0x738] sm:$0xff]  ;;  %v5949_v15 = vld [vmem:[#allocation23 + $0x770] sm:$0xff] }
 0xa1a   : > { %12652 = vmatprep.subr.bf16.mxu0 %v12651_v28  ;;  %v12728_v28 = vpack.c.bf16 %v5346_v57, %v5343_v60 }
 0xa1d   : > { %12654 = vmatpush1.bf16.msra.mxu0 %v12653_v16  ;;  %v5349_v16 = vld [vmem:[#allocation20 + $0xac0] sm:$0xff] }
 0xa1e   : > { %12656 = vmatprep.subr.bf16.mxu0 %v12655_v19  ;;  %v5352_v19 = vld [vmem:[#allocation20 + $0xad8] sm:$0xff] }
 0xa1f   : > { %v12731_v23 = vpack.c.bf16 %v5352_v19, %v5349_v16 }
 0xa21   : > { %12658 = vmatpush1.bf16.msra.mxu0 %v12657_v24  ;;  %v5353_v24 = vld [vmem:[#allocation20 + $0xae0] sm:$0xff] }
 0xa22   : > { %12660 = vmatprep.subr.bf16.mxu0 %v12659_v25  ;;  %v12689_v3 = vpack.c.bf16 %v5356_v27, %v5353_v24  ;;  %v5954_v24 = vld [vmem:[#allocation23 + $0x798] sm:$0xff] }
 0xa25   : > { %12662 = vmatpush1.bf16.msra.mxu0 %v12661_v31 }
 0xa26   : > { %12664 = vmatprep.subr.bf16.mxu0 %v12663_v32  ;;  %v5360_v32 = vld [vmem:[#allocation20 + $0xb18] sm:$0xff] }
 0xa29   : > { %12666 = vmatpush1.bf16.msra.mxu0 %v12665_v58  ;;  %v12691_v58 = vpack.c.bf16 %v5363_v46, %v5360_v32  ;;  %v5964_v32 = vld [vmem:[#allocation23 + $0x7e8] sm:$0xff]  ;;  %v5967_v46 = vld [vmem:[#allocation23 + $0x800] sm:$0xff] }
 0xa2a   : > { %12668 = vmatprep.subr.bf16.mxu0 %v12667_v59  ;;  %v5362_v59 = vld [vmem:[#allocation20 + $0xb28] sm:$0xff] }
 0xa2d   : > { %12670 = vmatpush1.bf16.msra.mxu0 %v12669_v39  ;;  %v12693_v39 = vpack.c.bf16 %v5362_v59, %v5359_v2  ;;  %v5970_v2 = vld [vmem:[#allocation23 + $0x818] sm:$0xff] }
 0xa2e   : > { %12672 = vmatprep.subr.bf16.mxu0 %v12671_v40  ;;  %v12737_v40 = vpack.c.bf16 %v5364_v33, %v5361_v54  ;;  %v5969_v33 = vld [vmem:[#allocation23 + $0x810] sm:$0xff] }
 0xa2f   : > { %v12769_v37 = vpack.c.bf16 %v5972_v34, %v5969_v33  ;;  %v6004_v33 = vld [vmem:[#allocation23 + $0x928] sm:$0xff]  ;;  %v5999_v34 = vld [vmem:[#allocation23 + $0x900] sm:$0xff] }
 0xa31   : > { %12674 = vmatpush1.bf16.msra.mxu0 %v12673_v44  ;;  %v5937_v44 = vld [vmem:[#allocation23 + $0x710] sm:$0xff] }
 0xa32   : > { %12676 = vmatprep.subr.bf16.mxu0 %v12675_v45  ;;  %v12741_v45 = vpack.c.bf16 %v5930_v62, %v5927_v42  ;;  %v12743_v47 = vpack.c.bf16 %v5937_v44, %v5934_v43  ;;  %v5980_v62 = vld [vmem:[#allocation23 + $0x868] sm:$0xff]  ;;  %v5975_v43 = vld [vmem:[#allocation23 + $0x840] sm:$0xff]  ;;  %v5978_v44 = vld [vmem:[#allocation23 + $0x858] sm:$0xff] }
 0xa33   : > { %v11129_v51 = vpop.f32.mrb[8].mxu1 }
 0xa34   : > { %v11130_v10 = vpop.f32.mrb[9].mxu1 }
 0xa35   : > { %v16038_v1 = vadd.f32 %v11130_v10, %v11129_v51  ;;  %12678 = vmatpush1.bf16.msra.mxu0 %v12677_v13  ;;  %v5943_v13 = vld [vmem:[#allocation23 + $0x740] sm:$0xff] }
 0xa36   : > { %12680 = vmatprep.subr.bf16.mxu0 %v12679_v50  ;;  %v12745_v50 = vpack.c.bf16 %v5936_v61, %v5933_v48  ;;  %v12747_v51 = vpack.c.bf16 %v5943_v13, %v5940_v49  ;;  %v5939_v10 = vld [vmem:[#allocation23 + $0x720] sm:$0xff]  ;;  %v5929_v48 = vld [vmem:[#allocation23 + $0x6d0] sm:$0xff]  ;;  %v5932_v61 = vld [vmem:[#allocation23 + $0x6e8] sm:$0xff] }
 0xa37   : > { %v12749_v60 = vpack.c.bf16 %v5942_v11, %v5939_v10  ;;  %v12885_v49 = vpack.c.bf16 %v5932_v61, %v5929_v48  ;;  %v5982_v13 = vld [vmem:[#allocation23 + $0x878] sm:$0xff]  ;;  %v6005_v61 = vld [vmem:[#allocation23 + $0x930] sm:$0xff] }
 0xa38   : > { %v5986_v11 = vld [vmem:[#allocation23 + $0x898] sm:$0xff] }
 0xa39   : > { %v6010_v48 = vld [vmem:[#allocation23 + $0x958] sm:$0xff] }
 0xa43   : > { %v16040_v52 = vpop.f32.mrb[10].mxu1 }
 0xa44   : > { %v11509_v55 = vpop.f32.mrb[11].mxu1 }
 0xa45   : > { %v5946_v55 = vld [vmem:[#allocation23 + $0x758] sm:$0xff] }
 0xa46   : > { %v12751_v57 = vpack.c.bf16 %v5949_v15, %v5946_v55  ;;  %v5981_v55 = vld [vmem:[#allocation23 + $0x870] sm:$0xff]  ;;  %v5984_v15 = vld [vmem:[#allocation23 + $0x888] sm:$0xff] }
 0xa47   : > { %v5169_v7 = vpop.f32.mrb[12].mxu1 }
 0xa48   : > { %v5171_v53 = vpop.f32.mrb[13].mxu1 }
 0xa49   : > { %5432 = vmatprep.mubr.f32.mxu0 %v5171_v53  ;;  %5574 = vmatprep.mubr.f32.mxu1 %v5171_v53 }
 0xa4a   : > { %5433 = vmatmul.mubr.f32.vlgmr.msra.gmra.mrb[28].mxu0 %v5169_v7  ;;  %5575 = vmatmul.mubr.f32.vlgmr.msra.gmra.mrb[16].mxu1 %v5169_v7  ;;  %v12753_v7 = vpack.c.bf16 %v5948_v6, %v5945_v5  ;;  %v5935_v5 = vld [vmem:[#allocation23 + $0x700] sm:$0xff]  ;;  %v5938_v6 = vld [vmem:[#allocation23 + $0x718] sm:$0xff] }
 0xa4b   : > { %12682 = vmatpush1.bf16.msra.mxu0 %v12681_v9  ;;  %12729 = vmatpush3.bf16.msra.mxu1 %v12728_v28  ;;  %v5240_v25 = vpop.f32.mrb[14].mxu1 }
 0xa4c   : > { %12684 = vmatprep.subr.bf16.mxu0 %v12683_v8  ;;  %12730 = vmatprep.subr.bf16.mxu1 %v15112_v63  ;;  %v11516_v31 = vpop.f32.mrb[15].mxu1 }
 0xa4d   : > { %5503 = vmatprep.mubr.f32.mxu0 %v15927_v17  ;;  %11533 = vmatprep.mubr.msk.f32.mxu1 %vm15113_vm7, %v15927_v17  ;;  %v5960_v31 = vld [vmem:[#allocation23 + $0x7c8] sm:$0xff] }
 0xa4f   : > { %12686 = vmatpush1.bf16.msra.mxu0 %v12685_v22  ;;  %12732 = vmatpush3.bf16.msra.mxu1 %v12731_v23  ;;  %v5951_v22 = vld [vmem:[#allocation23 + $0x780] sm:$0xff]  ;;  %v12755_v23 = vpack.c.bf16 %v5955_v21, %v5952_v20 }
 0xa50   : > { %12688 = vmatprep.subr.bf16.mxu0 %v12687_v26  ;;  %12733 = vmatprep.subr.bf16.mxu1 %v15112_v63  ;;  %v5961_v26 = vld [vmem:[#allocation23 + $0x7d0] sm:$0xff]  ;;  %v12757_v27 = vpack.c.bf16 %v5954_v24, %v5951_v22 }
 0xa51   : > { %v5941_v22 = vld [vmem:[#allocation23 + $0x730] sm:$0xff] }
 0xa53   : > { %12690 = vmatpush1.bf16.msra.mxu0 %v12689_v3  ;;  %12735 = vmatpush3.bf16.msra.mxu1 %v12734_v56  ;;  %v12761_v3 = vpack.c.bf16 %v5960_v31, %v5957_v30  ;;  %v5966_v56 = vld [vmem:[#allocation23 + $0x7f8] sm:$0xff]  ;;  %v5993_v31 = vld [vmem:[#allocation23 + $0x8d0] sm:$0xff] }
 0xa54   : > { %12692 = vmatprep.subr.bf16.mxu0 %v12691_v58  ;;  %12736 = vmatprep.subr.bf16.mxu1 %v15112_v63  ;;  %v5973_v58 = vld [vmem:[#allocation23 + $0x830] sm:$0xff]  ;;  %v5998_v30 = vld [vmem:[#allocation23 + $0x8f8] sm:$0xff] }
 0xa55   : > { %v12767_v54 = vpack.c.bf16 %v5973_v58, %v5970_v2  ;;  %v6000_v2 = vld [vmem:[#allocation23 + $0x908] sm:$0xff]  ;;  %v6003_v58 = vld [vmem:[#allocation23 + $0x920] sm:$0xff] }
 0xa57   : > { %12694 = vmatpush1.bf16.msra.mxu0 %v12693_v39  ;;  %12738 = vmatpush3.bf16.msra.mxu1 %v12737_v40  ;;  %v5976_v39 = vld [vmem:[#allocation23 + $0x848] sm:$0xff]  ;;  %v5979_v40 = vld [vmem:[#allocation23 + $0x860] sm:$0xff] }
 0xa58   : > { %12740 = vmatprep.subr.bf16.mxu1 %v12739_v41  ;;  %v5977_v41 = vld [vmem:[#allocation23 + $0x850] sm:$0xff]  ;;  %v12771_v42 = vpack.c.bf16 %v5979_v40, %v5976_v39 }
 0xa5a   : > { %10991 = vmatmul.mubr.msk.f32.vlgmr.msra.gmra.mrb[28].mxu0 %vm842_vm12, %v5240_v25  ;;  %11534 = vmatmul.mubr.msk.f32.vlgmr.msra.gmra.mrb[18].mxu1 %vm842_vm12, %v5240_v25  ;;  %v5958_v25 = vld [vmem:[#allocation23 + $0x7b8] sm:$0xff] }
 0xa5b   : > { %12742 = vmatpush1.bf16.msra.mxu1 %v12741_v45  ;;  %v12759_v29 = vpack.c.bf16 %v5961_v26, %v5958_v25  ;;  %v12883_v45 = vpack.c.bf16 %v5980_v62, %v5977_v41  ;;  %v5994_v25 = vld [vmem:[#allocation23 + $0x8d8] sm:$0xff]  ;;  %v5997_v26 = vld [vmem:[#allocation23 + $0x8f0] sm:$0xff] }
 0xa5c   : > { %12744 = vmatprep.subr.bf16.mxu1 %v12743_v47  ;;  %v12773_v47 = vpack.c.bf16 %v5978_v44, %v5975_v43  ;;  %v5953_v41 = vld [vmem:[#allocation23 + $0x790] sm:$0xff]  ;;  %v6006_v43 = vld [vmem:[#allocation23 + $0x938] sm:$0xff] }
 0xa5d   : > { %12884 = vmatprep.subr.bf16.mxu0 %v12883_v45  ;;  %v6009_v44 = vld [vmem:[#allocation23 + $0x950] sm:$0xff]  ;;  %v6007_v45 = vld [vmem:[#allocation23 + $0x940] sm:$0xff] }
 0xa5e   : > { %12886 = vmatpush3.bf16.msra.mxu0 %v12885_v49  ;;  %v6008_v49 = vld [vmem:[#allocation23 + $0x948] sm:$0xff] }
 0xa5f   : > { %12746 = vmatpush1.bf16.msra.mxu1 %v12745_v50  ;;  %v5985_v50 = vld [vmem:[#allocation23 + $0x890] sm:$0xff] }
 0xa60   : > { %12748 = vmatprep.subr.bf16.mxu1 %v12747_v51  ;;  %v5983_v51 = vld [vmem:[#allocation23 + $0x880] sm:$0xff]  ;;  %v12775_v10 = vpack.c.bf16 %v5985_v50, %v5982_v13  ;;  %v12903_v13 = vpack.c.bf16 %v6010_v48, %v6007_v45  ;;  %v12793_v50 = vpack.c.bf16 %v6008_v49, %v6005_v61 }
 0xa63   : > { %12750 = vmatpush1.bf16.msra.mxu1 %v12749_v60  ;;  %v12887_v60 = vpack.c.bf16 %v5986_v11, %v5983_v51  ;;  %v5959_v51 = vld [vmem:[#allocation23 + $0x7c0] sm:$0xff] }
 0xa64   : > { %12752 = vmatprep.subr.bf16.mxu1 %v12751_v57  ;;  %v12777_v57 = vpack.c.bf16 %v5984_v15, %v5981_v55  ;;  %v6012_v55 = vld [vmem:[#allocation23 + $0x968] sm:$0xff]  ;;  %v6015_v15 = vld [vmem:[#allocation23 + $0x980] sm:$0xff] }
 0xa65   : > { %12888 = vmatprep.subr.bf16.mxu0 %v12887_v60  ;;  %v6013_v60 = vld [vmem:[#allocation23 + $0x970] sm:$0xff] }
 0xa67   : > { %12754 = vmatpush1.bf16.msra.mxu1 %v12753_v7  ;;  %v12889_v7 = vpack.c.bf16 %v5938_v6, %v5935_v5  ;;  %v6016_v5 = vld [vmem:[#allocation23 + $0x988] sm:$0xff]  ;;  %v6011_v6 = vld [vmem:[#allocation23 + $0x960] sm:$0xff] }
 0xa68   : > { %12756 = vmatprep.subr.bf16.mxu1 %v12755_v23  ;;  %v5944_v23 = vld [vmem:[#allocation23 + $0x748] sm:$0xff] }
 0xa69   : > { %12890 = vmatpush3.bf16.msra.mxu0 %v12889_v7  ;;  %v12893_v24 = vpack.c.bf16 %v5944_v23, %v5941_v22  ;;  %v6014_v7 = vld [vmem:[#allocation23 + $0x978] sm:$0xff] }
 0xa6b   : > { %v11085_v9 = vpop.f32.mrb[30].mxu0  ;;  %12758 = vmatpush1.bf16.msra.mxu1 %v12757_v27  ;;  %v5995_v27 = vld [vmem:[#allocation23 + $0x8e0] sm:$0xff] }
 0xa6c   : > { %v11086_v28 = vpop.f32.mrb[31].mxu0  ;;  %12760 = vmatprep.subr.bf16.mxu1 %v12759_v29  ;;  %v12783_v29 = vpack.c.bf16 %v5997_v26, %v5994_v25  ;;  %v6020_v25 = vld [vmem:[#allocation23 + $0x9a8] sm:$0xff]  ;;  %v5971_v26 = vld [vmem:[#allocation23 + $0x820] sm:$0xff] }
 0xa6d   : > { %v11087_v0 = vadd.f32 %v11086_v28, %v11085_v9  ;;  %v5988_v9 = vld [vmem:[#allocation23 + $0x8a8] sm:$0xff]  ;;  %v5991_v28 = vld [vmem:[#allocation23 + $0x8c0] sm:$0xff] }
 0xa6f   : > { %12762 = vmatpush1.bf16.msra.mxu1 %v12761_v3 }
 0xa7b   : > { %v4812_v53 = vpop.f32.mrb[32].mxu0 }
 0xa7c   : > { %v4813_v8 = vadd.f32 %v11087_v0, %v4812_v53  ;;  %v11490_v12 = vpop.f32.mrb[33].mxu0  ;;  %v5989_v0 = vld [vmem:[#allocation23 + $0x8b0] sm:$0xff]  ;;  %v12779_v53 = vpack.c.bf16 %v5991_v28, %v5988_v9  ;;  %v12907_v9 = vpack.c.bf16 %v6016_v5, %v6013_v60  ;;  %v12797_v28 = vpack.c.bf16 %v6014_v7, %v6011_v6 }
 0xa7d   : > { %v5987_v12 = vld [vmem:[#allocation23 + $0x8a0] sm:$0xff] }
 0xa7e   : > { %v5028_v16 = vadd.f32 %v16038_v1, %v4813_v8  ;;  %v12763_v1 = vpack.c.bf16 %v5967_v46, %v5964_v32  ;;  %v5992_v8 = vld [vmem:[#allocation23 + $0x8c8] sm:$0xff]  ;;  %v12895_v46 = vpack.c.bf16 %v5998_v30, %v5995_v27 }
 0xa7f   : > { %v12891_v20 = vpack.c.bf16 %v5992_v8, %v5989_v0  ;;  %v5996_v32 = vld [vmem:[#allocation23 + $0x8e8] sm:$0xff]  ;;  %v5965_v0 = vld [vmem:[#allocation23 + $0x7f0] sm:$0xff]  ;;  %v6018_v8 = vld [vmem:[#allocation23 + $0x998] sm:$0xff] }
 0xa80   : > { %v16052_v19 = vadd.f32 %v16040_v52, %v5028_v16  ;;  %v5963_v52 = vld [vmem:[#allocation23 + $0x7e0] sm:$0xff]  ;;  %12764 = vmatprep.subr.bf16.mxu1 %v12763_v1  ;;  %v5990_v16 = vld [vmem:[#allocation23 + $0x8b8] sm:$0xff]  ;;  %v12785_v3 = vpack.c.bf16 %v5996_v32, %v5993_v31  ;;  %v6024_v31 = vld [vmem:[#allocation23 + $0x9c8] sm:$0xff] }
 0xa81   : > { %v12765_v59 = vpack.c.bf16 %v5966_v56, %v5963_v52  ;;  %v12781_v21 = vpack.c.bf16 %v5990_v16, %v5987_v12  ;;  %12892 = vmatprep.subr.bf16.mxu0 %v12891_v20  ;;  %v5947_v1 = vld [vmem:[#allocation23 + $0x760] sm:$0xff]  ;;  %v5950_v52 = vld [vmem:[#allocation23 + $0x778] sm:$0xff]  ;;  %v6021_v16 = vld [vmem:[#allocation23 + $0x9b0] sm:$0xff] }
 0xa82   : > { %12894 = vmatpush3.bf16.msra.mxu0 %v12893_v24  ;;  %v12897_v56 = vpack.c.bf16 %v5950_v52, %v5947_v1  ;;  %v6019_v20 = vld [vmem:[#allocation23 + $0x9a0] sm:$0xff]  ;;  %v12799_v22 = vpack.c.bf16 %v6021_v16, %v6018_v8  ;;  %v6017_v24 = vld [vmem:[#allocation23 + $0x990] sm:$0xff]  ;;  %v6076_v1 = vld [vmem:[#allocation23 + $0xb68] sm:$0xff] }
 0xa83   : > { %12766 = vmatpush1.bf16.msra.mxu1 %v12765_v59  ;;  %12896 = vmatprep.subr.bf16.mxu0 %v12895_v46  ;;  %v6001_v59 = vld [vmem:[#allocation23 + $0x910] sm:$0xff]  ;;  %v12801_v27 = vpack.c.bf16 %v6020_v25, %v6017_v24  ;;  %v6027_v32 = vld [vmem:[#allocation23 + $0x9e0] sm:$0xff]  ;;  %v6030_v16 = vld [vmem:[#allocation23 + $0x9f8] sm:$0xff] }
 0xa84   : > { %12768 = vmatprep.subr.bf16.mxu1 %v12767_v54  ;;  %v12787_v54 = vpack.c.bf16 %v6003_v58, %v6000_v2  ;;  %v12899_v39 = vpack.c.bf16 %v6004_v33, %v6001_v59  ;;  %v6073_v46 = vld [vmem:[#allocation23 + $0xb50] sm:$0xff]  ;;  %v5653_v59 = vld [vmem:[#allocation22] sm:$0x7]  ;;  %v16058_v33 = vsub.s32 2, %v15761_v35 }
 0xa85   : > { %v12915_v52 = vpack.c.bf16 %v6076_v1, %v6073_v46  ;;  %v6025_v8 = vld [vmem:[#allocation23 + $0x9d0] sm:$0xff]  ;;  %v5924_v25 = vld [vmem:[#allocation6 + $0x18] sm:$0x1e] }
 0xa86   : > { %12898 = vmatpush3.bf16.msra.mxu0 %v12897_v56  ;;  %v6031_v1 = vld [vmem:[#allocation23 + $0xa00] sm:$0xff] }
 0xa87   : > { %12770 = vmatpush1.bf16.msra.mxu1 %v12769_v37  ;;  %v6002_v37 = vld [vmem:[#allocation23 + $0x918] sm:$0xff]  ;;  %12900 = vmatprep.subr.bf16.mxu0 %v12899_v39 }
 0xa88   : > { %12772 = vmatprep.subr.bf16.mxu1 %v12771_v42  ;;  %v12789_v40 = vpack.c.bf16 %v6002_v37, %v5999_v34  ;;  %v5956_v42 = vld [vmem:[#allocation23 + $0x7a8] sm:$0xff]  ;;  %v5662_v34 = vrot.slane %v5653_v59, %v15767_v38 }
 0xa89   : > { %v12901_v62 = vpack.c.bf16 %v5956_v42, %v5953_v41  ;;  %v5666_v42 = vrot.slane %v5653_v59, %v16058_v33 }
 0xa8b   : > { %12774 = vmatpush1.bf16.msra.mxu1 %v12773_v47  ;;  %12902 = vmatpush3.bf16.msra.mxu0 %v12901_v62  ;;  %v12791_v47 = vpack.c.bf16 %v6009_v44, %v6006_v43 }
 0xa8c   : > { %12776 = vmatprep.subr.bf16.mxu1 %v12775_v10  ;;  %v5962_v10 = vld [vmem:[#allocation23 + $0x7d8] sm:$0xff]  ;;  %12904 = vmatprep.subr.bf16.mxu0 %v12903_v13 }
 0xa8d   : > { %v12905_v11 = vpack.c.bf16 %v5962_v10, %v5959_v51 }
 0xa8f   : > { %12778 = vmatpush1.bf16.msra.mxu1 %v12777_v57  ;;  %12906 = vmatpush3.bf16.msra.mxu0 %v12905_v11  ;;  %v12795_v57 = vpack.c.bf16 %v6015_v15, %v6012_v55 }
 0xa90   : > { %12780 = vmatprep.subr.bf16.mxu1 %v12779_v53  ;;  %v5968_v53 = vld [vmem:[#allocation23 + $0x808] sm:$0xff]  ;;  %12908 = vmatprep.subr.bf16.mxu0 %v12907_v9 }
 0xa91   : > { %v12909_v12 = vpack.c.bf16 %v5968_v53, %v5965_v0  ;;  %v6023_v0 = vld [vmem:[#allocation23 + $0x9c0] sm:$0xff]  ;;  %v6026_v53 = vld [vmem:[#allocation23 + $0x9d8] sm:$0xff] }
 0xa93   : > { %12782 = vmatpush1.bf16.msra.mxu1 %v12781_v21  ;;  %v6022_v21 = vld [vmem:[#allocation23 + $0x9b8] sm:$0xff]  ;;  %12910 = vmatpush3.bf16.msra.mxu0 %v12909_v12  ;;  %v6028_v12 = vld [vmem:[#allocation23 + $0x9e8] sm:$0xff] }
 0xa94   : > { %12784 = vmatprep.subr.bf16.mxu1 %v12783_v29  ;;  %v12911_v23 = vpack.c.bf16 %v6022_v21, %v6019_v20  ;;  %v5974_v29 = vld [vmem:[#allocation23 + $0x838] sm:$0xff]  ;;  %v6033_v20 = vld [vmem:[#allocation23 + $0xa10] sm:$0xff] }
 0xa95   : > { %v12913_v30 = vpack.c.bf16 %v5974_v29, %v5971_v26  ;;  %v12917_v29 = vpack.c.bf16 %v6028_v12, %v6025_v8  ;;  %v12807_v46 = vpack.c.bf16 %v6033_v20, %v6030_v16  ;;  %v6052_v8 = vld [vmem:[#allocation23 + $0xaa8] sm:$0xff]  ;;  %v6054_v12 = vld [vmem:[#allocation23 + $0xab8] sm:$0xff]  ;;  %v6057_v16 = vld [vmem:[#allocation23 + $0xad0] sm:$0xff] }
 0xa96   : > { %12912 = vmatprep.subr.bf16.mxu0 %v12911_v23  ;;  %v6082_v23 = vld [vmem:[#allocation23 + $0xb98] sm:$0xff]  ;;  %v6103_v20 = vld [vmem:[#allocation23 + $0xc40] sm:$0xff] }
 0xa97   : > { %12786 = vmatpush1.bf16.msra.mxu1 %v12785_v3  ;;  %12914 = vmatpush3.bf16.msra.mxu0 %v12913_v30  ;;  %v12803_v3 = vpack.c.bf16 %v6027_v32, %v6024_v31  ;;  %v6029_v30 = vld [vmem:[#allocation23 + $0x9f0] sm:$0xff]  ;;  %v6032_v31 = vld [vmem:[#allocation23 + $0xa08] sm:$0xff] }
 0xa98   : > { %12788 = vmatprep.subr.bf16.mxu1 %v12787_v54  ;;  %12916 = vmatprep.subr.bf16.mxu0 %v12915_v52  ;;  %v5658_v54 = vrot.slane %v5653_v59, %v15764_v36  ;;  %v6034_v52 = vld [vmem:[#allocation23 + $0xa18] sm:$0xff]  ;;  %v6088_v59 = vld [vmem:[#allocation23 + $0xbc8] sm:$0xff] }
 0xa9b   : > { %12790 = vmatpush1.bf16.msra.mxu1 %v12789_v40 }
 0xa9c   : > { %12792 = vmatprep.subr.bf16.mxu1 %v12791_v47 }
 0xa9f   : > { %12794 = vmatpush1.bf16.msra.mxu1 %v12793_v50 }
 0xaa0   : > { %12796 = vmatprep.subr.bf16.mxu1 %v12795_v57 }
 0xaa3   : > { %12798 = vmatpush1.bf16.msra.mxu1 %v12797_v28 }
 0xaa4   : > { %12800 = vmatprep.subr.bf16.mxu1 %v12799_v22  ;;  %v6079_v22 = vld [vmem:[#allocation23 + $0xb80] sm:$0xff] }
 0xaa7   : > { %12802 = vmatpush1.bf16.msra.mxu1 %v12801_v27  ;;  %v12805_v27 = vpack.c.bf16 %v6026_v53, %v6023_v0  ;;  %v6049_v53 = vld [vmem:[#allocation23 + $0xa90] sm:$0xff] }
 0xaa8   : > { %12804 = vmatprep.subr.bf16.mxu1 %v12803_v3  ;;  %v12919_v3 = vpack.c.bf16 %v6082_v23, %v6079_v22  ;;  %v12933_v23 = vpack.c.bf16 %v6052_v8, %v6049_v53  ;;  %v6080_v53 = vld [vmem:[#allocation23 + $0xb88] sm:$0xff]  ;;  %v6127_v8 = vld [vmem:[#allocation23 + $0xd00] sm:$0xff] }
 0xb1d   : > { %v11176_v56 = vpop.f32.mrb[16].mxu1 }
 0xb1e   : > { %v11177_v2 = vpop.f32.mrb[17].mxu1 }
 0xb1f   : > { %v11178_v58 = vadd.f32 %v11177_v2, %v11176_v56  ;;  %v6036_v56 = vld [vmem:[#allocation23 + $0xa28] sm:$0xff]  ;;  %v6039_v2 = vld [vmem:[#allocation23 + $0xa40] sm:$0xff] }
 0xb2d   : > { %v5505_v37 = vpop.f32.mrb[28].mxu0  ;;  %v5646_v39 = vpop.f32.mrb[18].mxu1 }
 0xb2e   : > { %v5670_v40 = vadd.f32 %v5658_v54, %v5505_v37  ;;  %v5647_v41 = vadd.f32 %v11178_v58, %v5646_v39  ;;  %v5507_v62 = vpop.f32.mrb[29].mxu0  ;;  %v11535_v43 = vpop.f32.mrb[19].mxu1  ;;  %v6085_v58 = vld [vmem:[#allocation23 + $0xbb0] sm:$0xff]  ;;  %v6151_v54 = vrot.slane %v5924_v25, 1  ;;  %v12921_v37 = vpack.c.bf16 %v6034_v52, %v6031_v1  ;;  %v6035_v39 = vld [vmem:[#allocation23 + $0xa20] sm:$0xff]  ;;  %v6056_v25 = vld [vmem:[#allocation23 + $0xac8] sm:$0xff] }
 0xb2f   : > { %v5671_v44 = vadd.f32 %v5662_v34, %v5507_v62  ;;  %v12809_v34 = vpack.c.bf16 %v6032_v31, %v6029_v30  ;;  %v6037_v62 = vld [vmem:[#allocation23 + $0xa30] sm:$0xff]  ;;  %v6040_v43 = vld [vmem:[#allocation23 + $0xa48] sm:$0xff]  ;;  %v6058_v30 = vld [vmem:[#allocation23 + $0xad8] sm:$0xff] }
 0xb30   : > { %v5673_v45 = vmul.f32 0.5, %v5670_v40  ;;  %v5652_v47 = vadd.f32 %v5647_v41, %v16052_v19  ;;  %v12811_v41 = vpack.c.bf16 %v6039_v2, %v6036_v56  ;;  %v6060_v31 = vld [vmem:[#allocation23 + $0xae8] sm:$0xff]  ;;  %v6059_v56 = vld [vmem:[#allocation23 + $0xae0] sm:$0xff]  ;;  %v6062_v2 = vld [vmem:[#allocation23 + $0xaf8] sm:$0xff] }
 0xb31   : > { %v5674_v48 = vmul.f32 0.5, %v5671_v44 }
 0xb32   : > { %14591 = vtanh.f32 %v5673_v45  ;;  %v5672_v61 = vadd.f32 %v5666_v42, %v5652_v47  ;;  %v12923_v42 = vpack.c.bf16 %v6088_v59, %v6085_v58  ;;  %v6045_v45 = vld [vmem:[#allocation23 + $0xa70] sm:$0xff]  ;;  %v6091_v47 = vld [vmem:[#allocation23 + $0xbe0] sm:$0xff] }
 0xb33   : > { %14593 = vtanh.f32 %v5674_v48  ;;  %v6094_v48 = vld [vmem:[#allocation23 + $0xbf8] sm:$0xff] }
 0xb34   : > { %v5675_v49 = vmul.f32 0.5, %v5672_v61 }
 0xb36   : > { %14595 = vtanh.f32 %v5675_v49  ;;  %v12925_v49 = vpack.c.bf16 %v6040_v43, %v6037_v62  ;;  %v6065_v43 = vld [vmem:[#allocation23 + $0xb10] sm:$0xff] }
 0xb3c   : > { %v14592_v13 = vpop.eup %14591 }
 0xb3d   : > { %v14594_v50 = vpop.eup %14593  ;;  %v5679_v51 = vadd.f32 1.0, %v14592_v13  ;;  %v6041_v13 = vld [vmem:[#allocation23 + $0xa50] sm:$0xff] }
 0xb3e   : > { %v5680_v10 = vadd.f32 1.0, %v14594_v50  ;;  %v6044_v50 = vld [vmem:[#allocation23 + $0xa68] sm:$0xff] }
 0xb3f   : > { %v5682_v11 = vmul.f32 0.5, %v5679_v51 }
 0xb40   : > { %v14596_v55 = vpop.eup %14595  ;;  %v5683_v15 = vmul.f32 0.5, %v5680_v10  ;;  %v12927_v10 = vpack.c.bf16 %v6094_v48, %v6091_v47  ;;  %v6068_v47 = vld [vmem:[#allocation23 + $0xb28] sm:$0xff]  ;;  %v6067_v48 = vld [vmem:[#allocation23 + $0xb20] sm:$0xff] }
 0xb41   : > { %v5685_v60 = vmul.f32 %v5682_v11, %v5670_v40  ;;  %v5681_v57 = vadd.f32 1.0, %v14596_v55  ;;  %v6038_v40 = vld [vmem:[#allocation23 + $0xa38] sm:$0xff]  ;;  %v6043_v11 = vld [vmem:[#allocation23 + $0xa60] sm:$0xff] }
 0xb42   : > { %v5686_v5 = vmul.f32 %v5683_v15, %v5671_v44  ;;  %v6042_v44 = vld [vmem:[#allocation23 + $0xa58] sm:$0xff]  ;;  %v6048_v15 = vld [vmem:[#allocation23 + $0xa88] sm:$0xff] }
 0xb43   : > { %v5691_v6 = vrot.slane %v5685_v60, 7  ;;  %v5684_v7 = vmul.f32 0.5, %v5681_v57  ;;  %v12815_v51 = vpack.c.bf16 %v6045_v45, %v6042_v44  ;;  %v6046_v55 = vld [vmem:[#allocation23 + $0xa78] sm:$0xff]  ;;  %v6051_v60 = vld [vmem:[#allocation23 + $0xaa0] sm:$0xff]  ;;  %v6097_v57 = vld [vmem:[#allocation23 + $0xc10] sm:$0xff] }
 0xb44   : > { %v5692_v9 = vrot.slane %v5686_v5, 7  ;;  %v6100_v5 = vld [vmem:[#allocation23 + $0xc28] sm:$0xff] }
 0xb45   : > { %5697 = vst [vmem:[#allocation6] sm:$0x1e] %v5691_v6  ;;  %v5687_v19 = vmul.f32 %v5684_v7, %v5672_v61  ;;  %v12813_v61 = vpack.c.bf16 %v6038_v40, %v6035_v39  ;;  %v12817_v6 = vpack.c.bf16 %v6044_v50, %v6041_v13  ;;  %v12929_v7 = vpack.c.bf16 %v6046_v55, %v6043_v11  ;;  %v6069_v39 = vld [vmem:[#allocation23 + $0xb30] sm:$0xff]  ;;  %v6115_v40 = vld [vmem:[#allocation23 + $0xca0] sm:$0xff]  ;;  %v6074_v55 = vld [vmem:[#allocation23 + $0xb58] sm:$0xff] }
 0xb46   : > { %5698 = vst [vmem:[#allocation6 + $0x8] sm:$0x1e] %v5692_v9  ;;  %v6047_v9 = vld [vmem:[#allocation23 + $0xa80] sm:$0xff]  ;;  %v12931_v0 = vpack.c.bf16 %v6100_v5, %v6097_v57  ;;  %v12833_v50 = vpack.c.bf16 %v6068_v47, %v6065_v43  ;;  %v6078_v5 = vld [vmem:[#allocation23 + $0xb78] sm:$0xff]  ;;  %v5707_v43 = vld [vmem:[#allocation23 + $0x10] sm:$0xff] }
 0xb47   : > { %v5693_v28 = vrot.slane %v5687_v19, 7  ;;  %v6050_v19 = vld [vmem:[#allocation23 + $0xa98] sm:$0xff]  ;;  %v6075_v13 = vld [vmem:[#allocation23 + $0xb60] sm:$0xff]  ;;  %v6105_v47 = vld [vmem:[#allocation23 + $0xc50] sm:$0xff] }
 0xb48   : > { %v12821_v22 = vpack.c.bf16 %v6050_v19, %v6047_v9  ;;  %v6077_v19 = vld [vmem:[#allocation23 + $0xb70] sm:$0xff] }
 0xb49   : > { %5699 = vst [vmem:[#allocation6 + $0x10] sm:$0x1e] %v5693_v28  ;;  %v12819_v28 = vpack.c.bf16 %v6051_v60, %v6048_v15  ;;  %v6121_v15 = vld [vmem:[#allocation23 + $0xcd0] sm:$0xff]  ;;  %v6124_v60 = vld [vmem:[#allocation23 + $0xce8] sm:$0xff] }
 0xb4a   : > { %v12948_v9 = vpack.c.bf16 %v6124_v60, %v6121_v15  ;;  %v5716_v15 = vld [vmem:[#allocation23 + $0x58] sm:$0xff]  ;;  %v6108_v60 = vld [vmem:[#allocation23 + $0xc68] sm:$0xff] }
 0xb4c   : > { %v5921_v21 = vld [vmem:[#allocation6] sm:$0x1e] }
 0xb4d   : > { %v5922_v24 = vld [vmem:[#allocation6 + $0x8] sm:$0x1e]  ;;  %v6148_v32 = vrot.slane %v5921_v21, 1  ;;  %v6106_v21 = vld [vmem:[#allocation23 + $0xc58] sm:$0xff] }
 0xb4e   : > { %v6149_v26 = vrot.slane %v5922_v24, 1  ;;  %v6053_v24 = vld [vmem:[#allocation23 + $0xab0] sm:$0xff] }
 0xb4f   : > { %v12825_v1 = vpack.c.bf16 %v6056_v25, %v6053_v24  ;;  %v6086_v25 = vld [vmem:[#allocation23 + $0xbb8] sm:$0xff] }
 0xb50   : > { %6223 = vmatprep.mubr.f32.mxu1 %v6149_v26  ;;  %6436 = vmatprep.mubr.f32.mxu0 %v6149_v26  ;;  %v12823_v26 = vpack.c.bf16 %v6057_v16, %v6054_v12  ;;  %v16063_v57 = vld [vmem:[#allocation6 + $0x10] sm:$0x1e]  ;;  %v6084_v16 = vld [vmem:[#allocation23 + $0xba8] sm:$0xff] }
 0xb51   : > { %6224 = vmatmul.mubr.f32.vlgmr.msra.gmra.mrb[20].mxu1 %v6148_v32  ;;  %6437 = vmatmul.mubr.f32.vlgmr.msra.gmra.mrb[34].mxu0 %v6148_v32  ;;  %v6063_v32 = vld [vmem:[#allocation23 + $0xb00] sm:$0xff]  ;;  %v6130_v12 = vld [vmem:[#allocation23 + $0xd18] sm:$0xff] }
 0xb52   : > { %12806 = vmatpush1.bf16.msra.mxu1 %v12805_v27  ;;  %12918 = vmatpush3.bf16.msra.mxu0 %v12917_v29  ;;  %v12935_v27 = vpack.c.bf16 %v6106_v21, %v6103_v20  ;;  %v6055_v29 = vld [vmem:[#allocation23 + $0xac0] sm:$0xff]  ;;  %v12827_v58 = vpack.c.bf16 %v6063_v32, %v6060_v31  ;;  %v12841_v21 = vpack.c.bf16 %v6080_v53, %v6077_v19  ;;  %v16080_v19 = vld [vmem:[#allocation6 + $0x8] sm:$0xf] }
 0xb53   : > { %12808 = vmatprep.subr.bf16.mxu1 %v12807_v46  ;;  %12920 = vmatprep.subr.bf16.mxu0 %v12919_v3  ;;  %v6109_v46 = vld [vmem:[#allocation23 + $0xc70] sm:$0xff]  ;;  %v6112_v3 = vld [vmem:[#allocation23 + $0xc88] sm:$0xff]  ;;  %v12937_v52 = vpack.c.bf16 %v6058_v30, %v6055_v29  ;;  %v6087_v20 = vld [vmem:[#allocation23 + $0xbc0] sm:$0xff] }
 0xb54   : > { %6506 = vmatprep.mubr.f32.mxu0 %v6151_v54  ;;  %6294 = vmatprep.mubr.f32.mxu1 %v6151_v54  ;;  %v12939_v59 = vpack.c.bf16 %v6112_v3, %v6109_v46  ;;  %v6061_v54 = vld [vmem:[#allocation23 + $0xaf0] sm:$0xff]  ;;  %v12843_v24 = vpack.c.bf16 %v6087_v20, %v6084_v16  ;;  %v6090_v29 = vld [vmem:[#allocation23 + $0xbd8] sm:$0xff]  ;;  %v6092_v3 = vld [vmem:[#allocation23 + $0xbe8] sm:$0xff] }
 0xb55   : > { %v6093_v30 = vld [vmem:[#allocation23 + $0xbf0] sm:$0xff] }
 0xb56   : > { %12810 = vmatpush1.bf16.msra.mxu1 %v12809_v34  ;;  %12922 = vmatpush3.bf16.msra.mxu0 %v12921_v37  ;;  %v6064_v34 = vld [vmem:[#allocation23 + $0xb08] sm:$0xff]  ;;  %v6066_v37 = vld [vmem:[#allocation23 + $0xb18] sm:$0xff]  ;;  %v6089_v46 = vld [vmem:[#allocation23 + $0xbd0] sm:$0xff] }
 0xb57   : > { %12812 = vmatprep.subr.bf16.mxu1 %v12811_v41  ;;  %12924 = vmatprep.subr.bf16.mxu0 %v12923_v42  ;;  %v6118_v41 = vld [vmem:[#allocation23 + $0xcb8] sm:$0xff]  ;;  %v12829_v42 = vpack.c.bf16 %v6062_v2, %v6059_v56  ;;  %v12941_v62 = vpack.c.bf16 %v6064_v34, %v6061_v54  ;;  %v12831_v44 = vpack.c.bf16 %v6069_v39, %v6066_v37  ;;  %v6096_v2 = vld [vmem:[#allocation23 + $0xc08] sm:$0xff] }
 0xb58   : > { %v12943_v45 = vpack.c.bf16 %v6118_v41, %v6115_v40  ;;  %v6142_v56 = vld [vmem:[#allocation23 + $0xd78] sm:$0xff]  ;;  %v5758_v54 = vld [vmem:[#allocation23 + $0x1a8] sm:$0xff]  ;;  %v12849_v34 = vpack.c.bf16 %v6092_v3, %v6089_v46  ;;  %v6095_v40 = vld [vmem:[#allocation23 + $0xc00] sm:$0xff] }
 0xb59   : > { %v16073_v39 = vld [vmem:[#allocation6 + $0x20] sm:$0x1e] }
 0xb5a   : > { %12814 = vmatpush1.bf16.msra.mxu1 %v12813_v61  ;;  %12926 = vmatpush3.bf16.msra.mxu0 %v12925_v49  ;;  %v6070_v61 = vld [vmem:[#allocation23 + $0xb38] sm:$0xff]  ;;  %v6072_v49 = vld [vmem:[#allocation23 + $0xb48] sm:$0xff]  ;;  %v5725_v3 = vld [vmem:[#allocation23 + $0xa0] sm:$0xff] }
 0xb5b   : > { %12816 = vmatprep.subr.bf16.mxu1 %v12815_v51  ;;  %12928 = vmatprep.subr.bf16.mxu0 %v12927_v10  ;;  %v12945_v51 = vpack.c.bf16 %v6070_v61, %v6067_v48  ;;  %v6071_v10 = vld [vmem:[#allocation23 + $0xb40] sm:$0xff]  ;;  %v12835_v11 = vpack.c.bf16 %v6075_v13, %v6072_v49  ;;  %v6152_v48 = vrot.slane %v16073_v39, 1  ;;  %v5764_v49 = vld [vmem:[#allocation23 + $0x1d8] sm:$0xff] }
 0xb5c   : > { %v5761_v61 = vld [vmem:[#allocation23 + $0x1c0] sm:$0xff] }
 0xb5e   : > { %12818 = vmatpush1.bf16.msra.mxu1 %v12817_v6  ;;  %12930 = vmatpush3.bf16.msra.mxu0 %v12929_v7  ;;  %v6081_v6 = vld [vmem:[#allocation23 + $0xb90] sm:$0xff]  ;;  %v12837_v7 = vpack.c.bf16 %v6074_v55, %v6071_v10  ;;  %v6104_v10 = vld [vmem:[#allocation23 + $0xc48] sm:$0xff]  ;;  %v5713_v55 = vld [vmem:[#allocation23 + $0x40] sm:$0xff] }
 0xb5f   : > { %12820 = vmatprep.subr.bf16.mxu1 %v12819_v28  ;;  %12932 = vmatprep.subr.bf16.mxu0 %v12931_v0  ;;  %v6150_v28 = vrot.slane %v16063_v57, 1  ;;  %v12839_v0 = vpack.c.bf16 %v6081_v6, %v6078_v5  ;;  %v13107_v5 = vpack.c.bf16 %v5764_v49, %v5761_v61  ;;  %v6111_v6 = vld [vmem:[#allocation23 + $0xc80] sm:$0xff]  ;;  %v13109_v53 = vpack.c.bf16 %v5716_v15, %v5713_v55  ;;  %v5740_v55 = vld [vmem:[#allocation23 + $0x118] sm:$0xff]  ;;  %v6132_v15 = vld [vmem:[#allocation23 + $0xd28] sm:$0xff] }
 0xb60   : > { %v12859_v16 = vpack.c.bf16 %v6111_v6, %v6108_v60  ;;  %v6135_v60 = vld [vmem:[#allocation23 + $0xd40] sm:$0xff]  ;;  %v5794_v6 = vld [vmem:[#allocation23 + $0x2c8] sm:$0xff] }
 0xb62   : > { %12822 = vmatpush1.bf16.msra.mxu1 %v12821_v22  ;;  %12934 = vmatpush3.bf16.msra.mxu0 %v12933_v23  ;;  %v12951_v22 = vpack.c.bf16 %v6130_v12, %v6127_v8  ;;  %v6083_v23 = vld [vmem:[#allocation23 + $0xba0] sm:$0xff]  ;;  %v6110_v12 = vld [vmem:[#allocation23 + $0xc78] sm:$0xff] }
 0xb63   : > { %12824 = vmatprep.subr.bf16.mxu1 %v12823_v26  ;;  %12936 = vmatprep.subr.bf16.mxu0 %v12935_v27  ;;  %v6133_v26 = vld [vmem:[#allocation23 + $0xd30] sm:$0xff]  ;;  %v6136_v27 = vld [vmem:[#allocation23 + $0xd48] sm:$0xff]  ;;  %v12845_v31 = vpack.c.bf16 %v6086_v25, %v6083_v23  ;;  %v6107_v8 = vld [vmem:[#allocation23 + $0xc60] sm:$0xff] }
 0xb64   : > { %v12954_v32 = vpack.c.bf16 %v6136_v27, %v6133_v26  ;;  %v6114_v23 = vld [vmem:[#allocation23 + $0xc98] sm:$0xff]  ;;  %v5773_v25 = vld [vmem:[#allocation23 + $0x220] sm:$0xff]  ;;  %v12861_v27 = vpack.c.bf16 %v6110_v12, %v6107_v8  ;;  %v12875_v8 = vpack.c.bf16 %v6135_v60, %v6132_v15  ;;  %v5866_v15 = vld [vmem:[#allocation23 + $0x508] sm:$0xff] }
 0xb65   : > { %v5776_v26 = vld [vmem:[#allocation23 + $0x238] sm:$0xff] }
 0xb66   : > { %12826 = vmatpush1.bf16.msra.mxu1 %v12825_v1  ;;  %12938 = vmatpush3.bf16.msra.mxu0 %v12937_v52  ;;  %v12847_v1 = vpack.c.bf16 %v6093_v30, %v6090_v29  ;;  %v6139_v52 = vld [vmem:[#allocation23 + $0xd60] sm:$0xff]  ;;  %v6113_v30 = vld [vmem:[#allocation23 + $0xc90] sm:$0xff]  ;;  %v13115_v46 = vpack.c.bf16 %v5776_v26, %v5773_v25  ;;  %v6140_v26 = vld [vmem:[#allocation23 + $0xd68] sm:$0xff] }
 0xb67   : > { %12828 = vmatprep.subr.bf16.mxu1 %v12827_v58  ;;  %12940 = vmatprep.subr.bf16.mxu0 %v12939_v59  ;;  %v6099_v58 = vld [vmem:[#allocation23 + $0xc20] sm:$0xff]  ;;  %v5755_v59 = vld [vmem:[#allocation23 + $0x190] sm:$0xff]  ;;  %v12957_v37 = vpack.c.bf16 %v6142_v56, %v6139_v52  ;;  %v6120_v52 = vld [vmem:[#allocation23 + $0xcc8] sm:$0xff] }
 0xb68   : > { %v12851_v41 = vpack.c.bf16 %v6099_v58, %v6096_v2  ;;  %v6123_v56 = vld [vmem:[#allocation23 + $0xce0] sm:$0xff]  ;;  %v5779_v2 = vld [vmem:[#allocation23 + $0x250] sm:$0xff]  ;;  %v5782_v58 = vld [vmem:[#allocation23 + $0x268] sm:$0xff] }
 0xb69   : > { %v6137_v25 = vld [vmem:[#allocation23 + $0xd50] sm:$0xff]  ;;  %v16092_v60 = vld [vmem:[#allocation6 + $0x18] sm:$0xf] }
 0xb6a   : > { %12830 = vmatpush1.bf16.msra.mxu1 %v12829_v42  ;;  %12942 = vmatpush3.bf16.msra.mxu0 %v12941_v62  ;;  %v13103_v42 = vpack.c.bf16 %v5758_v54, %v5755_v59  ;;  %v6098_v62 = vld [vmem:[#allocation23 + $0xc18] sm:$0xff] }
 0xb6b   : > { %12832 = vmatprep.subr.bf16.mxu1 %v12831_v44  ;;  %12944 = vmatprep.subr.bf16.mxu0 %v12943_v45  ;;  %v5710_v44 = vld [vmem:[#allocation23 + $0x28] sm:$0xff]  ;;  %v6102_v45 = vld [vmem:[#allocation23 + $0xc38] sm:$0xff]  ;;  %v12853_v13 = vpack.c.bf16 %v6098_v62, %v6095_v40  ;;  %v12867_v40 = vpack.c.bf16 %v6123_v56, %v6120_v52  ;;  %v12881_v52 = vpack.c.bf16 %v6140_v26, %v6137_v25 }
 0xb6c   : > { %v5734_v62 = vld [vmem:[#allocation23 + $0xe8] sm:$0xff]  ;;  %v5824_v25 = vld [vmem:[#allocation23 + $0x3b8] sm:$0xff] }
 0xb6d   : > { %v5730_v26 = vld [vmem:[#allocation23 + $0xc8] sm:$0xff] }
 0xb6e   : > { %12834 = vmatpush1.bf16.msra.mxu1 %v12833_v50  ;;  %12946 = vmatpush3.bf16.msra.mxu0 %v12945_v51  ;;  %v13105_v50 = vpack.c.bf16 %v5710_v44, %v5707_v43  ;;  %v6101_v51 = vld [vmem:[#allocation23 + $0xc30] sm:$0xff]  ;;  %v6126_v43 = vld [vmem:[#allocation23 + $0xcf8] sm:$0xff] }
 0xb6f   : > { %12836 = vmatprep.subr.bf16.mxu1 %v12835_v11  ;;  %12947 = vmatprep.subr.bf16.mxu0 %v15112_v63  ;;  %v12855_v11 = vpack.c.bf16 %v6105_v47, %v6102_v45  ;;  %v6129_v44 = vld [vmem:[#allocation23 + $0xd10] sm:$0xff]  ;;  %v5785_v45 = vld [vmem:[#allocation23 + $0x280] sm:$0xff]  ;;  %v5788_v47 = vld [vmem:[#allocation23 + $0x298] sm:$0xff] }
 0xb71   : > { %6507 = vmatmul.mubr.f32.vlgmr.msra.gmra.mrb[36].mxu0 %v6150_v28 }
 0xb72   : > { %12838 = vmatpush1.bf16.msra.mxu1 %v12837_v7  ;;  %12949 = vmatpush3.bf16.msra.mxu0 %v12948_v9  ;;  %v5767_v7 = vld [vmem:[#allocation23 + $0x1f0] sm:$0xff]  ;;  %v5770_v9 = vld [vmem:[#allocation23 + $0x208] sm:$0xff] }
 0xb73   : > { %12840 = vmatprep.subr.bf16.mxu1 %v12839_v0  ;;  %12950 = vmatprep.subr.bf16.mxu0 %v15112_v63  ;;  %v12857_v0 = vpack.c.bf16 %v6104_v10, %v6101_v51  ;;  %v13111_v20 = vpack.c.bf16 %v5770_v9, %v5767_v7  ;;  %v12871_v51 = vpack.c.bf16 %v6129_v44, %v6126_v43  ;;  %v5711_v44 = vld [vmem:[#allocation23 + $0x30] sm:$0xff] }
 0xb74   : > { %11552 = vmatprep.mubr.msk.f32.mxu0 %vm15113_vm7, %v15927_v17  ;;  %v13123_v10 = vpack.c.bf16 %v5788_v47, %v5785_v45 }
 0xb76   : > { %12842 = vmatpush1.bf16.msra.mxu1 %v12841_v21  ;;  %12952 = vmatpush3.bf16.msra.mxu0 %v12951_v22  ;;  %v5719_v21 = vld [vmem:[#allocation23 + $0x70] sm:$0xff]  ;;  %v5722_v22 = vld [vmem:[#allocation23 + $0x88] sm:$0xff] }
 0xb77   : > { %12844 = vmatprep.subr.bf16.mxu1 %v12843_v24  ;;  %12953 = vmatprep.subr.bf16.mxu0 %v15112_v63  ;;  %v6117_v24 = vld [vmem:[#allocation23 + $0xcb0] sm:$0xff]  ;;  %v13113_v29 = vpack.c.bf16 %v5722_v22, %v5719_v21  ;;  %v6138_v21 = vld [vmem:[#allocation23 + $0xd58] sm:$0xff] }
 0xb78   : > { %v6141_v22 = vld [vmem:[#allocation23 + $0xd70] sm:$0xff] }
 0xb7a   : > { %12846 = vmatpush1.bf16.msra.mxu1 %v12845_v31  ;;  %12955 = vmatpush3.bf16.msra.mxu0 %v12954_v32  ;;  %v6116_v31 = vld [vmem:[#allocation23 + $0xca8] sm:$0xff]  ;;  %v12863_v32 = vpack.c.bf16 %v6117_v24, %v6114_v23  ;;  %v5797_v23 = vld [vmem:[#allocation23 + $0x2e0] sm:$0xff]  ;;  %v5800_v24 = vld [vmem:[#allocation23 + $0x2f8] sm:$0xff] }
 0xb7b   : > { %12848 = vmatprep.subr.bf16.mxu1 %v12847_v1  ;;  %12956 = vmatprep.subr.bf16.mxu0 %v15112_v63  ;;  %v5728_v1 = vld [vmem:[#allocation23 + $0xb8] sm:$0xff]  ;;  %v12865_v59 = vpack.c.bf16 %v6116_v31, %v6113_v30  ;;  %v5749_v30 = vld [vmem:[#allocation23 + $0x160] sm:$0xff] }
 0xb7c   : > { %v13117_v54 = vpack.c.bf16 %v5728_v1, %v5725_v3  ;;  %v5752_v31 = vld [vmem:[#allocation23 + $0x178] sm:$0xff]  ;;  %v5851_v3 = vld [vmem:[#allocation23 + $0x490] sm:$0xff]  ;;  %v5854_v1 = vld [vmem:[#allocation23 + $0x4a8] sm:$0xff] }
 0xb7d   : > { %v13133_v56 = vpack.c.bf16 %v5752_v31, %v5749_v30  ;;  %v5878_v30 = vld [vmem:[#allocation23 + $0x568] sm:$0xff] }
 0xb7e   : > { %12850 = vmatpush1.bf16.msra.mxu1 %v12849_v34  ;;  %12958 = vmatpush3.bf16.msra.mxu0 %v12957_v37  ;;  %v6119_v34 = vld [vmem:[#allocation23 + $0xcc0] sm:$0xff]  ;;  %v6122_v37 = vld [vmem:[#allocation23 + $0xcd8] sm:$0xff] }
 0xb7f   : > { %12852 = vmatprep.subr.bf16.mxu1 %v12851_v41  ;;  %13104 = vmatprep.subr.bf16.mxu0 %v13103_v42  ;;  %v13119_v41 = vpack.c.bf16 %v5782_v58, %v5779_v2  ;;  %v5731_v42 = vld [vmem:[#allocation23 + $0xd0] sm:$0xff]  ;;  %v12869_v61 = vpack.c.bf16 %v6122_v37, %v6119_v34  ;;  %v13135_v58 = vpack.c.bf16 %v5854_v1, %v5851_v3  ;;  %v5806_v37 = vld [vmem:[#allocation23 + $0x328] sm:$0xff]  ;;  %v5729_v3 = vld [vmem:[#allocation23 + $0xc0] sm:$0xff] }
 0xb80   : > { %v13121_v49 = vpack.c.bf16 %v5734_v62, %v5731_v42  ;;  %v5803_v34 = vld [vmem:[#allocation23 + $0x310] sm:$0xff]  ;;  %v5857_v42 = vld [vmem:[#allocation23 + $0x4c0] sm:$0xff]  ;;  %v5860_v62 = vld [vmem:[#allocation23 + $0x4d8] sm:$0xff] }
 0xb81   : > { %11553 = vmatmul.mubr.msk.f32.vlgmr.msra.gmra.mrb[38].mxu0 %vm842_vm12, %v6152_v48  ;;  %v13137_v45 = vpack.c.bf16 %v5806_v37, %v5803_v34  ;;  %v5732_v1 = vld [vmem:[#allocation23 + $0xd8] sm:$0xff] }
 0xb82   : > { %12854 = vmatpush1.bf16.msra.mxu1 %v12853_v13  ;;  %13106 = vmatpush3.bf16.msra.mxu0 %v13105_v50  ;;  %v6125_v13 = vld [vmem:[#allocation23 + $0xcf0] sm:$0xff]  ;;  %v6128_v50 = vld [vmem:[#allocation23 + $0xd08] sm:$0xff]  ;;  %v5884_v34 = vld [vmem:[#allocation23 + $0x598] sm:$0xff]  ;;  %v12977_v37 = vpack.c.bf16 %v5732_v1, %v5729_v3 }
 0xb83   : > { %6862 = vmatprep.mubr.f32.mxu0 %v16080_v19  ;;  %12856 = vmatprep.subr.bf16.mxu1 %v12855_v11  ;;  %v5737_v11 = vld [vmem:[#allocation23 + $0x100] sm:$0xff]  ;;  %v12873_v7 = vpack.c.bf16 %v6128_v50, %v6125_v13  ;;  %v5812_v13 = vld [vmem:[#allocation23 + $0x358] sm:$0xff] }
 0xb84   : > { %13108 = vmatprep.subr.bf16.mxu0 %v13107_v5  ;;  %v5791_v5 = vld [vmem:[#allocation23 + $0x2b0] sm:$0xff]  ;;  %v13125_v9 = vpack.c.bf16 %v5740_v55, %v5737_v11  ;;  %v16086_v50 = vld [vmem:[#allocation6] sm:$0xf] }
 0xb85   : > { %v13127_v12 = vpack.c.bf16 %v5794_v6, %v5791_v5  ;;  %v5721_v11 = vld [vmem:[#allocation23 + $0x80] sm:$0xff]  ;;  %v5863_v55 = vld [vmem:[#allocation23 + $0x4f0] sm:$0xff] }
 0xb86   : > { %12858 = vmatpush1.bf16.msra.mxu1 %v12857_v0  ;;  %13110 = vmatpush3.bf16.msra.mxu0 %v13109_v53  ;;  %v6131_v0 = vld [vmem:[#allocation23 + $0xd20] sm:$0xff]  ;;  %v6134_v53 = vld [vmem:[#allocation23 + $0xd38] sm:$0xff]  ;;  %v13143_v39 = vpack.c.bf16 %v5866_v15, %v5863_v55 }
 0xb87   : > { %12860 = vmatprep.subr.bf16.mxu1 %v12859_v16  ;;  %13112 = vmatprep.subr.bf16.mxu0 %v13111_v20  ;;  %v5743_v16 = vld [vmem:[#allocation23 + $0x130] sm:$0xff]  ;;  %v5746_v20 = vld [vmem:[#allocation23 + $0x148] sm:$0xff]  ;;  %v12877_v57 = vpack.c.bf16 %v6134_v53, %v6131_v0  ;;  %v5720_v0 = vld [vmem:[#allocation23 + $0x78] sm:$0xff] }
 0xb88   : > { %v5815_v53 = vld [vmem:[#allocation23 + $0x370] sm:$0xff]  ;;  %v5741_v55 = vld [vmem:[#allocation23 + $0x120] sm:$0xff]  ;;  %v5744_v15 = vld [vmem:[#allocation23 + $0x138] sm:$0xff] }
 0xb8a   : > { %12862 = vmatpush1.bf16.msra.mxu1 %v12861_v27  ;;  %13114 = vmatpush3.bf16.msra.mxu0 %v13113_v29  ;;  %v12879_v27 = vpack.c.bf16 %v6141_v22, %v6138_v21  ;;  %v13131_v29 = vpack.c.bf16 %v5800_v24, %v5797_v23  ;;  %v5723_v23 = vld [vmem:[#allocation23 + $0x90] sm:$0xff]  ;;  %v5726_v24 = vld [vmem:[#allocation23 + $0xa8] sm:$0xff] }
 0xb8b   : > { %12864 = vmatprep.subr.bf16.mxu1 %v12863_v32  ;;  %13116 = vmatprep.subr.bf16.mxu0 %v13115_v46  ;;  %v5706_v32 = vld [vmem:[#allocation23 + $0x8] sm:$0xff]  ;;  %v5709_v46 = vld [vmem:[#allocation23 + $0x20] sm:$0xff]  ;;  %v12973_v31 = vpack.c.bf16 %v5726_v24, %v5723_v23 }
 0xb8c   : > { %v12959_v2 = vpack.c.bf16 %v5709_v46, %v5706_v32  ;;  %v5754_v23 = vld [vmem:[#allocation23 + $0x188] sm:$0xff]  ;;  %v5757_v24 = vld [vmem:[#allocation23 + $0x1a0] sm:$0xff] }
 0xb8e   : > { %12866 = vmatpush1.bf16.msra.mxu1 %v12865_v59  ;;  %13118 = vmatpush3.bf16.msra.mxu0 %v13117_v54  ;;  %v5705_v59 = vld [vmem:[#allocation23] sm:$0xff]  ;;  %v5708_v54 = vld [vmem:[#allocation23 + $0x18] sm:$0xff] }
 0xb8f   : > { %12868 = vmatprep.subr.bf16.mxu1 %v12867_v40  ;;  %13120 = vmatprep.subr.bf16.mxu0 %v13119_v41  ;;  %v5712_v40 = vld [vmem:[#allocation23 + $0x38] sm:$0xff]  ;;  %v5715_v41 = vld [vmem:[#allocation23 + $0x50] sm:$0xff]  ;;  %v12961_v43 = vpack.c.bf16 %v5708_v54, %v5705_v59  ;;  %v5881_v54 = vld [vmem:[#allocation23 + $0x580] sm:$0xff] }
 0xb90   : > { %v12963_v47 = vpack.c.bf16 %v5715_v41, %v5712_v40  ;;  %v5739_v59 = vld [vmem:[#allocation23 + $0x110] sm:$0xff] }
 0xb91   : > { %6295 = vmatmul.mubr.f32.vlgmr.msra.gmra.mrb[20].mxu1 %v6150_v28  ;;  %v13129_v28 = vpack.c.bf16 %v5746_v20, %v5743_v16  ;;  %v5869_v16 = vld [vmem:[#allocation23 + $0x520] sm:$0xff]  ;;  %v5872_v20 = vld [vmem:[#allocation23 + $0x538] sm:$0xff] }
 0xb92   : > { %12870 = vmatpush1.bf16.msra.mxu1 %v12869_v61  ;;  %13122 = vmatpush3.bf16.msra.mxu0 %v13121_v49  ;;  %v5714_v61 = vld [vmem:[#allocation23 + $0x48] sm:$0xff]  ;;  %v5809_v49 = vld [vmem:[#allocation23 + $0x340] sm:$0xff] }
 0xb93   : > { %12872 = vmatprep.subr.bf16.mxu1 %v12871_v51  ;;  %13124 = vmatprep.subr.bf16.mxu0 %v13123_v10  ;;  %v13139_v51 = vpack.c.bf16 %v5860_v62, %v5857_v42  ;;  %v5718_v10 = vld [vmem:[#allocation23 + $0x68] sm:$0xff]  ;;  %v12965_v5 = vpack.c.bf16 %v5714_v61, %v5711_v44  ;;  %v13141_v6 = vpack.c.bf16 %v5812_v13, %v5809_v49  ;;  %v5735_v42 = vld [vmem:[#allocation23 + $0xf0] sm:$0xff]  ;;  %v5745_v61 = vld [vmem:[#allocation23 + $0x140] sm:$0xff] }
 0xb94   : > { %6365 = vmatprep.mubr.f32.mxu1 %v15927_v17  ;;  %v5738_v62 = vld [vmem:[#allocation23 + $0x108] sm:$0xff]  ;;  %v13155_v44 = vpack.c.bf16 %v5884_v34, %v5881_v54  ;;  %v5887_v49 = vld [vmem:[#allocation23 + $0x5b0] sm:$0xff]  ;;  %v5769_v54 = vld [vmem:[#allocation23 + $0x200] sm:$0xff] }
 0xb95   : > { %v5890_v13 = vld [vmem:[#allocation23 + $0x5c8] sm:$0xff]  ;;  %v16097_v34 = vld [vmem:[#allocation6 + $0x10] sm:$0xf] }
 0xb96   : > { %12874 = vmatpush1.bf16.msra.mxu1 %v12873_v7  ;;  %13126 = vmatpush3.bf16.msra.mxu0 %v13125_v9  ;;  %v12967_v7 = vpack.c.bf16 %v5721_v11, %v5718_v10  ;;  %v5717_v9 = vld [vmem:[#allocation23 + $0x60] sm:$0xff] }
 0xb97   : > { %12876 = vmatprep.subr.bf16.mxu1 %v12875_v8  ;;  %13128 = vmatprep.subr.bf16.mxu0 %v13127_v12  ;;  %v5724_v8 = vld [vmem:[#allocation23 + $0x98] sm:$0xff]  ;;  %v5727_v12 = vld [vmem:[#allocation23 + $0xb0] sm:$0xff]  ;;  %v12969_v21 = vpack.c.bf16 %v5720_v0, %v5717_v9 }
 0xb98   : > { %v12971_v22 = vpack.c.bf16 %v5727_v12, %v5724_v8  ;;  %v5748_v9 = vld [vmem:[#allocation23 + $0x158] sm:$0xff]  ;;  %v5751_v0 = vld [vmem:[#allocation23 + $0x170] sm:$0xff] }
 0xb99   : > { %v12987_v12 = vpack.c.bf16 %v5751_v0, %v5748_v9 }
 0xb9a   : > { %12878 = vmatpush1.bf16.msra.mxu1 %v12877_v57  ;;  %13130 = vmatpush3.bf16.msra.mxu0 %v13129_v28  ;;  %v5821_v57 = vld [vmem:[#allocation23 + $0x3a0] sm:$0xff]  ;;  %v13147_v28 = vpack.c.bf16 %v5872_v20, %v5869_v16  ;;  %v5747_v16 = vld [vmem:[#allocation23 + $0x150] sm:$0xff]  ;;  %v5750_v20 = vld [vmem:[#allocation23 + $0x168] sm:$0xff] }
 0xb9b   : > { %12880 = vmatprep.subr.bf16.mxu1 %v12879_v27  ;;  %13132 = vmatprep.subr.bf16.mxu0 %v13131_v29  ;;  %v5733_v27 = vld [vmem:[#allocation23 + $0xe0] sm:$0xff]  ;;  %v5875_v29 = vld [vmem:[#allocation23 + $0x550] sm:$0xff]  ;;  %v13149_v32 = vpack.c.bf16 %v5824_v25, %v5821_v57  ;;  %v12989_v57 = vpack.c.bf16 %v5750_v20, %v5747_v16  ;;  %v12991_v25 = vpack.c.bf16 %v5757_v24, %v5754_v23  ;;  %v7019_v16 = vld [vmem:[#allocation23 + $0xda8] sm:$0xff] }
 0xb9c   : > { %v12975_v46 = vpack.c.bf16 %v5733_v27, %v5730_v26  ;;  %v5753_v26 = vld [vmem:[#allocation23 + $0x180] sm:$0xff]  ;;  %v5756_v27 = vld [vmem:[#allocation23 + $0x198] sm:$0xff] }
 0xb9d   : > { %v5784_v20 = vld [vmem:[#allocation23 + $0x278] sm:$0xff]  ;;  %v16105_v23 = vld [vmem:[#allocation6 + $0x20] sm:$0xf] }
 0xb9e   : > { %12882 = vmatpush1.bf16.msra.mxu1 %v12881_v52  ;;  %13134 = vmatpush3.bf16.msra.mxu0 %v13133_v56  ;;  %v5827_v52 = vld [vmem:[#allocation23 + $0x3d0] sm:$0xff]  ;;  %v13151_v56 = vpack.c.bf16 %v5878_v30, %v5875_v29  ;;  %v5902_v30 = vld [vmem:[#allocation23 + $0x628] sm:$0xff] }
 0xb9f   : > { %12960 = vmatprep.subr.bf16.mxu1 %v12959_v2  ;;  %13136 = vmatprep.subr.bf16.mxu0 %v13135_v58  ;;  %v5830_v2 = vld [vmem:[#allocation23 + $0x3e8] sm:$0xff]  ;;  %v5736_v58 = vld [vmem:[#allocation23 + $0xf8] sm:$0xff]  ;;  %v5899_v29 = vld [vmem:[#allocation23 + $0x610] sm:$0xff] }
 0xba0   : > { %v13153_v40 = vpack.c.bf16 %v5830_v2, %v5827_v52  ;;  %v12979_v41 = vpack.c.bf16 %v5739_v59, %v5736_v58  ;;  %v13168_v3 = vpack.c.bf16 %v5902_v30, %v5899_v29  ;;  %v5759_v52 = vld [vmem:[#allocation23 + $0x1b0] sm:$0xff]  ;;  %v5905_v2 = vld [vmem:[#allocation23 + $0x640] sm:$0xff]  ;;  %v5908_v58 = vld [vmem:[#allocation23 + $0x658] sm:$0xff] }
 0xba1   : > { %10993 = vmatmul.mubr.msk.f32.vlgmr.msra.gmra.mrb[20].mxu1 %vm842_vm12, %v6152_v48  ;;  %6863 = vmatmul.mubr.f32.vlgmr.msra.gmra.mrb[40].mxu0 %v16086_v50  ;;  %v5818_v48 = vld [vmem:[#allocation23 + $0x388] sm:$0xff] }
 0xba2   : > { %12962 = vmatpush1.bf16.msra.mxu1 %v12961_v43  ;;  %6649 = vmatprep.mubr.f32.mxu1 %v16080_v19  ;;  %v13145_v19 = vpack.c.bf16 %v5818_v48, %v5815_v53  ;;  %v5833_v43 = vld [vmem:[#allocation23 + $0x400] sm:$0xff]  ;;  %v12985_v48 = vpack.c.bf16 %v5744_v15, %v5741_v55  ;;  %v5766_v59 = vld [vmem:[#allocation23 + $0x1e8] sm:$0xff]  ;;  %v5920_v55 = vld [vmem:[#allocation23 + $0x6b8] sm:$0xff] }
 0xba3   : > { %13138 = vmatpush3.bf16.msra.mxu0 %v13137_v45  ;;  %12964 = vmatprep.subr.bf16.mxu1 %v12963_v47  ;;  %v5836_v45 = vld [vmem:[#allocation23 + $0x418] sm:$0xff]  ;;  %v5742_v47 = vld [vmem:[#allocation23 + $0x128] sm:$0xff]  ;;  %v5893_v53 = vld [vmem:[#allocation23 + $0x5e0] sm:$0xff] }
 0xba4   : > { %13140 = vmatprep.subr.bf16.mxu0 %v13139_v51  ;;  %6932 = vmatprep.mubr.f32.mxu0 %v16092_v60  ;;  %v12981_v51 = vpack.c.bf16 %v5738_v62, %v5735_v42  ;;  %v13157_v10 = vpack.c.bf16 %v5836_v45, %v5833_v43  ;;  %v12983_v11 = vpack.c.bf16 %v5745_v61, %v5742_v47  ;;  %v5765_v42 = vld [vmem:[#allocation23 + $0x1e0] sm:$0xff]  ;;  %v5768_v62 = vld [vmem:[#allocation23 + $0x1f8] sm:$0xff]  ;;  %v5911_v43 = vld [vmem:[#allocation23 + $0x670] sm:$0xff] }
 0xba5   : > { %v5772_v45 = vld [vmem:[#allocation23 + $0x218] sm:$0xff]  ;;  %v5775_v47 = vld [vmem:[#allocation23 + $0x230] sm:$0xff]  ;;  %v13001_v61 = vpack.c.bf16 %v5768_v62, %v5765_v42  ;;  %v5778_v15 = vld [vmem:[#allocation23 + $0x248] sm:$0xff] }
 0xba6   : > { %12966 = vmatpush1.bf16.msra.mxu1 %v12965_v5  ;;  %v5839_v5 = vld [vmem:[#allocation23 + $0x430] sm:$0xff]  ;;  %v5796_v42 = vld [vmem:[#allocation23 + $0x2d8] sm:$0xff] }
 0xba7   : > { %13142 = vmatpush3.bf16.msra.mxu0 %v13141_v6  ;;  %12968 = vmatprep.subr.bf16.mxu1 %v12967_v7  ;;  %v13159_v6 = vpack.c.bf16 %v5890_v13, %v5887_v49  ;;  %v5842_v7 = vld [vmem:[#allocation23 + $0x448] sm:$0xff]  ;;  %v13003_v13 = vpack.c.bf16 %v5775_v47, %v5772_v45  ;;  %v5799_v62 = vld [vmem:[#allocation23 + $0x2f0] sm:$0xff] }
 0xba8   : > { %13144 = vmatprep.subr.bf16.mxu0 %v13143_v39  ;;  %v5896_v39 = vld [vmem:[#allocation23 + $0x5f8] sm:$0xff]  ;;  %v13161_v8 = vpack.c.bf16 %v5842_v7, %v5839_v5  ;;  %v5781_v5 = vld [vmem:[#allocation23 + $0x260] sm:$0xff]  ;;  %v7067_v7 = vld [vmem:[#allocation23 + $0xf28] sm:$0xff] }
 0xbaa   : > { %12970 = vmatpush1.bf16.msra.mxu1 %v12969_v21  ;;  %v5845_v21 = vld [vmem:[#allocation23 + $0x460] sm:$0xff] }
 0xbab   : > { %13146 = vmatpush3.bf16.msra.mxu0 %v13145_v19  ;;  %12972 = vmatprep.subr.bf16.mxu1 %v12971_v22  ;;  %v13163_v19 = vpack.c.bf16 %v5896_v39, %v5893_v53  ;;  %v5848_v22 = vld [vmem:[#allocation23 + $0x478] sm:$0xff]  ;;  %v13007_v53 = vpack.c.bf16 %v5781_v5, %v5778_v15  ;;  %v5777_v39 = vld [vmem:[#allocation23 + $0x240] sm:$0xff]  ;;  %v7088_v5 = vld [vmem:[#allocation23 + $0xfd0] sm:$0xff] }
 0xbac   : > { %13148 = vmatprep.subr.bf16.mxu0 %v13147_v28  ;;  %v13165_v28 = vpack.c.bf16 %v5848_v22, %v5845_v21  ;;  %v5787_v21 = vld [vmem:[#allocation23 + $0x290] sm:$0xff]  ;;  %v7073_v22 = vld [vmem:[#allocation23 + $0xf58] sm:$0xff]  ;;  %v5805_v15 = vld [vmem:[#allocation23 + $0x320] sm:$0xff] }
 0xbad   : > { %v13011_v29 = vpack.c.bf16 %v5787_v21, %v5784_v20  ;;  %v5811_v20 = vld [vmem:[#allocation23 + $0x350] sm:$0xff]  ;;  %v7094_v21 = vld [vmem:[#allocation23 + $0x1000] sm:$0xff] }
 0xbae   : > { %12974 = vmatpush1.bf16.msra.mxu1 %v12973_v31  ;;  %v5760_v31 = vld [vmem:[#allocation23 + $0x1b8] sm:$0xff] }
 0xbaf   : > { %13150 = vmatpush3.bf16.msra.mxu0 %v13149_v32  ;;  %12976 = vmatprep.subr.bf16.mxu1 %v12975_v46  ;;  %v5763_v32 = vld [vmem:[#allocation23 + $0x1d0] sm:$0xff]  ;;  %v12993_v46 = vpack.c.bf16 %v5756_v27, %v5753_v26  ;;  %v5786_v26 = vld [vmem:[#allocation23 + $0x288] sm:$0xff]  ;;  %v7022_v27 = vld [vmem:[#allocation23 + $0xdc0] sm:$0xff] }
 0xbb0   : > { %13152 = vmatprep.subr.bf16.mxu0 %v13151_v56  ;;  %v12995_v1 = vpack.c.bf16 %v5763_v32, %v5760_v31  ;;  %v5762_v56 = vld [vmem:[#allocation23 + $0x1c8] sm:$0xff]  ;;  %v7025_v31 = vld [vmem:[#allocation23 + $0xdd8] sm:$0xff] }
 0xbb1   : > { %v5790_v32 = vld [vmem:[#allocation23 + $0x2a8] sm:$0xff] }
 0xbb2   : > { %12978 = vmatpush1.bf16.msra.mxu1 %v12977_v37  ;;  %v12997_v37 = vpack.c.bf16 %v5762_v56, %v5759_v52  ;;  %v7079_v52 = vld [vmem:[#allocation23 + $0xf88] sm:$0xff] }
 0xbb3   : > { %13154 = vmatpush3.bf16.msra.mxu0 %v13153_v40  ;;  %12980 = vmatprep.subr.bf16.mxu1 %v12979_v41  ;;  %v13171_v40 = vpack.c.bf16 %v5908_v58, %v5905_v2  ;;  %v12999_v41 = vpack.c.bf16 %v5769_v54, %v5766_v59  ;;  %v13329_v2 = vpack.c.bf16 %v7025_v31, %v7022_v27  ;;  %v5789_v59 = vld [vmem:[#allocation23 + $0x2a0] sm:$0xff]  ;;  %v5792_v54 = vld [vmem:[#allocation23 + $0x2b8] sm:$0xff]  ;;  %v5814_v31 = vld [vmem:[#allocation23 + $0x368] sm:$0xff] }
 0xbb4   : > { %13156 = vmatprep.subr.bf16.mxu0 %v13155_v44  ;;  %v5914_v44 = vld [vmem:[#allocation23 + $0x688] sm:$0xff]  ;;  %v13017_v45 = vpack.c.bf16 %v5792_v54, %v5789_v59  ;;  %v7046_v27 = vld [vmem:[#allocation23 + $0xe80] sm:$0xff]  ;;  %v5816_v59 = vld [vmem:[#allocation23 + $0x378] sm:$0xff] }
 0xbb5   : > { %v13174_v49 = vpack.c.bf16 %v5914_v44, %v5911_v43  ;;  %v7082_v43 = vld [vmem:[#allocation23 + $0xfa0] sm:$0xff]  ;;  %v7085_v44 = vld [vmem:[#allocation23 + $0xfb8] sm:$0xff]  ;;  %v7052_v54 = vld [vmem:[#allocation23 + $0xeb0] sm:$0xff] }
 0xbb6   : > { %12982 = vmatpush1.bf16.msra.mxu1 %v12981_v51  ;;  %v5771_v51 = vld [vmem:[#allocation23 + $0x210] sm:$0xff] }
 0xbb7   : > { %13158 = vmatpush3.bf16.msra.mxu0 %v13157_v10  ;;  %12984 = vmatprep.subr.bf16.mxu1 %v12983_v11  ;;  %v5774_v10 = vld [vmem:[#allocation23 + $0x228] sm:$0xff]  ;;  %v5917_v11 = vld [vmem:[#allocation23 + $0x6a0] sm:$0xff] }
 0xbb8   : > { %13160 = vmatprep.subr.bf16.mxu0 %v13159_v6  ;;  %v7064_v6 = vld [vmem:[#allocation23 + $0xf10] sm:$0xff]  ;;  %v13005_v9 = vpack.c.bf16 %v5774_v10, %v5771_v51  ;;  %v13177_v0 = vpack.c.bf16 %v5920_v55, %v5917_v11  ;;  %v7034_v51 = vld [vmem:[#allocation23 + $0xe20] sm:$0xff]  ;;  %v13335_v10 = vpack.c.bf16 %v7085_v44, %v7082_v43  ;;  %v7037_v11 = vld [vmem:[#allocation23 + $0xe38] sm:$0xff] }
 0xbb9   : > { %v5802_v55 = vld [vmem:[#allocation23 + $0x308] sm:$0xff] }
 0xbba   : > { %12986 = vmatpush1.bf16.msra.mxu1 %v12985_v48  ;;  %v5780_v48 = vld [vmem:[#allocation23 + $0x258] sm:$0xff] }
 0xbbb   : > { %13162 = vmatpush3.bf16.msra.mxu0 %v13161_v8  ;;  %12988 = vmatprep.subr.bf16.mxu1 %v12987_v12  ;;  %v13323_v8 = vpack.c.bf16 %v7067_v7, %v7064_v6  ;;  %v7016_v12 = vld [vmem:[#allocation23 + $0xd90] sm:$0xff]  ;;  %v13009_v24 = vpack.c.bf16 %v5780_v48, %v5777_v39  ;;  %v7091_v6 = vld [vmem:[#allocation23 + $0xfe8] sm:$0xff]  ;;  %v5804_v39 = vld [vmem:[#allocation23 + $0x318] sm:$0xff] }
 0xbbc   : > { %13164 = vmatprep.subr.bf16.mxu0 %v13163_v19  ;;  %v7070_v19 = vld [vmem:[#allocation23 + $0xf40] sm:$0xff]  ;;  %v7040_v48 = vld [vmem:[#allocation23 + $0xe50] sm:$0xff] }
 0xbbd   : > { %v13327_v30 = vpack.c.bf16 %v7073_v22, %v7070_v19  ;;  %v7097_v19 = vld [vmem:[#allocation23 + $0x1018] sm:$0xff] }
 0xbbe   : > { %12990 = vmatpush1.bf16.msra.mxu1 %v12989_v57  ;;  %v16107_v57 = vld [vmem:[#allocation6 + $0x8] sm:$0x3c] }
 0xbbf   : > { %13166 = vmatpush3.bf16.msra.mxu0 %v13165_v28  ;;  %12992 = vmatprep.subr.bf16.mxu1 %v12991_v25  ;;  %v13325_v28 = vpack.c.bf16 %v7019_v16, %v7016_v12  ;;  %v5783_v25 = vld [vmem:[#allocation23 + $0x270] sm:$0xff]  ;;  %v7043_v12 = vld [vmem:[#allocation23 + $0xe68] sm:$0xff]  ;;  %v5808_v16 = vld [vmem:[#allocation23 + $0x338] sm:$0xff] }
 0xbc0   : > { %13167 = vmatprep.subr.bf16.mxu0 %v15112_v63  ;;  %v13013_v56 = vpack.c.bf16 %v5786_v26, %v5783_v25  ;;  %v5807_v25 = vld [vmem:[#allocation23 + $0x330] sm:$0xff]  ;;  %v5810_v26 = vld [vmem:[#allocation23 + $0x348] sm:$0xff] }
 0xbc2   : > { %6933 = vmatmul.mubr.f32.vlgmr.msra.gmra.mrb[42].mxu0 %v16097_v34  ;;  %12994 = vmatpush1.bf16.msra.mxu1 %v12993_v46  ;;  %v5793_v46 = vld [vmem:[#allocation23 + $0x2c0] sm:$0xff] }
 0xbc3   : > { %13169 = vmatpush3.bf16.msra.mxu0 %v13168_v3  ;;  %12996 = vmatprep.subr.bf16.mxu1 %v12995_v1  ;;  %v7236_v3 = vrot.slane %v16107_v57, 2  ;;  %v7076_v1 = vld [vmem:[#allocation23 + $0xf70] sm:$0xff]  ;;  %v13015_v58 = vpack.c.bf16 %v5793_v46, %v5790_v32  ;;  %v5817_v32 = vld [vmem:[#allocation23 + $0x380] sm:$0xff] }
 0xbc4   : > { %13170 = vmatprep.subr.bf16.mxu0 %v15112_v63  ;;  %11571 = vmatprep.mubr.msk.f32.mxu0 %vm15113_vm7, %v15927_v17  ;;  %v7100_v46 = vld [vmem:[#allocation23 + $0x1030] sm:$0xff] }
 0xbc6   : > { %12998 = vmatpush1.bf16.msra.mxu1 %v12997_v37  ;;  %v7028_v37 = vld [vmem:[#allocation23 + $0xdf0] sm:$0xff] }
 0xbc7   : > { %13172 = vmatpush3.bf16.msra.mxu0 %v13171_v40  ;;  %13000 = vmatprep.subr.bf16.mxu1 %v12999_v41  ;;  %v13331_v40 = vpack.c.bf16 %v7079_v52, %v7076_v1  ;;  %v7031_v41 = vld [vmem:[#allocation23 + $0xe08] sm:$0xff]  ;;  %v13029_v52 = vpack.c.bf16 %v5810_v26, %v5807_v25  ;;  %v7118_v26 = vld [vmem:[#allocation23 + $0x10c0] sm:$0xff] }
 0xbc8   : > { %13173 = vmatprep.subr.bf16.mxu0 %v15112_v63  ;;  %v13333_v47 = vpack.c.bf16 %v7031_v41, %v7028_v37  ;;  %v7103_v1 = vld [vmem:[#allocation23 + $0x1048] sm:$0xff]  ;;  %v5820_v41 = vld [vmem:[#allocation23 + $0x398] sm:$0xff] }
 0xbc9   : > { %v13347_v37 = vpack.c.bf16 %v7103_v1, %v7100_v46  ;;  %v5834_v25 = vld [vmem:[#allocation23 + $0x408] sm:$0xff]  ;;  %v7172_v1 = vld [vmem:[#allocation23 + $0x1270] sm:$0xff] }
 0xbca   : > { %13002 = vmatpush1.bf16.msra.mxu1 %v13001_v61  ;;  %v13019_v61 = vpack.c.bf16 %v5799_v62, %v5796_v42  ;;  %v5823_v42 = vld [vmem:[#allocation23 + $0x3b0] sm:$0xff]  ;;  %v7106_v62 = vld [vmem:[#allocation23 + $0x1060] sm:$0xff] }
 0xbcb   : > { %13175 = vmatpush3.bf16.msra.mxu0 %v13174_v49  ;;  %13004 = vmatprep.subr.bf16.mxu1 %v13003_v13  ;;  %v5795_v49 = vld [vmem:[#allocation23 + $0x2d0] sm:$0xff]  ;;  %v5798_v13 = vld [vmem:[#allocation23 + $0x2e8] sm:$0xff] }
 0xbcc   : > { %13176 = vmatprep.subr.bf16.mxu0 %v15112_v63  ;;  %v13021_v7 = vpack.c.bf16 %v5798_v13, %v5795_v49  ;;  %v7061_v13 = vld [vmem:[#allocation23 + $0xef8] sm:$0xff] }
 0xbce   : > { %13006 = vmatpush1.bf16.msra.mxu1 %v13005_v9  ;;  %v13337_v9 = vpack.c.bf16 %v7037_v11, %v7034_v51  ;;  %v5826_v51 = vld [vmem:[#allocation23 + $0x3c8] sm:$0xff]  ;;  %v7160_v11 = vld [vmem:[#allocation23 + $0x1210] sm:$0xff] }
 0xbcf   : > { %13178 = vmatpush3.bf16.msra.mxu0 %v13177_v0  ;;  %13008 = vmatprep.subr.bf16.mxu1 %v13007_v53  ;;  %v13023_v0 = vpack.c.bf16 %v5805_v15, %v5802_v55  ;;  %v5801_v53 = vld [vmem:[#allocation23 + $0x300] sm:$0xff]  ;;  %v7163_v55 = vld [vmem:[#allocation23 + $0x1228] sm:$0xff] }
 0xbd0   : > { %13324 = vmatprep.subr.bf16.mxu0 %v13323_v8  ;;  %v13339_v8 = vpack.c.bf16 %v7091_v6, %v7088_v5  ;;  %v13025_v22 = vpack.c.bf16 %v5804_v39, %v5801_v53  ;;  %v7112_v53 = vld [vmem:[#allocation23 + $0x1090] sm:$0xff]  ;;  %v13355_v39 = vpack.c.bf16 %v7163_v55, %v7160_v11  ;;  %v5853_v11 = vld [vmem:[#allocation23 + $0x4a0] sm:$0xff] }
 0xbd1   : > { %v7184_v55 = vld [vmem:[#allocation23 + $0x12d0] sm:$0xff] }
 0xbd2   : > { %11572 = vmatmul.mubr.msk.f32.vlgmr.msra.gmra.mrb[44].mxu0 %vm842_vm12, %v16105_v23  ;;  %13010 = vmatpush1.bf16.msra.mxu1 %v13009_v24  ;;  %v13341_v24 = vpack.c.bf16 %v7043_v12, %v7040_v48  ;;  %v7115_v48 = vld [vmem:[#allocation23 + $0x10a8] sm:$0xff]  ;;  %v5835_v12 = vld [vmem:[#allocation23 + $0x410] sm:$0xff] }
 0xbd3   : > { %13326 = vmatpush3.bf16.msra.mxu0 %v13325_v28  ;;  %7523 = vmatprep.mubr.f32.mxu0 %v7236_v3  ;;  %v13027_v28 = vpack.c.bf16 %v5811_v20, %v5808_v16  ;;  %v7166_v16 = vld [vmem:[#allocation23 + $0x1240] sm:$0xff]  ;;  %v7169_v20 = vld [vmem:[#allocation23 + $0x1258] sm:$0xff] }
 0xbd4   : > { %13012 = vmatprep.subr.bf16.mxu1 %v13011_v29  ;;  %13328 = vmatprep.subr.bf16.mxu0 %v13327_v30  ;;  %v13343_v29 = vpack.c.bf16 %v7097_v19, %v7094_v21  ;;  %v7049_v30 = vld [vmem:[#allocation23 + $0xe98] sm:$0xff] }
 0xbd5   : > { %v16118_v21 = vld [vmem:[#allocation6 + $0x18] sm:$0x3c] }
 0xbd6   : > { %13014 = vmatpush1.bf16.msra.mxu1 %v13013_v56  ;;  %v13345_v56 = vpack.c.bf16 %v7049_v30, %v7046_v27  ;;  %v7121_v30 = vld [vmem:[#allocation23 + $0x10d8] sm:$0xff]  ;;  %v7238_v46 = vrot.slane %v16118_v21, 2  ;;  %v7135_v21 = vld [vmem:[#allocation23 + $0x1148] sm:$0xff] }
 0xbd7   : > { %13330 = vmatpush3.bf16.msra.mxu0 %v13329_v2  ;;  %13016 = vmatprep.subr.bf16.mxu1 %v13015_v58  ;;  %v13031_v2 = vpack.c.bf16 %v5817_v32, %v5814_v31  ;;  %v5813_v58 = vld [vmem:[#allocation23 + $0x360] sm:$0xff]  ;;  %v5838_v31 = vld [vmem:[#allocation23 + $0x428] sm:$0xff] }
 0xbd8   : > { %13332 = vmatprep.subr.bf16.mxu0 %v13331_v40  ;;  %v7055_v40 = vld [vmem:[#allocation23 + $0xec8] sm:$0xff]  ;;  %v13033_v43 = vpack.c.bf16 %v5816_v59, %v5813_v58  ;;  %v5841_v32 = vld [vmem:[#allocation23 + $0x440] sm:$0xff] }
 0xbd9   : > { %v13349_v44 = vpack.c.bf16 %v7055_v40, %v7052_v54  ;;  %v13047_v58 = vpack.c.bf16 %v5841_v32, %v5838_v31  ;;  %v5837_v59 = vld [vmem:[#allocation23 + $0x420] sm:$0xff]  ;;  %v5840_v54 = vld [vmem:[#allocation23 + $0x438] sm:$0xff]  ;;  %v5862_v32 = vld [vmem:[#allocation23 + $0x4e8] sm:$0xff] }
 0xbda   : > { %13018 = vmatpush1.bf16.msra.mxu1 %v13017_v45  ;;  %v5819_v45 = vld [vmem:[#allocation23 + $0x390] sm:$0xff]  ;;  %v7145_v31 = vld [vmem:[#allocation23 + $0x1198] sm:$0xff] }
 0xbdb   : > { %13334 = vmatpush3.bf16.msra.mxu0 %v13333_v47  ;;  %13020 = vmatprep.subr.bf16.mxu1 %v13019_v61  ;;  %v5822_v47 = vld [vmem:[#allocation23 + $0x3a8] sm:$0xff]  ;;  %v7058_v61 = vld [vmem:[#allocation23 + $0xee0] sm:$0xff] }
 0xbdc   : > { %13336 = vmatprep.subr.bf16.mxu0 %v13335_v10  ;;  %v5829_v10 = vld [vmem:[#allocation23 + $0x3e0] sm:$0xff]  ;;  %v13037_v15 = vpack.c.bf16 %v5822_v47, %v5819_v45  ;;  %v13353_v5 = vpack.c.bf16 %v7061_v13, %v7058_v61  ;;  %v5843_v47 = vld [vmem:[#allocation23 + $0x450] sm:$0xff]  ;;  %v5846_v61 = vld [vmem:[#allocation23 + $0x468] sm:$0xff] }
 0xbdd   : > { %v13039_v6 = vpack.c.bf16 %v5829_v10, %v5826_v51  ;;  %v7133_v51 = vld [vmem:[#allocation23 + $0x1138] sm:$0xff]  ;;  %v5850_v10 = vld [vmem:[#allocation23 + $0x488] sm:$0xff] }
 0xbde   : > { %13022 = vmatpush1.bf16.msra.mxu1 %v13021_v7  ;;  %v16116_v7 = vld [vmem:[#allocation6] sm:$0x3c] }
 0xbdf   : > { %13338 = vmatpush3.bf16.msra.mxu0 %v13337_v9  ;;  %13024 = vmatprep.subr.bf16.mxu1 %v13023_v0  ;;  %v5825_v9 = vld [vmem:[#allocation23 + $0x3c0] sm:$0xff]  ;;  %v5828_v0 = vld [vmem:[#allocation23 + $0x3d8] sm:$0xff]  ;;  %v7235_v27 = vrot.slane %v16116_v7, 2  ;;  %v7128_v7 = vld [vmem:[#allocation23 + $0x1110] sm:$0xff] }
 0xbe0   : > { %13340 = vmatprep.subr.bf16.mxu0 %v13339_v8  ;;  %v5832_v8 = vld [vmem:[#allocation23 + $0x3f8] sm:$0xff]  ;;  %v13041_v19 = vpack.c.bf16 %v5828_v0, %v5825_v9  ;;  %v13055_v9 = vpack.c.bf16 %v5853_v11, %v5850_v10  ;;  %v5849_v0 = vld [vmem:[#allocation23 + $0x480] sm:$0xff]  ;;  %v5874_v11 = vld [vmem:[#allocation23 + $0x548] sm:$0xff] }
 0xbe1   : > { %6650 = vmatmul.mubr.f32.vlgmr.msra.gmra.mrb[20].mxu1 %v16086_v50  ;;  %v7109_v50 = vld [vmem:[#allocation23 + $0x1078] sm:$0xff] }
 0xbe2   : > { %13026 = vmatpush1.bf16.msra.mxu1 %v13025_v22  ;;  %6720 = vmatprep.mubr.f32.mxu1 %v16092_v60  ;;  %v13035_v60 = vpack.c.bf16 %v5823_v42, %v5820_v41  ;;  %v13351_v49 = vpack.c.bf16 %v7109_v50, %v7106_v62  ;;  %v13357_v22 = vpack.c.bf16 %v7115_v48, %v7112_v53  ;;  %v7127_v41 = vld [vmem:[#allocation23 + $0x1108] sm:$0xff]  ;;  %v5844_v42 = vld [vmem:[#allocation23 + $0x458] sm:$0xff]  ;;  %v5847_v62 = vld [vmem:[#allocation23 + $0x470] sm:$0xff] }
 0xbe3   : > { %13342 = vmatpush3.bf16.msra.mxu0 %v13341_v24  ;;  %13028 = vmatprep.subr.bf16.mxu1 %v13027_v28  ;;  %v13043_v24 = vpack.c.bf16 %v5835_v12, %v5832_v8  ;;  %v5831_v28 = vld [vmem:[#allocation23 + $0x3f0] sm:$0xff]  ;;  %v7178_v50 = vld [vmem:[#allocation23 + $0x12a0] sm:$0xff]  ;;  %v13051_v45 = vpack.c.bf16 %v5847_v62, %v5844_v42  ;;  %v5852_v53 = vld [vmem:[#allocation23 + $0x498] sm:$0xff] }
 0xbe4   : > { %13344 = vmatprep.subr.bf16.mxu0 %v13343_v29  ;;  %v13359_v29 = vpack.c.bf16 %v7169_v20, %v7166_v16  ;;  %v7139_v8 = vld [vmem:[#allocation23 + $0x1168] sm:$0xff]  ;;  %v5856_v12 = vld [vmem:[#allocation23 + $0x4b8] sm:$0xff]  ;;  %v5859_v16 = vld [vmem:[#allocation23 + $0x4d0] sm:$0xff] }
 0xbe5   : > { %v7190_v20 = vld [vmem:[#allocation23 + $0x1300] sm:$0xff]  ;;  %v7151_v42 = vld [vmem:[#allocation23 + $0x11c8] sm:$0xff]  ;;  %v5868_v62 = vld [vmem:[#allocation23 + $0x518] sm:$0xff] }
 0xbe6   : > { %13030 = vmatpush1.bf16.msra.mxu1 %v13029_v52  ;;  %v7175_v52 = vld [vmem:[#allocation23 + $0x1288] sm:$0xff]  ;;  %v7157_v10 = vld [vmem:[#allocation23 + $0x11f8] sm:$0xff] }
 0xbe7   : > { %13346 = vmatpush3.bf16.msra.mxu0 %v13345_v56  ;;  %13032 = vmatprep.subr.bf16.mxu1 %v13031_v2  ;;  %v13045_v56 = vpack.c.bf16 %v5834_v25, %v5831_v28  ;;  %v13361_v2 = vpack.c.bf16 %v7121_v30, %v7118_v26  ;;  %v13363_v40 = vpack.c.bf16 %v7175_v52, %v7172_v1  ;;  %v5855_v25 = vld [vmem:[#allocation23 + $0x4b0] sm:$0xff]  ;;  %v5858_v26 = vld [vmem:[#allocation23 + $0x4c8] sm:$0xff]  ;;  %v5865_v1 = vld [vmem:[#allocation23 + $0x500] sm:$0xff] }
 0xbe8   : > { %13348 = vmatprep.subr.bf16.mxu0 %v13347_v37  ;;  %v7124_v37 = vld [vmem:[#allocation23 + $0x10f0] sm:$0xff]  ;;  %v13059_v28 = vpack.c.bf16 %v5859_v16, %v5856_v12 }
 0xbe9   : > { %v7196_v52 = vld [vmem:[#allocation23 + $0x1330] sm:$0xff] }
 0xbea   : > { %13034 = vmatpush1.bf16.msra.mxu1 %v13033_v43  ;;  %v7181_v43 = vld [vmem:[#allocation23 + $0x12b8] sm:$0xff] }
 0xbeb   : > { %13350 = vmatpush3.bf16.msra.mxu0 %v13349_v44  ;;  %13036 = vmatprep.subr.bf16.mxu1 %v13035_v60  ;;  %v13049_v44 = vpack.c.bf16 %v5840_v54, %v5837_v59  ;;  %v13365_v60 = vpack.c.bf16 %v7127_v41, %v7124_v37  ;;  %v13367_v13 = vpack.c.bf16 %v7181_v43, %v7178_v50  ;;  %v5861_v54 = vld [vmem:[#allocation23 + $0x4e0] sm:$0xff]  ;;  %v5864_v37 = vld [vmem:[#allocation23 + $0x4f8] sm:$0xff]  ;;  %v5871_v50 = vld [vmem:[#allocation23 + $0x530] sm:$0xff] }
 0xbec   : > { %13352 = vmatprep.subr.bf16.mxu0 %v13351_v49  ;;  %v7130_v49 = vld [vmem:[#allocation23 + $0x1120] sm:$0xff]  ;;  %v13063_v59 = vpack.c.bf16 %v5865_v1, %v5862_v32  ;;  %v16126_v12 = vld [vmem:[#allocation6 + $0x10] sm:$0x3c] }
 0xbed   : > { %v7202_v43 = vld [vmem:[#allocation23 + $0x1360] sm:$0xff] }
 0xbee   : > { %13038 = vmatpush1.bf16.msra.mxu1 %v13037_v15  ;;  %v7187_v15 = vld [vmem:[#allocation23 + $0x12e8] sm:$0xff] }
 0xbef   : > { %13354 = vmatpush3.bf16.msra.mxu0 %v13353_v5  ;;  %13040 = vmatprep.subr.bf16.mxu1 %v13039_v6  ;;  %v13053_v5 = vpack.c.bf16 %v5846_v61, %v5843_v47  ;;  %v13369_v6 = vpack.c.bf16 %v7133_v51, %v7130_v49  ;;  %v13371_v48 = vpack.c.bf16 %v7187_v15, %v7184_v55  ;;  %v5867_v61 = vld [vmem:[#allocation23 + $0x510] sm:$0xff]  ;;  %v5870_v49 = vld [vmem:[#allocation23 + $0x528] sm:$0xff]  ;;  %v5877_v55 = vld [vmem:[#allocation23 + $0x560] sm:$0xff] }
 0xbf0   : > { %13356 = vmatprep.subr.bf16.mxu0 %v13355_v39  ;;  %v7136_v39 = vld [vmem:[#allocation23 + $0x1150] sm:$0xff]  ;;  %v13067_v47 = vpack.c.bf16 %v5871_v50, %v5868_v62  ;;  %v13069_v15 = vpack.c.bf16 %v5870_v49, %v5867_v61  ;;  %v5894_v62 = vld [vmem:[#allocation23 + $0x5e8] sm:$0xff]  ;;  %v7226_v50 = vld [vmem:[#allocation23 + $0x1420] sm:$0xff] }
 0xbf1   : > { %v16136_v49 = vld [vmem:[#allocation6 + $0x20] sm:$0x3c] }
 0xbf2   : > { %7524 = vmatmul.mubr.f32.vlgmr.msra.gmra.mrb[46].mxu0 %v7235_v27  ;;  %13042 = vmatpush1.bf16.msra.mxu1 %v13041_v19  ;;  %v7193_v19 = vld [vmem:[#allocation23 + $0x1318] sm:$0xff] }
 0xbf3   : > { %13358 = vmatpush3.bf16.msra.mxu0 %v13357_v22  ;;  %13044 = vmatprep.subr.bf16.mxu1 %v13043_v24  ;;  %v13057_v22 = vpack.c.bf16 %v5852_v53, %v5849_v0  ;;  %v13373_v24 = vpack.c.bf16 %v7139_v8, %v7136_v39  ;;  %v13375_v30 = vpack.c.bf16 %v7193_v19, %v7190_v20  ;;  %v5876_v0 = vld [vmem:[#allocation23 + $0x558] sm:$0xff]  ;;  %v7208_v53 = vld [vmem:[#allocation23 + $0x1390] sm:$0xff]  ;;  %v7211_v39 = vld [vmem:[#allocation23 + $0x13a8] sm:$0xff] }
 0xbf4   : > { %13360 = vmatprep.subr.bf16.mxu0 %v13359_v29  ;;  %7593 = vmatprep.mubr.f32.mxu0 %v7238_v46  ;;  %v7142_v29 = vld [vmem:[#allocation23 + $0x1180] sm:$0xff]  ;;  %v5883_v8 = vld [vmem:[#allocation23 + $0x590] sm:$0xff]  ;;  %v13388_v20 = vpack.c.bf16 %v7211_v39, %v7208_v53 }
 0xbf5   : > { %v5913_v53 = vld [vmem:[#allocation23 + $0x680] sm:$0xff] }
 0xbf6   : > { %13046 = vmatpush1.bf16.msra.mxu1 %v13045_v56  ;;  %v7199_v56 = vld [vmem:[#allocation23 + $0x1348] sm:$0xff] }
 0xbf7   : > { %13362 = vmatpush3.bf16.msra.mxu0 %v13361_v2  ;;  %13048 = vmatprep.subr.bf16.mxu1 %v13047_v58  ;;  %v13061_v2 = vpack.c.bf16 %v5858_v26, %v5855_v25  ;;  %v13377_v58 = vpack.c.bf16 %v7145_v31, %v7142_v29  ;;  %v13379_v41 = vpack.c.bf16 %v7199_v56, %v7196_v52  ;;  %v7237_v25 = vrot.slane %v16126_v12, 2  ;;  %v7217_v26 = vld [vmem:[#allocation23 + $0x13d8] sm:$0xff]  ;;  %v5886_v29 = vld [vmem:[#allocation23 + $0x5a8] sm:$0xff]  ;;  %v5885_v52 = vld [vmem:[#allocation23 + $0x5a0] sm:$0xff] }
 0xbf8   : > { %13364 = vmatprep.subr.bf16.mxu0 %v13363_v40  ;;  %v7148_v40 = vld [vmem:[#allocation23 + $0x11b0] sm:$0xff]  ;;  %v5888_v56 = vld [vmem:[#allocation23 + $0x5b8] sm:$0xff] }
 0xbfa   : > { %13050 = vmatpush1.bf16.msra.mxu1 %v13049_v44  ;;  %v7205_v44 = vld [vmem:[#allocation23 + $0x1378] sm:$0xff] }
 0xbfb   : > { %13366 = vmatpush3.bf16.msra.mxu0 %v13365_v60  ;;  %13052 = vmatprep.subr.bf16.mxu1 %v13051_v45  ;;  %v13065_v60 = vpack.c.bf16 %v5864_v37, %v5861_v54  ;;  %v13381_v45 = vpack.c.bf16 %v7151_v42, %v7148_v40  ;;  %v13383_v51 = vpack.c.bf16 %v7205_v44, %v7202_v43  ;;  %v5895_v54 = vld [vmem:[#allocation23 + $0x5f0] sm:$0xff]  ;;  %v7229_v43 = vld [vmem:[#allocation23 + $0x1438] sm:$0xff]  ;;  %v5898_v44 = vld [vmem:[#allocation23 + $0x608] sm:$0xff] }
 0xbfc   : > { %13368 = vmatprep.subr.bf16.mxu0 %v13367_v13  ;;  %v7154_v13 = vld [vmem:[#allocation23 + $0x11e0] sm:$0xff]  ;;  %v13081_v37 = vpack.c.bf16 %v5888_v56, %v5885_v52  ;;  %v5891_v42 = vld [vmem:[#allocation23 + $0x5d0] sm:$0xff]  ;;  %v7017_v56 = vld [vmem:[#allocation23 + $0xd98] sm:$0xff] }
 0xbfd   : > { %v7014_v52 = vld [vmem:[#allocation23 + $0xd80] sm:$0xff] }
 0xbfe   : > { %13054 = vmatpush1.bf16.msra.mxu1 %v13053_v5  ;;  %v13385_v5 = vpack.c.bf16 %v7157_v10, %v7154_v13  ;;  %v5897_v13 = vld [vmem:[#allocation23 + $0x600] sm:$0xff]  ;;  %v5904_v10 = vld [vmem:[#allocation23 + $0x638] sm:$0xff] }
 0xbff   : > { %13370 = vmatpush3.bf16.msra.mxu0 %v13369_v6  ;;  %13056 = vmatprep.subr.bf16.mxu1 %v13055_v9  ;;  %v13071_v6 = vpack.c.bf16 %v5877_v55, %v5874_v11  ;;  %v5873_v9 = vld [vmem:[#allocation23 + $0x540] sm:$0xff]  ;;  %v5907_v11 = vld [vmem:[#allocation23 + $0x650] sm:$0xff]  ;;  %v7239_v55 = vrot.slane %v16136_v49, 2 }
 0xc00   : > { %13372 = vmatprep.subr.bf16.mxu0 %v13371_v48  ;;  %v5880_v48 = vld [vmem:[#allocation23 + $0x578] sm:$0xff]  ;;  %v13073_v16 = vpack.c.bf16 %v5876_v0, %v5873_v9  ;;  %v5906_v9 = vld [vmem:[#allocation23 + $0x648] sm:$0xff] }
 0xc01   : > { %v13075_v19 = vpack.c.bf16 %v5883_v8, %v5880_v48  ;;  %v5910_v0 = vld [vmem:[#allocation23 + $0x668] sm:$0xff]  ;;  %v5909_v48 = vld [vmem:[#allocation23 + $0x660] sm:$0xff]  ;;  %v5912_v8 = vld [vmem:[#allocation23 + $0x678] sm:$0xff] }
 0xc02   : > { %13058 = vmatpush1.bf16.msra.mxu1 %v13057_v22  ;;  %v5879_v22 = vld [vmem:[#allocation23 + $0x570] sm:$0xff]  ;;  %v13095_v39 = vpack.c.bf16 %v5913_v53, %v5910_v0 }
 0xc03   : > { %13374 = vmatpush3.bf16.msra.mxu0 %v13373_v24  ;;  %13060 = vmatprep.subr.bf16.mxu1 %v13059_v28  ;;  %v5882_v24 = vld [vmem:[#allocation23 + $0x588] sm:$0xff]  ;;  %v7214_v28 = vld [vmem:[#allocation23 + $0x13c0] sm:$0xff]  ;;  %v7044_v53 = vld [vmem:[#allocation23 + $0xe70] sm:$0xff] }
 0xc04   : > { %13376 = vmatprep.subr.bf16.mxu0 %v13375_v30  ;;  %v5889_v30 = vld [vmem:[#allocation23 + $0x5c0] sm:$0xff]  ;;  %v13077_v31 = vpack.c.bf16 %v5882_v24, %v5879_v22  ;;  %v13391_v32 = vpack.c.bf16 %v7217_v26, %v7214_v28  ;;  %v5915_v26 = vld [vmem:[#allocation23 + $0x690] sm:$0xff] }
 0xc05   : > { %v13079_v1 = vpack.c.bf16 %v5889_v30, %v5886_v29  ;;  %v5918_v29 = vld [vmem:[#allocation23 + $0x6a8] sm:$0xff] }
 0xc06   : > { %13062 = vmatpush1.bf16.msra.mxu1 %v13061_v2  ;;  %v7220_v2 = vld [vmem:[#allocation23 + $0x13f0] sm:$0xff]  ;;  %v7015_v30 = vld [vmem:[#allocation23 + $0xd88] sm:$0xff] }
 0xc07   : > { %13378 = vmatpush3.bf16.msra.mxu0 %v13377_v58  ;;  %13064 = vmatprep.subr.bf16.mxu1 %v13063_v59  ;;  %v7223_v58 = vld [vmem:[#allocation23 + $0x1408] sm:$0xff]  ;;  %v5892_v59 = vld [vmem:[#allocation23 + $0x5d8] sm:$0xff] }
 0xc08   : > { %13380 = vmatprep.subr.bf16.mxu0 %v13379_v41  ;;  %v13394_v40 = vpack.c.bf16 %v7223_v58, %v7220_v2  ;;  %v13083_v41 = vpack.c.bf16 %v5895_v54, %v5892_v59  ;;  %v7021_v2 = vld [vmem:[#allocation23 + $0xdb8] sm:$0xff]  ;;  %v7024_v58 = vld [vmem:[#allocation23 + $0xdd0] sm:$0xff]  ;;  %v13181_v59 = vpack.c.bf16 %v7017_v56, %v7014_v52  ;;  %v7063_v52 = vld [vmem:[#allocation23 + $0xf08] sm:$0xff] }
 0xc09   : > { %v13183_v54 = vpack.c.bf16 %v7024_v58, %v7021_v2  ;;  %v7066_v56 = vld [vmem:[#allocation23 + $0xf20] sm:$0xff] }
 0xc0a   : > { %13066 = vmatpush1.bf16.msra.mxu1 %v13065_v60  ;;  %v5901_v60 = vld [vmem:[#allocation23 + $0x620] sm:$0xff] }
 0xc0b   : > { %13382 = vmatpush3.bf16.msra.mxu0 %v13381_v45  ;;  %13068 = vmatprep.subr.bf16.mxu1 %v13067_v47  ;;  %v13085_v45 = vpack.c.bf16 %v5894_v62, %v5891_v42  ;;  %v13397_v47 = vpack.c.bf16 %v7229_v43, %v7226_v50  ;;  %v13087_v61 = vpack.c.bf16 %v5901_v60, %v5898_v44  ;;  %v7030_v42 = vld [vmem:[#allocation23 + $0xe00] sm:$0xff]  ;;  %v7029_v44 = vld [vmem:[#allocation23 + $0xdf8] sm:$0xff] }
 0xc0c   : > { %13384 = vmatprep.subr.bf16.mxu0 %v13383_v51  ;;  %v5900_v51 = vld [vmem:[#allocation23 + $0x618] sm:$0xff]  ;;  %v7026_v43 = vld [vmem:[#allocation23 + $0xde0] sm:$0xff] }
 0xc0d   : > { %v7033_v60 = vld [vmem:[#allocation23 + $0xe18] sm:$0xff] }
 0xc0e   : > { %13070 = vmatpush1.bf16.msra.mxu1 %v13069_v15  ;;  %v13089_v15 = vpack.c.bf16 %v5900_v51, %v5897_v13  ;;  %v7032_v13 = vld [vmem:[#allocation23 + $0xe10] sm:$0xff]  ;;  %v7035_v51 = vld [vmem:[#allocation23 + $0xe28] sm:$0xff] }
 0xc0f   : > { %13386 = vmatpush3.bf16.msra.mxu0 %v13385_v5  ;;  %13072 = vmatprep.subr.bf16.mxu1 %v13071_v6  ;;  %v13091_v5 = vpack.c.bf16 %v5907_v11, %v5904_v10  ;;  %v5903_v6 = vld [vmem:[#allocation23 + $0x630] sm:$0xff]  ;;  %v7039_v10 = vld [vmem:[#allocation23 + $0xe48] sm:$0xff]  ;;  %v7042_v11 = vld [vmem:[#allocation23 + $0xe60] sm:$0xff] }
 0xc10   : > { %13387 = vmatprep.subr.bf16.mxu0 %v15112_v63  ;;  %v13195_v57 = vpack.c.bf16 %v7042_v11, %v7039_v10  ;;  %v7084_v10 = vld [vmem:[#allocation23 + $0xfb0] sm:$0xff] }
 0xc12   : > { %7594 = vmatmul.mubr.f32.vlgmr.msra.gmra.mrb[48].mxu0 %v7237_v25  ;;  %13074 = vmatpush1.bf16.msra.mxu1 %v13073_v16 }
 0xc13   : > { %13389 = vmatpush3.bf16.msra.mxu0 %v13388_v20  ;;  %13076 = vmatprep.subr.bf16.mxu1 %v13075_v19  ;;  %v5916_v20 = vld [vmem:[#allocation23 + $0x698] sm:$0xff]  ;;  %v5919_v19 = vld [vmem:[#allocation23 + $0x6b0] sm:$0xff] }
 0xc14   : > { %13390 = vmatprep.subr.bf16.mxu0 %v15112_v63  ;;  %11590 = vmatprep.mubr.msk.f32.mxu0 %vm15113_vm7, %v15927_v17  ;;  %v13099_v28 = vpack.c.bf16 %v5919_v19, %v5916_v20  ;;  %v7050_v20 = vld [vmem:[#allocation23 + $0xea0] sm:$0xff]  ;;  %v7053_v19 = vld [vmem:[#allocation23 + $0xeb8] sm:$0xff] }
 0xc16   : > { %13078 = vmatpush1.bf16.msra.mxu1 %v13077_v31  ;;  %v7018_v31 = vld [vmem:[#allocation23 + $0xda0] sm:$0xff] }
 0xc17   : > { %13392 = vmatpush3.bf16.msra.mxu0 %v13391_v32  ;;  %13080 = vmatprep.subr.bf16.mxu1 %v13079_v1  ;;  %v13101_v32 = vpack.c.bf16 %v5918_v29, %v5915_v26  ;;  %v13179_v1 = vpack.c.bf16 %v7018_v31, %v7015_v30  ;;  %v13205_v30 = vpack.c.bf16 %v7053_v19, %v7050_v20  ;;  %v7092_v19 = vld [vmem:[#allocation23 + $0xff0] sm:$0xff] }
 0xc18   : > { %13393 = vmatprep.subr.bf16.mxu0 %v15112_v63 }
 0xc1a   : > { %13082 = vmatpush1.bf16.msra.mxu1 %v13081_v37  ;;  %v7020_v37 = vld [vmem:[#allocation23 + $0xdb0] sm:$0xff] }
 0xc1b   : > { %13395 = vmatpush3.bf16.msra.mxu0 %v13394_v40  ;;  %13084 = vmatprep.subr.bf16.mxu1 %v13083_v41  ;;  %v7023_v40 = vld [vmem:[#allocation23 + $0xdc8] sm:$0xff] }
 0xc1c   : > { %13396 = vmatprep.subr.bf16.mxu0 %v15112_v63  ;;  %v13093_v63 = vpack.c.bf16 %v5906_v9, %v5903_v6  ;;  %v7027_v41 = vld [vmem:[#allocation23 + $0xde8] sm:$0xff]  ;;  %v13185_v62 = vpack.c.bf16 %v7023_v40, %v7020_v37  ;;  %v7048_v6 = vld [vmem:[#allocation23 + $0xe90] sm:$0xff]  ;;  %v7065_v37 = vld [vmem:[#allocation23 + $0xf18] sm:$0xff] }
 0xc1d   : > { %v13187_v50 = vpack.c.bf16 %v7030_v42, %v7027_v41  ;;  %v7069_v40 = vld [vmem:[#allocation23 + $0xf38] sm:$0xff]  ;;  %v7072_v41 = vld [vmem:[#allocation23 + $0xf50] sm:$0xff] }
 0xc1e   : > { %13086 = vmatpush1.bf16.msra.mxu1 %v13085_v45  ;;  %v7036_v45 = vld [vmem:[#allocation23 + $0xe30] sm:$0xff] }
 0xc1f   : > { %13398 = vmatpush3.bf16.msra.mxu0 %v13397_v47  ;;  %13088 = vmatprep.subr.bf16.mxu1 %v13087_v61  ;;  %v13189_v47 = vpack.c.bf16 %v7029_v44, %v7026_v43  ;;  %v13191_v61 = vpack.c.bf16 %v7036_v45, %v7033_v60  ;;  %v7071_v43 = vld [vmem:[#allocation23 + $0xf48] sm:$0xff]  ;;  %v7078_v60 = vld [vmem:[#allocation23 + $0xf80] sm:$0xff] }
 0xc20   : > { %v7075_v44 = vld [vmem:[#allocation23 + $0xf68] sm:$0xff] }
 0xc21   : > { %6721 = vmatmul.mubr.f32.vlgmr.msra.gmra.mrb[20].mxu1 %v16097_v34  ;;  %v13097_v34 = vpack.c.bf16 %v5912_v8, %v5909_v48  ;;  %v7054_v48 = vld [vmem:[#allocation23 + $0xec0] sm:$0xff] }
 0xc22   : > { %11591 = vmatmul.mubr.msk.f32.vlgmr.msra.gmra.mrb[50].mxu0 %vm842_vm12, %v7239_v55  ;;  %13090 = vmatpush1.bf16.msra.mxu1 %v13089_v15  ;;  %v7041_v15 = vld [vmem:[#allocation23 + $0xe58] sm:$0xff] }
 0xc23   : > { %13092 = vmatprep.subr.bf16.mxu1 %v13091_v5  ;;  %6791 = vmatprep.mubr.f32.mxu1 %v15927_v17  ;;  %v7045_v5 = vld [vmem:[#allocation23 + $0xe78] sm:$0xff] }
 0xc24   : > { %v11220_v16 = vpop.f32.mrb[34].mxu0  ;;  %7806 = vmatprep.mubr.f32.mxu0 %v15927_v17  ;;  %v13199_v0 = vpack.c.bf16 %v7048_v6, %v7045_v5  ;;  %v7083_v5 = vld [vmem:[#allocation23 + $0xfa8] sm:$0xff] }
 0xc25   : > { %v11221_v22 = vpop.f32.mrb[35].mxu0  ;;  %v7087_v6 = vld [vmem:[#allocation23 + $0xfc8] sm:$0xff] }
 0xc26   : > { %v16146_v24 = vadd.f32 %v11221_v22, %v11220_v16  ;;  %13094 = vmatpush1.bf16.msra.mxu1 %v13093_v63  ;;  %v7047_v63 = vld [vmem:[#allocation23 + $0xe88] sm:$0xff] }
 0xc27   : > { %13096 = vmatprep.subr.bf16.mxu1 %v13095_v39  ;;  %v7051_v39 = vld [vmem:[#allocation23 + $0xea8] sm:$0xff]  ;;  %v13201_v8 = vpack.c.bf16 %v7047_v63, %v7044_v53  ;;  %v7086_v63 = vld [vmem:[#allocation23 + $0xfc0] sm:$0xff] }
 0xc28   : > { %v13203_v16 = vpack.c.bf16 %v7054_v48, %v7051_v39  ;;  %v7089_v39 = vld [vmem:[#allocation23 + $0xfd8] sm:$0xff] }
 0xc29   : > { %v7093_v48 = vld [vmem:[#allocation23 + $0xff8] sm:$0xff] }
 0xc2a   : > { %13098 = vmatpush1.bf16.msra.mxu1 %v13097_v34  ;;  %v7057_v34 = vld [vmem:[#allocation23 + $0xed8] sm:$0xff] }
 0xc2b   : > { %13100 = vmatprep.subr.bf16.mxu1 %v13099_v28  ;;  %v7060_v28 = vld [vmem:[#allocation23 + $0xef0] sm:$0xff] }
 0xc2c   : > { %v13207_v31 = vpack.c.bf16 %v7060_v28, %v7057_v34  ;;  %v7099_v34 = vld [vmem:[#allocation23 + $0x1028] sm:$0xff]  ;;  %v7102_v28 = vld [vmem:[#allocation23 + $0x1040] sm:$0xff] }
 0xc2e   : > { %13102 = vmatpush1.bf16.msra.mxu1 %v13101_v32  ;;  %v7056_v32 = vld [vmem:[#allocation23 + $0xed0] sm:$0xff] }
 0xc2f   : > { %13180 = vmatprep.subr.bf16.mxu1 %v13179_v1  ;;  %v7059_v1 = vld [vmem:[#allocation23 + $0xee8] sm:$0xff] }
 0xc30   : > { %v13209_v58 = vpack.c.bf16 %v7059_v1, %v7056_v32  ;;  %v7105_v32 = vld [vmem:[#allocation23 + $0x1058] sm:$0xff]  ;;  %v7108_v1 = vld [vmem:[#allocation23 + $0x1070] sm:$0xff] }
 0xc31   : > { %10995 = vmatmul.mubr.msk.f32.vlgmr.msra.gmra.mrb[20].mxu1 %vm842_vm12, %v16105_v23  ;;  %v13193_v23 = vpack.c.bf16 %v7035_v51, %v7032_v13  ;;  %v7081_v51 = vld [vmem:[#allocation23 + $0xf98] sm:$0xff] }
 0xc32   : > { %13182 = vmatpush1.bf16.msra.mxu1 %v13181_v59  ;;  %7310 = vmatprep.mubr.f32.mxu1 %v7236_v3  ;;  %v7038_v3 = vld [vmem:[#allocation23 + $0xe40] sm:$0xff]  ;;  %v13211_v59 = vpack.c.bf16 %v7066_v56, %v7063_v52  ;;  %v13239_v56 = vpack.c.bf16 %v7108_v1, %v7105_v32  ;;  %v7153_v32 = vld [vmem:[#allocation23 + $0x11d8] sm:$0xff]  ;;  %v7156_v1 = vld [vmem:[#allocation23 + $0x11f0] sm:$0xff] }
 0xc33   : > { %13184 = vmatprep.subr.bf16.mxu1 %v13183_v54  ;;  %v13197_v9 = vpack.c.bf16 %v7041_v15, %v7038_v3  ;;  %v7062_v54 = vld [vmem:[#allocation23 + $0xf00] sm:$0xff]  ;;  %v13223_v3 = vpack.c.bf16 %v7084_v10, %v7081_v51  ;;  %v7080_v15 = vld [vmem:[#allocation23 + $0xf90] sm:$0xff]  ;;  %v7125_v10 = vld [vmem:[#allocation23 + $0x10f8] sm:$0xff] }
 0xc34   : > { %v13213_v42 = vpack.c.bf16 %v7065_v37, %v7062_v54  ;;  %v7114_v54 = vld [vmem:[#allocation23 + $0x10a0] sm:$0xff] }
 0xc35   : > { %v7122_v51 = vld [vmem:[#allocation23 + $0x10e0] sm:$0xff] }
 0xc36   : > { %13186 = vmatpush1.bf16.msra.mxu1 %v13185_v62  ;;  %v13215_v62 = vpack.c.bf16 %v7072_v41, %v7069_v40  ;;  %v7110_v41 = vld [vmem:[#allocation23 + $0x1080] sm:$0xff] }
 0xc37   : > { %13188 = vmatprep.subr.bf16.mxu1 %v13187_v50  ;;  %v7068_v50 = vld [vmem:[#allocation23 + $0xf30] sm:$0xff] }
 0xc38   : > { %v13217_v45 = vpack.c.bf16 %v7071_v43, %v7068_v50  ;;  %v7120_v50 = vld [vmem:[#allocation23 + $0x10d0] sm:$0xff] }
 0xc3a   : > { %13190 = vmatpush1.bf16.msra.mxu1 %v13189_v47  ;;  %v7074_v47 = vld [vmem:[#allocation23 + $0xf60] sm:$0xff] }
 0xc3b   : > { %13192 = vmatprep.subr.bf16.mxu1 %v13191_v61  ;;  %v7077_v61 = vld [vmem:[#allocation23 + $0xf78] sm:$0xff] }
 0xc3e   : > { %13194 = vmatpush1.bf16.msra.mxu1 %v13193_v23 }
 0xc3f   : > { %13196 = vmatprep.subr.bf16.mxu1 %v13195_v57  ;;  %v13221_v57 = vpack.c.bf16 %v7077_v61, %v7074_v47  ;;  %v7126_v47 = vld [vmem:[#allocation23 + $0x1100] sm:$0xff] }
 0xc42   : > { %13198 = vmatpush1.bf16.msra.mxu1 %v13197_v9  ;;  %v7090_v9 = vld [vmem:[#allocation23 + $0xfe0] sm:$0xff] }
 0xc43   : > { %13200 = vmatprep.subr.bf16.mxu1 %v13199_v0  ;;  %v13225_v0 = vpack.c.bf16 %v7083_v5, %v7080_v15  ;;  %v13227_v53 = vpack.c.bf16 %v7090_v9, %v7087_v6  ;;  %v13253_v6 = vpack.c.bf16 %v7125_v10, %v7122_v51  ;;  %v7170_v51 = vld [vmem:[#allocation23 + $0x1260] sm:$0xff]  ;;  %v7173_v10 = vld [vmem:[#allocation23 + $0x1278] sm:$0xff] }
 0xc44   : > { %v11255_v22 = vpop.f32.mrb[36].mxu0 }
 0xc45   : > { %v11256_v26 = vpop.f32.mrb[37].mxu0 }
 0xc46   : > { %v11257_v29 = vadd.f32 %v11256_v26, %v11255_v22  ;;  %13202 = vmatpush1.bf16.msra.mxu1 %v13201_v8  ;;  %v7096_v8 = vld [vmem:[#allocation23 + $0x1010] sm:$0xff]  ;;  %v7095_v22 = vld [vmem:[#allocation23 + $0x1008] sm:$0xff] }
 0xc47   : > { %13204 = vmatprep.subr.bf16.mxu1 %v13203_v16  ;;  %v13229_v16 = vpack.c.bf16 %v7089_v39, %v7086_v63  ;;  %v13231_v20 = vpack.c.bf16 %v7096_v8, %v7093_v48  ;;  %v13233_v26 = vpack.c.bf16 %v7095_v22, %v7092_v19  ;;  %v7134_v39 = vld [vmem:[#allocation23 + $0x1140] sm:$0xff]  ;;  %v7137_v48 = vld [vmem:[#allocation23 + $0x1158] sm:$0xff]  ;;  %v7140_v22 = vld [vmem:[#allocation23 + $0x1170] sm:$0xff] }
 0xc48   : > { %v6509_v2 = vadd.f32 %v11257_v29, %v16146_v24  ;;  %v13219_v24 = vpack.c.bf16 %v7078_v60, %v7075_v44  ;;  %v13235_v29 = vpack.c.bf16 %v7102_v28, %v7099_v34  ;;  %v7116_v60 = vld [vmem:[#allocation23 + $0x10b0] sm:$0xff]  ;;  %v7141_v8 = vld [vmem:[#allocation23 + $0x1178] sm:$0xff]  ;;  %v7143_v34 = vld [vmem:[#allocation23 + $0x1188] sm:$0xff] }
 0xc49   : > { %v7147_v28 = vld [vmem:[#allocation23 + $0x11a8] sm:$0xff] }
 0xc4a   : > { %13206 = vmatpush1.bf16.msra.mxu1 %v13205_v30  ;;  %v7098_v30 = vld [vmem:[#allocation23 + $0x1020] sm:$0xff] }
 0xc4b   : > { %13208 = vmatprep.subr.bf16.mxu1 %v13207_v31  ;;  %v7101_v31 = vld [vmem:[#allocation23 + $0x1038] sm:$0xff] }
 0xc4c   : > { %v13237_v52 = vpack.c.bf16 %v7101_v31, %v7098_v30  ;;  %v7146_v30 = vld [vmem:[#allocation23 + $0x11a0] sm:$0xff]  ;;  %v7149_v31 = vld [vmem:[#allocation23 + $0x11b8] sm:$0xff] }
 0xc4e   : > { %13210 = vmatpush1.bf16.msra.mxu1 %v13209_v58  ;;  %v7107_v58 = vld [vmem:[#allocation23 + $0x1068] sm:$0xff] }
 0xc4f   : > { %13212 = vmatprep.subr.bf16.mxu1 %v13211_v59  ;;  %v7111_v59 = vld [vmem:[#allocation23 + $0x1088] sm:$0xff] }
 0xc50   : > { %v13243_v40 = vpack.c.bf16 %v7114_v54, %v7111_v59  ;;  %v7159_v59 = vld [vmem:[#allocation23 + $0x1208] sm:$0xff]  ;;  %v7162_v54 = vld [vmem:[#allocation23 + $0x1220] sm:$0xff] }
 0xc52   : > { %13214 = vmatpush1.bf16.msra.mxu1 %v13213_v42  ;;  %v7113_v42 = vld [vmem:[#allocation23 + $0x1098] sm:$0xff] }
 0xc53   : > { %13216 = vmatprep.subr.bf16.mxu1 %v13215_v62  ;;  %v7117_v62 = vld [vmem:[#allocation23 + $0x10b8] sm:$0xff]  ;;  %v13245_v43 = vpack.c.bf16 %v7113_v42, %v7110_v41  ;;  %v7158_v41 = vld [vmem:[#allocation23 + $0x1200] sm:$0xff] }
 0xc54   : > { %v6578_v13 = vpop.f32.mrb[38].mxu0  ;;  %v13247_v44 = vpack.c.bf16 %v7120_v50, %v7117_v62  ;;  %v7161_v42 = vld [vmem:[#allocation23 + $0x1218] sm:$0xff]  ;;  %v7168_v50 = vld [vmem:[#allocation23 + $0x1250] sm:$0xff] }
 0xc55   : > { %v16153_v11 = vadd.f32 %v6578_v13, %v6509_v2  ;;  %v11554_v23 = vpop.f32.mrb[39].mxu0  ;;  %v7104_v2 = vld [vmem:[#allocation23 + $0x1050] sm:$0xff]  ;;  %v7165_v62 = vld [vmem:[#allocation23 + $0x1238] sm:$0xff] }
 0xc56   : > { %13218 = vmatpush1.bf16.msra.mxu1 %v13217_v45  ;;  %v13241_v37 = vpack.c.bf16 %v7107_v58, %v7104_v2  ;;  %v7119_v45 = vld [vmem:[#allocation23 + $0x10c8] sm:$0xff]  ;;  %v7152_v2 = vld [vmem:[#allocation23 + $0x11d0] sm:$0xff] }
 0xc57   : > { %13220 = vmatprep.subr.bf16.mxu1 %v13219_v24  ;;  %v7123_v24 = vld [vmem:[#allocation23 + $0x10e8] sm:$0xff]  ;;  %v13249_v61 = vpack.c.bf16 %v7119_v45, %v7116_v60  ;;  %v7164_v60 = vld [vmem:[#allocation23 + $0x1230] sm:$0xff] }
 0xc58   : > { %v13251_v13 = vpack.c.bf16 %v7126_v47, %v7123_v24  ;;  %v7155_v58 = vld [vmem:[#allocation23 + $0x11e8] sm:$0xff]  ;;  %v7174_v47 = vld [vmem:[#allocation23 + $0x1280] sm:$0xff] }
 0xc59   : > { %v7167_v45 = vld [vmem:[#allocation23 + $0x1248] sm:$0xff] }
 0xc5a   : > { %13222 = vmatpush1.bf16.msra.mxu1 %v13221_v57  ;;  %v7129_v57 = vld [vmem:[#allocation23 + $0x1118] sm:$0xff]  ;;  %v7171_v24 = vld [vmem:[#allocation23 + $0x1268] sm:$0xff] }
 0xc5b   : > { %13224 = vmatprep.subr.bf16.mxu1 %v13223_v3  ;;  %v7132_v3 = vld [vmem:[#allocation23 + $0x1130] sm:$0xff] }
 0xc5c   : > { %v13255_v9 = vpack.c.bf16 %v7132_v3, %v7129_v57  ;;  %v7180_v57 = vld [vmem:[#allocation23 + $0x12b0] sm:$0xff] }
 0xc5e   : > { %13226 = vmatpush1.bf16.msra.mxu1 %v13225_v0 }
 0xc5f   : > { %13228 = vmatprep.subr.bf16.mxu1 %v13227_v53 }
 0xc62   : > { %13230 = vmatpush1.bf16.msra.mxu1 %v13229_v16  ;;  %v7144_v16 = vld [vmem:[#allocation23 + $0x1190] sm:$0xff] }
 0xc63   : > { %13232 = vmatprep.subr.bf16.mxu1 %v13231_v20  ;;  %v13261_v20 = vpack.c.bf16 %v7137_v48, %v7134_v39  ;;  %v13263_v19 = vpack.c.bf16 %v7144_v16, %v7141_v8  ;;  %v7182_v48 = vld [vmem:[#allocation23 + $0x12c0] sm:$0xff]  ;;  %v7185_v8 = vld [vmem:[#allocation23 + $0x12d8] sm:$0xff] }
 0xc64   : > { %v7189_v16 = vld [vmem:[#allocation23 + $0x12f8] sm:$0xff] }
 0xc66   : > { %13234 = vmatpush1.bf16.msra.mxu1 %v13233_v26  ;;  %v7150_v26 = vld [vmem:[#allocation23 + $0x11c0] sm:$0xff] }
 0xc67   : > { %13236 = vmatprep.subr.bf16.mxu1 %v13235_v29  ;;  %v13267_v29 = vpack.c.bf16 %v7150_v26, %v7147_v28  ;;  %v7191_v28 = vld [vmem:[#allocation23 + $0x1308] sm:$0xff] }
 0xc68   : > { %v7195_v26 = vld [vmem:[#allocation23 + $0x1328] sm:$0xff] }
 0xc6a   : > { %13238 = vmatpush1.bf16.msra.mxu1 %v13237_v52  ;;  %v13269_v52 = vpack.c.bf16 %v7149_v31, %v7146_v30  ;;  %v7194_v30 = vld [vmem:[#allocation23 + $0x1320] sm:$0xff]  ;;  %v7197_v31 = vld [vmem:[#allocation23 + $0x1338] sm:$0xff] }
 0xc6b   : > { %13240 = vmatprep.subr.bf16.mxu1 %v13239_v56  ;;  %v13271_v56 = vpack.c.bf16 %v7156_v1, %v7153_v32  ;;  %v7201_v32 = vld [vmem:[#allocation23 + $0x1358] sm:$0xff]  ;;  %v7204_v1 = vld [vmem:[#allocation23 + $0x1370] sm:$0xff] }
 0xc6e   : > { %13242 = vmatpush1.bf16.msra.mxu1 %v13241_v37  ;;  %v13273_v37 = vpack.c.bf16 %v7155_v58, %v7152_v2  ;;  %v13301_v2 = vpack.c.bf16 %v7197_v31, %v7194_v30  ;;  %v8460_v30 = vld [vmem:[#allocation26 + $0x918] sm:$0xff] }
 0xc6f   : > { %13244 = vmatprep.subr.bf16.mxu1 %v13243_v40  ;;  %v13275_v40 = vpack.c.bf16 %v7162_v54, %v7159_v59  ;;  %v13303_v59 = vpack.c.bf16 %v7204_v1, %v7201_v32  ;;  %v7200_v54 = vld [vmem:[#allocation23 + $0x1350] sm:$0xff]  ;;  %v8464_v31 = vld [vmem:[#allocation26 + $0x938] sm:$0xff] }
 0xc70   : > { %v13543_v32 = vpack.c.bf16 %v8464_v31, %v8460_v30  ;;  %v8459_v1 = vld [vmem:[#allocation26 + $0x910] sm:$0xff]  ;;  %v8536_v30 = vld [vmem:[#allocation26 + $0xb78] sm:$0xff] }
 0xc71   : > { %7311 = vmatmul.mubr.f32.vlgmr.msra.gmra.mrb[20].mxu1 %v7235_v27  ;;  %v7131_v27 = vld [vmem:[#allocation23 + $0x1128] sm:$0xff] }
 0xc72   : > { %13246 = vmatpush1.bf16.msra.mxu1 %v13245_v43  ;;  %7381 = vmatprep.mubr.f32.mxu1 %v7238_v46  ;;  %v7138_v46 = vld [vmem:[#allocation23 + $0x1160] sm:$0xff]  ;;  %v13257_v53 = vpack.c.bf16 %v7131_v27, %v7128_v7  ;;  %v13277_v43 = vpack.c.bf16 %v7161_v42, %v7158_v41  ;;  %v7176_v7 = vld [vmem:[#allocation23 + $0x1290] sm:$0xff]  ;;  %v7179_v27 = vld [vmem:[#allocation23 + $0x12a8] sm:$0xff] }
 0xc73   : > { %13248 = vmatprep.subr.bf16.mxu1 %v13247_v44  ;;  %v13259_v63 = vpack.c.bf16 %v7138_v46, %v7135_v21  ;;  %v13279_v44 = vpack.c.bf16 %v7168_v50, %v7165_v62  ;;  %v7183_v21 = vld [vmem:[#allocation23 + $0x12c8] sm:$0xff]  ;;  %v7186_v46 = vld [vmem:[#allocation23 + $0x12e0] sm:$0xff] }
 0xc74   : > { %v11299_v23 = vpop.f32.mrb[40].mxu0  ;;  %v13291_v39 = vpack.c.bf16 %v7186_v46, %v7183_v21  ;;  %v7210_v41 = vld [vmem:[#allocation23 + $0x13a0] sm:$0xff] }
 0xc75   : > { %v11300_v15 = vpop.f32.mrb[41].mxu0  ;;  %v7206_v50 = vld [vmem:[#allocation23 + $0x1380] sm:$0xff] }
 0xc76   : > { %v11301_v5 = vadd.f32 %v11300_v15, %v11299_v23  ;;  %13250 = vmatpush1.bf16.msra.mxu1 %v13249_v61  ;;  %v13281_v61 = vpack.c.bf16 %v7167_v45, %v7164_v60  ;;  %v7177_v23 = vld [vmem:[#allocation23 + $0x1298] sm:$0xff]  ;;  %v7216_v60 = vld [vmem:[#allocation23 + $0x13d0] sm:$0xff] }
 0xc77   : > { %13252 = vmatprep.subr.bf16.mxu1 %v13251_v13  ;;  %v13283_v13 = vpack.c.bf16 %v7174_v47, %v7171_v24  ;;  %v7212_v47 = vld [vmem:[#allocation23 + $0x13b0] sm:$0xff] }
 0xc78   : > { %v16160_v0 = vadd.f32 %v11301_v5, %v16153_v11  ;;  %v13265_v11 = vpack.c.bf16 %v7143_v34, %v7140_v22  ;;  %v13285_v5 = vpack.c.bf16 %v7173_v10, %v7170_v51  ;;  %v7188_v34 = vld [vmem:[#allocation23 + $0x12f0] sm:$0xff]  ;;  %v7222_v51 = vld [vmem:[#allocation23 + $0x1400] sm:$0xff] }
 0xc7a   : > { %13254 = vmatpush1.bf16.msra.mxu1 %v13253_v6 }
 0xc7b   : > { %13256 = vmatprep.subr.bf16.mxu1 %v13255_v9  ;;  %v13287_v9 = vpack.c.bf16 %v7180_v57, %v7177_v23  ;;  %v7218_v57 = vld [vmem:[#allocation23 + $0x13e0] sm:$0xff] }
 0xc7e   : > { %13258 = vmatpush1.bf16.msra.mxu1 %v13257_v53 }
 0xc7f   : > { %13260 = vmatprep.subr.bf16.mxu1 %v13259_v63  ;;  %v13289_v63 = vpack.c.bf16 %v7179_v27, %v7176_v7  ;;  %v7224_v7 = vld [vmem:[#allocation23 + $0x1410] sm:$0xff]  ;;  %v7227_v27 = vld [vmem:[#allocation23 + $0x1428] sm:$0xff] }
 0xc80   : > { %v13321_v21 = vpack.c.bf16 %v7227_v27, %v7224_v7  ;;  %v8499_v7 = vld [vmem:[#allocation26 + $0xa50] sm:$0xff] }
 0xc81   : > { %v8503_v27 = vld [vmem:[#allocation26 + $0xa70] sm:$0xff] }
 0xc82   : > { %13262 = vmatpush1.bf16.msra.mxu1 %v13261_v20  ;;  %v7192_v20 = vld [vmem:[#allocation23 + $0x1310] sm:$0xff] }
 0xc83   : > { %13264 = vmatprep.subr.bf16.mxu1 %v13263_v19  ;;  %v13293_v19 = vpack.c.bf16 %v7185_v8, %v7182_v48  ;;  %v13295_v22 = vpack.c.bf16 %v7192_v20, %v7189_v16  ;;  %v16169_v8 = vld [vmem:[#allocation25] sm:$0x7] }
 0xc86   : > { %13266 = vmatpush1.bf16.msra.mxu1 %v13265_v11  ;;  %v7198_v11 = vld [vmem:[#allocation23 + $0x1340] sm:$0xff] }
 0xc87   : > { %13268 = vmatprep.subr.bf16.mxu1 %v13267_v29  ;;  %v13297_v29 = vpack.c.bf16 %v7191_v28, %v7188_v34 }
 0xc8a   : > { %13270 = vmatpush1.bf16.msra.mxu1 %v13269_v52 }
 0xc8b   : > { %13272 = vmatprep.subr.bf16.mxu1 %v13271_v56 }
 0xc8e   : > { %13274 = vmatpush1.bf16.msra.mxu1 %v13273_v37  ;;  %v7203_v37 = vld [vmem:[#allocation23 + $0x1368] sm:$0xff] }
 0xc8f   : > { %13276 = vmatprep.subr.bf16.mxu1 %v13275_v40  ;;  %v7207_v40 = vld [vmem:[#allocation23 + $0x1388] sm:$0xff]  ;;  %v13305_v42 = vpack.c.bf16 %v7203_v37, %v7200_v54  ;;  %v8471_v37 = vld [vmem:[#allocation26 + $0x970] sm:$0xff] }
 0xc90   : > { %v13307_v62 = vpack.c.bf16 %v7210_v41, %v7207_v40  ;;  %v8476_v41 = vld [vmem:[#allocation26 + $0x998] sm:$0xff] }
 0xc92   : > { %13278 = vmatpush1.bf16.msra.mxu1 %v13277_v43  ;;  %v7209_v43 = vld [vmem:[#allocation23 + $0x1398] sm:$0xff] }
 0xc93   : > { %13280 = vmatprep.subr.bf16.mxu1 %v13279_v44  ;;  %v7213_v44 = vld [vmem:[#allocation23 + $0x13b8] sm:$0xff]  ;;  %v13309_v45 = vpack.c.bf16 %v7209_v43, %v7206_v50 }
 0xc94   : > { %v13311_v24 = vpack.c.bf16 %v7216_v60, %v7213_v44  ;;  %v8475_v50 = vld [vmem:[#allocation26 + $0x990] sm:$0xff]  ;;  %v8484_v60 = vld [vmem:[#allocation26 + $0x9d8] sm:$0xff] }
 0xc95   : > { %v11334_v3 = vpop.f32.mrb[42].mxu0  ;;  %v8479_v43 = vld [vmem:[#allocation26 + $0x9b0] sm:$0xff] }
 0xc96   : > { %v11335_v15 = vpop.f32.mrb[43].mxu0  ;;  %13282 = vmatpush1.bf16.msra.mxu1 %v13281_v61  ;;  %v7215_v61 = vld [vmem:[#allocation23 + $0x13c8] sm:$0xff]  ;;  %v13553_v44 = vpack.c.bf16 %v8479_v43, %v8475_v50  ;;  %v8551_v50 = vld [vmem:[#allocation26 + $0xbf0] sm:$0xff] }
 0xc97   : > { %v11336_v6 = vadd.f32 %v11335_v15, %v11334_v3  ;;  %13284 = vmatprep.subr.bf16.mxu1 %v13283_v13  ;;  %v7219_v13 = vld [vmem:[#allocation23 + $0x13e8] sm:$0xff]  ;;  %v13313_v10 = vpack.c.bf16 %v7215_v61, %v7212_v47  ;;  %v7221_v3 = vld [vmem:[#allocation23 + $0x13f8] sm:$0xff] }
 0xc98   : > { %v13315_v23 = vpack.c.bf16 %v7222_v51, %v7219_v13  ;;  %v7225_v15 = vld [vmem:[#allocation23 + $0x1418] sm:$0xff] }
 0xc99   : > { %v6935_v53 = vadd.f32 %v11336_v6, %v16160_v0  ;;  %v13299_v0 = vpack.c.bf16 %v7198_v11, %v7195_v26  ;;  %v13317_v6 = vpack.c.bf16 %v7221_v3, %v7218_v57  ;;  %v8483_v47 = vld [vmem:[#allocation26 + $0x9d0] sm:$0xff]  ;;  %v8492_v51 = vld [vmem:[#allocation26 + $0xa18] sm:$0xff] }
 0xc9a   : > { %13286 = vmatpush1.bf16.msra.mxu1 %v13285_v5  ;;  %v7228_v5 = vld [vmem:[#allocation23 + $0x1430] sm:$0xff] }
 0xc9b   : > { %13288 = vmatprep.subr.bf16.mxu1 %v13287_v9  ;;  %v13319_v9 = vpack.c.bf16 %v7228_v5, %v7225_v15  ;;  %v8487_v61 = vld [vmem:[#allocation26 + $0x9f0] sm:$0xff]  ;;  %v8500_v5 = vld [vmem:[#allocation26 + $0xa58] sm:$0xff] }
 0xc9c   : > { %v13557_v13 = vpack.c.bf16 %v8487_v61, %v8483_v47  ;;  %v8491_v57 = vld [vmem:[#allocation26 + $0xa10] sm:$0xff] }
 0xc9d   : > { %v8495_v3 = vld [vmem:[#allocation26 + $0xa30] sm:$0xff] }
 0xc9e   : > { %13290 = vmatpush1.bf16.msra.mxu1 %v13289_v63  ;;  %v13561_v15 = vpack.c.bf16 %v8495_v3, %v8491_v57  ;;  %v8559_v47 = vld [vmem:[#allocation26 + $0xc30] sm:$0xff] }
 0xc9f   : > { %13292 = vmatprep.subr.bf16.mxu1 %v13291_v39 }
 0xca2   : > { %13294 = vmatpush1.bf16.msra.mxu1 %v13293_v19  ;;  %v7685_v19 = vrot.slane %v16169_v8, %v16058_v33 }
 0xca3   : > { %13296 = vmatprep.subr.bf16.mxu1 %v13295_v22 }
 0xca5   : > { %v7004_v52 = vpop.f32.mrb[44].mxu0 }
 0xca6   : > { %v7005_v56 = vadd.f32 %v7004_v52, %v6935_v53  ;;  %13298 = vmatpush1.bf16.msra.mxu1 %v13297_v29  ;;  %v11573_v58 = vpop.f32.mrb[45].mxu0  ;;  %v8463_v52 = vld [vmem:[#allocation26 + $0x930] sm:$0xff] }
 0xca7   : > { %13300 = vmatprep.subr.bf16.mxu1 %v13299_v0  ;;  %v8468_v58 = vld [vmem:[#allocation26 + $0x958] sm:$0xff] }
 0xcaa   : > { %13302 = vmatpush1.bf16.msra.mxu1 %v13301_v2  ;;  %v13545_v2 = vpack.c.bf16 %v8463_v52, %v8459_v1  ;;  %v8535_v1 = vld [vmem:[#allocation26 + $0xb70] sm:$0xff] }
 0xcab   : > { %13304 = vmatprep.subr.bf16.mxu1 %v13303_v59  ;;  %v8472_v59 = vld [vmem:[#allocation26 + $0x978] sm:$0xff] }
 0xcac   : > { %v13547_v54 = vpack.c.bf16 %v8472_v59, %v8468_v58  ;;  %v8544_v58 = vld [vmem:[#allocation26 + $0xbb8] sm:$0xff] }
 0xcae   : > { %13306 = vmatpush1.bf16.msra.mxu1 %v13305_v42  ;;  %v8480_v42 = vld [vmem:[#allocation26 + $0x9b8] sm:$0xff] }
 0xcaf   : > { %13308 = vmatprep.subr.bf16.mxu1 %v13307_v62  ;;  %v13551_v62 = vpack.c.bf16 %v8480_v42, %v8476_v41  ;;  %v8552_v41 = vld [vmem:[#allocation26 + $0xbf8] sm:$0xff] }
 0xcb1   : > { %7382 = vmatmul.mubr.f32.vlgmr.msra.gmra.mrb[20].mxu1 %v7237_v25 }
 0xcb2   : > { %13310 = vmatpush1.bf16.msra.mxu1 %v13309_v45  ;;  %7452 = vmatprep.mubr.f32.mxu1 %v15927_v17  ;;  %v8488_v45 = vld [vmem:[#allocation26 + $0x9f8] sm:$0xff] }
 0xcb3   : > { %13312 = vmatprep.subr.bf16.mxu1 %v13311_v24  ;;  %v13555_v24 = vpack.c.bf16 %v8488_v45, %v8484_v60  ;;  %v8560_v60 = vld [vmem:[#allocation26 + $0xc38] sm:$0xff] }
 0xcb6   : > { %13314 = vmatpush1.bf16.msra.mxu1 %v13313_v10  ;;  %v8496_v10 = vld [vmem:[#allocation26 + $0xa38] sm:$0xff] }
 0xcb7   : > { %13316 = vmatprep.subr.bf16.mxu1 %v13315_v23  ;;  %v13559_v23 = vpack.c.bf16 %v8496_v10, %v8492_v51  ;;  %v7681_v51 = vrot.slane %v16169_v8, %v15767_v38 }
 0xcba   : > { %13318 = vmatpush1.bf16.msra.mxu1 %v13317_v6  ;;  %v8504_v6 = vld [vmem:[#allocation26 + $0xa78] sm:$0xff] }
 0xcbb   : > { %13320 = vmatprep.subr.bf16.mxu1 %v13319_v9  ;;  %v13563_v9 = vpack.c.bf16 %v8504_v6, %v8500_v5 }
 0xcbe   : > { %13322 = vmatpush1.bf16.msra.mxu1 %v13321_v21  ;;  %v13565_v21 = vpack.c.bf16 %v8503_v27, %v8499_v7 }
 0xcbf   : > { %13544 = vmatprep.subr.bf16.mxu1 %v13543_v32  ;;  %v8531_v32 = vld [vmem:[#allocation26 + $0xb50] sm:$0xff] }
 0xcc0   : > { %v13581_v52 = vpack.c.bf16 %v8535_v1, %v8531_v32 }
 0xcc1   : > { %10997 = vmatmul.mubr.msk.f32.vlgmr.msra.gmra.mrb[20].mxu1 %vm842_vm12, %v7239_v55 }
 0xcc2   : > { %13546 = vmatpush1.bf16.msra.mxu1 %v13545_v2  ;;  %v8540_v2 = vld [vmem:[#allocation26 + $0xb98] sm:$0xff] }
 0xcc3   : > { %13548 = vmatprep.subr.bf16.mxu1 %v13547_v54  ;;  %v13583_v59 = vpack.c.bf16 %v8544_v58, %v8540_v2  ;;  %v8539_v54 = vld [vmem:[#allocation26 + $0xb90] sm:$0xff]  ;;  %v8477_v2 = vld [vmem:[#allocation26 + $0x9a0] sm:$0xff]  ;;  %v8482_v58 = vld [vmem:[#allocation26 + $0x9c8] sm:$0xff] }
 0xcc5   : > { %v11378_v12 = vpop.f32.mrb[46].mxu0 }
 0xcc6   : > { %v11379_v25 = vpop.f32.mrb[47].mxu0 }
 0xcc7   : > { %v11380_v46 = vadd.f32 %v11379_v25, %v11378_v12  ;;  %v8508_v12 = vld [vmem:[#allocation26 + $0xa98] sm:$0xff] }
 0xcc8   : > { %v8512_v25 = vld [vmem:[#allocation26 + $0xab8] sm:$0xff] }
 0xce5   : > { %v11413_v53 = vpop.f32.mrb[48].mxu0 }
 0xce6   : > { %v11414_v63 = vpop.f32.mrb[49].mxu0 }
 0xce7   : > { %v11415_v39 = vadd.f32 %v11414_v63, %v11413_v53  ;;  %v8507_v53 = vld [vmem:[#allocation26 + $0xa90] sm:$0xff] }
 0xce8   : > { %v8511_v63 = vld [vmem:[#allocation26 + $0xab0] sm:$0xff] }
 0xce9   : > { %v7596_v48 = vadd.f32 %v11415_v39, %v11380_v46  ;;  %v13567_v46 = vpack.c.bf16 %v8512_v25, %v8508_v12  ;;  %v13569_v39 = vpack.c.bf16 %v8511_v63, %v8507_v53 }
 0xcf5   : > { %v7665_v16 = vpop.f32.mrb[50].mxu0 }
 0xcf6   : > { %v7666_v20 = vadd.f32 %v7665_v16, %v7596_v48  ;;  %v11592_v22 = vpop.f32.mrb[51].mxu0  ;;  %v8516_v48 = vld [vmem:[#allocation26 + $0xad8] sm:$0xff] }
 0xcf7   : > { %v8520_v16 = vld [vmem:[#allocation26 + $0xaf8] sm:$0xff]  ;;  %v8519_v22 = vld [vmem:[#allocation26 + $0xaf0] sm:$0xff] }
 0xcf8   : > { %v7671_v34 = vadd.f32 %v7666_v20, %v7005_v56  ;;  %v8467_v56 = vld [vmem:[#allocation26 + $0x950] sm:$0xff]  ;;  %v13571_v20 = vpack.c.bf16 %v8520_v16, %v8516_v48 }
 0xcf9   : > { %v13549_v40 = vpack.c.bf16 %v8471_v37, %v8467_v56  ;;  %v8543_v56 = vld [vmem:[#allocation26 + $0xbb0] sm:$0xff] }
 0xcfa   : > { %v7691_v28 = vadd.f32 %v7685_v19, %v7671_v34  ;;  %v8515_v19 = vld [vmem:[#allocation26 + $0xad0] sm:$0xff]  ;;  %v13585_v37 = vpack.c.bf16 %v8543_v56, %v8539_v54 }
 0xcfb   : > { %13550 = vmatpush1.bf16.msra.mxu1 %v13549_v40  ;;  %v13573_v34 = vpack.c.bf16 %v8519_v22, %v8515_v19  ;;  %v8548_v40 = vld [vmem:[#allocation26 + $0xbd8] sm:$0xff]  ;;  %v8458_v19 = vld [vmem:[#allocation26 + $0x908] sm:$0xff] }
 0xcfc   : > { %v7694_v49 = vmul.f32 0.5, %v7691_v28  ;;  %13552 = vmatprep.subr.bf16.mxu1 %v13551_v62  ;;  %v13587_v42 = vpack.c.bf16 %v8552_v41, %v8548_v40  ;;  %v8547_v62 = vld [vmem:[#allocation26 + $0xbd0] sm:$0xff]  ;;  %v8462_v22 = vld [vmem:[#allocation26 + $0x928] sm:$0xff]  ;;  %v8485_v40 = vld [vmem:[#allocation26 + $0x9e0] sm:$0xff] }
 0xcfd   : > { %v13589_v43 = vpack.c.bf16 %v8551_v50, %v8547_v62  ;;  %v8490_v41 = vld [vmem:[#allocation26 + $0xa08] sm:$0xff]  ;;  %v8489_v50 = vld [vmem:[#allocation26 + $0xa00] sm:$0xff] }
 0xcfe   : > { %14597 = vtanh.f32 %v7694_v49  ;;  %v8528_v49 = vld [vmem:[#allocation26 + $0xb38] sm:$0xff] }
 0xcff   : > { %13554 = vmatpush1.bf16.msra.mxu1 %v13553_v44  ;;  %v8556_v44 = vld [vmem:[#allocation26 + $0xc18] sm:$0xff] }
 0xd00   : > { %13556 = vmatprep.subr.bf16.mxu1 %v13555_v24  ;;  %v13591_v45 = vpack.c.bf16 %v8560_v60, %v8556_v44  ;;  %v8555_v24 = vld [vmem:[#allocation26 + $0xc10] sm:$0xff]  ;;  %v8498_v44 = vld [vmem:[#allocation26 + $0xa48] sm:$0xff] }
 0xd01   : > { %v13593_v61 = vpack.c.bf16 %v8559_v47, %v8555_v24  ;;  %v8502_v60 = vld [vmem:[#allocation26 + $0xa68] sm:$0xff]  ;;  %v8497_v47 = vld [vmem:[#allocation26 + $0xa40] sm:$0xff] }
 0xd02   : > { %v13419_v24 = vpack.c.bf16 %v8502_v60, %v8498_v44  ;;  %v8563_v44 = vld [vmem:[#allocation26 + $0xc50] sm:$0xff] }
 0xd03   : > { %13558 = vmatpush1.bf16.msra.mxu1 %v13557_v13  ;;  %v7677_v13 = vrot.slane %v16169_v8, %v15764_v36  ;;  %v8567_v60 = vld [vmem:[#allocation26 + $0xc70] sm:$0xff] }
 0xd04   : > { %13560 = vmatprep.subr.bf16.mxu1 %v13559_v23 }
 0xd07   : > { %13562 = vmatpush1.bf16.msra.mxu1 %v13561_v15 }
 0xd08   : > { %v14598_v55 = vpop.eup %14597  ;;  %13564 = vmatprep.subr.bf16.mxu1 %v13563_v9 }
 0xd09   : > { %v7700_v26 = vadd.f32 1.0, %v14598_v55 }
 0xd0b   : > { %v7703_v11 = vmul.f32 0.5, %v7700_v26  ;;  %13566 = vmatpush1.bf16.msra.mxu1 %v13565_v21  ;;  %v8523_v26 = vld [vmem:[#allocation26 + $0xb10] sm:$0xff] }
 0xd0c   : > { %13568 = vmatprep.subr.bf16.mxu1 %v13567_v46 }
 0xd0d   : > { %v7706_v29 = vmul.f32 %v7703_v11, %v7691_v28  ;;  %v8524_v28 = vld [vmem:[#allocation26 + $0xb18] sm:$0xff]  ;;  %v8527_v11 = vld [vmem:[#allocation26 + $0xb30] sm:$0xff] }
 0xd0e   : > { %v13575_v55 = vpack.c.bf16 %v8528_v49, %v8524_v28  ;;  %v8457_v28 = vld [vmem:[#allocation26 + $0x900] sm:$0xff]  ;;  %v8466_v49 = vld [vmem:[#allocation26 + $0x948] sm:$0xff] }
 0xd0f   : > { %v7712_v0 = vrot.slane %v7706_v29, 7  ;;  %13570 = vmatpush1.bf16.msra.mxu1 %v13569_v39  ;;  %v13577_v29 = vpack.c.bf16 %v8527_v11, %v8523_v26  ;;  %v7722_v39 = vld [vmem:[#allocation7 + $0x18] sm:$0x3f] }
 0xd10   : > { %13572 = vmatprep.subr.bf16.mxu1 %v13571_v20  ;;  %v7723_v20 = vld [vmem:[#allocation7 + $0x20] sm:$0x3f] }
 0xd11   : > { %7718 = vst [vmem:[#allocation7 + $0x10] sm:$0x1e] %v7712_v0  ;;  %v8532_v0 = vld [vmem:[#allocation26 + $0xb58] sm:$0xff] }
 0xd12   : > { %v13579_v31 = vpack.c.bf16 %v8536_v30, %v8532_v0  ;;  %v8469_v0 = vld [vmem:[#allocation26 + $0x960] sm:$0xff]  ;;  %v8474_v30 = vld [vmem:[#allocation26 + $0x988] sm:$0xff] }
 0xd13   : > { %13574 = vmatpush1.bf16.msra.mxu1 %v13573_v34  ;;  %v13399_v34 = vpack.c.bf16 %v8462_v22, %v8458_v19  ;;  %v8533_v19 = vld [vmem:[#allocation26 + $0xb60] sm:$0xff]  ;;  %v8538_v22 = vld [vmem:[#allocation26 + $0xb88] sm:$0xff] }
 0xd14   : > { %13576 = vmatprep.subr.bf16.mxu1 %v13575_v55  ;;  %v8470_v55 = vld [vmem:[#allocation26 + $0x968] sm:$0xff] }
 0xd15   : > { %v13403_v11 = vpack.c.bf16 %v8470_v55, %v8466_v49  ;;  %v8537_v49 = vld [vmem:[#allocation26 + $0xb80] sm:$0xff] }
 0xd16   : > { %v8541_v55 = vld [vmem:[#allocation26 + $0xba0] sm:$0xff] }
 0xd17   : > { %13578 = vmatpush1.bf16.msra.mxu1 %v13577_v29  ;;  %v8465_v29 = vld [vmem:[#allocation26 + $0x940] sm:$0xff] }
 0xd18   : > { %13580 = vmatprep.subr.bf16.mxu1 %v13579_v31  ;;  %v7721_v16 = vld [vmem:[#allocation7 + $0x10] sm:$0x3f]  ;;  %v8478_v31 = vld [vmem:[#allocation26 + $0x9a8] sm:$0xff]  ;;  %v13405_v32 = vpack.c.bf16 %v8469_v0, %v8465_v29  ;;  %v13441_v29 = vpack.c.bf16 %v8541_v55, %v8537_v49 }
 0xd19   : > { %v13407_v1 = vpack.c.bf16 %v8478_v31, %v8474_v30  ;;  %v8545_v30 = vld [vmem:[#allocation26 + $0xbc0] sm:$0xff] }
 0xd1a   : > { %v8549_v31 = vld [vmem:[#allocation26 + $0xbe0] sm:$0xff] }
 0xd1b   : > { %13582 = vmatpush1.bf16.msra.mxu1 %v13581_v52  ;;  %v8473_v52 = vld [vmem:[#allocation26 + $0x980] sm:$0xff] }
 0xd1c   : > { %13584 = vmatprep.subr.bf16.mxu1 %v13583_v59  ;;  %v8486_v59 = vld [vmem:[#allocation26 + $0x9e8] sm:$0xff]  ;;  %v13409_v54 = vpack.c.bf16 %v8477_v2, %v8473_v52  ;;  %v13445_v52 = vpack.c.bf16 %v8549_v31, %v8545_v30  ;;  %v8587_v31 = vld [vmem:[#allocation26 + $0xd10] sm:$0xff] }
 0xd1d   : > { %v13411_v56 = vpack.c.bf16 %v8486_v59, %v8482_v58  ;;  %v8553_v58 = vld [vmem:[#allocation26 + $0xc00] sm:$0xff] }
 0xd1e   : > { %v8557_v59 = vld [vmem:[#allocation26 + $0xc20] sm:$0xff] }
 0xd1f   : > { %13586 = vmatpush1.bf16.msra.mxu1 %v13585_v37  ;;  %v8481_v37 = vld [vmem:[#allocation26 + $0x9c0] sm:$0xff] }
 0xd20   : > { %13588 = vmatprep.subr.bf16.mxu1 %v13587_v42  ;;  %v8494_v42 = vld [vmem:[#allocation26 + $0xa28] sm:$0xff]  ;;  %v13413_v62 = vpack.c.bf16 %v8485_v40, %v8481_v37  ;;  %v8564_v40 = vld [vmem:[#allocation26 + $0xc58] sm:$0xff] }
 0xd21   : > { %v8566_v37 = vld [vmem:[#allocation26 + $0xc68] sm:$0xff] }
 0xd23   : > { %13590 = vmatpush1.bf16.msra.mxu1 %v13589_v43  ;;  %v8493_v43 = vld [vmem:[#allocation26 + $0xa20] sm:$0xff] }
 0xd24   : > { %13592 = vmatprep.subr.bf16.mxu1 %v13591_v45  ;;  %v13417_v45 = vpack.c.bf16 %v8493_v43, %v8489_v50 }
 0xd27   : > { %13594 = vmatpush1.bf16.msra.mxu1 %v13593_v61  ;;  %v8501_v61 = vld [vmem:[#allocation26 + $0xa60] sm:$0xff] }
 0xd94   : > { %v7454_v10 = vpop.f32.mrb[20].mxu1 }
 0xd95   : > { %v7689_v23 = vadd.f32 %v7677_v13, %v7454_v10  ;;  %v7456_v57 = vpop.f32.mrb[21].mxu1  ;;  %v8506_v13 = vld [vmem:[#allocation26 + $0xa88] sm:$0xff]  ;;  %v13421_v10 = vpack.c.bf16 %v8501_v61, %v8497_v47  ;;  %v8572_v61 = vld [vmem:[#allocation26 + $0xc98] sm:$0xff] }
 0xd96   : > { %v7690_v3 = vadd.f32 %v7681_v51, %v7456_v57  ;;  %v8510_v51 = vld [vmem:[#allocation26 + $0xaa8] sm:$0xff]  ;;  %v8505_v57 = vld [vmem:[#allocation26 + $0xa80] sm:$0xff] }
 0xd97   : > { %v7692_v15 = vmul.f32 0.5, %v7689_v23  ;;  %v8574_v47 = vld [vmem:[#allocation26 + $0xca8] sm:$0xff] }
 0xd98   : > { %v7693_v5 = vmul.f32 0.5, %v7690_v3 }
 0xd99   : > { %14599 = vtanh.f32 %v7692_v15  ;;  %v8514_v15 = vld [vmem:[#allocation26 + $0xac8] sm:$0xff] }
 0xd9a   : > { %14601 = vtanh.f32 %v7693_v5  ;;  %v8518_v5 = vld [vmem:[#allocation26 + $0xae8] sm:$0xff] }
 0xda3   : > { %v14600_v6 = vpop.eup %14599 }
 0xda4   : > { %v14602_v9 = vpop.eup %14601  ;;  %v7698_v7 = vadd.f32 1.0, %v14600_v6 }
 0xda5   : > { %v7699_v27 = vadd.f32 1.0, %v14602_v9  ;;  %v13427_v9 = vpack.c.bf16 %v8518_v5, %v8514_v15  ;;  %v8571_v15 = vld [vmem:[#allocation26 + $0xc90] sm:$0xff] }
 0xda6   : > { %v7701_v21 = vmul.f32 0.5, %v7698_v7  ;;  %v8513_v7 = vld [vmem:[#allocation26 + $0xac0] sm:$0xff]  ;;  %v8575_v5 = vld [vmem:[#allocation26 + $0xcb0] sm:$0xff] }
 0xda7   : > { %v7702_v12 = vmul.f32 0.5, %v7699_v27  ;;  %v8517_v27 = vld [vmem:[#allocation26 + $0xae0] sm:$0xff] }
 0xda8   : > { %v7704_v25 = vmul.f32 %v7701_v21, %v7689_v23  ;;  %v13423_v23 = vpack.c.bf16 %v8510_v51, %v8506_v13  ;;  %v8522_v21 = vld [vmem:[#allocation26 + $0xb08] sm:$0xff]  ;;  %v8576_v51 = vld [vmem:[#allocation26 + $0xcb8] sm:$0xff] }
 0xda9   : > { %v7705_v46 = vmul.f32 %v7702_v12, %v7690_v3  ;;  %v8509_v3 = vld [vmem:[#allocation26 + $0xaa0] sm:$0xff]  ;;  %v8526_v12 = vld [vmem:[#allocation26 + $0xb28] sm:$0xff] }
 0xdaa   : > { %v7710_v53 = vrot.slane %v7704_v25, 7  ;;  %v13425_v6 = vpack.c.bf16 %v8509_v3, %v8505_v57  ;;  %v13429_v25 = vpack.c.bf16 %v8517_v27, %v8513_v7  ;;  %v13599_v57 = vpack.c.bf16 %v8576_v51, %v8572_v61  ;;  %v8582_v7 = vld [vmem:[#allocation26 + $0xce8] sm:$0xff]  ;;  %v8580_v27 = vld [vmem:[#allocation26 + $0xcd8] sm:$0xff]  ;;  %v8601_v61 = vld [vmem:[#allocation26 + $0xd80] sm:$0xff] }
 0xdab   : > { %v7711_v63 = vrot.slane %v7705_v46, 7  ;;  %v13431_v46 = vpack.c.bf16 %v8526_v12, %v8522_v21  ;;  %v8584_v12 = vld [vmem:[#allocation26 + $0xcf8] sm:$0xff] }
 0xdac   : > { %7716 = vst [vmem:[#allocation7] sm:$0x1e] %v7710_v53  ;;  %v8521_v53 = vld [vmem:[#allocation26 + $0xb00] sm:$0xff] }
 0xdad   : > { %7717 = vst [vmem:[#allocation7 + $0x8] sm:$0x1e] %v7711_v63  ;;  %v8525_v63 = vld [vmem:[#allocation26 + $0xb20] sm:$0xff] }
 0xdb3   : > { %v7719_v48 = vld [vmem:[#allocation7] sm:$0x3f] }
 0xdb4   : > { %v7720_v8 = vld [vmem:[#allocation7 + $0x8] sm:$0x3f] }
 0xdb5   : > { %10999 = vmatprep.subr.msk.mxu0 %vm905_vm1, %v7720_v8 }
 0xdb6   : > { %11000 = vmatpush1.msk.msra.mxu0 %vm905_vm1, %v7719_v48 }
 0xdb7   : > { %11001 = vmatmul.mubr.msk.f32.vlgmr.msra.gmra.mrb[52].mxu0 %vm7724_vm3, %v15829_v4  ;;  %11002 = vmatprep.subr.msk.mxu0 %vm905_vm1, %v7722_v39 }
 0xdb8   : > { %11003 = vmatpush1.msk.msra.mxu0 %vm905_vm1, %v7721_v16  ;;  %7877 = vmatprep.mubr.f32.mxu0 %v15927_v17 }
 0xdb9   : > { %11593 = vmatprep.subr.mxu0 %v15927_v17 }
 0xdbb   : > { %11004 = vmatmul.mubr.msk.f32.vlgmr.msra.gmra.mrb[54].mxu0 %vm7724_vm3, %v15829_v4 }
 0xdbc   : > { %11594 = vmatpush3.msk.msra.mxu0 %vm905_vm1, %v7723_v20  ;;  %11595 = vmatprep.mubr.msk.f32.mxu0 %vm15113_vm7, %v15927_v17 }
 0xdbd   : > { %11007 = vmatprep.subr.msk.mxu0 %vm905_vm1, %v7720_v8  ;;  %v8530_v8 = vld [vmem:[#allocation26 + $0xb48] sm:$0xff] }
 0xdbf   : > { %11596 = vmatmul.mubr.msk.f32.vlgmr.msra.gmra.mrb[56].mxu0 %vm7724_vm3, %v15829_v4  ;;  %v8461_v4 = vld [vmem:[#allocation26 + $0x920] sm:$0xff] }
 0xdc0   : > { %11008 = vmatpush1.msk.msra.mxu0 %vm905_vm1, %v7719_v48  ;;  %8308 = vmatprep.mubr.f32.mxu0 %v15927_v17  ;;  %v13401_v26 = vpack.c.bf16 %v8461_v4, %v8457_v28  ;;  %v13433_v48 = vpack.c.bf16 %v8525_v63, %v8521_v53  ;;  %v13603_v53 = vpack.c.bf16 %v8584_v12, %v8580_v27  ;;  %v8609_v12 = vld [vmem:[#allocation26 + $0xdc0] sm:$0xff] }
 0xdc1   : > { %11010 = vmatprep.subr.msk.mxu0 %vm905_vm1, %v7722_v39  ;;  %v8534_v39 = vld [vmem:[#allocation26 + $0xb68] sm:$0xff] }
 0xdc3   : > { %11009 = vmatmul.mubr.msk.f32.vlgmr.msra.gmra.mrb[58].mxu0 %vm7724_vm3, %v15855_v14 }
 0xdc4   : > { %11011 = vmatpush1.msk.msra.mxu0 %vm905_vm1, %v7721_v16  ;;  %8379 = vmatprep.mubr.f32.mxu0 %v15927_v17  ;;  %v13435_v16 = vpack.c.bf16 %v8534_v39, %v8530_v8  ;;  %v8579_v8 = vld [vmem:[#allocation26 + $0xcd0] sm:$0xff] }
 0xdc5   : > { %11598 = vmatprep.subr.mxu0 %v15927_v17  ;;  %v8583_v39 = vld [vmem:[#allocation26 + $0xcf0] sm:$0xff] }
 0xdc7   : > { %11012 = vmatmul.mubr.msk.f32.vlgmr.msra.gmra.mrb[60].mxu0 %vm7724_vm3, %v15855_v14 }
 0xdc8   : > { %11599 = vmatpush3.msk.msra.mxu0 %vm905_vm1, %v7723_v20  ;;  %11600 = vmatprep.mubr.msk.f32.mxu0 %vm15113_vm7, %v15927_v17  ;;  %v8529_v20 = vld [vmem:[#allocation26 + $0xb40] sm:$0xff] }
 0xdc9   : > { %13400 = vmatprep.subr.bf16.mxu0 %v13399_v34  ;;  %v8542_v34 = vld [vmem:[#allocation26 + $0xba8] sm:$0xff]  ;;  %v13437_v28 = vpack.c.bf16 %v8533_v19, %v8529_v20  ;;  %v8588_v19 = vld [vmem:[#allocation26 + $0xd18] sm:$0xff] }
 0xdca   : > { %v13439_v4 = vpack.c.bf16 %v8542_v34, %v8538_v22  ;;  %v8590_v20 = vld [vmem:[#allocation26 + $0xd28] sm:$0xff]  ;;  %v8592_v34 = vld [vmem:[#allocation26 + $0xd38] sm:$0xff] }
 0xdcb   : > { %11601 = vmatmul.mubr.msk.f32.vlgmr.msra.gmra.mrb[62].mxu0 %vm7724_vm3, %v15855_v14  ;;  %v13415_v14 = vpack.c.bf16 %v8494_v42, %v8490_v41  ;;  %v8568_v42 = vld [vmem:[#allocation26 + $0xc78] sm:$0xff] }
 0xdcc   : > { %13402 = vmatpush1.bf16.msra.mxu0 %v13401_v26  ;;  %v8546_v26 = vld [vmem:[#allocation26 + $0xbc8] sm:$0xff]  ;;  %v13595_v50 = vpack.c.bf16 %v8568_v42, %v8564_v40  ;;  %v8597_v40 = vld [vmem:[#allocation26 + $0xd60] sm:$0xff] }
 0xdcd   : > { %13404 = vmatprep.subr.bf16.mxu0 %v13403_v11  ;;  %v8550_v11 = vld [vmem:[#allocation26 + $0xbe8] sm:$0xff] }
 0xdce   : > { %v13443_v0 = vpack.c.bf16 %v8550_v11, %v8546_v26  ;;  %13596 = vmatprep.subr.bf16.mxu1 %v13595_v50  ;;  %v8599_v50 = vld [vmem:[#allocation26 + $0xd70] sm:$0xff] }
 0xdd0   : > { %13406 = vmatpush1.bf16.msra.mxu0 %v13405_v32  ;;  %v8554_v32 = vld [vmem:[#allocation26 + $0xc08] sm:$0xff] }
 0xdd1   : > { %13408 = vmatprep.subr.bf16.mxu0 %v13407_v1  ;;  %v8558_v1 = vld [vmem:[#allocation26 + $0xc28] sm:$0xff] }
 0xdd2   : > { %v13447_v2 = vpack.c.bf16 %v8558_v1, %v8554_v32  ;;  %v8591_v32 = vld [vmem:[#allocation26 + $0xd30] sm:$0xff]  ;;  %v8594_v1 = vld [vmem:[#allocation26 + $0xd48] sm:$0xff] }
 0xdd4   : > { %13410 = vmatpush1.bf16.msra.mxu0 %v13409_v54  ;;  %v13449_v54 = vpack.c.bf16 %v8557_v59, %v8553_v58  ;;  %v8600_v58 = vld [vmem:[#allocation26 + $0xd78] sm:$0xff] }
 0xdd5   : > { %13412 = vmatprep.subr.bf16.mxu0 %v13411_v56  ;;  %v8562_v56 = vld [vmem:[#allocation26 + $0xc48] sm:$0xff] }
 0xdd6   : > { %v13451_v41 = vpack.c.bf16 %v8566_v37, %v8562_v56  ;;  %v13609_v56 = vpack.c.bf16 %v8591_v32, %v8587_v31  ;;  %v8593_v37 = vld [vmem:[#allocation26 + $0xd40] sm:$0xff]  ;;  %v8619_v32 = vld [vmem:[#allocation26 + $0xe10] sm:$0xff] }
 0xdd8   : > { %13414 = vmatpush1.bf16.msra.mxu0 %v13413_v62  ;;  %v8561_v62 = vld [vmem:[#allocation26 + $0xc40] sm:$0xff] }
 0xdd9   : > { %13416 = vmatprep.subr.bf16.mxu0 %v13415_v14  ;;  %v8565_v14 = vld [vmem:[#allocation26 + $0xc60] sm:$0xff] }
 0xdda   : > { %v13453_v43 = vpack.c.bf16 %v8565_v14, %v8561_v62  ;;  %v8595_v14 = vld [vmem:[#allocation26 + $0xd50] sm:$0xff] }
 0xddc   : > { %13418 = vmatpush1.bf16.msra.mxu0 %v13417_v45  ;;  %v13597_v45 = vpack.c.bf16 %v8567_v60, %v8563_v44  ;;  %v8606_v44 = vld [vmem:[#allocation26 + $0xda8] sm:$0xff]  ;;  %v8604_v60 = vld [vmem:[#allocation26 + $0xd98] sm:$0xff] }
 0xddd   : > { %13420 = vmatprep.subr.bf16.mxu0 %v13419_v24  ;;  %v8570_v24 = vld [vmem:[#allocation26 + $0xc88] sm:$0xff] }
 0xdde   : > { %13598 = vmatpush1.bf16.msra.mxu1 %v13597_v45  ;;  %v13455_v13 = vpack.c.bf16 %v8574_v47, %v8570_v24  ;;  %v8608_v45 = vld [vmem:[#allocation26 + $0xdb8] sm:$0xff]  ;;  %v13469_v24 = vpack.c.bf16 %v8597_v40, %v8593_v37  ;;  %v13613_v47 = vpack.c.bf16 %v8599_v50, %v8595_v14  ;;  %v8625_v37 = vld [vmem:[#allocation26 + $0xe40] sm:$0xff]  ;;  %v8631_v14 = vld [vmem:[#allocation26 + $0xe70] sm:$0xff] }
 0xddf   : > { %13600 = vmatprep.subr.bf16.mxu1 %v13599_v57  ;;  %v8603_v57 = vld [vmem:[#allocation26 + $0xd90] sm:$0xff]  ;;  %v8629_v40 = vld [vmem:[#allocation26 + $0xe60] sm:$0xff]  ;;  %v8634_v50 = vld [vmem:[#allocation26 + $0xe88] sm:$0xff] }
 0xde0   : > { %13422 = vmatpush1.bf16.msra.mxu0 %v13421_v10  ;;  %v8569_v10 = vld [vmem:[#allocation26 + $0xc80] sm:$0xff] }
 0xde1   : > { %13424 = vmatprep.subr.bf16.mxu0 %v13423_v23  ;;  %v8573_v23 = vld [vmem:[#allocation26 + $0xca0] sm:$0xff] }
 0xde2   : > { %v13457_v3 = vpack.c.bf16 %v8573_v23, %v8569_v10  ;;  %v13615_v23 = vpack.c.bf16 %v8608_v45, %v8604_v60  ;;  %v8640_v60 = vld [vmem:[#allocation26 + $0xeb8] sm:$0xff]  ;;  %v13485_v45 = vpack.c.bf16 %v8629_v40, %v8625_v37  ;;  %v8659_v40 = vld [vmem:[#allocation26 + $0xf50] sm:$0xff] }
 0xde4   : > { %13426 = vmatpush1.bf16.msra.mxu0 %v13425_v6  ;;  %v13601_v6 = vpack.c.bf16 %v8575_v5, %v8571_v15  ;;  %v8610_v15 = vld [vmem:[#allocation26 + $0xdc8] sm:$0xff] }
 0xde5   : > { %13428 = vmatprep.subr.bf16.mxu0 %v13427_v9  ;;  %v8578_v9 = vld [vmem:[#allocation26 + $0xcc8] sm:$0xff] }
 0xde6   : > { %13602 = vmatpush1.bf16.msra.mxu1 %v13601_v6  ;;  %v13459_v21 = vpack.c.bf16 %v8582_v7, %v8578_v9  ;;  %v8614_v6 = vld [vmem:[#allocation26 + $0xde8] sm:$0xff]  ;;  %v8612_v9 = vld [vmem:[#allocation26 + $0xdd8] sm:$0xff] }
 0xde7   : > { %13604 = vmatprep.subr.bf16.mxu1 %v13603_v53  ;;  %v8616_v7 = vld [vmem:[#allocation26 + $0xdf8] sm:$0xff]  ;;  %v13475_v53 = vpack.c.bf16 %v8614_v6, %v8610_v15  ;;  %v8646_v15 = vld [vmem:[#allocation26 + $0xee8] sm:$0xff] }
 0xde8   : > { %13430 = vmatpush1.bf16.msra.mxu0 %v13429_v25  ;;  %v8577_v25 = vld [vmem:[#allocation26 + $0xcc0] sm:$0xff]  ;;  %v8648_v6 = vld [vmem:[#allocation26 + $0xef8] sm:$0xff] }
 0xde9   : > { %13432 = vmatprep.subr.bf16.mxu0 %v13431_v46  ;;  %v8581_v46 = vld [vmem:[#allocation26 + $0xce0] sm:$0xff] }
 0xdea   : > { %v13461_v63 = vpack.c.bf16 %v8581_v46, %v8577_v25  ;;  %v8613_v25 = vld [vmem:[#allocation26 + $0xde0] sm:$0xff] }
 0xdec   : > { %13434 = vmatpush1.bf16.msra.mxu0 %v13433_v48  ;;  %v13605_v48 = vpack.c.bf16 %v8583_v39, %v8579_v8  ;;  %v8611_v8 = vld [vmem:[#allocation26 + $0xdd0] sm:$0xff] }
 0xded   : > { %13436 = vmatprep.subr.bf16.mxu0 %v13435_v16  ;;  %v8586_v16 = vld [vmem:[#allocation26 + $0xd08] sm:$0xff]  ;;  %v8615_v39 = vld [vmem:[#allocation26 + $0xdf0] sm:$0xff] }
 0xdee   : > { %13606 = vmatpush1.bf16.msra.mxu1 %v13605_v48  ;;  %v13463_v22 = vpack.c.bf16 %v8590_v20, %v8586_v16  ;;  %v8618_v48 = vld [vmem:[#allocation26 + $0xe08] sm:$0xff] }
 0xdef   : > { %v8622_v20 = vld [vmem:[#allocation26 + $0xe28] sm:$0xff] }
 0xdf0   : > { %13438 = vmatpush1.bf16.msra.mxu0 %v13437_v28  ;;  %v13607_v28 = vpack.c.bf16 %v8592_v34, %v8588_v19  ;;  %v8620_v19 = vld [vmem:[#allocation26 + $0xe18] sm:$0xff]  ;;  %v13477_v34 = vpack.c.bf16 %v8613_v25, %v8609_v12 }
 0xdf1   : > { %13440 = vmatprep.subr.bf16.mxu0 %v13439_v4 }
 0xdf2   : > { %13608 = vmatprep.subr.bf16.mxu1 %v13607_v28  ;;  %v13621_v28 = vpack.c.bf16 %v8615_v39, %v8611_v8  ;;  %v8650_v8 = vld [vmem:[#allocation26 + $0xf08] sm:$0xff] }
 0xdf3   : > { %v8654_v39 = vld [vmem:[#allocation26 + $0xf28] sm:$0xff] }
 0xdf4   : > { %13442 = vmatpush1.bf16.msra.mxu0 %v13441_v29  ;;  %v8585_v29 = vld [vmem:[#allocation26 + $0xd00] sm:$0xff] }
 0xdf5   : > { %13444 = vmatprep.subr.bf16.mxu0 %v13443_v0  ;;  %v8589_v0 = vld [vmem:[#allocation26 + $0xd20] sm:$0xff] }
 0xdf8   : > { %13446 = vmatpush1.bf16.msra.mxu0 %v13445_v52  ;;  %v8598_v52 = vld [vmem:[#allocation26 + $0xd68] sm:$0xff] }
 0xdf9   : > { %13448 = vmatprep.subr.bf16.mxu0 %v13447_v2  ;;  %v8596_v2 = vld [vmem:[#allocation26 + $0xd58] sm:$0xff]  ;;  %v13467_v42 = vpack.c.bf16 %v8598_v52, %v8594_v1  ;;  %v8623_v1 = vld [vmem:[#allocation26 + $0xe30] sm:$0xff]  ;;  %v8626_v52 = vld [vmem:[#allocation26 + $0xe48] sm:$0xff] }
 0xdfa   : > { %v13611_v62 = vpack.c.bf16 %v8600_v58, %v8596_v2  ;;  %v8630_v2 = vld [vmem:[#allocation26 + $0xe68] sm:$0xff]  ;;  %v8628_v58 = vld [vmem:[#allocation26 + $0xe58] sm:$0xff] }
 0xdfc   : > { %13450 = vmatpush1.bf16.msra.mxu0 %v13449_v54  ;;  %v13465_v54 = vpack.c.bf16 %v8589_v0, %v8585_v29  ;;  %v8617_v29 = vld [vmem:[#allocation26 + $0xe00] sm:$0xff] }
 0xdfd   : > { %13452 = vmatprep.subr.bf16.mxu0 %v13451_v41  ;;  %v8621_v0 = vld [vmem:[#allocation26 + $0xe20] sm:$0xff] }
 0xe00   : > { %13454 = vmatpush1.bf16.msra.mxu0 %v13453_v43  ;;  %v8602_v43 = vld [vmem:[#allocation26 + $0xd88] sm:$0xff] }
 0xe01   : > { %13456 = vmatprep.subr.bf16.mxu0 %v13455_v13  ;;  %v8605_v13 = vld [vmem:[#allocation26 + $0xda0] sm:$0xff]  ;;  %v13471_v10 = vpack.c.bf16 %v8606_v44, %v8602_v43  ;;  %v8638_v43 = vld [vmem:[#allocation26 + $0xea8] sm:$0xff]  ;;  %v8636_v44 = vld [vmem:[#allocation26 + $0xe98] sm:$0xff] }
 0xe02   : > { %v13473_v27 = vpack.c.bf16 %v8605_v13, %v8601_v61  ;;  %v8637_v61 = vld [vmem:[#allocation26 + $0xea0] sm:$0xff]  ;;  %v13487_v13 = vpack.c.bf16 %v8638_v43, %v8634_v50  ;;  %v8672_v50 = vld [vmem:[#allocation26 + $0xfb8] sm:$0xff] }
 0xe04   : > { %13458 = vmatpush1.bf16.msra.mxu0 %v13457_v3  ;;  %v8607_v3 = vld [vmem:[#allocation26 + $0xdb0] sm:$0xff] }
 0xe05   : > { %13460 = vmatprep.subr.bf16.mxu0 %v13459_v21  ;;  %v13617_v21 = vpack.c.bf16 %v8607_v3, %v8603_v57  ;;  %v8639_v57 = vld [vmem:[#allocation26 + $0xeb0] sm:$0xff]  ;;  %v8642_v3 = vld [vmem:[#allocation26 + $0xec8] sm:$0xff] }
 0xe06   : > { %v13491_v12 = vpack.c.bf16 %v8646_v15, %v8642_v3  ;;  %v8680_v3 = vld [vmem:[#allocation26 + $0xff8] sm:$0xff] }
 0xe08   : > { %13462 = vmatpush1.bf16.msra.mxu0 %v13461_v63  ;;  %v13619_v63 = vpack.c.bf16 %v8616_v7, %v8612_v9 }
 0xe09   : > { %13464 = vmatprep.subr.bf16.mxu0 %v13463_v22  ;;  %v8624_v22 = vld [vmem:[#allocation26 + $0xe38] sm:$0xff] }
 0xe0a   : > { %v13623_v31 = vpack.c.bf16 %v8624_v22, %v8620_v19  ;;  %v8649_v22 = vld [vmem:[#allocation26 + $0xf00] sm:$0xff] }
 0xe8a   : > { %v16208_v4 = vpop.f32.mrb[52].mxu0 }
 0xe8b   : > { %v16210_v49 = vpop.f32.mrb[53].mxu0 }
 0xe8e   : > { %v16212_v55 = vpop.f32.mrb[54].mxu0 }
 0xe8f   : > { %v16214_v26 = vpop.f32.mrb[55].mxu0 }
 0xe92   : > { %v16216_v11 = vpop.f32.mrb[56].mxu0 }
 0xe93   : > { %v11597_v30 = vpop.f32.mrb[57].mxu0 }
 0xe94   : > { %v13479_v30 = vpack.c.bf16 %v8622_v20, %v8618_v48  ;;  %v8652_v48 = vld [vmem:[#allocation26 + $0xf18] sm:$0xff] }
 0xe96   : > { %v8310_v59 = vpop.f32.mrb[58].mxu0 }
 0xe97   : > { %v8312_v41 = vpop.f32.mrb[59].mxu0 }
 0xe98   : > { %8812 = vmatprep.mubr.f32.mxu0 %v8312_v41  ;;  %9025 = vmatprep.mubr.f32.mxu1 %v8312_v41  ;;  %v13483_v41 = vpack.c.bf16 %v8630_v2, %v8626_v52  ;;  %v8664_v52 = vld [vmem:[#allocation26 + $0xf78] sm:$0xff] }
 0xe99   : > { %8813 = vmatmul.mubr.f32.vlgmr.msra.gmra.mrb[64].mxu0 %v8310_v59  ;;  %9026 = vmatmul.mubr.f32.vlgmr.msra.gmra.mrb[22].mxu1 %v8310_v59  ;;  %v8632_v59 = vld [vmem:[#allocation26 + $0xe78] sm:$0xff] }
 0xe9a   : > { %13466 = vmatpush1.bf16.msra.mxu0 %v13465_v54  ;;  %13610 = vmatpush1.bf16.msra.mxu1 %v13609_v56  ;;  %v16218_v51 = vpop.f32.mrb[60].mxu0  ;;  %v13481_v54 = vpack.c.bf16 %v8621_v0, %v8617_v29  ;;  %v13625_v56 = vpack.c.bf16 %v8623_v1, %v8619_v32  ;;  %v8651_v0 = vld [vmem:[#allocation26 + $0xf10] sm:$0xff]  ;;  %v8662_v32 = vld [vmem:[#allocation26 + $0xf68] sm:$0xff]  ;;  %v8660_v1 = vld [vmem:[#allocation26 + $0xf58] sm:$0xff] }
 0xe9b   : > { %13468 = vmatprep.subr.bf16.mxu0 %v13467_v42  ;;  %13612 = vmatprep.subr.bf16.mxu1 %v13611_v62  ;;  %v8383_v5 = vpop.f32.mrb[61].mxu0  ;;  %v13627_v42 = vpack.c.bf16 %v8632_v59, %v8628_v58  ;;  %v8627_v62 = vld [vmem:[#allocation26 + $0xe50] sm:$0xff]  ;;  %v8657_v59 = vld [vmem:[#allocation26 + $0xf40] sm:$0xff]  ;;  %v13643_v37 = vpack.c.bf16 %v8664_v52, %v8660_v1 }
 0xe9c   : > { %8883 = vmatprep.mubr.f32.mxu0 %v8383_v5  ;;  %9096 = vmatprep.mubr.f32.mxu1 %v8383_v5  ;;  %v8644_v5 = vld [vmem:[#allocation26 + $0xed8] sm:$0xff]  ;;  %v8689_v52 = vld [vmem:[#allocation26 + $0x1040] sm:$0xff] }
 0xe9d   : > { %v13635_v25 = vpack.c.bf16 %v8648_v6, %v8644_v5  ;;  %v8673_v6 = vld [vmem:[#allocation26 + $0xfc0] sm:$0xff] }
 0xe9e   : > { %13470 = vmatpush1.bf16.msra.mxu0 %v13469_v24  ;;  %13614 = vmatpush1.bf16.msra.mxu1 %v13613_v47  ;;  %v16220_v46 = vpop.f32.mrb[62].mxu0  ;;  %v13629_v24 = vpack.c.bf16 %v8631_v14, %v8627_v62  ;;  %v8633_v47 = vld [vmem:[#allocation26 + $0xe80] sm:$0xff]  ;;  %v8670_v62 = vld [vmem:[#allocation26 + $0xfa8] sm:$0xff]  ;;  %v8668_v14 = vld [vmem:[#allocation26 + $0xf98] sm:$0xff] }
 0xe9f   : > { %13472 = vmatprep.subr.bf16.mxu0 %v13471_v10  ;;  %13616 = vmatprep.subr.bf16.mxu1 %v13615_v23  ;;  %v11602_v16 = vpop.f32.mrb[63].mxu0  ;;  %v13631_v10 = vpack.c.bf16 %v8640_v60, %v8636_v44  ;;  %v8635_v23 = vld [vmem:[#allocation26 + $0xe90] sm:$0xff]  ;;  %v13489_v9 = vpack.c.bf16 %v8637_v61, %v8633_v47  ;;  %v8665_v60 = vld [vmem:[#allocation26 + $0xf80] sm:$0xff]  ;;  %v13647_v47 = vpack.c.bf16 %v8672_v50, %v8668_v14 }
 0xea0   : > { %v13633_v7 = vpack.c.bf16 %v8639_v57, %v8635_v23  ;;  %v8656_v16 = vld [vmem:[#allocation26 + $0xf38] sm:$0xff]  ;;  %v8667_v61 = vld [vmem:[#allocation26 + $0xf90] sm:$0xff]  ;;  %v8678_v23 = vld [vmem:[#allocation26 + $0xfe8] sm:$0xff] }
 0xea1   : > { %v13639_v29 = vpack.c.bf16 %v8656_v16, %v8652_v48  ;;  %v8676_v57 = vld [vmem:[#allocation26 + $0xfd8] sm:$0xff]  ;;  %v8681_v16 = vld [vmem:[#allocation26 + $0x1000] sm:$0xff] }
 0xea2   : > { %13474 = vmatpush1.bf16.msra.mxu0 %v13473_v27  ;;  %13618 = vmatpush1.bf16.msra.mxu1 %v13617_v21  ;;  %v8641_v27 = vld [vmem:[#allocation26 + $0xec0] sm:$0xff] }
 0xea3   : > { %13476 = vmatprep.subr.bf16.mxu0 %v13475_v53  ;;  %13620 = vmatprep.subr.bf16.mxu1 %v13619_v63  ;;  %v8645_v21 = vld [vmem:[#allocation26 + $0xee0] sm:$0xff]  ;;  %v8643_v53 = vld [vmem:[#allocation26 + $0xed0] sm:$0xff] }
 0xea4   : > { %v8647_v63 = vld [vmem:[#allocation26 + $0xef0] sm:$0xff]  ;;  %v13493_v20 = vpack.c.bf16 %v8645_v21, %v8641_v27  ;;  %v13651_v27 = vpack.c.bf16 %v8680_v3, %v8676_v57  ;;  %v8697_v50 = vld [vmem:[#allocation26 + $0x1080] sm:$0xff] }
 0xea5   : > { %v13637_v19 = vpack.c.bf16 %v8647_v63, %v8643_v53  ;;  %v8675_v21 = vld [vmem:[#allocation26 + $0xfd0] sm:$0xff]  ;;  %v8686_v53 = vld [vmem:[#allocation26 + $0x1028] sm:$0xff]  ;;  %v8684_v63 = vld [vmem:[#allocation26 + $0x1018] sm:$0xff] }
 0xea6   : > { %13478 = vmatpush1.bf16.msra.mxu0 %v13477_v34  ;;  %13622 = vmatpush1.bf16.msra.mxu1 %v13621_v28  ;;  %v8653_v34 = vld [vmem:[#allocation26 + $0xf20] sm:$0xff]  ;;  %v13495_v28 = vpack.c.bf16 %v8654_v39, %v8650_v8  ;;  %v8688_v8 = vld [vmem:[#allocation26 + $0x1038] sm:$0xff] }
 0xea7   : > { %13480 = vmatprep.subr.bf16.mxu0 %v13479_v30  ;;  %13624 = vmatprep.subr.bf16.mxu1 %v13623_v31  ;;  %v8655_v30 = vld [vmem:[#allocation26 + $0xf30] sm:$0xff]  ;;  %v8658_v31 = vld [vmem:[#allocation26 + $0xf48] sm:$0xff]  ;;  %v13497_v2 = vpack.c.bf16 %v8653_v34, %v8649_v22  ;;  %v13655_v22 = vpack.c.bf16 %v8688_v8, %v8684_v63  ;;  %v8705_v3 = vld [vmem:[#allocation26 + $0x10c0] sm:$0xff] }
 0xea8   : > { %v13641_v58 = vpack.c.bf16 %v8655_v30, %v8651_v0  ;;  %v8683_v34 = vld [vmem:[#allocation26 + $0x1010] sm:$0xff]  ;;  %v8694_v0 = vld [vmem:[#allocation26 + $0x1068] sm:$0xff]  ;;  %v8692_v30 = vld [vmem:[#allocation26 + $0x1058] sm:$0xff] }
 0xea9   : > { %v8713_v8 = vld [vmem:[#allocation26 + $0x1100] sm:$0xff] }
 0xeaa   : > { %13482 = vmatpush1.bf16.msra.mxu0 %v13481_v54  ;;  %13626 = vmatpush1.bf16.msra.mxu1 %v13625_v56  ;;  %v8661_v54 = vld [vmem:[#allocation26 + $0xf60] sm:$0xff]  ;;  %v13499_v56 = vpack.c.bf16 %v8662_v32, %v8658_v31  ;;  %v8696_v31 = vld [vmem:[#allocation26 + $0x1078] sm:$0xff] }
 0xeab   : > { %13484 = vmatprep.subr.bf16.mxu0 %v13483_v41  ;;  %13628 = vmatprep.subr.bf16.mxu1 %v13627_v42  ;;  %v8663_v41 = vld [vmem:[#allocation26 + $0xf70] sm:$0xff]  ;;  %v8666_v42 = vld [vmem:[#allocation26 + $0xf88] sm:$0xff]  ;;  %v13501_v43 = vpack.c.bf16 %v8661_v54, %v8657_v59  ;;  %v13659_v59 = vpack.c.bf16 %v8696_v31, %v8692_v30  ;;  %v8721_v31 = vld [vmem:[#allocation26 + $0x1140] sm:$0xff] }
 0xeac   : > { %v13645_v44 = vpack.c.bf16 %v8663_v41, %v8659_v40  ;;  %v8691_v54 = vld [vmem:[#allocation26 + $0x1050] sm:$0xff]  ;;  %v8702_v40 = vld [vmem:[#allocation26 + $0x10a8] sm:$0xff]  ;;  %v8700_v41 = vld [vmem:[#allocation26 + $0x1098] sm:$0xff] }
 0xeae   : > { %13486 = vmatpush1.bf16.msra.mxu0 %v13485_v45  ;;  %13630 = vmatpush1.bf16.msra.mxu1 %v13629_v24  ;;  %v8669_v45 = vld [vmem:[#allocation26 + $0xfa0] sm:$0xff]  ;;  %v13503_v24 = vpack.c.bf16 %v8670_v62, %v8666_v42  ;;  %v8704_v42 = vld [vmem:[#allocation26 + $0x10b8] sm:$0xff] }
 0xeaf   : > { %13488 = vmatprep.subr.bf16.mxu0 %v13487_v13  ;;  %13632 = vmatprep.subr.bf16.mxu1 %v13631_v10  ;;  %v8671_v13 = vld [vmem:[#allocation26 + $0xfb0] sm:$0xff]  ;;  %v8674_v10 = vld [vmem:[#allocation26 + $0xfc8] sm:$0xff]  ;;  %v13505_v15 = vpack.c.bf16 %v8669_v45, %v8665_v60  ;;  %v13663_v60 = vpack.c.bf16 %v8704_v42, %v8700_v41  ;;  %v8729_v42 = vld [vmem:[#allocation26 + $0x1180] sm:$0xff] }
 0xeb0   : > { %v13649_v5 = vpack.c.bf16 %v8671_v13, %v8667_v61  ;;  %v8699_v45 = vld [vmem:[#allocation26 + $0x1090] sm:$0xff]  ;;  %v8710_v61 = vld [vmem:[#allocation26 + $0x10e8] sm:$0xff]  ;;  %v8708_v13 = vld [vmem:[#allocation26 + $0x10d8] sm:$0xff] }
 0xeb2   : > { %13490 = vmatpush1.bf16.msra.mxu0 %v13489_v9  ;;  %13634 = vmatpush1.bf16.msra.mxu1 %v13633_v7  ;;  %v8677_v9 = vld [vmem:[#allocation26 + $0xfe0] sm:$0xff]  ;;  %v13507_v7 = vpack.c.bf16 %v8678_v23, %v8674_v10  ;;  %v8712_v10 = vld [vmem:[#allocation26 + $0x10f8] sm:$0xff] }
 0xeb3   : > { %13492 = vmatprep.subr.bf16.mxu0 %v13491_v12  ;;  %13636 = vmatprep.subr.bf16.mxu1 %v13635_v25  ;;  %v8679_v12 = vld [vmem:[#allocation26 + $0xff0] sm:$0xff]  ;;  %v8682_v25 = vld [vmem:[#allocation26 + $0x1008] sm:$0xff]  ;;  %v13509_v39 = vpack.c.bf16 %v8677_v9, %v8673_v6  ;;  %v13667_v6 = vpack.c.bf16 %v8712_v10, %v8708_v13  ;;  %v8737_v13 = vld [vmem:[#allocation26 + $0x11c0] sm:$0xff] }
 0xeb4   : > { %v13653_v48 = vpack.c.bf16 %v8679_v12, %v8675_v21  ;;  %v8707_v9 = vld [vmem:[#allocation26 + $0x10d0] sm:$0xff]  ;;  %v8718_v21 = vld [vmem:[#allocation26 + $0x1128] sm:$0xff]  ;;  %v8716_v12 = vld [vmem:[#allocation26 + $0x1118] sm:$0xff] }
 0xeb5   : > { %v8741_v10 = vld [vmem:[#allocation26 + $0x11e0] sm:$0xff] }
 0xeb6   : > { %13494 = vmatpush1.bf16.msra.mxu0 %v13493_v20  ;;  %13638 = vmatpush1.bf16.msra.mxu1 %v13637_v19  ;;  %v8685_v20 = vld [vmem:[#allocation26 + $0x1020] sm:$0xff]  ;;  %v13511_v19 = vpack.c.bf16 %v8686_v53, %v8682_v25  ;;  %v8720_v25 = vld [vmem:[#allocation26 + $0x1138] sm:$0xff] }
 0xeb7   : > { %13496 = vmatprep.subr.bf16.mxu0 %v13495_v28  ;;  %13640 = vmatprep.subr.bf16.mxu1 %v13639_v29  ;;  %v8687_v28 = vld [vmem:[#allocation26 + $0x1030] sm:$0xff]  ;;  %v8690_v29 = vld [vmem:[#allocation26 + $0x1048] sm:$0xff]  ;;  %v13513_v32 = vpack.c.bf16 %v8685_v20, %v8681_v16  ;;  %v13671_v16 = vpack.c.bf16 %v8720_v25, %v8716_v12 }
 0xeb8   : > { %v13657_v1 = vpack.c.bf16 %v8687_v28, %v8683_v34  ;;  %v8715_v20 = vld [vmem:[#allocation26 + $0x1110] sm:$0xff]  ;;  %v8726_v34 = vld [vmem:[#allocation26 + $0x1168] sm:$0xff]  ;;  %v8724_v28 = vld [vmem:[#allocation26 + $0x1158] sm:$0xff] }
 0xeba   : > { %13498 = vmatpush1.bf16.msra.mxu0 %v13497_v2  ;;  %13642 = vmatpush1.bf16.msra.mxu1 %v13641_v58  ;;  %v8693_v2 = vld [vmem:[#allocation26 + $0x1060] sm:$0xff]  ;;  %v13515_v58 = vpack.c.bf16 %v8694_v0, %v8690_v29  ;;  %v8728_v29 = vld [vmem:[#allocation26 + $0x1178] sm:$0xff] }
 0xebb   : > { %13500 = vmatprep.subr.bf16.mxu0 %v13499_v56  ;;  %13644 = vmatprep.subr.bf16.mxu1 %v13643_v37  ;;  %v8695_v56 = vld [vmem:[#allocation26 + $0x1070] sm:$0xff]  ;;  %v8698_v37 = vld [vmem:[#allocation26 + $0x1088] sm:$0xff]  ;;  %v13517_v62 = vpack.c.bf16 %v8693_v2, %v8689_v52  ;;  %v13675_v52 = vpack.c.bf16 %v8728_v29, %v8724_v28  ;;  %v7962_v28 = vld [vmem:[#allocation26 + $0x40] sm:$0xff] }
 0xebc   : > { %v13661_v14 = vpack.c.bf16 %v8695_v56, %v8691_v54  ;;  %v8723_v2 = vld [vmem:[#allocation26 + $0x1150] sm:$0xff]  ;;  %v8734_v54 = vld [vmem:[#allocation26 + $0x11a8] sm:$0xff]  ;;  %v8732_v56 = vld [vmem:[#allocation26 + $0x1198] sm:$0xff] }
 0xebd   : > { %v7966_v29 = vld [vmem:[#allocation26 + $0x60] sm:$0xff] }
 0xebe   : > { %13502 = vmatpush1.bf16.msra.mxu0 %v13501_v43  ;;  %13646 = vmatpush1.bf16.msra.mxu1 %v13645_v44  ;;  %v8701_v43 = vld [vmem:[#allocation26 + $0x10a0] sm:$0xff]  ;;  %v13519_v44 = vpack.c.bf16 %v8702_v40, %v8698_v37  ;;  %v8736_v37 = vld [vmem:[#allocation26 + $0x11b8] sm:$0xff] }
 0xebf   : > { %13504 = vmatprep.subr.bf16.mxu0 %v13503_v24  ;;  %13648 = vmatprep.subr.bf16.mxu1 %v13647_v47  ;;  %v8703_v24 = vld [vmem:[#allocation26 + $0x10b0] sm:$0xff]  ;;  %v8706_v47 = vld [vmem:[#allocation26 + $0x10c8] sm:$0xff]  ;;  %v13521_v23 = vpack.c.bf16 %v8701_v43, %v8697_v50  ;;  %v13679_v50 = vpack.c.bf16 %v8736_v37, %v8732_v56  ;;  %v7970_v37 = vld [vmem:[#allocation26 + $0x80] sm:$0xff] }
 0xec0   : > { %v13665_v57 = vpack.c.bf16 %v8703_v24, %v8699_v45  ;;  %v8731_v43 = vld [vmem:[#allocation26 + $0x1190] sm:$0xff]  ;;  %v8742_v45 = vld [vmem:[#allocation26 + $0x11e8] sm:$0xff]  ;;  %v8740_v24 = vld [vmem:[#allocation26 + $0x11d8] sm:$0xff] }
 0xec2   : > { %13506 = vmatpush1.bf16.msra.mxu0 %v13505_v15  ;;  %13650 = vmatpush1.bf16.msra.mxu1 %v13649_v5  ;;  %v8709_v15 = vld [vmem:[#allocation26 + $0x10e0] sm:$0xff]  ;;  %v13523_v5 = vpack.c.bf16 %v8710_v61, %v8706_v47  ;;  %v8744_v47 = vld [vmem:[#allocation26 + $0x11f8] sm:$0xff] }
 0xec3   : > { %13508 = vmatprep.subr.bf16.mxu0 %v13507_v7  ;;  %13652 = vmatprep.subr.bf16.mxu1 %v13651_v27  ;;  %v8711_v7 = vld [vmem:[#allocation26 + $0x10f0] sm:$0xff]  ;;  %v8714_v27 = vld [vmem:[#allocation26 + $0x1108] sm:$0xff]  ;;  %v13525_v53 = vpack.c.bf16 %v8709_v15, %v8705_v3 }
 0xec4   : > { %v13669_v63 = vpack.c.bf16 %v8711_v7, %v8707_v9  ;;  %v8739_v3 = vld [vmem:[#allocation26 + $0x11d0] sm:$0xff]  ;;  %v7957_v9 = vld [vmem:[#allocation26 + $0x18] sm:$0xff] }
 0xec5   : > { %v8743_v15 = vld [vmem:[#allocation26 + $0x11f0] sm:$0xff]  ;;  %v7961_v7 = vld [vmem:[#allocation26 + $0x38] sm:$0xff] }
 0xec6   : > { %13510 = vmatpush1.bf16.msra.mxu0 %v13509_v39  ;;  %13654 = vmatpush1.bf16.msra.mxu1 %v13653_v48  ;;  %v8717_v39 = vld [vmem:[#allocation26 + $0x1120] sm:$0xff]  ;;  %v13527_v48 = vpack.c.bf16 %v8718_v21, %v8714_v27  ;;  %v13541_v27 = vpack.c.bf16 %v8741_v10, %v8737_v13  ;;  %v13685_v21 = vpack.c.bf16 %v8743_v15, %v8739_v3  ;;  %v7987_v13 = vld [vmem:[#allocation26 + $0x108] sm:$0xff] }
 0xec7   : > { %13512 = vmatprep.subr.bf16.mxu0 %v13511_v19  ;;  %13656 = vmatprep.subr.bf16.mxu1 %v13655_v22  ;;  %v8719_v19 = vld [vmem:[#allocation26 + $0x1130] sm:$0xff]  ;;  %v8722_v22 = vld [vmem:[#allocation26 + $0x1148] sm:$0xff]  ;;  %v13529_v0 = vpack.c.bf16 %v8717_v39, %v8713_v8  ;;  %v13831_v25 = vpack.c.bf16 %v7961_v7, %v7957_v9  ;;  %v7990_v9 = vld [vmem:[#allocation26 + $0x120] sm:$0xff] }
 0xec8   : > { %v13673_v30 = vpack.c.bf16 %v8719_v19, %v8715_v20  ;;  %v7956_v8 = vld [vmem:[#allocation26 + $0x10] sm:$0xff]  ;;  %v7965_v20 = vld [vmem:[#allocation26 + $0x58] sm:$0xff]  ;;  %v7991_v10 = vld [vmem:[#allocation26 + $0x128] sm:$0xff] }
 0xec9   : > { %v7960_v39 = vld [vmem:[#allocation26 + $0x30] sm:$0xff]  ;;  %v7969_v19 = vld [vmem:[#allocation26 + $0x78] sm:$0xff] }
 0xeca   : > { %13514 = vmatpush1.bf16.msra.mxu0 %v13513_v32  ;;  %13658 = vmatpush1.bf16.msra.mxu1 %v13657_v1  ;;  %v8725_v32 = vld [vmem:[#allocation26 + $0x1160] sm:$0xff]  ;;  %v13531_v1 = vpack.c.bf16 %v8726_v34, %v8722_v22  ;;  %v13833_v34 = vpack.c.bf16 %v7960_v39, %v7956_v8  ;;  %v7988_v7 = vld [vmem:[#allocation26 + $0x110] sm:$0xff] }
 0xecb   : > { %13516 = vmatprep.subr.bf16.mxu0 %v13515_v58  ;;  %13660 = vmatprep.subr.bf16.mxu1 %v13659_v59  ;;  %v8727_v58 = vld [vmem:[#allocation26 + $0x1170] sm:$0xff]  ;;  %v8730_v59 = vld [vmem:[#allocation26 + $0x1188] sm:$0xff]  ;;  %v13533_v40 = vpack.c.bf16 %v8725_v32, %v8721_v31  ;;  %v13835_v31 = vpack.c.bf16 %v7969_v19, %v7965_v20  ;;  %v7998_v20 = vld [vmem:[#allocation26 + $0x160] sm:$0xff] }
 0xecc   : > { %v13677_v41 = vpack.c.bf16 %v8727_v58, %v8723_v2  ;;  %v7968_v32 = vld [vmem:[#allocation26 + $0x70] sm:$0xff]  ;;  %v7973_v2 = vld [vmem:[#allocation26 + $0x98] sm:$0xff] }
 0xecd   : > { %v7977_v58 = vld [vmem:[#allocation26 + $0xb8] sm:$0xff]  ;;  %v7996_v19 = vld [vmem:[#allocation26 + $0x150] sm:$0xff] }
 0xece   : > { %13518 = vmatpush1.bf16.msra.mxu0 %v13517_v62  ;;  %13662 = vmatpush1.bf16.msra.mxu1 %v13661_v14  ;;  %v8733_v62 = vld [vmem:[#allocation26 + $0x11a0] sm:$0xff]  ;;  %v13535_v14 = vpack.c.bf16 %v8734_v54, %v8730_v59  ;;  %v13693_v59 = vpack.c.bf16 %v7966_v29, %v7962_v28  ;;  %v8003_v28 = vld [vmem:[#allocation26 + $0x188] sm:$0xff] }
 0xecf   : > { %13520 = vmatprep.subr.bf16.mxu0 %v13519_v44  ;;  %13664 = vmatprep.subr.bf16.mxu1 %v13663_v60  ;;  %v8735_v44 = vld [vmem:[#allocation26 + $0x11b0] sm:$0xff]  ;;  %v8738_v60 = vld [vmem:[#allocation26 + $0x11c8] sm:$0xff] }
 0xed0   : > { %v13681_v61 = vpack.c.bf16 %v8735_v44, %v8731_v43  ;;  %v7985_v43 = vld [vmem:[#allocation26 + $0xf8] sm:$0xff]  ;;  %v8007_v29 = vld [vmem:[#allocation26 + $0x1a8] sm:$0xff] }
 0xed2   : > { %13522 = vmatpush1.bf16.msra.mxu0 %v13521_v23  ;;  %13666 = vmatpush1.bf16.msra.mxu1 %v13665_v57  ;;  %v13539_v23 = vpack.c.bf16 %v8742_v45, %v8738_v60  ;;  %v13683_v57 = vpack.c.bf16 %v8744_v47, %v8740_v24  ;;  %v7982_v24 = vld [vmem:[#allocation26 + $0xe0] sm:$0xff]  ;;  %v7980_v47 = vld [vmem:[#allocation26 + $0xd0] sm:$0xff] }
 0xed3   : > { %13524 = vmatprep.subr.bf16.mxu0 %v13523_v5  ;;  %13668 = vmatprep.subr.bf16.mxu1 %v13667_v6  ;;  %v7955_v5 = vld [vmem:[#allocation26 + $0x8] sm:$0xff] }
 0xed4   : > { %v7959_v6 = vld [vmem:[#allocation26 + $0x28] sm:$0xff] }
 0xed5   : > { %v13687_v12 = vpack.c.bf16 %v7959_v6, %v7955_v5  ;;  %v13703_v5 = vpack.c.bf16 %v7991_v10, %v7987_v13  ;;  %v7986_v6 = vld [vmem:[#allocation26 + $0x100] sm:$0xff] }
 0xed6   : > { %13526 = vmatpush1.bf16.msra.mxu0 %v13525_v53  ;;  %13670 = vmatpush1.bf16.msra.mxu1 %v13669_v63  ;;  %v7954_v53 = vld [vmem:[#allocation26] sm:$0xff]  ;;  %v13705_v8 = vpack.c.bf16 %v7990_v9, %v7986_v6  ;;  %v8031_v6 = vld [vmem:[#allocation26 + $0x268] sm:$0xff]  ;;  %v8029_v9 = vld [vmem:[#allocation26 + $0x258] sm:$0xff] }
 0xed7   : > { %13528 = vmatprep.subr.bf16.mxu0 %v13527_v48  ;;  %13672 = vmatprep.subr.bf16.mxu1 %v13671_v16  ;;  %v7958_v63 = vld [vmem:[#allocation26 + $0x20] sm:$0xff]  ;;  %v7963_v48 = vld [vmem:[#allocation26 + $0x48] sm:$0xff] }
 0xed8   : > { %v7967_v16 = vld [vmem:[#allocation26 + $0x68] sm:$0xff]  ;;  %v13689_v22 = vpack.c.bf16 %v7958_v63, %v7954_v53  ;;  %v7997_v53 = vld [vmem:[#allocation26 + $0x158] sm:$0xff]  ;;  %v8018_v10 = vld [vmem:[#allocation26 + $0x200] sm:$0xff] }
 0xed9   : > { %8884 = vmatmul.mubr.f32.vlgmr.msra.gmra.mrb[64].mxu0 %v16218_v51  ;;  %9097 = vmatmul.mubr.f32.vlgmr.msra.gmra.mrb[22].mxu1 %v16218_v51  ;;  %v13537_v51 = vpack.c.bf16 %v8733_v62, %v8729_v42  ;;  %v13839_v42 = vpack.c.bf16 %v7977_v58, %v7973_v2  ;;  %v7976_v62 = vld [vmem:[#allocation26 + $0xb0] sm:$0xff]  ;;  %v8001_v63 = vld [vmem:[#allocation26 + $0x178] sm:$0xff]  ;;  %v8006_v2 = vld [vmem:[#allocation26 + $0x1a0] sm:$0xff] }
 0xeda   : > { %13530 = vmatpush1.bf16.msra.mxu0 %v13529_v0  ;;  %13674 = vmatpush1.bf16.msra.mxu1 %v13673_v30  ;;  %v7964_v0 = vld [vmem:[#allocation26 + $0x50] sm:$0xff]  ;;  %v13691_v30 = vpack.c.bf16 %v7967_v16, %v7963_v48  ;;  %v7994_v16 = vld [vmem:[#allocation26 + $0x140] sm:$0xff] }
 0xedb   : > { %13532 = vmatprep.subr.bf16.mxu0 %v13531_v1  ;;  %13676 = vmatprep.subr.bf16.mxu1 %v13675_v52  ;;  %v7971_v1 = vld [vmem:[#allocation26 + $0x88] sm:$0xff]  ;;  %v13837_v54 = vpack.c.bf16 %v7968_v32, %v7964_v0  ;;  %v8005_v0 = vld [vmem:[#allocation26 + $0x198] sm:$0xff]  ;;  %v8004_v58 = vld [vmem:[#allocation26 + $0x190] sm:$0xff] }
 0xedc   : > { %8954 = vmatprep.mubr.f32.mxu0 %v15927_v17  ;;  %9167 = vmatprep.mubr.f32.mxu1 %v15927_v17  ;;  %v7975_v52 = vld [vmem:[#allocation26 + $0xa8] sm:$0xff] }
 0xedd   : > { %v13695_v56 = vpack.c.bf16 %v7975_v52, %v7971_v1  ;;  %v13711_v1 = vpack.c.bf16 %v8007_v29, %v8003_v28  ;;  %v8002_v52 = vld [vmem:[#allocation26 + $0x180] sm:$0xff] }
 0xede   : > { %13534 = vmatpush1.bf16.msra.mxu0 %v13533_v40  ;;  %13678 = vmatpush1.bf16.msra.mxu1 %v13677_v41  ;;  %v7974_v40 = vld [vmem:[#allocation26 + $0xa0] sm:$0xff]  ;;  %v7972_v41 = vld [vmem:[#allocation26 + $0x90] sm:$0xff] }
 0xedf   : > { %13536 = vmatprep.subr.bf16.mxu0 %v13535_v14  ;;  %13680 = vmatprep.subr.bf16.mxu1 %v13679_v50  ;;  %v7979_v14 = vld [vmem:[#allocation26 + $0xc8] sm:$0xff]  ;;  %v7981_v50 = vld [vmem:[#allocation26 + $0xd8] sm:$0xff]  ;;  %v13697_v44 = vpack.c.bf16 %v7974_v40, %v7970_v37  ;;  %v13841_v60 = vpack.c.bf16 %v7976_v62, %v7972_v41  ;;  %v8034_v29 = vld [vmem:[#allocation26 + $0x280] sm:$0xff] }
 0xee0   : > { %v8015_v37 = vld [vmem:[#allocation26 + $0x1e8] sm:$0xff]  ;;  %v8013_v40 = vld [vmem:[#allocation26 + $0x1d8] sm:$0xff] }
 0xee1   : > { %v8017_v41 = vld [vmem:[#allocation26 + $0x1f8] sm:$0xff] }
 0xee2   : > { %13538 = vmatpush1.bf16.msra.mxu0 %v13537_v51  ;;  %13682 = vmatpush1.bf16.msra.mxu1 %v13681_v61  ;;  %v13843_v51 = vpack.c.bf16 %v7985_v43, %v7981_v50  ;;  %v7984_v61 = vld [vmem:[#allocation26 + $0xf0] sm:$0xff]  ;;  %v8014_v50 = vld [vmem:[#allocation26 + $0x1e0] sm:$0xff] }
 0xee3   : > { %13540 = vmatprep.subr.bf16.mxu0 %v13539_v23  ;;  %13684 = vmatprep.subr.bf16.mxu1 %v13683_v57  ;;  %v7989_v23 = vld [vmem:[#allocation26 + $0x118] sm:$0xff]  ;;  %v13845_v15 = vpack.c.bf16 %v7984_v61, %v7980_v47  ;;  %v8012_v43 = vld [vmem:[#allocation26 + $0x1d0] sm:$0xff] }
 0xee4   : > { %v7993_v57 = vld [vmem:[#allocation26 + $0x138] sm:$0xff] }
 0xee5   : > { %v8025_v47 = vld [vmem:[#allocation26 + $0x238] sm:$0xff] }
 0xee6   : > { %13542 = vmatpush1.bf16.msra.mxu0 %v13541_v27  ;;  %13686 = vmatpush1.bf16.msra.mxu1 %v13685_v21  ;;  %v13847_v27 = vpack.c.bf16 %v7993_v57, %v7989_v23  ;;  %v7992_v21 = vld [vmem:[#allocation26 + $0x130] sm:$0xff]  ;;  %v8022_v23 = vld [vmem:[#allocation26 + $0x220] sm:$0xff] }
 0xee7   : > { %13688 = vmatprep.subr.bf16.mxu0 %v13687_v12  ;;  %13832 = vmatprep.subr.bf16.mxu1 %v13831_v25  ;;  %v7995_v12 = vld [vmem:[#allocation26 + $0x148] sm:$0xff]  ;;  %v13849_v39 = vpack.c.bf16 %v7992_v21, %v7988_v7  ;;  %v8020_v57 = vld [vmem:[#allocation26 + $0x210] sm:$0xff]  ;;  %v8033_v7 = vld [vmem:[#allocation26 + $0x278] sm:$0xff] }
 0xee8   : > { %v7999_v25 = vld [vmem:[#allocation26 + $0x168] sm:$0xff] }
 0xee9   : > { %11015 = vmatmul.mubr.msk.f32.vlgmr.msra.gmra.mrb[64].mxu0 %vm842_vm12, %v16220_v46  ;;  %11016 = vmatmul.mubr.msk.f32.vlgmr.msra.gmra.mrb[22].mxu1 %vm842_vm12, %v16220_v46  ;;  %v7983_v46 = vld [vmem:[#allocation26 + $0xe8] sm:$0xff]  ;;  %v13707_v48 = vpack.c.bf16 %v7999_v25, %v7995_v12  ;;  %v8026_v25 = vld [vmem:[#allocation26 + $0x240] sm:$0xff] }
 0xeea   : > { %13690 = vmatpush1.bf16.msra.mxu0 %v13689_v22  ;;  %9241 = vmatprep.mubr.f32.mxu0 %v16210_v49  ;;  %v13699_v45 = vpack.c.bf16 %v7983_v46, %v7979_v14  ;;  %v13851_v22 = vpack.c.bf16 %v8001_v63, %v7997_v53  ;;  %v8010_v46 = vld [vmem:[#allocation26 + $0x1c0] sm:$0xff]  ;;  %v8028_v63 = vld [vmem:[#allocation26 + $0x250] sm:$0xff] }
 0xeeb   : > { %13834 = vmatpush1.bf16.msra.mxu1 %v13833_v34  ;;  %9454 = vmatprep.mubr.f32.mxu1 %v16210_v49  ;;  %v7978_v49 = vld [vmem:[#allocation26 + $0xc0] sm:$0xff]  ;;  %v8000_v34 = vld [vmem:[#allocation26 + $0x170] sm:$0xff] }
 0xeec   : > { %13692 = vmatprep.subr.bf16.mxu0 %v13691_v30  ;;  %13836 = vmatprep.subr.bf16.mxu1 %v13835_v31  ;;  %v13701_v3 = vpack.c.bf16 %v7982_v24, %v7978_v49  ;;  %v8009_v30 = vld [vmem:[#allocation26 + $0x1b8] sm:$0xff]  ;;  %v13709_v31 = vpack.c.bf16 %v7998_v20, %v7994_v16  ;;  %v13853_v32 = vpack.c.bf16 %v8000_v34, %v7996_v19  ;;  %v8023_v49 = vld [vmem:[#allocation26 + $0x228] sm:$0xff]  ;;  %v8030_v53 = vld [vmem:[#allocation26 + $0x260] sm:$0xff] }
 0xeed   : > { %v8021_v24 = vld [vmem:[#allocation26 + $0x218] sm:$0xff]  ;;  %v8039_v16 = vld [vmem:[#allocation26 + $0x2a8] sm:$0xff] }
 0xeee   : > { %13694 = vmatpush1.bf16.msra.mxu0 %v13693_v59  ;;  %v13855_v59 = vpack.c.bf16 %v8009_v30, %v8005_v0  ;;  %v8037_v20 = vld [vmem:[#allocation26 + $0x298] sm:$0xff]  ;;  %v8038_v0 = vld [vmem:[#allocation26 + $0x2a0] sm:$0xff]  ;;  %v8036_v30 = vld [vmem:[#allocation26 + $0x290] sm:$0xff] }
 0xeef   : > { %13838 = vmatpush1.bf16.msra.mxu1 %v13837_v54  ;;  %13696 = vmatprep.subr.bf16.mxu0 %v13695_v56  ;;  %v8008_v54 = vld [vmem:[#allocation26 + $0x1b0] sm:$0xff]  ;;  %v8011_v56 = vld [vmem:[#allocation26 + $0x1c8] sm:$0xff]  ;;  %v8041_v19 = vld [vmem:[#allocation26 + $0x2b8] sm:$0xff] }
 0xef0   : > { %13840 = vmatprep.subr.bf16.mxu1 %v13839_v42  ;;  %v13713_v42 = vpack.c.bf16 %v8006_v2, %v8002_v52  ;;  %v13857_v62 = vpack.c.bf16 %v8008_v54, %v8004_v58  ;;  %v13715_v14 = vpack.c.bf16 %v8015_v37, %v8011_v56  ;;  %v8047_v52 = vld [vmem:[#allocation26 + $0x2e8] sm:$0xff]  ;;  %v8045_v2 = vld [vmem:[#allocation26 + $0x2d8] sm:$0xff]  ;;  %v8042_v37 = vld [vmem:[#allocation26 + $0x2c0] sm:$0xff] }
 0xef1   : > { %v8049_v58 = vld [vmem:[#allocation26 + $0x2f8] sm:$0xff] }
 0xef2   : > { %13698 = vmatpush1.bf16.msra.mxu0 %v13697_v44  ;;  %v13859_v44 = vpack.c.bf16 %v8017_v41, %v8013_v40  ;;  %v8046_v40 = vld [vmem:[#allocation26 + $0x2e0] sm:$0xff]  ;;  %v8044_v41 = vld [vmem:[#allocation26 + $0x2d0] sm:$0xff] }
 0xef3   : > { %13842 = vmatpush1.bf16.msra.mxu1 %v13841_v60  ;;  %13700 = vmatprep.subr.bf16.mxu0 %v13699_v45  ;;  %v8016_v60 = vld [vmem:[#allocation26 + $0x1f0] sm:$0xff]  ;;  %v8019_v45 = vld [vmem:[#allocation26 + $0x208] sm:$0xff] }
 0xef4   : > { %13844 = vmatprep.subr.bf16.mxu1 %v13843_v51  ;;  %v13717_v51 = vpack.c.bf16 %v8014_v50, %v8010_v46  ;;  %v13861_v61 = vpack.c.bf16 %v8016_v60, %v8012_v43  ;;  %v13719_v13 = vpack.c.bf16 %v8023_v49, %v8019_v45  ;;  %v8055_v46 = vld [vmem:[#allocation26 + $0x328] sm:$0xff]  ;;  %v8053_v50 = vld [vmem:[#allocation26 + $0x318] sm:$0xff]  ;;  %v8050_v49 = vld [vmem:[#allocation26 + $0x300] sm:$0xff] }
 0xef5   : > { %v8057_v43 = vld [vmem:[#allocation26 + $0x338] sm:$0xff] }
 0xef6   : > { %13702 = vmatpush1.bf16.msra.mxu0 %v13701_v3  ;;  %v13863_v3 = vpack.c.bf16 %v8025_v47, %v8021_v24  ;;  %v8054_v24 = vld [vmem:[#allocation26 + $0x320] sm:$0xff]  ;;  %v8052_v47 = vld [vmem:[#allocation26 + $0x310] sm:$0xff] }
 0xef7   : > { %13846 = vmatpush1.bf16.msra.mxu1 %v13845_v15  ;;  %13704 = vmatprep.subr.bf16.mxu0 %v13703_v5  ;;  %v8024_v15 = vld [vmem:[#allocation26 + $0x230] sm:$0xff]  ;;  %v8027_v5 = vld [vmem:[#allocation26 + $0x248] sm:$0xff] }
 0xef8   : > { %13848 = vmatprep.subr.bf16.mxu1 %v13847_v27  ;;  %v13721_v27 = vpack.c.bf16 %v8022_v23, %v8018_v10  ;;  %v13865_v21 = vpack.c.bf16 %v8024_v15, %v8020_v57  ;;  %v13723_v12 = vpack.c.bf16 %v8031_v6, %v8027_v5  ;;  %v8063_v10 = vld [vmem:[#allocation26 + $0x368] sm:$0xff]  ;;  %v8061_v23 = vld [vmem:[#allocation26 + $0x358] sm:$0xff]  ;;  %v8058_v6 = vld [vmem:[#allocation26 + $0x340] sm:$0xff] }
 0xef9   : > { %v8065_v57 = vld [vmem:[#allocation26 + $0x378] sm:$0xff] }
 0xefa   : > { %13706 = vmatpush1.bf16.msra.mxu0 %v13705_v8  ;;  %v13867_v8 = vpack.c.bf16 %v8033_v7, %v8029_v9  ;;  %v8062_v9 = vld [vmem:[#allocation26 + $0x360] sm:$0xff]  ;;  %v8060_v7 = vld [vmem:[#allocation26 + $0x350] sm:$0xff] }
 0xefb   : > { %13850 = vmatpush1.bf16.msra.mxu1 %v13849_v39  ;;  %13708 = vmatprep.subr.bf16.mxu0 %v13707_v48  ;;  %v8032_v39 = vld [vmem:[#allocation26 + $0x270] sm:$0xff]  ;;  %v8035_v48 = vld [vmem:[#allocation26 + $0x288] sm:$0xff] }
 0xefc   : > { %13852 = vmatprep.subr.bf16.mxu1 %v13851_v22  ;;  %v13725_v22 = vpack.c.bf16 %v8030_v53, %v8026_v25  ;;  %v13869_v34 = vpack.c.bf16 %v8032_v39, %v8028_v63  ;;  %v13727_v28 = vpack.c.bf16 %v8039_v16, %v8035_v48  ;;  %v8071_v25 = vld [vmem:[#allocation26 + $0x3a8] sm:$0xff]  ;;  %v8069_v53 = vld [vmem:[#allocation26 + $0x398] sm:$0xff]  ;;  %v8066_v16 = vld [vmem:[#allocation26 + $0x380] sm:$0xff] }
 0xefd   : > { %v8073_v63 = vld [vmem:[#allocation26 + $0x3b8] sm:$0xff] }
 0xefe   : > { %13710 = vmatpush1.bf16.msra.mxu0 %v13709_v31  ;;  %v13871_v31 = vpack.c.bf16 %v8041_v19, %v8037_v20  ;;  %v8070_v20 = vld [vmem:[#allocation26 + $0x3a0] sm:$0xff]  ;;  %v8068_v19 = vld [vmem:[#allocation26 + $0x390] sm:$0xff] }
 0xeff   : > { %13854 = vmatpush1.bf16.msra.mxu1 %v13853_v32  ;;  %13712 = vmatprep.subr.bf16.mxu0 %v13711_v1  ;;  %v8040_v32 = vld [vmem:[#allocation26 + $0x2b0] sm:$0xff]  ;;  %v8043_v1 = vld [vmem:[#allocation26 + $0x2c8] sm:$0xff] }
 0xf00   : > { %13856 = vmatprep.subr.bf16.mxu1 %v13855_v59  ;;  %v13729_v59 = vpack.c.bf16 %v8038_v0, %v8034_v29  ;;  %v13873_v54 = vpack.c.bf16 %v8040_v32, %v8036_v30  ;;  %v13731_v56 = vpack.c.bf16 %v8047_v52, %v8043_v1  ;;  %v8079_v29 = vld [vmem:[#allocation26 + $0x3e8] sm:$0xff]  ;;  %v8077_v0 = vld [vmem:[#allocation26 + $0x3d8] sm:$0xff]  ;;  %v8074_v52 = vld [vmem:[#allocation26 + $0x3c0] sm:$0xff] }
 0xf01   : > { %v8081_v30 = vld [vmem:[#allocation26 + $0x3f8] sm:$0xff] }
 0xf02   : > { %13714 = vmatpush1.bf16.msra.mxu0 %v13713_v42  ;;  %v13875_v42 = vpack.c.bf16 %v8049_v58, %v8045_v2  ;;  %v8078_v2 = vld [vmem:[#allocation26 + $0x3e0] sm:$0xff]  ;;  %v8076_v58 = vld [vmem:[#allocation26 + $0x3d0] sm:$0xff] }
 0xf03   : > { %13858 = vmatpush1.bf16.msra.mxu1 %v13857_v62  ;;  %13716 = vmatprep.subr.bf16.mxu0 %v13715_v14  ;;  %v8048_v62 = vld [vmem:[#allocation26 + $0x2f0] sm:$0xff]  ;;  %v8051_v14 = vld [vmem:[#allocation26 + $0x308] sm:$0xff] }
 0xf04   : > { %13860 = vmatprep.subr.bf16.mxu1 %v13859_v44  ;;  %v13733_v44 = vpack.c.bf16 %v8046_v40, %v8042_v37  ;;  %v13877_v60 = vpack.c.bf16 %v8048_v62, %v8044_v41  ;;  %v13735_v45 = vpack.c.bf16 %v8055_v46, %v8051_v14  ;;  %v8087_v37 = vld [vmem:[#allocation26 + $0x428] sm:$0xff]  ;;  %v8085_v40 = vld [vmem:[#allocation26 + $0x418] sm:$0xff]  ;;  %v8082_v46 = vld [vmem:[#allocation26 + $0x400] sm:$0xff] }
 0xf05   : > { %v8089_v41 = vld [vmem:[#allocation26 + $0x438] sm:$0xff] }
 0xf06   : > { %13718 = vmatpush1.bf16.msra.mxu0 %v13717_v51  ;;  %v13879_v51 = vpack.c.bf16 %v8057_v43, %v8053_v50  ;;  %v8086_v50 = vld [vmem:[#allocation26 + $0x420] sm:$0xff]  ;;  %v13895_v43 = vpack.c.bf16 %v8089_v41, %v8085_v40  ;;  %v8120_v41 = vld [vmem:[#allocation26 + $0x530] sm:$0xff] }
 0xf07   : > { %13862 = vmatpush1.bf16.msra.mxu1 %v13861_v61  ;;  %13720 = vmatprep.subr.bf16.mxu0 %v13719_v13  ;;  %v8056_v61 = vld [vmem:[#allocation26 + $0x330] sm:$0xff]  ;;  %v8059_v13 = vld [vmem:[#allocation26 + $0x348] sm:$0xff] }
 0xf08   : > { %13864 = vmatprep.subr.bf16.mxu1 %v13863_v3  ;;  %v13737_v3 = vpack.c.bf16 %v8054_v24, %v8050_v49  ;;  %v13881_v15 = vpack.c.bf16 %v8056_v61, %v8052_v47  ;;  %v13739_v5 = vpack.c.bf16 %v8063_v10, %v8059_v13  ;;  %v8095_v49 = vld [vmem:[#allocation26 + $0x468] sm:$0xff]  ;;  %v13753_v24 = vpack.c.bf16 %v8086_v50, %v8082_v46  ;;  %v8093_v47 = vld [vmem:[#allocation26 + $0x458] sm:$0xff]  ;;  %v8090_v13 = vld [vmem:[#allocation26 + $0x440] sm:$0xff] }
 0xf09   : > { %v8094_v10 = vld [vmem:[#allocation26 + $0x460] sm:$0xff]  ;;  %v8129_v46 = vld [vmem:[#allocation26 + $0x578] sm:$0xff] }
 0xf0a   : > { %13722 = vmatpush1.bf16.msra.mxu0 %v13721_v27  ;;  %v13883_v27 = vpack.c.bf16 %v8065_v57, %v8061_v23  ;;  %v8092_v23 = vld [vmem:[#allocation26 + $0x450] sm:$0xff] }
 0xf0b   : > { %13866 = vmatpush1.bf16.msra.mxu1 %v13865_v21  ;;  %13724 = vmatprep.subr.bf16.mxu0 %v13723_v12  ;;  %v8064_v21 = vld [vmem:[#allocation26 + $0x370] sm:$0xff]  ;;  %v8067_v12 = vld [vmem:[#allocation26 + $0x388] sm:$0xff] }
 0xf0c   : > { %13868 = vmatprep.subr.bf16.mxu1 %v13867_v8  ;;  %v13741_v8 = vpack.c.bf16 %v8062_v9, %v8058_v6  ;;  %v13885_v39 = vpack.c.bf16 %v8064_v21, %v8060_v7  ;;  %v13743_v48 = vpack.c.bf16 %v8071_v25, %v8067_v12  ;;  %v8101_v9 = vld [vmem:[#allocation26 + $0x498] sm:$0xff]  ;;  %v8098_v25 = vld [vmem:[#allocation26 + $0x480] sm:$0xff] }
 0xf0d   : > { %v8105_v7 = vld [vmem:[#allocation26 + $0x4b8] sm:$0xff] }
 0xf0e   : > { %13726 = vmatpush1.bf16.msra.mxu0 %v13725_v22  ;;  %v13887_v22 = vpack.c.bf16 %v8073_v63, %v8069_v53  ;;  %v8102_v53 = vld [vmem:[#allocation26 + $0x4a0] sm:$0xff]  ;;  %v8100_v63 = vld [vmem:[#allocation26 + $0x490] sm:$0xff] }
 0xf0f   : > { %13870 = vmatpush1.bf16.msra.mxu1 %v13869_v34  ;;  %13728 = vmatprep.subr.bf16.mxu0 %v13727_v28  ;;  %v8072_v34 = vld [vmem:[#allocation26 + $0x3b0] sm:$0xff]  ;;  %v8075_v28 = vld [vmem:[#allocation26 + $0x3c8] sm:$0xff] }
 0xf10   : > { %13872 = vmatprep.subr.bf16.mxu1 %v13871_v31  ;;  %v13745_v31 = vpack.c.bf16 %v8070_v20, %v8066_v16  ;;  %v13889_v32 = vpack.c.bf16 %v8072_v34, %v8068_v19  ;;  %v13747_v1 = vpack.c.bf16 %v8079_v29, %v8075_v28  ;;  %v8111_v16 = vld [vmem:[#allocation26 + $0x4e8] sm:$0xff]  ;;  %v8109_v20 = vld [vmem:[#allocation26 + $0x4d8] sm:$0xff]  ;;  %v13761_v19 = vpack.c.bf16 %v8102_v53, %v8098_v25  ;;  %v8106_v28 = vld [vmem:[#allocation26 + $0x4c0] sm:$0xff] }
 0xf11   : > { %v8110_v29 = vld [vmem:[#allocation26 + $0x4e0] sm:$0xff]  ;;  %v8145_v25 = vld [vmem:[#allocation26 + $0x5f8] sm:$0xff] }
 0xf12   : > { %13730 = vmatpush1.bf16.msra.mxu0 %v13729_v59  ;;  %v13891_v59 = vpack.c.bf16 %v8081_v30, %v8077_v0  ;;  %v8108_v0 = vld [vmem:[#allocation26 + $0x4d0] sm:$0xff] }
 0xf13   : > { %13874 = vmatpush1.bf16.msra.mxu1 %v13873_v54  ;;  %13732 = vmatprep.subr.bf16.mxu0 %v13731_v56  ;;  %v8080_v54 = vld [vmem:[#allocation26 + $0x3f0] sm:$0xff]  ;;  %v8083_v56 = vld [vmem:[#allocation26 + $0x408] sm:$0xff] }
 0xf14   : > { %13876 = vmatprep.subr.bf16.mxu1 %v13875_v42  ;;  %v13749_v42 = vpack.c.bf16 %v8078_v2, %v8074_v52  ;;  %v13893_v62 = vpack.c.bf16 %v8080_v54, %v8076_v58  ;;  %v13751_v14 = vpack.c.bf16 %v8087_v37, %v8083_v56  ;;  %v8121_v52 = vld [vmem:[#allocation26 + $0x538] sm:$0xff]  ;;  %v13765_v2 = vpack.c.bf16 %v8110_v29, %v8106_v28  ;;  %v8114_v54 = vld [vmem:[#allocation26 + $0x500] sm:$0xff]  ;;  %v8116_v37 = vld [vmem:[#allocation26 + $0x510] sm:$0xff] }
 0xf15   : > { %v8118_v56 = vld [vmem:[#allocation26 + $0x520] sm:$0xff]  ;;  %v8153_v28 = vld [vmem:[#allocation26 + $0x638] sm:$0xff] }
 0xf16   : > { %13734 = vmatpush1.bf16.msra.mxu0 %v13733_v44  ;;  %v8084_v44 = vld [vmem:[#allocation26 + $0x410] sm:$0xff]  ;;  %v13769_v50 = vpack.c.bf16 %v8118_v56, %v8114_v54  ;;  %v8161_v54 = vld [vmem:[#allocation26 + $0x678] sm:$0xff] }
 0xf17   : > { %13878 = vmatpush1.bf16.msra.mxu1 %v13877_v60  ;;  %13736 = vmatprep.subr.bf16.mxu0 %v13735_v45  ;;  %v8088_v60 = vld [vmem:[#allocation26 + $0x430] sm:$0xff]  ;;  %v8091_v45 = vld [vmem:[#allocation26 + $0x448] sm:$0xff] }
 0xf18   : > { %13880 = vmatprep.subr.bf16.mxu1 %v13879_v51  ;;  %v8097_v51 = vld [vmem:[#allocation26 + $0x478] sm:$0xff]  ;;  %v13897_v61 = vpack.c.bf16 %v8088_v60, %v8084_v44  ;;  %v13755_v57 = vpack.c.bf16 %v8095_v49, %v8091_v45  ;;  %v8122_v60 = vld [vmem:[#allocation26 + $0x540] sm:$0xff]  ;;  %v8124_v49 = vld [vmem:[#allocation26 + $0x550] sm:$0xff] }
 0xf19   : > { %v13899_v6 = vpack.c.bf16 %v8097_v51, %v8093_v47  ;;  %v8126_v45 = vld [vmem:[#allocation26 + $0x560] sm:$0xff]  ;;  %v8128_v47 = vld [vmem:[#allocation26 + $0x570] sm:$0xff]  ;;  %v8131_v51 = vld [vmem:[#allocation26 + $0x588] sm:$0xff] }
 0xf1a   : > { %13738 = vmatpush1.bf16.msra.mxu0 %v13737_v3  ;;  %v8096_v3 = vld [vmem:[#allocation26 + $0x470] sm:$0xff] }
 0xf1b   : > { %13882 = vmatpush1.bf16.msra.mxu1 %v13881_v15  ;;  %13740 = vmatprep.subr.bf16.mxu0 %v13739_v5  ;;  %v8099_v15 = vld [vmem:[#allocation26 + $0x488] sm:$0xff]  ;;  %v13901_v21 = vpack.c.bf16 %v8096_v3, %v8092_v23  ;;  %v13773_v23 = vpack.c.bf16 %v8126_v45, %v8122_v60  ;;  %v8169_v60 = vld [vmem:[#allocation26 + $0x6b8] sm:$0xff] }
 0xf1c   : > { %13884 = vmatprep.subr.bf16.mxu1 %v13883_v27  ;;  %v8103_v5 = vld [vmem:[#allocation26 + $0x4a8] sm:$0xff]  ;;  %v13757_v27 = vpack.c.bf16 %v8094_v10, %v8090_v13  ;;  %v8133_v13 = vld [vmem:[#allocation26 + $0x598] sm:$0xff] }
 0xf1d   : > { %v13759_v12 = vpack.c.bf16 %v8103_v5, %v8099_v15  ;;  %v8137_v10 = vld [vmem:[#allocation26 + $0x5b8] sm:$0xff]  ;;  %v8130_v15 = vld [vmem:[#allocation26 + $0x580] sm:$0xff] }
 0xf1e   : > { %13742 = vmatpush1.bf16.msra.mxu0 %v13741_v8  ;;  %v13903_v8 = vpack.c.bf16 %v8105_v7, %v8101_v9  ;;  %v8134_v5 = vld [vmem:[#allocation26 + $0x5a0] sm:$0xff]  ;;  %v13919_v9 = vpack.c.bf16 %v8137_v10, %v8133_v13  ;;  %v8136_v7 = vld [vmem:[#allocation26 + $0x5b0] sm:$0xff] }
 0xf1f   : > { %13886 = vmatpush1.bf16.msra.mxu1 %v13885_v39  ;;  %13744 = vmatprep.subr.bf16.mxu0 %v13743_v48  ;;  %v8104_v39 = vld [vmem:[#allocation26 + $0x4b0] sm:$0xff]  ;;  %v8107_v48 = vld [vmem:[#allocation26 + $0x4c8] sm:$0xff]  ;;  %v13777_v53 = vpack.c.bf16 %v8134_v5, %v8130_v15  ;;  %v8177_v15 = vld [vmem:[#allocation26 + $0x6f8] sm:$0xff] }
 0xf20   : > { %13888 = vmatprep.subr.bf16.mxu1 %v13887_v22  ;;  %v13905_v22 = vpack.c.bf16 %v8104_v39, %v8100_v63  ;;  %v13763_v34 = vpack.c.bf16 %v8111_v16, %v8107_v48  ;;  %v8138_v39 = vld [vmem:[#allocation26 + $0x5c0] sm:$0xff]  ;;  %v8140_v16 = vld [vmem:[#allocation26 + $0x5d0] sm:$0xff] }
 0xf21   : > { %v8142_v48 = vld [vmem:[#allocation26 + $0x5e0] sm:$0xff]  ;;  %v8168_v10 = vld [vmem:[#allocation26 + $0x6b0] sm:$0xff] }
 0xf22   : > { %13746 = vmatpush1.bf16.msra.mxu0 %v13745_v31  ;;  %v8115_v31 = vld [vmem:[#allocation26 + $0x508] sm:$0xff]  ;;  %v13781_v29 = vpack.c.bf16 %v8142_v48, %v8138_v39  ;;  %v8185_v39 = vld [vmem:[#allocation26 + $0x738] sm:$0xff] }
 0xf23   : > { %13890 = vmatpush1.bf16.msra.mxu1 %v13889_v32  ;;  %13748 = vmatprep.subr.bf16.mxu0 %v13747_v1  ;;  %v8119_v32 = vld [vmem:[#allocation26 + $0x528] sm:$0xff]  ;;  %v8117_v1 = vld [vmem:[#allocation26 + $0x518] sm:$0xff] }
 0xf24   : > { %13892 = vmatprep.subr.bf16.mxu1 %v13891_v59  ;;  %v13767_v59 = vpack.c.bf16 %v8119_v32, %v8115_v31  ;;  %v13911_v40 = vpack.c.bf16 %v8121_v52, %v8117_v1  ;;  %v8150_v31 = vld [vmem:[#allocation26 + $0x620] sm:$0xff]  ;;  %v8148_v32 = vld [vmem:[#allocation26 + $0x610] sm:$0xff] }
 0xf25   : > { %v8152_v52 = vld [vmem:[#allocation26 + $0x630] sm:$0xff] }
 0xf26   : > { %13750 = vmatpush1.bf16.msra.mxu0 %v13749_v42  ;;  %v8123_v42 = vld [vmem:[#allocation26 + $0x548] sm:$0xff] }
 0xf27   : > { %13894 = vmatpush1.bf16.msra.mxu1 %v13893_v62  ;;  %13752 = vmatprep.subr.bf16.mxu0 %v13751_v14  ;;  %v8127_v62 = vld [vmem:[#allocation26 + $0x568] sm:$0xff]  ;;  %v8125_v14 = vld [vmem:[#allocation26 + $0x558] sm:$0xff] }
 0xf28   : > { %13896 = vmatprep.subr.bf16.mxu1 %v13895_v43  ;;  %v13913_v43 = vpack.c.bf16 %v8120_v41, %v8116_v37  ;;  %v13771_v44 = vpack.c.bf16 %v8127_v62, %v8123_v42  ;;  %v13929_v37 = vpack.c.bf16 %v8152_v52, %v8148_v32  ;;  %v8154_v41 = vld [vmem:[#allocation26 + $0x640] sm:$0xff]  ;;  %v8156_v62 = vld [vmem:[#allocation26 + $0x650] sm:$0xff] }
 0xf29   : > { %9242 = vmatmul.mubr.f32.vlgmr.msra.gmra.mrb[64].mxu0 %v16208_v4  ;;  %v8158_v42 = vld [vmem:[#allocation26 + $0x660] sm:$0xff] }
 0xf2a   : > { %9455 = vmatmul.mubr.f32.vlgmr.msra.gmra.mrb[22].mxu1 %v16208_v4  ;;  %13754 = vmatpush1.bf16.msra.mxu0 %v13753_v24  ;;  %v8113_v4 = vld [vmem:[#allocation26 + $0x4f8] sm:$0xff]  ;;  %v13915_v24 = vpack.c.bf16 %v8129_v46, %v8125_v14  ;;  %v8160_v46 = vld [vmem:[#allocation26 + $0x670] sm:$0xff]  ;;  %v13789_v45 = vpack.c.bf16 %v8158_v42, %v8154_v41  ;;  %v8186_v52 = vld [vmem:[#allocation26 + $0x740] sm:$0xff] }
 0xf2b   : > { %9312 = vmatprep.mubr.f32.mxu0 %v16214_v26  ;;  %13898 = vmatpush1.bf16.msra.mxu1 %v13897_v61  ;;  %v13907_v30 = vpack.c.bf16 %v8113_v4, %v8109_v20  ;;  %v8135_v61 = vld [vmem:[#allocation26 + $0x5a8] sm:$0xff]  ;;  %v8144_v4 = vld [vmem:[#allocation26 + $0x5f0] sm:$0xff]  ;;  %v8201_v41 = vld [vmem:[#allocation26 + $0x7b8] sm:$0xff] }
 0xf2c   : > { %9525 = vmatprep.mubr.f32.mxu1 %v16214_v26  ;;  %13756 = vmatprep.subr.bf16.mxu0 %v13755_v57  ;;  %v8112_v26 = vld [vmem:[#allocation26 + $0x4f0] sm:$0xff]  ;;  %v13917_v57 = vpack.c.bf16 %v8128_v47, %v8124_v49  ;;  %v13775_v3 = vpack.c.bf16 %v8135_v61, %v8131_v51  ;;  %v13933_v49 = vpack.c.bf16 %v8160_v46, %v8156_v62  ;;  %v8162_v47 = vld [vmem:[#allocation26 + $0x680] sm:$0xff] }
 0xf2d   : > { %13900 = vmatprep.subr.bf16.mxu1 %v13899_v6  ;;  %v13909_v58 = vpack.c.bf16 %v8112_v26, %v8108_v0  ;;  %v8132_v6 = vld [vmem:[#allocation26 + $0x590] sm:$0xff]  ;;  %v13925_v0 = vpack.c.bf16 %v8144_v4, %v8140_v16  ;;  %v8146_v26 = vld [vmem:[#allocation26 + $0x600] sm:$0xff] }
 0xf2e   : > { %13758 = vmatpush1.bf16.msra.mxu0 %v13757_v27  ;;  %v8139_v27 = vld [vmem:[#allocation26 + $0x5c8] sm:$0xff]  ;;  %v13921_v63 = vpack.c.bf16 %v8136_v7, %v8132_v6  ;;  %v13785_v56 = vpack.c.bf16 %v8150_v31, %v8146_v26  ;;  %v8166_v51 = vld [vmem:[#allocation26 + $0x6a0] sm:$0xff]  ;;  %v8164_v61 = vld [vmem:[#allocation26 + $0x690] sm:$0xff] }
 0xf2f   : > { %13902 = vmatpush1.bf16.msra.mxu1 %v13901_v21  ;;  %13760 = vmatprep.subr.bf16.mxu0 %v13759_v12  ;;  %v8143_v21 = vld [vmem:[#allocation26 + $0x5e8] sm:$0xff]  ;;  %v8141_v12 = vld [vmem:[#allocation26 + $0x5d8] sm:$0xff]  ;;  %v13793_v5 = vpack.c.bf16 %v8166_v51, %v8162_v47  ;;  %v13937_v6 = vpack.c.bf16 %v8168_v10, %v8164_v61  ;;  %v8170_v7 = vld [vmem:[#allocation26 + $0x6c0] sm:$0xff] }
 0xf30   : > { %13904 = vmatprep.subr.bf16.mxu1 %v13903_v8  ;;  %v13779_v8 = vpack.c.bf16 %v8143_v21, %v8139_v27  ;;  %v13923_v20 = vpack.c.bf16 %v8145_v25, %v8141_v12  ;;  %v8174_v27 = vld [vmem:[#allocation26 + $0x6e0] sm:$0xff]  ;;  %v8172_v21 = vld [vmem:[#allocation26 + $0x6d0] sm:$0xff]  ;;  %v8193_v26 = vld [vmem:[#allocation26 + $0x778] sm:$0xff] }
 0xf31   : > { %v8176_v25 = vld [vmem:[#allocation26 + $0x6f0] sm:$0xff]  ;;  %v13797_v48 = vpack.c.bf16 %v8174_v27, %v8170_v7  ;;  %v8178_v4 = vld [vmem:[#allocation26 + $0x700] sm:$0xff]  ;;  %v8209_v47 = vld [vmem:[#allocation26 + $0x7f8] sm:$0xff] }
 0xf32   : > { %13762 = vmatpush1.bf16.msra.mxu0 %v13761_v19  ;;  %v8147_v19 = vld [vmem:[#allocation26 + $0x608] sm:$0xff]  ;;  %v13941_v16 = vpack.c.bf16 %v8176_v25, %v8172_v21  ;;  %v8194_v46 = vld [vmem:[#allocation26 + $0x780] sm:$0xff]  ;;  %v8217_v7 = vld [vmem:[#allocation26 + $0x838] sm:$0xff] }
 0xf33   : > { %13906 = vmatpush1.bf16.msra.mxu1 %v13905_v22  ;;  %13764 = vmatprep.subr.bf16.mxu0 %v13763_v34  ;;  %v8151_v22 = vld [vmem:[#allocation26 + $0x628] sm:$0xff]  ;;  %v8149_v34 = vld [vmem:[#allocation26 + $0x618] sm:$0xff]  ;;  %v8202_v10 = vld [vmem:[#allocation26 + $0x7c0] sm:$0xff] }
 0xf34   : > { %13908 = vmatprep.subr.bf16.mxu1 %v13907_v30  ;;  %v13783_v30 = vpack.c.bf16 %v8151_v22, %v8147_v19  ;;  %v13927_v1 = vpack.c.bf16 %v8153_v28, %v8149_v34  ;;  %v8182_v19 = vld [vmem:[#allocation26 + $0x720] sm:$0xff]  ;;  %v8180_v22 = vld [vmem:[#allocation26 + $0x710] sm:$0xff] }
 0xf35   : > { %v8184_v28 = vld [vmem:[#allocation26 + $0x730] sm:$0xff]  ;;  %v13801_v31 = vpack.c.bf16 %v8182_v19, %v8178_v4  ;;  %v8210_v25 = vld [vmem:[#allocation26 + $0x800] sm:$0xff]  ;;  %v8225_v4 = vld [vmem:[#allocation26 + $0x878] sm:$0xff] }
 0xf36   : > { %13766 = vmatpush1.bf16.msra.mxu0 %v13765_v2  ;;  %v8155_v2 = vld [vmem:[#allocation26 + $0x648] sm:$0xff]  ;;  %v13945_v32 = vpack.c.bf16 %v8184_v28, %v8180_v22  ;;  %v8218_v28 = vld [vmem:[#allocation26 + $0x840] sm:$0xff] }
 0xf37   : > { %13910 = vmatpush1.bf16.msra.mxu1 %v13909_v58  ;;  %13768 = vmatprep.subr.bf16.mxu0 %v13767_v59  ;;  %v8159_v58 = vld [vmem:[#allocation26 + $0x668] sm:$0xff]  ;;  %v8157_v59 = vld [vmem:[#allocation26 + $0x658] sm:$0xff] }
 0xf38   : > { %13912 = vmatprep.subr.bf16.mxu1 %v13911_v40  ;;  %v13787_v40 = vpack.c.bf16 %v8159_v58, %v8155_v2  ;;  %v13931_v14 = vpack.c.bf16 %v8161_v54, %v8157_v59  ;;  %v8190_v2 = vld [vmem:[#allocation26 + $0x760] sm:$0xff]  ;;  %v8188_v58 = vld [vmem:[#allocation26 + $0x750] sm:$0xff] }
 0xf39   : > { %v8192_v54 = vld [vmem:[#allocation26 + $0x770] sm:$0xff]  ;;  %v13805_v42 = vpack.c.bf16 %v8190_v2, %v8186_v52  ;;  %v8233_v52 = vld [vmem:[#allocation26 + $0x8b8] sm:$0xff] }
 0xf3a   : > { %13770 = vmatpush1.bf16.msra.mxu0 %v13769_v50  ;;  %v8163_v50 = vld [vmem:[#allocation26 + $0x688] sm:$0xff]  ;;  %v13949_v62 = vpack.c.bf16 %v8192_v54, %v8188_v58  ;;  %v8226_v54 = vld [vmem:[#allocation26 + $0x880] sm:$0xff] }
 0xf3b   : > { %13914 = vmatpush1.bf16.msra.mxu1 %v13913_v43  ;;  %13772 = vmatprep.subr.bf16.mxu0 %v13771_v44  ;;  %v8167_v43 = vld [vmem:[#allocation26 + $0x6a8] sm:$0xff]  ;;  %v8165_v44 = vld [vmem:[#allocation26 + $0x698] sm:$0xff] }
 0xf3c   : > { %13916 = vmatprep.subr.bf16.mxu1 %v13915_v24  ;;  %v13791_v24 = vpack.c.bf16 %v8167_v43, %v8163_v50  ;;  %v13935_v13 = vpack.c.bf16 %v8169_v60, %v8165_v44  ;;  %v8198_v50 = vld [vmem:[#allocation26 + $0x7a0] sm:$0xff]  ;;  %v8196_v43 = vld [vmem:[#allocation26 + $0x790] sm:$0xff] }
 0xf3d   : > { %v8200_v60 = vld [vmem:[#allocation26 + $0x7b0] sm:$0xff]  ;;  %v13809_v51 = vpack.c.bf16 %v8198_v50, %v8194_v46  ;;  %v8241_v46 = vld [vmem:[#allocation26 + $0x8f8] sm:$0xff] }
 0xf3e   : > { %13774 = vmatpush1.bf16.msra.mxu0 %v13773_v23  ;;  %v8171_v23 = vld [vmem:[#allocation26 + $0x6c8] sm:$0xff]  ;;  %v13953_v61 = vpack.c.bf16 %v8200_v60, %v8196_v43  ;;  %v8238_v60 = vld [vmem:[#allocation26 + $0x8e0] sm:$0xff] }
 0xf3f   : > { %13918 = vmatpush1.bf16.msra.mxu1 %v13917_v57  ;;  %13776 = vmatprep.subr.bf16.mxu0 %v13775_v3  ;;  %v8175_v57 = vld [vmem:[#allocation26 + $0x6e8] sm:$0xff]  ;;  %v8173_v3 = vld [vmem:[#allocation26 + $0x6d8] sm:$0xff] }
 0xf40   : > { %13920 = vmatprep.subr.bf16.mxu1 %v13919_v9  ;;  %v13795_v9 = vpack.c.bf16 %v8175_v57, %v8171_v23  ;;  %v13939_v12 = vpack.c.bf16 %v8177_v15, %v8173_v3  ;;  %v8206_v23 = vld [vmem:[#allocation26 + $0x7e0] sm:$0xff]  ;;  %v8204_v57 = vld [vmem:[#allocation26 + $0x7d0] sm:$0xff] }
 0xf41   : > { %v8208_v15 = vld [vmem:[#allocation26 + $0x7f0] sm:$0xff]  ;;  %v13813_v27 = vpack.c.bf16 %v8206_v23, %v8202_v10 }
 0xf42   : > { %13778 = vmatpush1.bf16.msra.mxu0 %v13777_v53  ;;  %v8179_v53 = vld [vmem:[#allocation26 + $0x708] sm:$0xff]  ;;  %v13957_v21 = vpack.c.bf16 %v8208_v15, %v8204_v57  ;;  %v9820_v23 = vld [vmem:[#allocation26 + $0x1210] sm:$0xff]  ;;  %v9833_v15 = vld [vmem:[#allocation26 + $0x1278] sm:$0xff] }
 0xf43   : > { %13922 = vmatpush1.bf16.msra.mxu1 %v13921_v63  ;;  %13780 = vmatprep.subr.bf16.mxu0 %v13779_v8  ;;  %v8183_v63 = vld [vmem:[#allocation26 + $0x728] sm:$0xff]  ;;  %v8181_v8 = vld [vmem:[#allocation26 + $0x718] sm:$0xff]  ;;  %v9824_v57 = vld [vmem:[#allocation26 + $0x1230] sm:$0xff] }
 0xf44   : > { %13924 = vmatprep.subr.bf16.mxu1 %v13923_v20  ;;  %v13799_v20 = vpack.c.bf16 %v8183_v63, %v8179_v53  ;;  %v13943_v34 = vpack.c.bf16 %v8185_v39, %v8181_v8  ;;  %v8214_v53 = vld [vmem:[#allocation26 + $0x820] sm:$0xff]  ;;  %v8212_v63 = vld [vmem:[#allocation26 + $0x810] sm:$0xff] }
 0xf45   : > { %v8216_v39 = vld [vmem:[#allocation26 + $0x830] sm:$0xff]  ;;  %v13817_v19 = vpack.c.bf16 %v8214_v53, %v8210_v25  ;;  %v9841_v25 = vld [vmem:[#allocation26 + $0x12b8] sm:$0xff]  ;;  %v14617_v53 = vld [vmem:[#allocation7 + $0x18] sm:$0x3f] }
 0xf46   : > { %13782 = vmatpush1.bf16.msra.mxu0 %v13781_v29  ;;  %v8187_v29 = vld [vmem:[#allocation26 + $0x748] sm:$0xff]  ;;  %v13961_v22 = vpack.c.bf16 %v8216_v39, %v8212_v63 }
 0xf47   : > { %13926 = vmatpush1.bf16.msra.mxu1 %v13925_v0  ;;  %13784 = vmatprep.subr.bf16.mxu0 %v13783_v30  ;;  %v8191_v0 = vld [vmem:[#allocation26 + $0x768] sm:$0xff]  ;;  %v8189_v30 = vld [vmem:[#allocation26 + $0x758] sm:$0xff] }
 0xf48   : > { %13928 = vmatprep.subr.bf16.mxu1 %v13927_v1  ;;  %v13803_v1 = vpack.c.bf16 %v8191_v0, %v8187_v29  ;;  %v13947_v59 = vpack.c.bf16 %v8193_v26, %v8189_v30  ;;  %v8222_v29 = vld [vmem:[#allocation26 + $0x860] sm:$0xff]  ;;  %v8220_v0 = vld [vmem:[#allocation26 + $0x850] sm:$0xff]  ;;  %v9819_v63 = vld [vmem:[#allocation26 + $0x1208] sm:$0xff] }
 0xf49   : > { %v8224_v26 = vld [vmem:[#allocation26 + $0x870] sm:$0xff]  ;;  %v13821_v2 = vpack.c.bf16 %v8222_v29, %v8218_v28  ;;  %v9822_v28 = vld [vmem:[#allocation26 + $0x1220] sm:$0xff]  ;;  %v9827_v29 = vld [vmem:[#allocation26 + $0x1248] sm:$0xff] }
 0xf4a   : > { %13786 = vmatpush1.bf16.msra.mxu0 %v13785_v56  ;;  %v8195_v56 = vld [vmem:[#allocation26 + $0x788] sm:$0xff]  ;;  %v13965_v58 = vpack.c.bf16 %v8224_v26, %v8220_v0 }
 0xf4b   : > { %13930 = vmatpush1.bf16.msra.mxu1 %v13929_v37  ;;  %13788 = vmatprep.subr.bf16.mxu0 %v13787_v40  ;;  %v8199_v37 = vld [vmem:[#allocation26 + $0x7a8] sm:$0xff]  ;;  %v8197_v40 = vld [vmem:[#allocation26 + $0x798] sm:$0xff] }
 0xf4c   : > { %13932 = vmatprep.subr.bf16.mxu1 %v13931_v14  ;;  %v13807_v14 = vpack.c.bf16 %v8199_v37, %v8195_v56  ;;  %v13951_v44 = vpack.c.bf16 %v8201_v41, %v8197_v40  ;;  %v8230_v56 = vld [vmem:[#allocation26 + $0x8a0] sm:$0xff]  ;;  %v8228_v37 = vld [vmem:[#allocation26 + $0x890] sm:$0xff]  ;;  %v9831_v0 = vld [vmem:[#allocation26 + $0x1268] sm:$0xff] }
 0xf4d   : > { %v8232_v41 = vld [vmem:[#allocation26 + $0x8b0] sm:$0xff] }
 0xf4e   : > { %13790 = vmatpush1.bf16.msra.mxu0 %v13789_v45  ;;  %v8203_v45 = vld [vmem:[#allocation26 + $0x7c8] sm:$0xff]  ;;  %v13969_v50 = vpack.c.bf16 %v8232_v41, %v8228_v37 }
 0xf4f   : > { %13934 = vmatpush1.bf16.msra.mxu1 %v13933_v49  ;;  %13792 = vmatprep.subr.bf16.mxu0 %v13791_v24  ;;  %v8207_v49 = vld [vmem:[#allocation26 + $0x7e8] sm:$0xff]  ;;  %v8205_v24 = vld [vmem:[#allocation26 + $0x7d8] sm:$0xff] }
 0xf50   : > { %13936 = vmatprep.subr.bf16.mxu1 %v13935_v13  ;;  %v13811_v13 = vpack.c.bf16 %v8207_v49, %v8203_v45  ;;  %v13955_v3 = vpack.c.bf16 %v8209_v47, %v8205_v24  ;;  %v8236_v49 = vld [vmem:[#allocation26 + $0x8d0] sm:$0xff]  ;;  %v9821_v47 = vld [vmem:[#allocation26 + $0x1218] sm:$0xff]  ;;  %v9835_v37 = vld [vmem:[#allocation26 + $0x1288] sm:$0xff] }
 0xf51   : > { %v8240_v24 = vld [vmem:[#allocation26 + $0x8f0] sm:$0xff] }
 0xf52   : > { %13794 = vmatpush1.bf16.msra.mxu0 %v13793_v5  ;;  %v8211_v5 = vld [vmem:[#allocation26 + $0x808] sm:$0xff] }
 0xf53   : > { %13938 = vmatpush1.bf16.msra.mxu1 %v13937_v6  ;;  %13796 = vmatprep.subr.bf16.mxu0 %v13795_v9  ;;  %v8215_v6 = vld [vmem:[#allocation26 + $0x828] sm:$0xff]  ;;  %v8213_v9 = vld [vmem:[#allocation26 + $0x818] sm:$0xff] }
 0xf54   : > { %13940 = vmatprep.subr.bf16.mxu1 %v13939_v12  ;;  %v13815_v12 = vpack.c.bf16 %v8215_v6, %v8211_v5  ;;  %v13959_v8 = vpack.c.bf16 %v8217_v7, %v8213_v9  ;;  %v14615_v5 = vld [vmem:[#allocation7 + $0x8] sm:$0x3f]  ;;  %v14121_v6 = vpack.c.bf16 %v9824_v57, %v9820_v23  ;;  %v9842_v57 = vld [vmem:[#allocation26 + $0x12c0] sm:$0xff] }
 0xf55   : > { %v9828_v7 = vld [vmem:[#allocation26 + $0x1250] sm:$0xff] }
 0xf56   : > { %13798 = vmatpush1.bf16.msra.mxu0 %v13797_v48  ;;  %v8219_v48 = vld [vmem:[#allocation26 + $0x848] sm:$0xff] }
 0xf57   : > { %13942 = vmatpush1.bf16.msra.mxu1 %v13941_v16  ;;  %13800 = vmatprep.subr.bf16.mxu0 %v13799_v20  ;;  %v8223_v16 = vld [vmem:[#allocation26 + $0x868] sm:$0xff]  ;;  %v8221_v20 = vld [vmem:[#allocation26 + $0x858] sm:$0xff] }
 0xf58   : > { %13944 = vmatprep.subr.bf16.mxu1 %v13943_v34  ;;  %v13819_v34 = vpack.c.bf16 %v8223_v16, %v8219_v48  ;;  %v13963_v30 = vpack.c.bf16 %v8225_v4, %v8221_v20  ;;  %v9840_v16 = vld [vmem:[#allocation26 + $0x12b0] sm:$0xff]  ;;  %v14618_v20 = vld [vmem:[#allocation7 + $0x10] sm:$0x3f] }
 0xf59   : > { %v9845_v4 = vld [vmem:[#allocation26 + $0x12d8] sm:$0xff] }
 0xf5a   : > { %13802 = vmatpush1.bf16.msra.mxu0 %v13801_v31  ;;  %v8227_v31 = vld [vmem:[#allocation26 + $0x888] sm:$0xff] }
 0xf5b   : > { %13946 = vmatpush1.bf16.msra.mxu1 %v13945_v32  ;;  %13804 = vmatprep.subr.bf16.mxu0 %v13803_v1  ;;  %v8231_v32 = vld [vmem:[#allocation26 + $0x8a8] sm:$0xff]  ;;  %v8229_v1 = vld [vmem:[#allocation26 + $0x898] sm:$0xff] }
 0xf5c   : > { %13948 = vmatprep.subr.bf16.mxu1 %v13947_v59  ;;  %v13823_v59 = vpack.c.bf16 %v8231_v32, %v8227_v31  ;;  %v13967_v40 = vpack.c.bf16 %v8233_v52, %v8229_v1  ;;  %v9844_v31 = vld [vmem:[#allocation26 + $0x12d0] sm:$0xff]  ;;  %v14619_v1 = vld [vmem:[#allocation7 + $0x20] sm:$0x3f] }
 0xf5d   : > { %v9848_v32 = vld [vmem:[#allocation26 + $0x12f0] sm:$0xff] }
 0xf5e   : > { %13806 = vmatpush1.bf16.msra.mxu0 %v13805_v42  ;;  %v8235_v42 = vld [vmem:[#allocation26 + $0x8c8] sm:$0xff]  ;;  %v14133_v41 = vpack.c.bf16 %v9848_v32, %v9844_v31 }
 0xf5f   : > { %13950 = vmatpush1.bf16.msra.mxu1 %v13949_v62  ;;  %13808 = vmatprep.subr.bf16.mxu0 %v13807_v14  ;;  %v8239_v62 = vld [vmem:[#allocation26 + $0x8e8] sm:$0xff]  ;;  %v8237_v14 = vld [vmem:[#allocation26 + $0x8d8] sm:$0xff] }
 0xf60   : > { %13952 = vmatprep.subr.bf16.mxu1 %v13951_v44  ;;  %v13827_v43 = vpack.c.bf16 %v8239_v62, %v8235_v42  ;;  %v8234_v44 = vld [vmem:[#allocation26 + $0x8c0] sm:$0xff]  ;;  %v13971_v45 = vpack.c.bf16 %v8241_v46, %v8237_v14  ;;  %v9852_v62 = vld [vmem:[#allocation26 + $0x1310] sm:$0xff] }
 0xf61   : > { %v9856_v14 = vld [vmem:[#allocation26 + $0x1330] sm:$0xff] }
 0xf62   : > { %13810 = vmatpush1.bf16.msra.mxu0 %v13809_v51  ;;  %v9825_v51 = vld [vmem:[#allocation26 + $0x1238] sm:$0xff] }
 0xf63   : > { %13954 = vmatpush1.bf16.msra.mxu1 %v13953_v61  ;;  %13812 = vmatprep.subr.bf16.mxu0 %v13811_v13  ;;  %v13829_v61 = vpack.c.bf16 %v8238_v60, %v8234_v44  ;;  %v13973_v13 = vpack.c.bf16 %v8240_v24, %v8236_v49  ;;  %v14119_v10 = vpack.c.bf16 %v9825_v51, %v9821_v47  ;;  %v9834_v44 = vld [vmem:[#allocation26 + $0x1280] sm:$0xff]  ;;  %v9847_v49 = vld [vmem:[#allocation26 + $0x12e8] sm:$0xff]  ;;  %v9860_v51 = vld [vmem:[#allocation26 + $0x1350] sm:$0xff] }
 0xf64   : > { %13956 = vmatprep.subr.bf16.mxu1 %v13955_v3  ;;  %v9829_v3 = vld [vmem:[#allocation26 + $0x1258] sm:$0xff]  ;;  %v9838_v60 = vld [vmem:[#allocation26 + $0x12a0] sm:$0xff]  ;;  %v14137_v24 = vpack.c.bf16 %v9856_v14, %v9852_v62  ;;  %v9892_v14 = vld [vmem:[#allocation26 + $0x1450] sm:$0xff] }
 0xf65   : > { %v14123_v9 = vpack.c.bf16 %v9833_v15, %v9829_v3  ;;  %v9846_v3 = vld [vmem:[#allocation26 + $0x12e0] sm:$0xff]  ;;  %v9851_v15 = vld [vmem:[#allocation26 + $0x1308] sm:$0xff] }
 0xf66   : > { %13814 = vmatpush1.bf16.msra.mxu0 %v13813_v27  ;;  %v9832_v27 = vld [vmem:[#allocation26 + $0x1270] sm:$0xff] }
 0xf67   : > { %13958 = vmatpush1.bf16.msra.mxu1 %v13957_v21  ;;  %13816 = vmatprep.subr.bf16.mxu0 %v13815_v12  ;;  %v14616_v21 = vld [vmem:[#allocation7] sm:$0x3f]  ;;  %v9837_v12 = vld [vmem:[#allocation26 + $0x1298] sm:$0xff]  ;;  %v14125_v39 = vpack.c.bf16 %v9832_v27, %v9828_v7  ;;  %v9868_v7 = vld [vmem:[#allocation26 + $0x1390] sm:$0xff] }
 0xf68   : > { %13960 = vmatprep.subr.bf16.mxu1 %v13959_v8  ;;  %v9823_v8 = vld [vmem:[#allocation26 + $0x1228] sm:$0xff]  ;;  %v14127_v48 = vpack.c.bf16 %v9841_v25, %v9837_v12  ;;  %v9872_v27 = vld [vmem:[#allocation26 + $0x13b0] sm:$0xff]  ;;  %v9877_v12 = vld [vmem:[#allocation26 + $0x13d8] sm:$0xff] }
 0xf69   : > { %9313 = vmatmul.mubr.f32.vlgmr.msra.gmra.mrb[64].mxu0 %v16212_v55  ;;  %v9881_v25 = vld [vmem:[#allocation26 + $0x13f8] sm:$0xff] }
 0xf6a   : > { %9526 = vmatmul.mubr.f32.vlgmr.msra.gmra.mrb[22].mxu1 %v16212_v55  ;;  %13818 = vmatpush1.bf16.msra.mxu0 %v13817_v19  ;;  %v13825_v55 = vpack.c.bf16 %v8230_v56, %v8226_v54  ;;  %v9849_v19 = vld [vmem:[#allocation26 + $0x12f8] sm:$0xff]  ;;  %v9826_v54 = vld [vmem:[#allocation26 + $0x1240] sm:$0xff] }
 0xf6b   : > { %13962 = vmatpush1.bf16.msra.mxu1 %v13961_v22  ;;  %13820 = vmatprep.subr.bf16.mxu0 %v13819_v34  ;;  %v13975_v22 = vpack.c.bf16 %v9823_v8, %v9819_v63  ;;  %v9818_v34 = vld [vmem:[#allocation26 + $0x1200] sm:$0xff]  ;;  %v14131_v26 = vpack.c.bf16 %v9849_v19, %v9845_v4  ;;  %v9880_v4 = vld [vmem:[#allocation26 + $0x13f0] sm:$0xff] }
 0xf6c   : > { %13964 = vmatprep.subr.bf16.mxu1 %v13963_v30  ;;  %9383 = vmatprep.mubr.f32.mxu0 %v15927_v17  ;;  %v13977_v52 = vpack.c.bf16 %v9822_v28, %v9818_v34  ;;  %v9830_v56 = vld [vmem:[#allocation26 + $0x1260] sm:$0xff]  ;;  %v9889_v34 = vld [vmem:[#allocation26 + $0x1438] sm:$0xff] }
 0xf6d   : > { %9596 = vmatprep.mubr.f32.mxu1 %v15927_v17  ;;  %v13981_v46 = vpack.c.bf16 %v9830_v56, %v9826_v54  ;;  %v9850_v63 = vld [vmem:[#allocation26 + $0x1300] sm:$0xff] }
 0xf6e   : > { %13822 = vmatpush1.bf16.msra.mxu0 %v13821_v2  ;;  %v9853_v2 = vld [vmem:[#allocation26 + $0x1318] sm:$0xff]  ;;  %v9854_v8 = vld [vmem:[#allocation26 + $0x1320] sm:$0xff] }
 0xf6f   : > { %13966 = vmatpush1.bf16.msra.mxu1 %v13965_v58  ;;  %13824 = vmatprep.subr.bf16.mxu0 %v13823_v59  ;;  %v9857_v58 = vld [vmem:[#allocation26 + $0x1338] sm:$0xff]  ;;  %v13979_v59 = vpack.c.bf16 %v9831_v0, %v9827_v29  ;;  %v13993_v19 = vpack.c.bf16 %v9854_v8, %v9850_v63  ;;  %v9858_v29 = vld [vmem:[#allocation26 + $0x1340] sm:$0xff] }
 0xf70   : > { %13968 = vmatprep.subr.bf16.mxu1 %v13967_v40  ;;  %v9839_v40 = vld [vmem:[#allocation26 + $0x12a8] sm:$0xff]  ;;  %v14135_v42 = vpack.c.bf16 %v9857_v58, %v9853_v2  ;;  %v9862_v0 = vld [vmem:[#allocation26 + $0x1360] sm:$0xff]  ;;  %v9893_v58 = vld [vmem:[#allocation26 + $0x1458] sm:$0xff] }
 0xf71   : > { %v13997_v2 = vpack.c.bf16 %v9862_v0, %v9858_v29  ;;  %v9866_v56 = vld [vmem:[#allocation26 + $0x1380] sm:$0xff] }
 0xf72   : > { %13826 = vmatpush1.bf16.msra.mxu0 %v13825_v55  ;;  %v9861_v55 = vld [vmem:[#allocation26 + $0x1358] sm:$0xff]  ;;  %v9890_v8 = vld [vmem:[#allocation26 + $0x1440] sm:$0xff] }
 0xf73   : > { %13970 = vmatpush1.bf16.msra.mxu1 %v13969_v50  ;;  %13828 = vmatprep.subr.bf16.mxu0 %v13827_v43  ;;  %v9865_v50 = vld [vmem:[#allocation26 + $0x1378] sm:$0xff]  ;;  %v13983_v43 = vpack.c.bf16 %v9839_v40, %v9835_v37  ;;  %v9870_v37 = vld [vmem:[#allocation26 + $0x13a0] sm:$0xff]  ;;  %v9875_v40 = vld [vmem:[#allocation26 + $0x13c8] sm:$0xff] }
 0xf74   : > { %13972 = vmatprep.subr.bf16.mxu1 %v13971_v45  ;;  %v9843_v45 = vld [vmem:[#allocation26 + $0x12c8] sm:$0xff]  ;;  %v14139_v47 = vpack.c.bf16 %v9865_v50, %v9861_v55  ;;  %v14001_v55 = vpack.c.bf16 %v9870_v37, %v9866_v56  ;;  %v9901_v50 = vld [vmem:[#allocation26 + $0x1498] sm:$0xff]  ;;  %v9898_v0 = vld [vmem:[#allocation26 + $0x1480] sm:$0xff] }
 0xf75   : > { %v13987_v23 = vpack.c.bf16 %v9847_v49, %v9843_v45  ;;  %v9878_v45 = vld [vmem:[#allocation26 + $0x13e0] sm:$0xff]  ;;  %v9883_v49 = vld [vmem:[#allocation26 + $0x1408] sm:$0xff] }
 0xf76   : > { %13830 = vmatpush1.bf16.msra.mxu0 %v13829_v61  ;;  %v13985_v61 = vpack.c.bf16 %v9838_v60, %v9834_v44  ;;  %v9874_v60 = vld [vmem:[#allocation26 + $0x13c0] sm:$0xff] }
 0xf77   : > { %13974 = vmatpush1.bf16.msra.mxu1 %v13973_v13  ;;  %11019 = vmatprep.subr.msk.mxu0 %vm905_vm1, %v14615_v5  ;;  %v9869_v13 = vld [vmem:[#allocation26 + $0x1398] sm:$0xff]  ;;  %v9855_v5 = vld [vmem:[#allocation26 + $0x1328] sm:$0xff]  ;;  %v9906_v37 = vld [vmem:[#allocation26 + $0x14c0] sm:$0xff] }
 0xf78   : > { %14120 = vmatprep.subr.bf16.mxu1 %v14119_v10  ;;  %v9873_v10 = vld [vmem:[#allocation26 + $0x13b8] sm:$0xff] }
 0xf79   : > { %11017 = vmatmul.mubr.msk.f32.vlgmr.msra.gmra.mrb[64].mxu0 %vm842_vm12, %v16216_v11 }
 0xf7a   : > { %11018 = vmatmul.mubr.msk.f32.vlgmr.msra.gmra.mrb[22].mxu1 %vm842_vm12, %v16216_v11  ;;  %11020 = vmatpush1.msk.msra.mxu0 %vm905_vm1, %v14616_v21  ;;  %v9836_v11 = vld [vmem:[#allocation26 + $0x1290] sm:$0xff]  ;;  %v13989_v21 = vpack.c.bf16 %v9846_v3, %v9842_v57  ;;  %v9882_v3 = vld [vmem:[#allocation26 + $0x1400] sm:$0xff] }
 0xf7b   : > { %9669 = vmatprep.mubr.f32.mxu0 %v15927_v17  ;;  %11022 = vmatprep.subr.msk.mxu0 %vm905_vm1, %v14617_v53  ;;  %v14129_v30 = vpack.c.bf16 %v9840_v16, %v9836_v11  ;;  %v13991_v53 = vpack.c.bf16 %v9855_v5, %v9851_v15  ;;  %v14145_v11 = vpack.c.bf16 %v9872_v27, %v9868_v7  ;;  %v9886_v15 = vld [vmem:[#allocation26 + $0x1420] sm:$0xff]  ;;  %v9891_v5 = vld [vmem:[#allocation26 + $0x1448] sm:$0xff]  ;;  %v9908_v27 = vld [vmem:[#allocation26 + $0x14d0] sm:$0xff] }
 0xf7c   : > { %14122 = vmatpush1.bf16.msra.mxu1 %v14121_v6  ;;  %v14147_v16 = vpack.c.bf16 %v9881_v25, %v9877_v12  ;;  %v14009_v12 = vpack.c.bf16 %v9886_v15, %v9882_v3  ;;  %v9917_v25 = vld [vmem:[#allocation26 + $0x1518] sm:$0xff]  ;;  %v9926_v3 = vld [vmem:[#allocation26 + $0x1560] sm:$0xff]  ;;  %v9931_v15 = vld [vmem:[#allocation26 + $0x1588] sm:$0xff] }
 0xf7d   : > { %11021 = vmatmul.mubr.msk.f32.vlgmr.msra.gmra.mrb[66].mxu0 %vm7724_vm3, %v15896_v18  ;;  %14124 = vmatprep.subr.bf16.mxu1 %v14123_v9  ;;  %v14143_v9 = vpack.c.bf16 %v9873_v10, %v9869_v13  ;;  %v14005_v13 = vpack.c.bf16 %v9878_v45, %v9874_v60  ;;  %v9909_v10 = vld [vmem:[#allocation26 + $0x14d8] sm:$0xff]  ;;  %v9914_v45 = vld [vmem:[#allocation26 + $0x1500] sm:$0xff] }
 0xf7e   : > { %11023 = vmatpush1.msk.msra.mxu0 %vm905_vm1, %v14618_v20  ;;  %9740 = vmatprep.mubr.f32.mxu0 %v15927_v17  ;;  %v9876_v20 = vld [vmem:[#allocation26 + $0x13d0] sm:$0xff] }
 0xf7f   : > { %11603 = vmatprep.subr.mxu0 %v15927_v17  ;;  %v14149_v31 = vpack.c.bf16 %v9880_v4, %v9876_v20  ;;  %v9916_v4 = vld [vmem:[#allocation26 + $0x1510] sm:$0xff] }
 0xf80   : > { %14126 = vmatpush1.bf16.msra.mxu1 %v14125_v39  ;;  %v9859_v39 = vld [vmem:[#allocation26 + $0x1348] sm:$0xff] }
 0xf81   : > { %11024 = vmatmul.mubr.msk.f32.vlgmr.msra.gmra.mrb[68].mxu0 %vm7724_vm3, %v15896_v18  ;;  %14128 = vmatprep.subr.bf16.mxu1 %v14127_v48  ;;  %v9863_v48 = vld [vmem:[#allocation26 + $0x1368] sm:$0xff] }
 0xf82   : > { %11604 = vmatpush3.msk.msra.mxu0 %vm905_vm1, %v14619_v1  ;;  %11605 = vmatprep.mubr.msk.f32.mxu0 %vm15113_vm7, %v15927_v17  ;;  %v13995_v28 = vpack.c.bf16 %v9863_v48, %v9859_v39  ;;  %v9884_v1 = vld [vmem:[#allocation26 + $0x1410] sm:$0xff]  ;;  %v9894_v39 = vld [vmem:[#allocation26 + $0x1460] sm:$0xff]  ;;  %v9899_v48 = vld [vmem:[#allocation26 + $0x1488] sm:$0xff] }
 0xf83   : > { %13976 = vmatprep.subr.bf16.mxu0 %v13975_v22  ;;  %v9885_v22 = vld [vmem:[#allocation26 + $0x1418] sm:$0xff] }
 0xf84   : > { %14130 = vmatpush1.bf16.msra.mxu1 %v14129_v30  ;;  %v9867_v30 = vld [vmem:[#allocation26 + $0x1388] sm:$0xff]  ;;  %v14151_v32 = vpack.c.bf16 %v9889_v34, %v9885_v22  ;;  %v14013_v22 = vpack.c.bf16 %v9894_v39, %v9890_v8  ;;  %v9925_v34 = vld [vmem:[#allocation26 + $0x1558] sm:$0xff]  ;;  %v9938_v8 = vld [vmem:[#allocation26 + $0x15c0] sm:$0xff] }
 0xf85   : > { %11606 = vmatmul.mubr.msk.f32.vlgmr.msra.gmra.mrb[70].mxu0 %vm7724_vm3, %v15896_v18  ;;  %14132 = vmatprep.subr.bf16.mxu1 %v14131_v26  ;;  %v9864_v18 = vld [vmem:[#allocation26 + $0x1370] sm:$0xff]  ;;  %v9871_v26 = vld [vmem:[#allocation26 + $0x13a8] sm:$0xff]  ;;  %v9942_v39 = vld [vmem:[#allocation26 + $0x15e0] sm:$0xff] }
 0xf86   : > { %13978 = vmatpush1.bf16.msra.mxu0 %v13977_v52  ;;  %v14141_v6 = vpack.c.bf16 %v9864_v18, %v9860_v51  ;;  %v9888_v52 = vld [vmem:[#allocation26 + $0x1430] sm:$0xff]  ;;  %v13999_v54 = vpack.c.bf16 %v9871_v26, %v9867_v30  ;;  %v9902_v30 = vld [vmem:[#allocation26 + $0x14a0] sm:$0xff]  ;;  %v9907_v26 = vld [vmem:[#allocation26 + $0x14c8] sm:$0xff] }
 0xf87   : > { %13980 = vmatprep.subr.bf16.mxu0 %v13979_v59  ;;  %v9897_v59 = vld [vmem:[#allocation26 + $0x1478] sm:$0xff]  ;;  %v9900_v18 = vld [vmem:[#allocation26 + $0x1490] sm:$0xff] }
 0xf88   : > { %14134 = vmatpush1.bf16.msra.mxu1 %v14133_v41  ;;  %v9879_v41 = vld [vmem:[#allocation26 + $0x13e8] sm:$0xff]  ;;  %v14155_v62 = vpack.c.bf16 %v9897_v59, %v9893_v58  ;;  %v14017_v58 = vpack.c.bf16 %v9902_v30, %v9898_v0  ;;  %v9933_v59 = vld [vmem:[#allocation26 + $0x1598] sm:$0xff]  ;;  %v9952_v0 = vld [vmem:[#allocation26 + $0x1630] sm:$0xff] }
 0xf89   : > { %14136 = vmatprep.subr.bf16.mxu1 %v14135_v42  ;;  %v14153_v42 = vpack.c.bf16 %v9888_v52, %v9884_v1  ;;  %v14003_v44 = vpack.c.bf16 %v9879_v41, %v9875_v40  ;;  %v9924_v52 = vld [vmem:[#allocation26 + $0x1550] sm:$0xff]  ;;  %v9910_v40 = vld [vmem:[#allocation26 + $0x14e0] sm:$0xff]  ;;  %v9915_v41 = vld [vmem:[#allocation26 + $0x1508] sm:$0xff] }
 0xf8a   : > { %13982 = vmatpush1.bf16.msra.mxu0 %v13981_v46  ;;  %v9896_v46 = vld [vmem:[#allocation26 + $0x1470] sm:$0xff]  ;;  %v9955_v30 = vld [vmem:[#allocation26 + $0x1648] sm:$0xff] }
 0xf8b   : > { %13984 = vmatprep.subr.bf16.mxu0 %v13983_v43  ;;  %v9905_v43 = vld [vmem:[#allocation26 + $0x14b8] sm:$0xff] }
 0xf8c   : > { %14138 = vmatpush1.bf16.msra.mxu1 %v14137_v24  ;;  %v9887_v24 = vld [vmem:[#allocation26 + $0x1428] sm:$0xff]  ;;  %v14159_v51 = vpack.c.bf16 %v9905_v43, %v9901_v50  ;;  %v14021_v50 = vpack.c.bf16 %v9910_v40, %v9906_v37  ;;  %v9941_v43 = vld [vmem:[#allocation26 + $0x15d8] sm:$0xff]  ;;  %v9956_v40 = vld [vmem:[#allocation26 + $0x1650] sm:$0xff] }
 0xf8d   : > { %14140 = vmatprep.subr.bf16.mxu1 %v14139_v47  ;;  %v14157_v47 = vpack.c.bf16 %v9896_v46, %v9892_v14  ;;  %v14007_v57 = vpack.c.bf16 %v9887_v24, %v9883_v49  ;;  %v9932_v46 = vld [vmem:[#allocation26 + $0x1590] sm:$0xff]  ;;  %v9918_v49 = vld [vmem:[#allocation26 + $0x1520] sm:$0xff]  ;;  %v9923_v24 = vld [vmem:[#allocation26 + $0x1548] sm:$0xff] }
 0xf8e   : > { %13986 = vmatpush1.bf16.msra.mxu0 %v13985_v61  ;;  %v9904_v61 = vld [vmem:[#allocation26 + $0x14b0] sm:$0xff] }
 0xf8f   : > { %13988 = vmatprep.subr.bf16.mxu0 %v13987_v23  ;;  %v9913_v23 = vld [vmem:[#allocation26 + $0x14f8] sm:$0xff] }
 0xf90   : > { %14142 = vmatpush1.bf16.msra.mxu1 %v14141_v6  ;;  %v9895_v6 = vld [vmem:[#allocation26 + $0x1468] sm:$0xff]  ;;  %v14163_v7 = vpack.c.bf16 %v9913_v23, %v9909_v10  ;;  %v14025_v10 = vpack.c.bf16 %v9918_v49, %v9914_v45 }
 0xf91   : > { %14144 = vmatprep.subr.bf16.mxu1 %v14143_v9  ;;  %v14161_v9 = vpack.c.bf16 %v9904_v61, %v9900_v18  ;;  %v14011_v63 = vpack.c.bf16 %v9895_v6, %v9891_v5  ;;  %v9940_v61 = vld [vmem:[#allocation26 + $0x15d0] sm:$0xff]  ;;  %v9935_v5 = vld [vmem:[#allocation26 + $0x15a8] sm:$0xff] }
 0xf92   : > { %13990 = vmatpush1.bf16.msra.mxu0 %v13989_v21  ;;  %v9912_v21 = vld [vmem:[#allocation26 + $0x14f0] sm:$0xff] }
 0xf93   : > { %13992 = vmatprep.subr.bf16.mxu0 %v13991_v53  ;;  %v9921_v53 = vld [vmem:[#allocation26 + $0x1538] sm:$0xff] }
 0xf94   : > { %14146 = vmatpush1.bf16.msra.mxu1 %v14145_v11  ;;  %v9903_v11 = vld [vmem:[#allocation26 + $0x14a8] sm:$0xff]  ;;  %v14167_v20 = vpack.c.bf16 %v9921_v53, %v9917_v25 }
 0xf95   : > { %14148 = vmatprep.subr.bf16.mxu1 %v14147_v16  ;;  %v14165_v16 = vpack.c.bf16 %v9912_v21, %v9908_v27  ;;  %v14015_v29 = vpack.c.bf16 %v9903_v11, %v9899_v48  ;;  %v9930_v27 = vld [vmem:[#allocation26 + $0x1580] sm:$0xff]  ;;  %v9943_v25 = vld [vmem:[#allocation26 + $0x15e8] sm:$0xff]  ;;  %v14037_v48 = vpack.c.bf16 %v9942_v39, %v9938_v8 }
 0xf96   : > { %13994 = vmatpush1.bf16.msra.mxu0 %v13993_v19  ;;  %v9920_v19 = vld [vmem:[#allocation26 + $0x1530] sm:$0xff]  ;;  %v9934_v21 = vld [vmem:[#allocation26 + $0x15a0] sm:$0xff]  ;;  %v9947_v11 = vld [vmem:[#allocation26 + $0x1608] sm:$0xff] }
 0xf97   : > { %13996 = vmatprep.subr.bf16.mxu0 %v13995_v28  ;;  %v9929_v28 = vld [vmem:[#allocation26 + $0x1578] sm:$0xff]  ;;  %v14033_v53 = vpack.c.bf16 %v9934_v21, %v9930_v27  ;;  %v9976_v27 = vld [vmem:[#allocation26 + $0x16f0] sm:$0xff]  ;;  %v9979_v21 = vld [vmem:[#allocation26 + $0x1708] sm:$0xff] }
 0xf98   : > { %14150 = vmatpush1.bf16.msra.mxu1 %v14149_v31  ;;  %v9911_v31 = vld [vmem:[#allocation26 + $0x14e8] sm:$0xff]  ;;  %v14171_v1 = vpack.c.bf16 %v9929_v28, %v9925_v34  ;;  %v9946_v34 = vld [vmem:[#allocation26 + $0x1600] sm:$0xff] }
 0xf99   : > { %14152 = vmatprep.subr.bf16.mxu1 %v14151_v32  ;;  %v14169_v32 = vpack.c.bf16 %v9920_v19, %v9916_v4  ;;  %v14019_v56 = vpack.c.bf16 %v9911_v31, %v9907_v26  ;;  %v9953_v19 = vld [vmem:[#allocation26 + $0x1638] sm:$0xff]  ;;  %v9950_v28 = vld [vmem:[#allocation26 + $0x1620] sm:$0xff]  ;;  %v9959_v26 = vld [vmem:[#allocation26 + $0x1668] sm:$0xff] }
 0xf9a   : > { %13998 = vmatpush1.bf16.msra.mxu0 %v13997_v2  ;;  %v9928_v2 = vld [vmem:[#allocation26 + $0x1570] sm:$0xff]  ;;  %v9957_v31 = vld [vmem:[#allocation26 + $0x1658] sm:$0xff] }
 0xf9b   : > { %14000 = vmatprep.subr.bf16.mxu0 %v13999_v54  ;;  %v9937_v54 = vld [vmem:[#allocation26 + $0x15b8] sm:$0xff] }
 0xf9c   : > { %14154 = vmatpush1.bf16.msra.mxu1 %v14153_v42  ;;  %v9919_v42 = vld [vmem:[#allocation26 + $0x1528] sm:$0xff]  ;;  %v14175_v14 = vpack.c.bf16 %v9937_v54, %v9933_v59  ;;  %v9958_v59 = vld [vmem:[#allocation26 + $0x1660] sm:$0xff] }
 0xf9d   : > { %14156 = vmatprep.subr.bf16.mxu1 %v14155_v62  ;;  %v14173_v62 = vpack.c.bf16 %v9928_v2, %v9924_v52  ;;  %v14023_v60 = vpack.c.bf16 %v9919_v42, %v9915_v41  ;;  %v14041_v52 = vpack.c.bf16 %v9950_v28, %v9946_v34  ;;  %v9960_v41 = vld [vmem:[#allocation26 + $0x1670] sm:$0xff]  ;;  %v9963_v42 = vld [vmem:[#allocation26 + $0x1688] sm:$0xff]  ;;  %v9989_v28 = vld [vmem:[#allocation26 + $0x1758] sm:$0xff] }
 0xf9e   : > { %14002 = vmatpush1.bf16.msra.mxu0 %v14001_v55  ;;  %v9936_v55 = vld [vmem:[#allocation26 + $0x15b0] sm:$0xff]  ;;  %v9991_v34 = vld [vmem:[#allocation26 + $0x1768] sm:$0xff] }
 0xf9f   : > { %14004 = vmatprep.subr.bf16.mxu0 %v14003_v44  ;;  %v9945_v44 = vld [vmem:[#allocation26 + $0x15f8] sm:$0xff] }
 0xfa0   : > { %14158 = vmatpush1.bf16.msra.mxu1 %v14157_v47  ;;  %v9927_v47 = vld [vmem:[#allocation26 + $0x1568] sm:$0xff]  ;;  %v14179_v18 = vpack.c.bf16 %v9945_v44, %v9941_v43  ;;  %v9962_v43 = vld [vmem:[#allocation26 + $0x1680] sm:$0xff] }
 0xfa1   : > { %14160 = vmatprep.subr.bf16.mxu1 %v14159_v51  ;;  %v14177_v51 = vpack.c.bf16 %v9936_v55, %v9932_v46  ;;  %v14027_v23 = vpack.c.bf16 %v9927_v47, %v9923_v24  ;;  %v9969_v46 = vld [vmem:[#allocation26 + $0x16b8] sm:$0xff]  ;;  %v9966_v44 = vld [vmem:[#allocation26 + $0x16a0] sm:$0xff]  ;;  %v9964_v24 = vld [vmem:[#allocation26 + $0x1690] sm:$0xff] }
 0xfa2   : > { %14006 = vmatpush1.bf16.msra.mxu0 %v14005_v13  ;;  %v9944_v13 = vld [vmem:[#allocation26 + $0x15f0] sm:$0xff] }
 0xfa3   : > { %14008 = vmatprep.subr.bf16.mxu0 %v14007_v57  ;;  %v9922_v57 = vld [vmem:[#allocation26 + $0x1540] sm:$0xff]  ;;  %v14181_v6 = vpack.c.bf16 %v9944_v13, %v9940_v61  ;;  %v9968_v47 = vld [vmem:[#allocation26 + $0x16b0] sm:$0xff]  ;;  %v9975_v61 = vld [vmem:[#allocation26 + $0x16e8] sm:$0xff] }
 0xfa4   : > { %14162 = vmatpush1.bf16.msra.mxu1 %v14161_v9  ;;  %v14029_v9 = vpack.c.bf16 %v9926_v3, %v9922_v57  ;;  %v9973_v13 = vld [vmem:[#allocation26 + $0x16d8] sm:$0xff]  ;;  %v14193_v57 = vpack.c.bf16 %v9968_v47, %v9964_v24  ;;  %v9970_v3 = vld [vmem:[#allocation26 + $0x16c0] sm:$0xff] }
 0xfa5   : > { %14164 = vmatprep.subr.bf16.mxu1 %v14163_v7  ;;  %v14031_v7 = vpack.c.bf16 %v9935_v5, %v9931_v15  ;;  %v9974_v15 = vld [vmem:[#allocation26 + $0x16e0] sm:$0xff] }
 0xfa6   : > { %14010 = vmatpush1.bf16.msra.mxu0 %v14009_v12  ;;  %v9939_v12 = vld [vmem:[#allocation26 + $0x15c8] sm:$0xff]  ;;  %v14053_v8 = vpack.c.bf16 %v9974_v15, %v9970_v3  ;;  %v10002_v47 = vld [vmem:[#allocation26 + $0x17c0] sm:$0xff]  ;;  %v10013_v3 = vld [vmem:[#allocation26 + $0x1818] sm:$0xff] }
 0xfa7   : > { %14012 = vmatprep.subr.bf16.mxu0 %v14011_v63  ;;  %v14035_v63 = vpack.c.bf16 %v9943_v25, %v9939_v12  ;;  %v9983_v25 = vld [vmem:[#allocation26 + $0x1728] sm:$0xff]  ;;  %v10017_v15 = vld [vmem:[#allocation26 + $0x1838] sm:$0xff] }
 0xfa8   : > { %14166 = vmatpush1.bf16.msra.mxu1 %v14165_v16  ;;  %v9951_v16 = vld [vmem:[#allocation26 + $0x1628] sm:$0xff] }
 0xfa9   : > { %14168 = vmatprep.subr.bf16.mxu1 %v14167_v20  ;;  %v9949_v20 = vld [vmem:[#allocation26 + $0x1618] sm:$0xff]  ;;  %v14039_v4 = vpack.c.bf16 %v9951_v16, %v9947_v11  ;;  %v9982_v11 = vld [vmem:[#allocation26 + $0x1720] sm:$0xff]  ;;  %v14055_v16 = vpack.c.bf16 %v9983_v25, %v9979_v21  ;;  %v10012_v25 = vld [vmem:[#allocation26 + $0x1810] sm:$0xff] }
 0xfaa   : > { %14014 = vmatpush1.bf16.msra.mxu0 %v14013_v22  ;;  %v14183_v22 = vpack.c.bf16 %v9953_v19, %v9949_v20  ;;  %v9984_v19 = vld [vmem:[#allocation26 + $0x1730] sm:$0xff] }
 0xfab   : > { %14016 = vmatprep.subr.bf16.mxu0 %v14015_v29  ;;  %v9948_v29 = vld [vmem:[#allocation26 + $0x1610] sm:$0xff] }
 0xfac   : > { %14170 = vmatpush1.bf16.msra.mxu1 %v14169_v32  ;;  %v9961_v32 = vld [vmem:[#allocation26 + $0x1678] sm:$0xff]  ;;  %v14185_v2 = vpack.c.bf16 %v9952_v0, %v9948_v29 }
 0xfad   : > { %14172 = vmatprep.subr.bf16.mxu1 %v14171_v1  ;;  %v14187_v37 = vpack.c.bf16 %v9961_v32, %v9957_v31  ;;  %v9993_v29 = vld [vmem:[#allocation26 + $0x1778] sm:$0xff]  ;;  %v9990_v31 = vld [vmem:[#allocation26 + $0x1760] sm:$0xff] }
 0xfae   : > { %14018 = vmatpush1.bf16.msra.mxu0 %v14017_v58  ;;  %v9954_v58 = vld [vmem:[#allocation26 + $0x1640] sm:$0xff] }
 0xfaf   : > { %14020 = vmatprep.subr.bf16.mxu0 %v14019_v56  ;;  %v14043_v56 = vpack.c.bf16 %v9959_v26, %v9955_v30  ;;  %v14045_v55 = vpack.c.bf16 %v9958_v59, %v9954_v58  ;;  %v9986_v26 = vld [vmem:[#allocation26 + $0x1740] sm:$0xff]  ;;  %v9995_v58 = vld [vmem:[#allocation26 + $0x1788] sm:$0xff] }
 0xfb0   : > { %14174 = vmatpush1.bf16.msra.mxu1 %v14173_v62  ;;  %v9967_v62 = vld [vmem:[#allocation26 + $0x16a8] sm:$0xff] }
 0xfb1   : > { %14176 = vmatprep.subr.bf16.mxu1 %v14175_v14  ;;  %v9965_v14 = vld [vmem:[#allocation26 + $0x1698] sm:$0xff]  ;;  %v14047_v45 = vpack.c.bf16 %v9967_v62, %v9963_v42  ;;  %v9999_v59 = vld [vmem:[#allocation26 + $0x17a8] sm:$0xff]  ;;  %v9998_v42 = vld [vmem:[#allocation26 + $0x17a0] sm:$0xff] }
 0xfb2   : > { %14022 = vmatpush1.bf16.msra.mxu0 %v14021_v50  ;;  %v14189_v50 = vpack.c.bf16 %v9960_v41, %v9956_v40  ;;  %v14191_v49 = vpack.c.bf16 %v9969_v46, %v9965_v14  ;;  %v9994_v41 = vld [vmem:[#allocation26 + $0x1780] sm:$0xff]  ;;  %v14063_v62 = vpack.c.bf16 %v9999_v59, %v9995_v58  ;;  %v9996_v46 = vld [vmem:[#allocation26 + $0x1790] sm:$0xff] }
 0xfb3   : > { %14024 = vmatprep.subr.bf16.mxu0 %v14023_v60  ;;  %v10028_v59 = vld [vmem:[#allocation26 + $0x1890] sm:$0xff] }
 0xfb4   : > { %14178 = vmatpush1.bf16.msra.mxu1 %v14177_v51  ;;  %v9971_v51 = vld [vmem:[#allocation26 + $0x16c8] sm:$0xff] }
 0xfb5   : > { %14180 = vmatprep.subr.bf16.mxu1 %v14179_v18 }
 0xfb6   : > { %14026 = vmatpush1.bf16.msra.mxu0 %v14025_v10  ;;  %v9977_v10 = vld [vmem:[#allocation26 + $0x16f8] sm:$0xff] }
 0xfb7   : > { %14028 = vmatprep.subr.bf16.mxu0 %v14027_v23  ;;  %v14049_v23 = vpack.c.bf16 %v9966_v44, %v9962_v43  ;;  %v10007_v43 = vld [vmem:[#allocation26 + $0x17e8] sm:$0xff]  ;;  %v10005_v44 = vld [vmem:[#allocation26 + $0x17d8] sm:$0xff] }
 0xfb8   : > { %14182 = vmatpush1.bf16.msra.mxu1 %v14181_v6  ;;  %v14051_v6 = vpack.c.bf16 %v9975_v61, %v9971_v51  ;;  %v10006_v51 = vld [vmem:[#allocation26 + $0x17e0] sm:$0xff] }
 0xfb9   : > { %14184 = vmatprep.subr.bf16.mxu1 %v14183_v22  ;;  %v9987_v22 = vld [vmem:[#allocation26 + $0x1748] sm:$0xff] }
 0xfba   : > { %14030 = vmatpush1.bf16.msra.mxu0 %v14029_v9  ;;  %v14195_v9 = vpack.c.bf16 %v9977_v10, %v9973_v13  ;;  %v14059_v32 = vpack.c.bf16 %v9991_v34, %v9987_v22  ;;  %v10004_v13 = vld [vmem:[#allocation26 + $0x17d0] sm:$0xff] }
 0xfbb   : > { %14032 = vmatprep.subr.bf16.mxu0 %v14031_v7  ;;  %v9972_v7 = vld [vmem:[#allocation26 + $0x16d0] sm:$0xff] }
 0xfbc   : > { %v14197_v39 = vpack.c.bf16 %v9976_v27, %v9972_v7  ;;  %v10008_v10 = vld [vmem:[#allocation26 + $0x17f0] sm:$0xff]  ;;  %v10010_v7 = vld [vmem:[#allocation26 + $0x1800] sm:$0xff] }
 0xfbd   : > { %v10014_v27 = vld [vmem:[#allocation26 + $0x1820] sm:$0xff]  ;;  %v10020_v34 = vld [vmem:[#allocation26 + $0x1850] sm:$0xff] }
 0xfbe   : > { %14034 = vmatpush1.bf16.msra.mxu0 %v14033_v53  ;;  %v9981_v53 = vld [vmem:[#allocation26 + $0x1718] sm:$0xff] }
 0xfbf   : > { %14036 = vmatprep.subr.bf16.mxu0 %v14035_v63  ;;  %v9985_v63 = vld [vmem:[#allocation26 + $0x1738] sm:$0xff] }
 0xfc0   : > { %v14199_v20 = vpack.c.bf16 %v9985_v63, %v9981_v53  ;;  %v10016_v53 = vld [vmem:[#allocation26 + $0x1830] sm:$0xff]  ;;  %v10019_v63 = vld [vmem:[#allocation26 + $0x1848] sm:$0xff] }
 0xfc2   : > { %14038 = vmatpush1.bf16.msra.mxu0 %v14037_v48  ;;  %v9978_v48 = vld [vmem:[#allocation26 + $0x1700] sm:$0xff] }
 0xfc3   : > { %14040 = vmatprep.subr.bf16.mxu0 %v14039_v4  ;;  %v9980_v4 = vld [vmem:[#allocation26 + $0x1710] sm:$0xff]  ;;  %v14057_v0 = vpack.c.bf16 %v9982_v11, %v9978_v48  ;;  %v10025_v48 = vld [vmem:[#allocation26 + $0x1878] sm:$0xff]  ;;  %v14073_v11 = vpack.c.bf16 %v10014_v27, %v10010_v7 }
 0xfc4   : > { %v14201_v30 = vpack.c.bf16 %v9984_v19, %v9980_v4  ;;  %v10022_v4 = vld [vmem:[#allocation26 + $0x1860] sm:$0xff]  ;;  %v10057_v7 = vld [vmem:[#allocation26 + $0x1978] sm:$0xff] }
0x1050   : > { %v9671_v1 = vpop.f32.mrb[66].mxu0 }
0x1051   : > { %v9673_v54 = vpop.f32.mrb[67].mxu0 }
0x1052   : > { %10173 = vmatprep.mubr.f32.mxu0 %v9673_v54  ;;  %10386 = vmatprep.mubr.f32.mxu1 %v9673_v54  ;;  %v9997_v54 = vld [vmem:[#allocation26 + $0x1798] sm:$0xff] }
0x1053   : > { %10174 = vmatmul.mubr.f32.vlgmr.msra.gmra.mrb[64].mxu0 %v9671_v1  ;;  %10387 = vmatmul.mubr.f32.vlgmr.msra.gmra.mrb[22].mxu1 %v9671_v1  ;;  %v14203_v1 = vpack.c.bf16 %v9993_v29, %v9989_v28  ;;  %v10024_v28 = vld [vmem:[#allocation26 + $0x1870] sm:$0xff]  ;;  %v10027_v29 = vld [vmem:[#allocation26 + $0x1888] sm:$0xff] }
0x1054   : > { %14042 = vmatpush1.bf16.msra.mxu0 %v14041_v52  ;;  %14186 = vmatpush1.bf16.msra.mxu1 %v14185_v2  ;;  %v16260_v60 = vpop.f32.mrb[68].mxu0  ;;  %v9988_v52 = vld [vmem:[#allocation26 + $0x1750] sm:$0xff] }
0x1055   : > { %14044 = vmatprep.subr.bf16.mxu0 %v14043_v56  ;;  %14188 = vmatprep.subr.bf16.mxu1 %v14187_v37  ;;  %v9744_v18 = vpop.f32.mrb[69].mxu0  ;;  %v9992_v2 = vld [vmem:[#allocation26 + $0x1770] sm:$0xff]  ;;  %v10001_v56 = vld [vmem:[#allocation26 + $0x17b8] sm:$0xff]  ;;  %v14061_v37 = vpack.c.bf16 %v9990_v31, %v9986_v26 }
0x1056   : > { %10244 = vmatprep.mubr.f32.mxu0 %v9744_v18  ;;  %10457 = vmatprep.mubr.f32.mxu1 %v9744_v18  ;;  %v14205_v40 = vpack.c.bf16 %v9992_v2, %v9988_v52  ;;  %v14207_v14 = vpack.c.bf16 %v10001_v56, %v9997_v54  ;;  %v10033_v26 = vld [vmem:[#allocation26 + $0x18b8] sm:$0xff]  ;;  %v10030_v52 = vld [vmem:[#allocation26 + $0x18a0] sm:$0xff]  ;;  %v10032_v54 = vld [vmem:[#allocation26 + $0x18b0] sm:$0xff] }
0x1057   : > { %v10035_v56 = vld [vmem:[#allocation26 + $0x18c8] sm:$0xff] }
0x1058   : > { %14046 = vmatpush1.bf16.msra.mxu0 %v14045_v55  ;;  %14190 = vmatpush1.bf16.msra.mxu1 %v14189_v50  ;;  %v16262_v5 = vpop.f32.mrb[70].mxu0  ;;  %v10000_v55 = vld [vmem:[#allocation26 + $0x17b0] sm:$0xff]  ;;  %v10003_v50 = vld [vmem:[#allocation26 + $0x17c8] sm:$0xff] }
0x1059   : > { %14048 = vmatprep.subr.bf16.mxu0 %v14047_v45  ;;  %14192 = vmatprep.subr.bf16.mxu1 %v14191_v49  ;;  %v11607_v12 = vpop.f32.mrb[71].mxu0  ;;  %v10009_v45 = vld [vmem:[#allocation26 + $0x17f8] sm:$0xff]  ;;  %v14065_v49 = vpack.c.bf16 %v9998_v42, %v9994_v41  ;;  %v14209_v24 = vpack.c.bf16 %v10000_v55, %v9996_v46  ;;  %v14067_v18 = vpack.c.bf16 %v10007_v43, %v10003_v50  ;;  %v10038_v46 = vld [vmem:[#allocation26 + $0x18e0] sm:$0xff]  ;;  %v10036_v43 = vld [vmem:[#allocation26 + $0x18d0] sm:$0xff] }
0x105a   : > { %v14211_v61 = vpack.c.bf16 %v10009_v45, %v10005_v44  ;;  %v14215_v12 = vpack.c.bf16 %v10017_v15, %v10013_v3  ;;  %v10041_v41 = vld [vmem:[#allocation26 + $0x18f8] sm:$0xff]  ;;  %v10040_v44 = vld [vmem:[#allocation26 + $0x18f0] sm:$0xff]  ;;  %v10043_v45 = vld [vmem:[#allocation26 + $0x1908] sm:$0xff] }
0x105b   : > { %v10048_v3 = vld [vmem:[#allocation26 + $0x1930] sm:$0xff]  ;;  %v10051_v15 = vld [vmem:[#allocation26 + $0x1948] sm:$0xff] }
0x105c   : > { %14050 = vmatpush1.bf16.msra.mxu0 %v14049_v23  ;;  %14194 = vmatpush1.bf16.msra.mxu1 %v14193_v57  ;;  %v10011_v23 = vld [vmem:[#allocation26 + $0x1808] sm:$0xff] }
0x105d   : > { %14052 = vmatprep.subr.bf16.mxu0 %v14051_v6  ;;  %14196 = vmatprep.subr.bf16.mxu1 %v14195_v9  ;;  %v10015_v57 = vld [vmem:[#allocation26 + $0x1828] sm:$0xff]  ;;  %v14069_v6 = vpack.c.bf16 %v10006_v51, %v10002_v47  ;;  %v14213_v9 = vpack.c.bf16 %v10008_v10, %v10004_v13  ;;  %v10049_v47 = vld [vmem:[#allocation26 + $0x1938] sm:$0xff]  ;;  %v10046_v13 = vld [vmem:[#allocation26 + $0x1920] sm:$0xff] }
0x105e   : > { %v14071_v21 = vpack.c.bf16 %v10015_v57, %v10011_v23  ;;  %v10044_v57 = vld [vmem:[#allocation26 + $0x1910] sm:$0xff] }
0x1060   : > { %14054 = vmatpush1.bf16.msra.mxu0 %v14053_v8  ;;  %14198 = vmatpush1.bf16.msra.mxu1 %v14197_v39  ;;  %v10023_v8 = vld [vmem:[#allocation26 + $0x1868] sm:$0xff]  ;;  %v10021_v39 = vld [vmem:[#allocation26 + $0x1858] sm:$0xff] }
0x1061   : > { %14056 = vmatprep.subr.bf16.mxu0 %v14055_v16  ;;  %14200 = vmatprep.subr.bf16.mxu1 %v14199_v20  ;;  %v14217_v16 = vpack.c.bf16 %v10016_v53, %v10012_v25  ;;  %v10018_v20 = vld [vmem:[#allocation26 + $0x1840] sm:$0xff]  ;;  %v14075_v19 = vpack.c.bf16 %v10023_v8, %v10019_v63  ;;  %v14219_v22 = vpack.c.bf16 %v10025_v48, %v10021_v39  ;;  %v10052_v8 = vld [vmem:[#allocation26 + $0x1950] sm:$0xff]  ;;  %v10059_v48 = vld [vmem:[#allocation26 + $0x1988] sm:$0xff] }
0x1062   : > { %v14077_v31 = vpack.c.bf16 %v10022_v4, %v10018_v20  ;;  %v10054_v25 = vld [vmem:[#allocation26 + $0x1960] sm:$0xff]  ;;  %v10056_v39 = vld [vmem:[#allocation26 + $0x1970] sm:$0xff]  ;;  %v10065_v20 = vld [vmem:[#allocation26 + $0x19b8] sm:$0xff] }
0x1064   : > { %14058 = vmatpush1.bf16.msra.mxu0 %v14057_v0  ;;  %14202 = vmatpush1.bf16.msra.mxu1 %v14201_v30  ;;  %v10031_v0 = vld [vmem:[#allocation26 + $0x18a8] sm:$0xff]  ;;  %v10029_v30 = vld [vmem:[#allocation26 + $0x1898] sm:$0xff] }
0x1065   : > { %14060 = vmatprep.subr.bf16.mxu0 %v14059_v32  ;;  %14204 = vmatprep.subr.bf16.mxu1 %v14203_v1  ;;  %v14221_v32 = vpack.c.bf16 %v10024_v28, %v10020_v34  ;;  %v10026_v1 = vld [vmem:[#allocation26 + $0x1880] sm:$0xff]  ;;  %v14079_v2 = vpack.c.bf16 %v10031_v0, %v10027_v29  ;;  %v14223_v58 = vpack.c.bf16 %v10033_v26, %v10029_v30  ;;  %v10060_v0 = vld [vmem:[#allocation26 + $0x1990] sm:$0xff]  ;;  %v10067_v26 = vld [vmem:[#allocation26 + $0x19c8] sm:$0xff] }
0x1066   : > { %v14081_v42 = vpack.c.bf16 %v10030_v52, %v10026_v1  ;;  %v10062_v34 = vld [vmem:[#allocation26 + $0x19a0] sm:$0xff]  ;;  %v10064_v30 = vld [vmem:[#allocation26 + $0x19b0] sm:$0xff]  ;;  %v10073_v1 = vld [vmem:[#allocation26 + $0x19f8] sm:$0xff] }
0x1068   : > { %14062 = vmatpush1.bf16.msra.mxu0 %v14061_v37  ;;  %14206 = vmatpush1.bf16.msra.mxu1 %v14205_v40  ;;  %v10039_v37 = vld [vmem:[#allocation26 + $0x18e8] sm:$0xff]  ;;  %v10037_v40 = vld [vmem:[#allocation26 + $0x18d8] sm:$0xff] }
0x1069   : > { %14064 = vmatprep.subr.bf16.mxu0 %v14063_v62  ;;  %14208 = vmatprep.subr.bf16.mxu1 %v14207_v14  ;;  %v14225_v62 = vpack.c.bf16 %v10032_v54, %v10028_v59  ;;  %v10034_v14 = vld [vmem:[#allocation26 + $0x18c0] sm:$0xff]  ;;  %v14083_v55 = vpack.c.bf16 %v10039_v37, %v10035_v56  ;;  %v14227_v50 = vpack.c.bf16 %v10041_v41, %v10037_v40  ;;  %v10068_v37 = vld [vmem:[#allocation26 + $0x19d0] sm:$0xff]  ;;  %v10075_v41 = vld [vmem:[#allocation26 + $0x1a08] sm:$0xff] }
0x106a   : > { %v14085_v51 = vpack.c.bf16 %v10038_v46, %v10034_v14  ;;  %v10070_v59 = vld [vmem:[#allocation26 + $0x19e0] sm:$0xff]  ;;  %v10072_v40 = vld [vmem:[#allocation26 + $0x19f0] sm:$0xff]  ;;  %v10081_v14 = vld [vmem:[#allocation26 + $0x1a38] sm:$0xff] }
0x106c   : > { %14066 = vmatpush1.bf16.msra.mxu0 %v14065_v49  ;;  %14210 = vmatpush1.bf16.msra.mxu1 %v14209_v24  ;;  %v10047_v49 = vld [vmem:[#allocation26 + $0x1928] sm:$0xff]  ;;  %v10045_v24 = vld [vmem:[#allocation26 + $0x1918] sm:$0xff] }
0x106d   : > { %14068 = vmatprep.subr.bf16.mxu0 %v14067_v18  ;;  %14212 = vmatprep.subr.bf16.mxu1 %v14211_v61  ;;  %v14229_v18 = vpack.c.bf16 %v10040_v44, %v10036_v43  ;;  %v10042_v61 = vld [vmem:[#allocation26 + $0x1900] sm:$0xff]  ;;  %v14087_v10 = vpack.c.bf16 %v10047_v49, %v10043_v45  ;;  %v14231_v23 = vpack.c.bf16 %v10049_v47, %v10045_v24  ;;  %v10076_v49 = vld [vmem:[#allocation26 + $0x1a10] sm:$0xff]  ;;  %v10083_v47 = vld [vmem:[#allocation26 + $0x1a48] sm:$0xff] }
0x106e   : > { %v14089_v27 = vpack.c.bf16 %v10046_v13, %v10042_v61  ;;  %v10078_v43 = vld [vmem:[#allocation26 + $0x1a20] sm:$0xff]  ;;  %v10080_v24 = vld [vmem:[#allocation26 + $0x1a30] sm:$0xff]  ;;  %v10089_v61 = vld [vmem:[#allocation26 + $0x1a78] sm:$0xff] }
0x1070   : > { %14070 = vmatpush1.bf16.msra.mxu0 %v14069_v6  ;;  %14214 = vmatpush1.bf16.msra.mxu1 %v14213_v9  ;;  %v10055_v6 = vld [vmem:[#allocation26 + $0x1968] sm:$0xff]  ;;  %v10053_v9 = vld [vmem:[#allocation26 + $0x1958] sm:$0xff] }
0x1071   : > { %14072 = vmatprep.subr.bf16.mxu0 %v14071_v21  ;;  %14216 = vmatprep.subr.bf16.mxu1 %v14215_v12  ;;  %v14233_v21 = vpack.c.bf16 %v10048_v3, %v10044_v57  ;;  %v10050_v12 = vld [vmem:[#allocation26 + $0x1940] sm:$0xff]  ;;  %v14091_v53 = vpack.c.bf16 %v10055_v6, %v10051_v15  ;;  %v14235_v63 = vpack.c.bf16 %v10057_v7, %v10053_v9  ;;  %v10084_v6 = vld [vmem:[#allocation26 + $0x1a50] sm:$0xff]  ;;  %v10091_v7 = vld [vmem:[#allocation26 + $0x1a88] sm:$0xff] }
0x1072   : > { %v14093_v4 = vpack.c.bf16 %v10054_v25, %v10050_v12  ;;  %v10086_v57 = vld [vmem:[#allocation26 + $0x1a60] sm:$0xff]  ;;  %v10088_v9 = vld [vmem:[#allocation26 + $0x1a70] sm:$0xff]  ;;  %v10097_v12 = vld [vmem:[#allocation26 + $0x1ab8] sm:$0xff] }
0x1074   : > { %14074 = vmatpush1.bf16.msra.mxu0 %v14073_v11  ;;  %14218 = vmatpush1.bf16.msra.mxu1 %v14217_v16  ;;  %v10063_v11 = vld [vmem:[#allocation26 + $0x19a8] sm:$0xff]  ;;  %v10061_v16 = vld [vmem:[#allocation26 + $0x1998] sm:$0xff] }
0x1075   : > { %14076 = vmatprep.subr.bf16.mxu0 %v14075_v19  ;;  %14220 = vmatprep.subr.bf16.mxu1 %v14219_v22  ;;  %v14237_v19 = vpack.c.bf16 %v10056_v39, %v10052_v8  ;;  %v10058_v22 = vld [vmem:[#allocation26 + $0x1980] sm:$0xff]  ;;  %v14095_v28 = vpack.c.bf16 %v10063_v11, %v10059_v48  ;;  %v14239_v29 = vpack.c.bf16 %v10065_v20, %v10061_v16  ;;  %v10092_v11 = vld [vmem:[#allocation26 + $0x1a90] sm:$0xff]  ;;  %v10099_v20 = vld [vmem:[#allocation26 + $0x1ac8] sm:$0xff] }
0x1076   : > { %v14097_v52 = vpack.c.bf16 %v10062_v34, %v10058_v22  ;;  %v10094_v8 = vld [vmem:[#allocation26 + $0x1aa0] sm:$0xff]  ;;  %v10096_v16 = vld [vmem:[#allocation26 + $0x1ab0] sm:$0xff]  ;;  %v10105_v22 = vld [vmem:[#allocation26 + $0x1af8] sm:$0xff] }
0x1077   : > { %v14257_v34 = vpack.c.bf16 %v10096_v16, %v10092_v11 }
0x1078   : > { %14078 = vmatpush1.bf16.msra.mxu0 %v14077_v31  ;;  %14222 = vmatpush1.bf16.msra.mxu1 %v14221_v32  ;;  %v10071_v31 = vld [vmem:[#allocation26 + $0x19e8] sm:$0xff]  ;;  %v10069_v32 = vld [vmem:[#allocation26 + $0x19d8] sm:$0xff] }
0x1079   : > { %14080 = vmatprep.subr.bf16.mxu0 %v14079_v2  ;;  %14224 = vmatprep.subr.bf16.mxu1 %v14223_v58  ;;  %v14241_v2 = vpack.c.bf16 %v10064_v30, %v10060_v0  ;;  %v10066_v58 = vld [vmem:[#allocation26 + $0x19c0] sm:$0xff]  ;;  %v14099_v54 = vpack.c.bf16 %v10071_v31, %v10067_v26  ;;  %v14243_v56 = vpack.c.bf16 %v10073_v1, %v10069_v32  ;;  %v10100_v26 = vld [vmem:[#allocation26 + $0x1ad0] sm:$0xff] }
0x107a   : > { %v14101_v46 = vpack.c.bf16 %v10070_v59, %v10066_v58  ;;  %v10102_v30 = vld [vmem:[#allocation26 + $0x1ae0] sm:$0xff]  ;;  %v10104_v31 = vld [vmem:[#allocation26 + $0x1af0] sm:$0xff] }
0x107b   : > { %v14261_v1 = vpack.c.bf16 %v10104_v31, %v10100_v26 }
0x107c   : > { %14082 = vmatpush1.bf16.msra.mxu0 %v14081_v42  ;;  %14226 = vmatpush1.bf16.msra.mxu1 %v14225_v62  ;;  %v10079_v42 = vld [vmem:[#allocation26 + $0x1a28] sm:$0xff]  ;;  %v10077_v62 = vld [vmem:[#allocation26 + $0x1a18] sm:$0xff] }
0x107d   : > { %14084 = vmatprep.subr.bf16.mxu0 %v14083_v55  ;;  %14228 = vmatprep.subr.bf16.mxu1 %v14227_v50  ;;  %v14245_v55 = vpack.c.bf16 %v10072_v40, %v10068_v37  ;;  %v10074_v50 = vld [vmem:[#allocation26 + $0x1a00] sm:$0xff]  ;;  %v14103_v44 = vpack.c.bf16 %v10079_v42, %v10075_v41  ;;  %v14247_v45 = vpack.c.bf16 %v10081_v14, %v10077_v62 }
0x107e   : > { %v14105_v13 = vpack.c.bf16 %v10078_v43, %v10074_v50 }
0x1080   : > { %14086 = vmatpush1.bf16.msra.mxu0 %v14085_v51  ;;  %14230 = vmatpush1.bf16.msra.mxu1 %v14229_v18  ;;  %v10087_v51 = vld [vmem:[#allocation26 + $0x1a68] sm:$0xff]  ;;  %v10085_v18 = vld [vmem:[#allocation26 + $0x1a58] sm:$0xff] }
0x1081   : > { %14088 = vmatprep.subr.bf16.mxu0 %v14087_v10  ;;  %14232 = vmatprep.subr.bf16.mxu1 %v14231_v23  ;;  %v14249_v10 = vpack.c.bf16 %v10080_v24, %v10076_v49  ;;  %v10082_v23 = vld [vmem:[#allocation26 + $0x1a40] sm:$0xff]  ;;  %v14107_v3 = vpack.c.bf16 %v10087_v51, %v10083_v47  ;;  %v14251_v15 = vpack.c.bf16 %v10089_v61, %v10085_v18 }
0x1082   : > { %v14109_v25 = vpack.c.bf16 %v10086_v57, %v10082_v23 }
0x1084   : > { %14090 = vmatpush1.bf16.msra.mxu0 %v14089_v27  ;;  %14234 = vmatpush1.bf16.msra.mxu1 %v14233_v21  ;;  %v10095_v27 = vld [vmem:[#allocation26 + $0x1aa8] sm:$0xff]  ;;  %v10093_v21 = vld [vmem:[#allocation26 + $0x1a98] sm:$0xff] }
0x1085   : > { %14092 = vmatprep.subr.bf16.mxu0 %v14091_v53  ;;  %14236 = vmatprep.subr.bf16.mxu1 %v14235_v63  ;;  %v14253_v53 = vpack.c.bf16 %v10088_v9, %v10084_v6  ;;  %v10090_v63 = vld [vmem:[#allocation26 + $0x1a80] sm:$0xff]  ;;  %v14111_v39 = vpack.c.bf16 %v10095_v27, %v10091_v7  ;;  %v14255_v48 = vpack.c.bf16 %v10097_v12, %v10093_v21 }
0x1088   : > { %14094 = vmatpush1.bf16.msra.mxu0 %v14093_v4  ;;  %14238 = vmatpush1.bf16.msra.mxu1 %v14237_v19  ;;  %v10103_v4 = vld [vmem:[#allocation26 + $0x1ae8] sm:$0xff]  ;;  %v10101_v19 = vld [vmem:[#allocation26 + $0x1ad8] sm:$0xff] }
0x1089   : > { %14096 = vmatprep.subr.bf16.mxu0 %v14095_v28  ;;  %14240 = vmatprep.subr.bf16.mxu1 %v14239_v29  ;;  %v10098_v28 = vld [vmem:[#allocation26 + $0x1ac0] sm:$0xff]  ;;  %v14115_v29 = vpack.c.bf16 %v10103_v4, %v10099_v20  ;;  %v14259_v0 = vpack.c.bf16 %v10105_v22, %v10101_v19 }
0x108a   : > { %v14117_v32 = vpack.c.bf16 %v10102_v30, %v10098_v28 }
0x108c   : > { %14098 = vmatpush1.bf16.msra.mxu0 %v14097_v52  ;;  %14242 = vmatpush1.bf16.msra.mxu1 %v14241_v2  ;;  %v10555_v52 = vsub.s32 3, %v15761_v35 }
0x108d   : > { %14100 = vmatprep.subr.bf16.mxu0 %v14099_v54  ;;  %14244 = vmatprep.subr.bf16.mxu1 %v14243_v56 }
0x1090   : > { %14102 = vmatpush1.bf16.msra.mxu0 %v14101_v46  ;;  %14246 = vmatpush1.bf16.msra.mxu1 %v14245_v55 }
0x1091   : > { %14104 = vmatprep.subr.bf16.mxu0 %v14103_v44  ;;  %14248 = vmatprep.subr.bf16.mxu1 %v14247_v45 }
0x1093   : > { %10245 = vmatmul.mubr.f32.vlgmr.msra.gmra.mrb[64].mxu0 %v16260_v60  ;;  %10458 = vmatmul.mubr.f32.vlgmr.msra.gmra.mrb[22].mxu1 %v16260_v60  ;;  %v14113_v60 = vpack.c.bf16 %v10094_v8, %v10090_v63 }
0x1094   : > { %14106 = vmatpush1.bf16.msra.mxu0 %v14105_v13  ;;  %14250 = vmatpush1.bf16.msra.mxu1 %v14249_v10 }
0x1095   : > { %14108 = vmatprep.subr.bf16.mxu0 %v14107_v3  ;;  %14252 = vmatprep.subr.bf16.mxu1 %v14251_v15 }
0x1096   : > { %10315 = vmatprep.mubr.f32.mxu0 %v15927_v17  ;;  %10528 = vmatprep.mubr.f32.mxu1 %v15927_v17  ;;  %v10539_v17 = vld [vmem:[#allocation28] sm:$0xf] }
0x1097   : > { %v10544_v2 = vrot.slane %v10539_v17, %v15764_v36  ;;  %v10552_v58 = vrot.slane %v10539_v17, %v16058_v33  ;;  %v10548_v59 = vrot.slane %v10539_v17, %v15767_v38  ;;  %v10556_v54 = vrot.slane %v10539_v17, %v10555_v52 }
0x1098   : > { %14110 = vmatpush1.bf16.msra.mxu0 %v14109_v25  ;;  %14254 = vmatpush1.bf16.msra.mxu1 %v14253_v53  ;;  %v15115_v36 = vmov 1983009808  }
0x1099   : > { %14112 = vmatprep.subr.bf16.mxu0 %v14111_v39  ;;  %14256 = vmatprep.subr.bf16.mxu1 %v14255_v48  ;;  %v10592_v38 = vunpack.c.l.s4 %v15115_v36 }
0x109b   : > { %v10593_v61 = vunpack.c.0.s8 %v10592_v38 }
0x109c   : > { %14114 = vmatpush1.bf16.msra.mxu0 %v14113_v60  ;;  %14258 = vmatpush1.bf16.msra.mxu1 %v14257_v34 }
0x109d   : > { %14116 = vmatprep.subr.bf16.mxu0 %v14115_v29  ;;  %14260 = vmatprep.subr.bf16.mxu1 %v14259_v0  ;;  %v10596_v9 = vsub.s32 %v10593_v61, %v15761_v35 }
0x10a0   : > { %14118 = vmatpush1.bf16.msra.mxu0 %v14117_v32  ;;  %14262 = vmatpush1.bf16.msra.mxu1 %v14261_v1 }
0x10a3   : > { %11027 = vmatmul.mubr.msk.f32.vlgmr.msra.gmra.mrb[64].mxu0 %vm842_vm12, %v16262_v5  ;;  %11028 = vmatmul.mubr.msk.f32.vlgmr.msra.gmra.mrb[22].mxu1 %vm842_vm12, %v16262_v5 }
0x1176   : > { %v10317_v56 = vpop.f32.mrb[64].mxu0  ;;  %v10530_v37 = vpop.f32.mrb[22].mxu1 }
0x1177   : > { %v10561_v40 = vadd.f32 %v10544_v2, %v10317_v56  ;;  %v10563_v41 = vadd.f32 %v10552_v58, %v10530_v37  ;;  %v10319_v42 = vpop.f32.mrb[65].mxu0  ;;  %v10532_v62 = vpop.f32.mrb[23].mxu1 }
0x1178   : > { %v10562_v14 = vadd.f32 %v10548_v59, %v10319_v42  ;;  %v10564_v46 = vadd.f32 %v10556_v54, %v10532_v62 }
0x1179   : > { %v10565_v5 = vmul.f32 0.5, %v10561_v40  ;;  %v10567_v55 = vmul.f32 0.5, %v10563_v41 }
0x117a   : > { %v10566_v50 = vmul.f32 0.5, %v10562_v14  ;;  %v10568_v43 = vmul.f32 0.5, %v10564_v46 }
0x117b   : > { %14603 = vtanh.f32 %v10565_v5 }
0x117c   : > { %14605 = vtanh.f32 %v10567_v55 }
0x117d   : > { %14607 = vtanh.f32 %v10566_v50 }
0x117e   : > { %14609 = vtanh.f32 %v10568_v43 }
0x1185   : > { %v14604_v33 = vpop.eup %14603 }
0x1186   : > { %v14606_v44 = vpop.eup %14605  ;;  %v10573_v45 = vadd.f32 1.0, %v14604_v33 }
0x1187   : > { %v14608_v49 = vpop.eup %14607  ;;  %v10575_v24 = vadd.f32 1.0, %v14606_v44 }
0x1188   : > { %v14610_v47 = vpop.eup %14609  ;;  %v10577_v51 = vmul.f32 0.5, %v10573_v45  ;;  %v10574_v18 = vadd.f32 1.0, %v14608_v49 }
0x1189   : > { %v10579_v13 = vmul.f32 0.5, %v10575_v24  ;;  %v10576_v10 = vadd.f32 1.0, %v14610_v47 }
0x118a   : > { %v10581_v23 = vmul.f32 %v10577_v51, %v10561_v40  ;;  %v10578_v57 = vmul.f32 0.5, %v10574_v18 }
0x118b   : > { %v10583_v3 = vmul.f32 %v10579_v13, %v10563_v41  ;;  %v10580_v15 = vmul.f32 0.5, %v10576_v10 }
0x118c   : > { %v10582_v6 = vmul.f32 %v10578_v57, %v10562_v14 }
0x118d   : > { %v10584_v7 = vmul.f32 %v10580_v15, %v10564_v46 }
0x118e   : > { %v10589_v27 = vcombine.low %v10581_v23, %v10582_v6 }
0x118f   : > { %v10590_v21 = vcombine.low %v10583_v3, %v10584_v7 }
0x1190   : > { %v10597_v12 = vrot.slane %v10589_v27, %v10596_v9 }
0x1191   : > { %v10604_v25 = vrot.slane %v10590_v21, %v10596_v9 }
0x1193   : > { %v10605_v53 = vcombine.low %v10597_v12, %v10604_v25 }
0x1195   : > { %10607 = vst [vmem:[%s805_s20] sm:$0xff] %v10605_v53 }
0x1196   : > { %14997 = shalt.err (!%p14994_p6)
}
0x1197   : > { %s14998_s26 = scalar_lea.hbm %s16282_s5, 128  ;;  %s15002_s16 = scalar_lea.hbm %s16394_s3, 256 }
0x1198   : > { %p14999_p7 = scmp.ne.s32.totalorder %s16282_s5, %s14998_s26  ;;  %p15003_p4 = scmp.lt.u32.totalorder %s16282_s5, %s16394_s3 }
0x1199   : > { %p15004_p8 = scmp.lt.u32.totalorder %s15002_s16, %s14998_s26  ;;  %p15006_p1 = scmp.lt.u32.totalorder %s14998_s26, %s16282_s5 }
0x119a   : > { %p15000_p9 = pnand %p14999_p7, %p16395_p10 }
0x119b   : > { %p15005_p13 = por %p15004_p8, %p15003_p4 }
0x119c   : > { %p15001_p12 = pneg %p15000_p9 }
0x119d   : > { %p15007_p11 = por %p15006_p1, %p15005_p13 }
0x119f   : > { %p15008_p0 = pnand %p15007_p11, %p15001_p12 }
0x11a1   : > { %15011 = shalt.err (!%p15008_p0)
}
0x11a2   : > { %14422 = dma.vmem_to_hbm [thread:$0]  (%p16395_p10), %s16284_s0, 128, %s16282_s5, %s10609_s24  }
0x11a3 PF: > { %s16396_s23 = sld [smem:[#allocation43_spill]]  ;;  %s16397_s20 = sld [smem:[#allocation38_spill]] }
0x11a4   : > { %s16398_s29 = sld [smem:[#allocation46_spill]] }
0x11a9   : > { %p14494_p2 = scmp.ge.s32.totalorder %s16396_s23, 2  ;;  %s10637_s22 = sand.u32 1, %s16397_s20  }
0x11aa   : > { %p16399_p3 = scmp.ne.s32.totalorder %s16398_s29, 0  ;;  %s10638_s28 = scalar_lea.sflag [#allocation10], %s10637_s22 }
0x11ac   : > { %p14465_p5 = pnand %p14494_p2, %p16399_p3 }
0x11ae   : > { %15065 = dma.done.wait (!%p14465_p5), %s10638_s28, 128  }
0x11af   : > { %15067 = vsyncadd (!%p14465_p5), %s10638_s28, 4294967168  ;;  %s35_s23 = sadd.s32 1, %s16396_s23   ;;  %s16400_s18 = sld [smem:[#allocation39_spill]] }
0x11b0   : > { %p32_p6 = scmp.ge.s32.totalorder %s35_s23, 4   ;;  %s16401_s19 = sld [smem:[#allocation40_spill]] }
0x11b1   : > { %s16402_s20 = sld [smem:[#allocation47_spill]]  ;;  %s16403_s21 = sld [smem:[#allocation42_spill]] }
0x11b2   : > { %s16404_s22 = sld [smem:[#allocation44_spill]]  ;;  %34 = sbr.rel (!%p32_p6) target bundleno = 17 (0x11), region = 198 }
0x11b9   :  { %10643 = vsyncpa [#allocation9], 1 }
0x11ba   :  { %10645 = vsyncpa [#allocation9 + $0x1], 1 }
0x11bb   :  { %10646 = vsyncpa [#allocation12], 1 }
0x11bc   :  { %10647 = vsyncpa [#allocation15], 1 }
0x11bd   :  { %10648 = vsyncpa [#allocation18], 1 }
0x11be   :  { %10649 = vsyncpa [#allocation21], 1 }
0x11bf   :  { %10650 = vsyncpa [#allocation24], 1 }
0x11c0   :  { %10651 = vsyncpa [#allocation27], 1 }
0x11c1   :  { %10652 = vsyncpa [#allocation10], 1 }
0x11c2   :  { %10654 = vsyncpa [#allocation10 + $0x1], 1 }

</bundles_post_ra>
